<compile_context>
chip_gen: v7x
topology: tpu7x:2x2x1
jax: 0.10.0
libtpu: 0.0.40
codegen_flags: <defaults>
</compile_context>

<pallas_src>
import functools

import jax
import jax.numpy as jnp
from jax.experimental import pallas as pl
from jax.experimental.pallas import tpu as pltpu

EPS = 1e-5

# Row layout of the packed (16, 128) f32 aux tile.
_ROW_DW0 = 0    # rows 0..8: depthwise 3x3 taps (index dy*3+dx), lanes [0, 32)
_ROW_T1 = 9     # conv_basic shift, lanes [0, 32)
_ROW_TDW = 10   # depthwise shift,  lanes [0, 32)
_ROW_TPW = 11   # pointwise shift,  lanes [0, 64)


def mobilenet_kernel(p_ref, w1_ref, wpw_ref, aux_ref, o_ref, *, B, MP, H1, W1):
    """Fused MobileNet stem forward for a block of B images.

    p_ref  : (1, B*MP, 9*Cin) bf16  padded im2col patches (flat rows per image)
    w1_ref : (9*Cin, 32)      bf16  conv_basic weights (BN scale folded in)
    wpw_ref: (32, 64)         bf16  1x1 conv weights  (BN scale folded in)
    aux_ref: (16, 128)        f32   packed depthwise taps + per-stage shifts
    o_ref  : (B, H2, W2*64)   bf16  lane-dense output slabs (W2*64 lanes)
    """
    C1 = w1_ref.shape[-1]            # 32
    C2 = wpw_ref.shape[-1]           # 64
    H2, W2 = H1 - 2, W1 - 2
    LT = (B - 1) * MP + H2 * W1      # rows carried through depthwise / 1x1

    t1 = aux_ref[_ROW_T1:_ROW_T1 + 1, :C1]
    tdw = aux_ref[_ROW_TDW:_ROW_TDW + 1, :C1]
    tpw = aux_ref[_ROW_TPW:_ROW_TPW + 1, :C2]
    wdw = aux_ref[_ROW_DW0:_ROW_DW0 + 9, :C1]        # (9, 32)

    # ---- conv_basic: one im2col matmul (K = 9*Cin) over all B images --------
    a1 = jnp.dot(p_ref[0], w1_ref[...], preferred_element_type=jnp.float32)
    a1 = jnp.maximum(a1 + t1, 0.0)                   # (B*MP, 32) f32

    # ---- depthwise 3x3 (VPU, f32): flat layout, 9 static row-offset slices --
    # No 3D reshape/relayout; rows that x-wrap or cross image boundaries only
    # land in positions that are cropped away at the store.
    acc = jnp.zeros((LT, C1), jnp.float32)
    for dy in range(3):
        for dx in range(3):
            off = dy * W1 + dx
            tap = wdw[dy * 3 + dx:dy * 3 + dx + 1, :]          # (1, 32)
            acc = acc + a1[off:off + LT, :] * tap
    a2 = jnp.maximum(acc + tdw, 0.0).astype(jnp.bfloat16)      # (LT, 32)

    # ---- 1x1 conv (MXU, bf16 operands, f32 accumulate) + shift + ReLU -------
    a3 = jnp.dot(a2, wpw_ref[...], preferred_element_type=jnp.float32)
    a3 = jnp.maximum(a3 + tpw, 0.0)                  # (LT, 64)

    # ---- lane-dense stores: crop W1->W2 pad columns, fold W into lanes ------
    for b in range(B):
        img = a3[b * MP:b * MP + H2 * W1, :].reshape(H2, W1, C2)
        o_ref[b] = img[:, :W2, :].reshape(H2, W2 * C2).astype(o_ref.dtype)


def fold_params(p):
    """Fold BN scales into conv weights; pack taps/shifts into one aux tile."""
    Cin = p["w1"].shape[2]
    C1 = p["wdw"].shape[-1]
    C2 = p["wpw"].shape[-1]

    w1f = (p["w1"] * p["s1"]).reshape(9 * Cin, C1).astype(jnp.bfloat16)
    wpwf = (p["wpw"] * p["spw"][0]).astype(jnp.bfloat16)

    aux = jnp.zeros((16, 128), jnp.float32)
    aux = aux.at[_ROW_DW0:_ROW_DW0 + 9, :C1].set(
        (p["wdw"] * p["sdw"][0]).reshape(9, C1))
    aux = aux.at[_ROW_T1, :C1].set(p["t1"].reshape(-1))
    aux = aux.at[_ROW_TDW, :C1].set(p["tdw"].reshape(-1))
    aux = aux.at[_ROW_TPW, :C2].set(p["tpw"].reshape(-1))

    return {"w1f": w1f, "wpwf": wpwf, "aux": aux}


def _pick_batch_block(n):
    """Largest batch block <= 8 dividing n that keeps >=2 grid steps (v7x)."""
    for b in (8, 4, 2, 1):
        if n % b == 0 and n // b >= 2:
            return b
    return 1


def mobilenet_forward(x_nchw, fp, *, batch_block=None):
    """Runs the fused Pallas kernel. Input is NCHW (PyTorch layout); output is
    NHWC (N, H-4, W-4, 64) — the PyTorch NCHW order is transpose(0, 3, 1, 2),
    left to the consumer to fold (avoids an extra HBM round trip here)."""
    x = jnp.transpose(x_nchw, (0, 2, 3, 1)).astype(jnp.float32)   # NHWC
    N, H, W, Cin = x.shape
    H1, W1 = H - 2, W - 2
    H2, W2 = H1 - 2, W1 - 2
    C2 = fp["wpwf"].shape[-1]
    M1 = H1 * W1
    MP = -(-(M1 + 2) // 8) * 8                # padded flat rows per image
    B = batch_block or _pick_batch_block(N)
    assert N % B == 0, (N, B)
    NB = N // B
    # Shifted depthwise reads of the last image must stay inside the block.
    assert (B - 1) * MP + H2 * W1 + 2 * W1 + 2 <= B * MP

    # im2col for the first 3x3 VALID conv (K = 9*Cin), padded to MP rows per
    # image; feature order (dy, dx, cin) matches w1f's reshape.
    # TODO(synk): at realistic H/W, build the patches in-kernel from a raw
    # row-strip DMA (4-row halo) instead of materializing them in HBM, and
    # switch the whole-image block to halo'd H-strips (v7x's 64 MiB VMEM).
    taps = [x[:, dy:dy + H1, dx:dx + W1, :] for dy in range(3) for dx in range(3)]
    patches = jnp.concatenate(taps, axis=-1).reshape(N, M1, 9 * Cin)
    patches = jnp.pad(patches, ((0, 0), (0, MP - M1), (0, 0)))
    patches = patches.astype(jnp.bfloat16).reshape(NB, B * MP, 9 * Cin)

    kernel = functools.partial(mobilenet_kernel, B=B, MP=MP, H1=H1, W1=W1)

    def full(a):
        return pl.BlockSpec(a.shape, lambda g: (0,) * a.ndim)

    out = pl.pallas_call(
        kernel,
        out_shape=jax.ShapeDtypeStruct((N, H2, W2 * C2), jnp.bfloat16),
        grid=(NB,),
        in_specs=[
            pl.BlockSpec((1, B * MP, 9 * Cin), lambda g: (g, 0, 0)),
            full(fp["w1f"]),
            full(fp["wpwf"]),
            full(fp["aux"]),
        ],
        out_specs=pl.BlockSpec((B, H2, W2 * C2), lambda g: (g, 0, 0)),
        compiler_params=pltpu.CompilerParams(
            dimension_semantics=("parallel",),
            vmem_limit_bytes=32 * 1024 * 1024),
    )(patches, fp["w1f"], fp["wpwf"], fp["aux"])

    return out.reshape(N, H2, W2, C2)                 # NHWC


def make_params(key, in_channels):
    """Deterministic synthetic parameters; BN + conv-bias folded to scale/shift."""
    ks = jax.random.split(key, 17)
    C1, C2 = 32, 64

    def bn(kg, kb, km, kv, c):
        gamma = 1.0 + 0.1 * jax.random.normal(kg, (c,), jnp.float32)
        beta = 0.1 * jax.random.normal(kb, (c,), jnp.float32)
        mean = 0.1 * jax.random.normal(km, (c,), jnp.float32)
        var = 0.5 + jax.random.uniform(kv, (c,), jnp.float32)
        return gamma, beta, mean, var

    # conv_basic: Conv2d(in, 32, 3, bias=False) + BN(32)
    w1 = 0.2 * jax.random.normal(ks[0], (3, 3, in_channels, C1), jnp.float32)
    g1, b1, m1, v1 = bn(ks[1], ks[2], ks[3], ks[4], C1)
    s1 = g1 / jnp.sqrt(v1 + EPS)
    t1 = b1 - m1 * s1

    # depthwise: Conv2d(32, 32, 3, groups=32, bias=True) + BN(32)
    wdw = 0.2 * jax.random.normal(ks[5], (3, 3, C1), jnp.float32)
    bdw = 0.1 * jax.random.normal(ks[6], (C1,), jnp.float32)
    gdw, bedw, mdw, vdw = bn(ks[7], ks[8], ks[9], ks[10], C1)
    sdw = gdw / jnp.sqrt(vdw + EPS)
    tdw = bedw + (bdw - mdw) * sdw

    # pointwise: Conv2d(32, 64, 1, bias=True) + BN(64)
    wpw = 0.2 * jax.random.normal(ks[11], (C1, C2), jnp.float32)
    bpw = 0.1 * jax.random.normal(ks[12], (C2,), jnp.float32)
    gpw, bepw, mpw, vpw = bn(ks[13], ks[14], ks[15], ks[16], C2)
    spw = gpw / jnp.sqrt(vpw + EPS)
    tpw = bepw + (bpw - mpw) * spw

    return {
        "w1": w1, "s1": s1.reshape(1, 1, C1), "t1": t1.reshape(1, 1, C1),
        "wdw": wdw, "sdw": sdw.reshape(1, 1, C1), "tdw": tdw.reshape(1, 1, C1),
        "wpw": wpw, "spw": spw.reshape(1, 1, C2), "tpw": tpw.reshape(1, 1, C2),
    }


def reference_forward(x_nchw, p):
    """Pure-JAX f32 reference (lax convolutions); returns NHWC."""
    x = jnp.transpose(x_nchw, (0, 2, 3, 1)).astype(jnp.float32)
    dn = ("NHWC", "HWIO", "NHWC")

    y = jax.lax.conv_general_dilated(x, p["w1"], (1, 1), "VALID",
                                     dimension_numbers=dn)
    y = jnp.maximum(y * p["s1"] + p["t1"], 0.0)

    wdw = p["wdw"][:, :, None, :]                        # (3,3,1,32) HWIO
    y = jax.lax.conv_general_dilated(y, wdw, (1, 1), "VALID",
                                     dimension_numbers=dn,
                                     feature_group_count=y.shape[-1])
    y = jnp.maximum(y * p["sdw"] + p["tdw"], 0.0)

    y = jax.lax.conv_general_dilated(y, p["wpw"][None, None], (1, 1), "VALID",
                                     dimension_numbers=dn)
    y = jnp.maximum(y * p["spw"] + p["tpw"], 0.0)
    return y                                             # NHWC


if __name__ == "__main__":
    key = jax.random.PRNGKey(0)
    k_x, k_p = jax.random.split(key)

    # N=8 so the default batch block B=4 still leaves 2 parallel grid steps.
    N, Cin, H, W = 8, 4, 16, 16
    x = jax.random.normal(k_x, (N, Cin, H, W), jnp.float32)   # NCHW like PyTorch
    params = make_params(k_p, Cin)
    folded = fold_params(params)

    fwd = jax.jit(mobilenet_forward)
    out = jax.block_until_ready(fwd(x, folded))
    ref = jax.block_until_ready(reference_forward(x, params))

    assert out.shape == (N, H - 4, W - 4, 64), out.shape
    # Kernel uses bf16 MXU operands (f32 accumulation) and a bf16 output cast;
    # compare against the full-f32 reference with a relaxed tolerance.
    out_f32 = out.astype(jnp.float32)
    max_err = float(jnp.max(jnp.abs(out_f32 - ref)))
    assert jnp.allclose(out_f32, ref, atol=1e-1, rtol=1e-1), f"mismatch: {max_err}"

    print("KERNEL_OK")
</pallas_src>

<mosaic_0001>
module attributes {stable_mosaic.version = 11 : i64} {
  func.func @mobilenet_kernel(%arg0: i32, %arg1: memref<1x800x36xbf16, #tpu.memory_space<vmem>>, %arg2: memref<36x32xbf16, #tpu.memory_space<vmem>>, %arg3: memref<32x64xbf16, #tpu.memory_space<vmem>>, %arg4: memref<16x128xf32, #tpu.memory_space<vmem>>, %arg5: memref<4x12x768xbf16, #tpu.memory_space<vmem>>) attributes {dimension_semantics = [#tpu.dimension_semantics<parallel>], iteration_bounds = array<i64: 2>, scalar_prefetch = 0 : i64, scratch_operands = 0 : i64, tpu.core_type = #tpu.core_type<tc>, window_params = [{transform_indices = @transform_0, window_bounds = array<i64: 1, 800, 36>}, {pipeline_mode = #tpu.pipeline_mode<synchronous>, transform_indices = @transform_1, window_bounds = array<i64: 36, 32>}, {pipeline_mode = #tpu.pipeline_mode<synchronous>, transform_indices = @transform_2, window_bounds = array<i64: 32, 64>}, {pipeline_mode = #tpu.pipeline_mode<synchronous>, transform_indices = @transform_3, window_bounds = array<i64: 16, 128>}, {transform_indices = @transform_4, window_bounds = array<i64: 4, 12, 768>}]} {
    %c9 = arith.constant 9 : index
    %c0 = arith.constant 0 : index
    %0 = vector.load %arg4[%c9, %c0] : memref<16x128xf32, #tpu.memory_space<vmem>>, vector<1x32xf32>
    %c10 = arith.constant 10 : index
    %c0_0 = arith.constant 0 : index
    %1 = vector.load %arg4[%c10, %c0_0] : memref<16x128xf32, #tpu.memory_space<vmem>>, vector<1x32xf32>
    %c11 = arith.constant 11 : index
    %c0_1 = arith.constant 0 : index
    %2 = vector.load %arg4[%c11, %c0_1] : memref<16x128xf32, #tpu.memory_space<vmem>>, vector<1x64xf32>
    %c0_2 = arith.constant 0 : index
    %c0_3 = arith.constant 0 : index
    %3 = vector.load %arg4[%c0_2, %c0_3] : memref<16x128xf32, #tpu.memory_space<vmem>>, vector<9x32xf32>
    %c0_4 = arith.constant 0 : index
    %c0_5 = arith.constant 0 : index
    %c0_6 = arith.constant 0 : index
    %4 = vector.load %arg1[%c0_4, %c0_5, %c0_6] : memref<1x800x36xbf16, #tpu.memory_space<vmem>>, vector<1x800x36xbf16>
    %5 = vector.shape_cast %4 : vector<1x800x36xbf16> to vector<800x36xbf16>
    %c0_7 = arith.constant 0 : index
    %c0_8 = arith.constant 0 : index
    %6 = vector.load %arg2[%c0_7, %c0_8] : memref<36x32xbf16, #tpu.memory_space<vmem>>, vector<36x32xbf16>
    %cst = arith.constant dense<0.000000e+00> : vector<800x32xf32>
    %7 = tpu.matmul %5, %6, %cst {dimension_numbers = #tpu.dot_dimension_numbers<[1], [0], [0], [1], [0, 0, 1, 1], [], []>} : vector<800x36xbf16>, vector<36x32xbf16>, vector<800x32xf32> -> vector<800x32xf32>
    %8 = vector.broadcast %0 : vector<1x32xf32> to vector<800x32xf32>
    %9 = arith.addf %7, %8 : vector<800x32xf32>
    %cst_9 = arith.constant 0.000000e+00 : f32
    %10 = vector.broadcast %cst_9 : f32 to vector<800x32xf32>
    %11 = arith.maximumf %9, %10 : vector<800x32xf32>
    %cst_10 = arith.constant 0.000000e+00 : f32
    %12 = vector.broadcast %cst_10 : f32 to vector<768x32xf32>
    %13 = vector.extract_strided_slice %3 {offsets = [0, 0], sizes = [1, 32], strides = [1, 1]} : vector<9x32xf32> to vector<1x32xf32>
    %14 = vector.extract_strided_slice %11 {offsets = [0, 0], sizes = [768, 32], strides = [1, 1]} : vector<800x32xf32> to vector<768x32xf32>
    %15 = vector.broadcast %13 : vector<1x32xf32> to vector<768x32xf32>
    %16 = arith.mulf %14, %15 : vector<768x32xf32>
    %17 = arith.addf %12, %16 : vector<768x32xf32>
    %18 = vector.extract_strided_slice %3 {offsets = [1, 0], sizes = [1, 32], strides = [1, 1]} : vector<9x32xf32> to vector<1x32xf32>
    %19 = vector.extract_strided_slice %11 {offsets = [1, 0], sizes = [768, 32], strides = [1, 1]} : vector<800x32xf32> to vector<768x32xf32>
    %20 = vector.broadcast %18 : vector<1x32xf32> to vector<768x32xf32>
    %21 = arith.mulf %19, %20 : vector<768x32xf32>
    %22 = arith.addf %17, %21 : vector<768x32xf32>
    %23 = vector.extract_strided_slice %3 {offsets = [2, 0], sizes = [1, 32], strides = [1, 1]} : vector<9x32xf32> to vector<1x32xf32>
    %24 = vector.extract_strided_slice %11 {offsets = [2, 0], sizes = [768, 32], strides = [1, 1]} : vector<800x32xf32> to vector<768x32xf32>
    %25 = vector.broadcast %23 : vector<1x32xf32> to vector<768x32xf32>
    %26 = arith.mulf %24, %25 : vector<768x32xf32>
    %27 = arith.addf %22, %26 : vector<768x32xf32>
    %28 = vector.extract_strided_slice %3 {offsets = [3, 0], sizes = [1, 32], strides = [1, 1]} : vector<9x32xf32> to vector<1x32xf32>
    %29 = vector.extract_strided_slice %11 {offsets = [14, 0], sizes = [768, 32], strides = [1, 1]} : vector<800x32xf32> to vector<768x32xf32>
    %30 = vector.broadcast %28 : vector<1x32xf32> to vector<768x32xf32>
    %31 = arith.mulf %29, %30 : vector<768x32xf32>
    %32 = arith.addf %27, %31 : vector<768x32xf32>
    %33 = vector.extract_strided_slice %3 {offsets = [4, 0], sizes = [1, 32], strides = [1, 1]} : vector<9x32xf32> to vector<1x32xf32>
    %34 = vector.extract_strided_slice %11 {offsets = [15, 0], sizes = [768, 32], strides = [1, 1]} : vector<800x32xf32> to vector<768x32xf32>
    %35 = vector.broadcast %33 : vector<1x32xf32> to vector<768x32xf32>
    %36 = arith.mulf %34, %35 : vector<768x32xf32>
    %37 = arith.addf %32, %36 : vector<768x32xf32>
    %38 = vector.extract_strided_slice %3 {offsets = [5, 0], sizes = [1, 32], strides = [1, 1]} : vector<9x32xf32> to vector<1x32xf32>
    %39 = vector.extract_strided_slice %11 {offsets = [16, 0], sizes = [768, 32], strides = [1, 1]} : vector<800x32xf32> to vector<768x32xf32>
    %40 = vector.broadcast %38 : vector<1x32xf32> to vector<768x32xf32>
    %41 = arith.mulf %39, %40 : vector<768x32xf32>
    %42 = arith.addf %37, %41 : vector<768x32xf32>
    %43 = vector.extract_strided_slice %3 {offsets = [6, 0], sizes = [1, 32], strides = [1, 1]} : vector<9x32xf32> to vector<1x32xf32>
    %44 = vector.extract_strided_slice %11 {offsets = [28, 0], sizes = [768, 32], strides = [1, 1]} : vector<800x32xf32> to vector<768x32xf32>
    %45 = vector.broadcast %43 : vector<1x32xf32> to vector<768x32xf32>
    %46 = arith.mulf %44, %45 : vector<768x32xf32>
    %47 = arith.addf %42, %46 : vector<768x32xf32>
    %48 = vector.extract_strided_slice %3 {offsets = [7, 0], sizes = [1, 32], strides = [1, 1]} : vector<9x32xf32> to vector<1x32xf32>
    %49 = vector.extract_strided_slice %11 {offsets = [29, 0], sizes = [768, 32], strides = [1, 1]} : vector<800x32xf32> to vector<768x32xf32>
    %50 = vector.broadcast %48 : vector<1x32xf32> to vector<768x32xf32>
    %51 = arith.mulf %49, %50 : vector<768x32xf32>
    %52 = arith.addf %47, %51 : vector<768x32xf32>
    %53 = vector.extract_strided_slice %3 {offsets = [8, 0], sizes = [1, 32], strides = [1, 1]} : vector<9x32xf32> to vector<1x32xf32>
    %54 = vector.extract_strided_slice %11 {offsets = [30, 0], sizes = [768, 32], strides = [1, 1]} : vector<800x32xf32> to vector<768x32xf32>
    %55 = vector.broadcast %53 : vector<1x32xf32> to vector<768x32xf32>
    %56 = arith.mulf %54, %55 : vector<768x32xf32>
    %57 = arith.addf %52, %56 : vector<768x32xf32>
    %58 = vector.broadcast %1 : vector<1x32xf32> to vector<768x32xf32>
    %59 = arith.addf %57, %58 : vector<768x32xf32>
    %cst_11 = arith.constant 0.000000e+00 : f32
    %60 = vector.broadcast %cst_11 : f32 to vector<768x32xf32>
    %61 = arith.maximumf %59, %60 : vector<768x32xf32>
    %62 = arith.truncf %61 : vector<768x32xf32> to vector<768x32xbf16>
    %c0_12 = arith.constant 0 : index
    %c0_13 = arith.constant 0 : index
    %63 = vector.load %arg3[%c0_12, %c0_13] : memref<32x64xbf16, #tpu.memory_space<vmem>>, vector<32x64xbf16>
    %cst_14 = arith.constant dense<0.000000e+00> : vector<768x64xf32>
    %64 = tpu.matmul %62, %63, %cst_14 {dimension_numbers = #tpu.dot_dimension_numbers<[1], [0], [0], [1], [0, 0, 1, 1], [], []>} : vector<768x32xbf16>, vector<32x64xbf16>, vector<768x64xf32> -> vector<768x64xf32>
    %65 = vector.broadcast %2 : vector<1x64xf32> to vector<768x64xf32>
    %66 = arith.addf %64, %65 : vector<768x64xf32>
    %cst_15 = arith.constant 0.000000e+00 : f32
    %67 = vector.broadcast %cst_15 : f32 to vector<768x64xf32>
    %68 = arith.maximumf %66, %67 : vector<768x64xf32>
    %69 = vector.extract_strided_slice %68 {offsets = [0, 0], sizes = [168, 64], strides = [1, 1]} : vector<768x64xf32> to vector<168x64xf32>
    %70 = vector.shape_cast %69 : vector<168x64xf32> to vector<12x14x64xf32>
    %71 = vector.extract_strided_slice %70 {offsets = [0, 0, 0], sizes = [12, 12, 64], strides = [1, 1, 1]} : vector<12x14x64xf32> to vector<12x12x64xf32>
    %72 = vector.shape_cast %71 : vector<12x12x64xf32> to vector<12x768xf32>
    %73 = arith.truncf %72 : vector<12x768xf32> to vector<12x768xbf16>
    %c0_16 = arith.constant 0 : index
    %c0_17 = arith.constant 0 : index
    %c0_18 = arith.constant 0 : index
    %74 = vector.load %arg5[%c0_16, %c0_17, %c0_18] : memref<4x12x768xbf16, #tpu.memory_space<vmem>>, vector<1x12x768xbf16>
    %75 = vector.shape_cast %74 : vector<1x12x768xbf16> to vector<12x768xbf16>
    %76 = vector.shape_cast %73 : vector<12x768xbf16> to vector<1x12x768xbf16>
    tpu.vector_store %arg5[%c0_16, %c0_17, %c0_18], %76 {strides = array<i32>} : memref<4x12x768xbf16, #tpu.memory_space<vmem>>, vector<1x12x768xbf16>,
    %77 = vector.extract_strided_slice %68 {offsets = [200, 0], sizes = [168, 64], strides = [1, 1]} : vector<768x64xf32> to vector<168x64xf32>
    %78 = vector.shape_cast %77 : vector<168x64xf32> to vector<12x14x64xf32>
    %79 = vector.extract_strided_slice %78 {offsets = [0, 0, 0], sizes = [12, 12, 64], strides = [1, 1, 1]} : vector<12x14x64xf32> to vector<12x12x64xf32>
    %80 = vector.shape_cast %79 : vector<12x12x64xf32> to vector<12x768xf32>
    %81 = arith.truncf %80 : vector<12x768xf32> to vector<12x768xbf16>
    %c1 = arith.constant 1 : index
    %c0_19 = arith.constant 0 : index
    %c0_20 = arith.constant 0 : index
    %82 = vector.load %arg5[%c1, %c0_19, %c0_20] : memref<4x12x768xbf16, #tpu.memory_space<vmem>>, vector<1x12x768xbf16>
    %83 = vector.shape_cast %82 : vector<1x12x768xbf16> to vector<12x768xbf16>
    %84 = vector.shape_cast %81 : vector<12x768xbf16> to vector<1x12x768xbf16>
    tpu.vector_store %arg5[%c1, %c0_19, %c0_20], %84 {strides = array<i32>} : memref<4x12x768xbf16, #tpu.memory_space<vmem>>, vector<1x12x768xbf16>,
    %85 = vector.extract_strided_slice %68 {offsets = [400, 0], sizes = [168, 64], strides = [1, 1]} : vector<768x64xf32> to vector<168x64xf32>
    %86 = vector.shape_cast %85 : vector<168x64xf32> to vector<12x14x64xf32>
    %87 = vector.extract_strided_slice %86 {offsets = [0, 0, 0], sizes = [12, 12, 64], strides = [1, 1, 1]} : vector<12x14x64xf32> to vector<12x12x64xf32>
    %88 = vector.shape_cast %87 : vector<12x12x64xf32> to vector<12x768xf32>
    %89 = arith.truncf %88 : vector<12x768xf32> to vector<12x768xbf16>
    %c2 = arith.constant 2 : index
    %c0_21 = arith.constant 0 : index
    %c0_22 = arith.constant 0 : index
    %90 = vector.load %arg5[%c2, %c0_21, %c0_22] : memref<4x12x768xbf16, #tpu.memory_space<vmem>>, vector<1x12x768xbf16>
    %91 = vector.shape_cast %90 : vector<1x12x768xbf16> to vector<12x768xbf16>
    %92 = vector.shape_cast %89 : vector<12x768xbf16> to vector<1x12x768xbf16>
    tpu.vector_store %arg5[%c2, %c0_21, %c0_22], %92 {strides = array<i32>} : memref<4x12x768xbf16, #tpu.memory_space<vmem>>, vector<1x12x768xbf16>,
    %93 = vector.extract_strided_slice %68 {offsets = [600, 0], sizes = [168, 64], strides = [1, 1]} : vector<768x64xf32> to vector<168x64xf32>
    %94 = vector.shape_cast %93 : vector<168x64xf32> to vector<12x14x64xf32>
    %95 = vector.extract_strided_slice %94 {offsets = [0, 0, 0], sizes = [12, 12, 64], strides = [1, 1, 1]} : vector<12x14x64xf32> to vector<12x12x64xf32>
    %96 = vector.shape_cast %95 : vector<12x12x64xf32> to vector<12x768xf32>
    %97 = arith.truncf %96 : vector<12x768xf32> to vector<12x768xbf16>
    %c3 = arith.constant 3 : index
    %c0_23 = arith.constant 0 : index
    %c0_24 = arith.constant 0 : index
    %98 = vector.load %arg5[%c3, %c0_23, %c0_24] : memref<4x12x768xbf16, #tpu.memory_space<vmem>>, vector<1x12x768xbf16>
    %99 = vector.shape_cast %98 : vector<1x12x768xbf16> to vector<12x768xbf16>
    %100 = vector.shape_cast %97 : vector<12x768xbf16> to vector<1x12x768xbf16>
    tpu.vector_store %arg5[%c3, %c0_23, %c0_24], %100 {strides = array<i32>} : memref<4x12x768xbf16, #tpu.memory_space<vmem>>, vector<1x12x768xbf16>,
    return
  }
  func.func @transform_0(%arg0: i32) -> (i32, i32, i32) {
    %c0_i32 = arith.constant 0 : i32
    %c0_i32_0 = arith.constant 0 : i32
    %c0_i32_1 = arith.constant 0 : i32
    return %arg0, %c0_i32, %c0_i32_0 : i32, i32, i32
  }
  func.func @transform_1(%arg0: i32) -> (i32, i32) {
    %c0_i32 = arith.constant 0 : i32
    %c0_i32_0 = arith.constant 0 : i32
    %c0_i32_1 = arith.constant 0 : i32
    return %c0_i32, %c0_i32_0 : i32, i32
  }
  func.func @transform_2(%arg0: i32) -> (i32, i32) {
    %c0_i32 = arith.constant 0 : i32
    %c0_i32_0 = arith.constant 0 : i32
    %c0_i32_1 = arith.constant 0 : i32
    return %c0_i32, %c0_i32_0 : i32, i32
  }
  func.func @transform_3(%arg0: i32) -> (i32, i32) {
    %c0_i32 = arith.constant 0 : i32
    %c0_i32_0 = arith.constant 0 : i32
    %c0_i32_1 = arith.constant 0 : i32
    return %c0_i32, %c0_i32_0 : i32, i32
  }
  func.func @transform_4(%arg0: i32) -> (i32, i32, i32) {
    %c0_i32 = arith.constant 0 : i32
    %c0_i32_0 = arith.constant 0 : i32
    %c0_i32_1 = arith.constant 0 : i32
    return %arg0, %c0_i32, %c0_i32_0 : i32, i32, i32
  }
}

</mosaic_0001>

<bundles_post_ra>
// kernel: mobilenet_forward.1
= control target key start
LH: loop header
LB: loop body
LE: loop exit
PB: predicated region body
PF: predicated region fallthrough
CT: control target
= control target key end

     0   :  { %s12533_s15 = smov 0   ;;  %s20213_s0 = inlined_call_operand.vmem [shape: bf16[2,800,36], index: 0, kind: input, shape index: {}]   ;;  %s20214_s1 = inlined_call_operand.vmem [shape: bf16[36,32], index: 1, kind: input, shape index: {}]   ;;  %s20215_s2 = inlined_call_operand.vmem [shape: bf16[32,64], index: 2, kind: input, shape index: {}]   ;;  %s20216_s3 = inlined_call_operand.vmem [shape: f32[16,128], index: 3, kind: input, shape index: {}]   ;;  %s20217_s4 = inlined_call_operand.vmem [shape: bf16[8,12,768], index: 4, kind: output, shape index: {}]  }
   0x1 LB: > { %s12539_s16 = sadd.s32 4294967295, %s12503_s15   ;;  %p11679_p0 = scmp.ge.s32.totalorder %s12503_s15, 1  ;;  %s12503_s15 = sphi %s12533_s15, %s14_s15  }
   0x2   : > { %p162_p1 = scmp.lt.s32.totalorder %s12503_s15, 3 }
   0x4   : > { %p163_p2 = pnand %p11679_p0, %p162_p1 }
   0x6   : > { %166 = sbr.rel (%p163_p2) target bundleno = 1572 (0x624), region = 36 }
   0xd   : > { %v12423_v0 = vld [vmem:[%s20214_s1] sm:$0xff]   ;;  %v12424_v1 = vld [vmem:[%s20214_s1 + $0x8] sm:$0xff]   ;;  %p189_p3 = scmp.lt.s32.totalorder %s12539_s16, 1  ;;  %v12425_v2 = vld [vmem:[%s20214_s1 + $0x10] ss:$0 sps:$4 sm:$0x33]   ;;  %v1269_v56 = vlaneseq }
   0xe   : > { %12083 = vmatprep.subr.bf16.mxu0 %v12423_v0  ;;  %vm732_vm0 = vcmask 1041408   ;;  %vm581_vm1 = vcmask 293888   ;;  %v12476_v37 = vld [vmem:[%s20215_s2] sm:$0xff]   ;;  %v12477_v38 = vld [vmem:[%s20215_s2 + $0x8] sm:$0xff]   ;;  %v12505_v59 = vmov 1983009808  }
   0xf   : > { %12084 = vmatpush3.bf16.msra.mxu0 %v12423_v0  ;;  %s190_s23 = scalar_select %p189_p3, %s12539_s16, 1  ;;  %v734_v3 = vsel %vm732_vm0, %v12425_v2, 0  ;;  %12189 = vmatprep.subr.bf16.mxu1 %v12476_v37  ;;  %v12667_v57 = vshrl.u32 %v1269_v56, 7  ;;  %v6668_v60 = vunpack.c.l.s4 %v12505_v59  ;;  %v205_v61 = vld [vmem:[%s20216_s3] sm:$0xff]  ;;  %vm1663_vm2 = vcmask 1046528  }
  0x10   : > { %12085 = vmatprep.subr.bf16.mxu0 %v12424_v1  ;;  %12190 = vmatpush3.bf16.msra.mxu1 %v12476_v37  ;;  %vm2247_vm3 = vcmask 1045504   ;;  %vm3414_vm4 = vcmask 1040384   ;;  %vm4194_vm5 = vcmask 1043456   ;;  %vm4778_vm6 = vcmask 1042432   ;;  %s12507_s28 = smov 64   ;;  %s11681_s5 = sshll.u32 %s12539_s16, 2 }
  0x11   : > { %s12290_s24 = smul.u32 400, %s190_s23  ;;  %12191 = vmatprep.subr.bf16.mxu1 %v12477_v38  ;;  %20577 = vst [vmem:[#allocation2_spill] sm:$0xff] %v12667_v57  ;;  %v1271_v58 = vsub.s32 0, %v12667_v57  ;;  %v1467_v62 = vsub.s32 1, %v12667_v57  ;;  %v2051_v63 = vsub.s32 2, %v12667_v57  ;;  %v2635_v0 = vsub.s32 3, %v12667_v57 }
  0x12   : > { %vm6011_vm7 = vcmask 261120   ;;  %vm7833_vm8 = vcmask 523264   ;;  %p19536_p4 = scmp.lt.s32.totalorder %s11681_s5, 7 }
  0x13   : > { %12086 = vmatpush3.bf16.msra.mxu0 %v12424_v1  ;;  %s12557_s27 = scalar_lea.vmem %s20213_s0, %s12290_s24  ;;  %v12679_v1 = vld [vmem:[%s20216_s3 + $0x9] ss:$0 sm:$0xff] }
  0x14   : > { %12289 = vmatprep.subr.msk.bf16.mxu0 %vm732_vm0, %v12425_v2  ;;  %v12426_v4 = vld [vmem:[%s12557_s27] sm:$0xff]   ;;  %v12427_v5 = vld [vmem:[%s12557_s27 + $0x8] sm:$0xff]   ;;  %v12428_v6 = vld [vmem:[%s12557_s27 + $0x10] sm:$0xff]   ;;  %12192 = vmatpush3.bf16.msra.mxu1 %v12477_v38  ;;  %v3218_v2 = vsub.s32 4, %v12667_v57  ;;  %s21364_s5 = smov (!%p19536_p4, %s11681_s5), 7 }
  0x15   : > { %12089 = vmatprep.mubr.msk.bf16.mxu0 %vm581_vm1, %v12426_v4  ;;  %v12429_v7 = vld [vmem:[%s12557_s27 + $0x18] sm:$0xff]   ;;  %v12430_v8 = vld [vmem:[%s12557_s27 + $0x20] sm:$0xff]   ;;  %v12431_v9 = vld [vmem:[%s12557_s27 + $0x28] sm:$0xff]   ;;  %v3998_v4 = vsub.s32 6, %v12667_v57  ;;  %s12291_s16 = smul.u32 48, %s21364_s5 }
  0x16   : > { %v12432_v10 = vld [vmem:[%s12557_s27 + $0x30] sm:$0xff]   ;;  %v12433_v11 = vld [vmem:[%s12557_s27 + $0x38] sm:$0xff]   ;;  %v12434_v12 = vld [vmem:[%s12557_s27 + $0x40] sm:$0xff]  }
  0x17   : > { %12088 = vmatpush3.bf16.msra.mxu0 %v734_v3  ;;  %v12435_v13 = vld [vmem:[%s12557_s27 + $0x48] sm:$0xff]   ;;  %v12436_v14 = vld [vmem:[%s12557_s27 + $0x50] sm:$0xff]   ;;  %v12437_v15 = vld [vmem:[%s12557_s27 + $0x58] sm:$0xff]   ;;  %v3802_v3 = vsub.s32 5, %v12667_v57  ;;  %s19623_s11 = scalar_lea.vmem %s20217_s4, %s12291_s16 }
  0x18   : > { %v12438_v16 = vld [vmem:[%s12557_s27 + $0x60] sm:$0xff]   ;;  %v12439_v17 = vld [vmem:[%s12557_s27 + $0x68] sm:$0xff]   ;;  %v12440_v18 = vld [vmem:[%s12557_s27 + $0x70] sm:$0xff]  }
  0x19   : > { %v12441_v19 = vld [vmem:[%s12557_s27 + $0x78] sm:$0xff]   ;;  %v12442_v20 = vld [vmem:[%s12557_s27 + $0x80] sm:$0xff]   ;;  %v12443_v21 = vld [vmem:[%s12557_s27 + $0x88] sm:$0xff]  }
  0x1a   : > { %12090 = vmatmul.mubr.msk.bf16.vlgmr.msra.gmra.mrb[0].mxu0 %vm581_vm1, %v12427_v5  ;;  %v12444_v22 = vld [vmem:[%s12557_s27 + $0x90] sm:$0xff]   ;;  %v12445_v23 = vld [vmem:[%s12557_s27 + $0x98] sm:$0xff]   ;;  %v12446_v24 = vld [vmem:[%s12557_s27 + $0xa0] sm:$0xff]   ;;  %v4582_v5 = vsub.s32 7, %v12667_v57 }
  0x1b   : > { %12093 = vmatprep.mubr.msk.bf16.mxu0 %vm581_vm1, %v12428_v6  ;;  %v12447_v25 = vld [vmem:[%s12557_s27 + $0xa8] sm:$0xff]   ;;  %v12448_v26 = vld [vmem:[%s12557_s27 + $0xb0] sm:$0xff]   ;;  %v12449_v27 = vld [vmem:[%s12557_s27 + $0xb8] sm:$0xff]  }
  0x1c   : > { %v12450_v28 = vld [vmem:[%s12557_s27 + $0xc0] sm:$0xff]   ;;  %v12451_v29 = vld [vmem:[%s12557_s27 + $0xc8] sm:$0xff]   ;;  %v12452_v30 = vld [vmem:[%s12557_s27 + $0xd0] sm:$0xff]  }
  0x1d   : > { %v12453_v31 = vld [vmem:[%s12557_s27 + $0xd8] sm:$0xff]   ;;  %v12454_v32 = vld [vmem:[%s12557_s27 + $0xe0] sm:$0xff]   ;;  %v12455_v33 = vld [vmem:[%s12557_s27 + $0xe8] sm:$0xff]  }
  0x1e   : > { %v12456_v34 = vld [vmem:[%s12557_s27 + $0xf0] sm:$0xff]   ;;  %v12457_v35 = vld [vmem:[%s12557_s27 + $0xf8] sm:$0xff]   ;;  %v12458_v36 = vld [vmem:[%s12557_s27 + $0x100] sm:$0xff]  }
  0x1f   : > { %v12459_v39 = vld [vmem:[%s12557_s27 + $0x108] sm:$0xff]   ;;  %v12460_v40 = vld [vmem:[%s12557_s27 + $0x110] sm:$0xff]   ;;  %v12461_v41 = vld [vmem:[%s12557_s27 + $0x118] sm:$0xff]  }
  0x20   : > { %v12462_v42 = vld [vmem:[%s12557_s27 + $0x120] sm:$0xff]   ;;  %v12463_v43 = vld [vmem:[%s12557_s27 + $0x128] sm:$0xff]   ;;  %v12464_v44 = vld [vmem:[%s12557_s27 + $0x130] sm:$0xff]  }
  0x21   : > { %v12465_v45 = vld [vmem:[%s12557_s27 + $0x138] sm:$0xff]   ;;  %v12466_v46 = vld [vmem:[%s12557_s27 + $0x140] sm:$0xff]   ;;  %v12467_v47 = vld [vmem:[%s12557_s27 + $0x148] sm:$0xff]  }
  0x22   : > { %12094 = vmatmul.mubr.msk.bf16.gmra.mrb[4].mxu0 %vm581_vm1, %v12429_v7  ;;  %v12468_v48 = vld [vmem:[%s12557_s27 + $0x150] sm:$0xff]   ;;  %v12469_v49 = vld [vmem:[%s12557_s27 + $0x158] sm:$0xff]   ;;  %v12470_v50 = vld [vmem:[%s12557_s27 + $0x160] sm:$0xff]   ;;  %v12685_v7 = vrot.slane %v205_v61, %v1271_v58 }
  0x23   : > { %12097 = vmatprep.mubr.msk.bf16.mxu0 %vm581_vm1, %v12430_v8  ;;  %v12471_v51 = vld [vmem:[%s12557_s27 + $0x168] sm:$0xff]   ;;  %v12472_v52 = vld [vmem:[%s12557_s27 + $0x170] sm:$0xff]   ;;  %v12473_v53 = vld [vmem:[%s12557_s27 + $0x178] sm:$0xff]   ;;  %v6669_v8 = vunpack.c.0.s8 %v6668_v60 }
  0x24   : > { %v12474_v54 = vld [vmem:[%s12557_s27 + $0x180] sm:$0xff]   ;;  %v12475_v55 = vld [vmem:[%s12557_s27 + $0x188] sm:$0xff]  }
  0x2a   : > { %12098 = vmatmul.mubr.msk.bf16.gmra.mrb[8].mxu0 %vm581_vm1, %v12431_v9  ;;  %v12506_v9 = vmov 1934713408  }
  0x2b   : > { %12101 = vmatprep.mubr.msk.bf16.mxu0 %vm581_vm1, %v12432_v10  ;;  %v12687_v10 = vunpack.c.l.s4 %v12506_v9 }
  0x2d   : > { %20578 = vst [vmem:[#allocation3_spill] sm:$0xff] %v12687_v10 }
  0x32   : > { %12102 = vmatmul.mubr.msk.bf16.gmra.mrb[12].mxu0 %vm581_vm1, %v12433_v11 }
  0x33   : > { %12105 = vmatprep.mubr.msk.bf16.mxu0 %vm581_vm1, %v12434_v12  ;;  %v12690_v12 = vrot.slane %v205_v61, %v1467_v62 }
  0x3a   : > { %12106 = vmatmul.mubr.msk.bf16.gmra.mrb[16].mxu0 %vm581_vm1, %v12435_v13  ;;  %v12692_v13 = vrot.slane %v205_v61, %v2051_v63 }
  0x3b   : > { %12109 = vmatprep.mubr.msk.bf16.mxu0 %vm581_vm1, %v12436_v14  ;;  %v12694_v14 = vrot.slane %v205_v61, %v2635_v0 }
  0x42   : > { %12110 = vmatmul.mubr.msk.bf16.gmra.mrb[20].mxu0 %vm581_vm1, %v12437_v15 }
  0x43   : > { %12113 = vmatprep.mubr.msk.bf16.mxu0 %vm581_vm1, %v12438_v16  ;;  %v12696_v16 = vrot.slane %v205_v61, %v3218_v2 }
  0x4a   : > { %12114 = vmatmul.mubr.msk.bf16.gmra.mrb[24].mxu0 %vm581_vm1, %v12439_v17 }
  0x4b   : > { %12117 = vmatprep.mubr.msk.bf16.mxu0 %vm581_vm1, %v12440_v18 }
  0x52   : > { %12118 = vmatmul.mubr.msk.bf16.gmra.mrb[28].mxu0 %vm581_vm1, %v12441_v19  ;;  %v12699_v19 = vrot.slane %v205_v61, %v3802_v3 }
  0x53   : > { %12121 = vmatprep.mubr.msk.bf16.mxu0 %vm581_vm1, %v12442_v20 }
  0x5a   : > { %12122 = vmatmul.mubr.msk.bf16.gmra.mrb[32].mxu0 %vm581_vm1, %v12443_v21 }
  0x5b   : > { %12125 = vmatprep.mubr.msk.bf16.mxu0 %vm581_vm1, %v12444_v22 }
  0x62   : > { %12126 = vmatmul.mubr.msk.bf16.gmra.mrb[36].mxu0 %vm581_vm1, %v12445_v23  ;;  %v12702_v23 = vrot.slane %v205_v61, %v3998_v4 }
  0x63   : > { %12129 = vmatprep.mubr.msk.bf16.mxu0 %vm581_vm1, %v12446_v24  ;;  %v12704_v24 = vrot.slane %v205_v61, %v4582_v5 }
  0x6a   : > { %12130 = vmatmul.mubr.msk.bf16.gmra.mrb[40].mxu0 %vm581_vm1, %v12447_v25 }
  0x6b   : > { %12133 = vmatprep.mubr.msk.bf16.mxu0 %vm581_vm1, %v12448_v26 }
  0x72   : > { %12134 = vmatmul.mubr.msk.bf16.gmra.mrb[44].mxu0 %vm581_vm1, %v12449_v27  ;;  %v12708_v27 = vsub.s32 %v6669_v8, %v12667_v57 }
  0x73   : > { %12137 = vmatprep.mubr.msk.bf16.mxu0 %vm581_vm1, %v12450_v28 }
  0x74   : > { %20579 = vst [vmem:[#allocation4_spill] sm:$0xff] %v12708_v27 }
  0x7a   : > { %12138 = vmatmul.mubr.msk.bf16.gmra.mrb[48].mxu0 %vm581_vm1, %v12451_v29 }
  0x7b   : > { %12141 = vmatprep.mubr.msk.bf16.mxu0 %vm581_vm1, %v12452_v30 }
  0x82   : > { %12142 = vmatmul.mubr.msk.bf16.gmra.mrb[52].mxu0 %vm581_vm1, %v12453_v31 }
  0x83   : > { %12145 = vmatprep.mubr.msk.bf16.mxu0 %vm581_vm1, %v12454_v32 }
  0x8a   : > { %12146 = vmatmul.mubr.msk.bf16.gmra.mrb[56].mxu0 %vm581_vm1, %v12455_v33 }
  0x8b   : > { %12149 = vmatprep.mubr.msk.bf16.mxu0 %vm581_vm1, %v12456_v34 }
  0x92   : > { %12150 = vmatmul.mubr.msk.bf16.gmra.mrb[60].mxu0 %vm581_vm1, %v12457_v35 }
  0x93   : > { %12153 = vmatprep.mubr.msk.bf16.mxu0 %vm581_vm1, %v12458_v36 }
  0x9a   : > { %12154 = vmatmul.mubr.msk.bf16.gmra.mrb[64].mxu0 %vm581_vm1, %v12459_v39 }
  0x9b   : > { %12157 = vmatprep.mubr.msk.bf16.mxu0 %vm581_vm1, %v12460_v40 }
  0xa2   : > { %12158 = vmatmul.mubr.msk.bf16.gmra.mrb[68].mxu0 %vm581_vm1, %v12461_v41 }
  0xa3   : > { %12161 = vmatprep.mubr.msk.bf16.mxu0 %vm581_vm1, %v12462_v42 }
  0xaa   : > { %12162 = vmatmul.mubr.msk.bf16.gmra.mrb[72].mxu0 %vm581_vm1, %v12463_v43 }
  0xab   : > { %12165 = vmatprep.mubr.msk.bf16.mxu0 %vm581_vm1, %v12464_v44 }
  0xb2   : > { %12166 = vmatmul.mubr.msk.bf16.gmra.mrb[76].mxu0 %vm581_vm1, %v12465_v45 }
  0xb3   : > { %12169 = vmatprep.mubr.msk.bf16.mxu0 %vm581_vm1, %v12466_v46 }
  0xba   : > { %12170 = vmatmul.mubr.msk.bf16.gmra.mrb[80].mxu0 %vm581_vm1, %v12467_v47 }
  0xbb   : > { %12173 = vmatprep.mubr.msk.bf16.mxu0 %vm581_vm1, %v12468_v48 }
  0xc2   : > { %12174 = vmatmul.mubr.msk.bf16.gmra.mrb[84].mxu0 %vm581_vm1, %v12469_v49 }
  0xc3   : > { %12177 = vmatprep.mubr.msk.bf16.mxu0 %vm581_vm1, %v12470_v50 }
  0xca   : > { %12178 = vmatmul.mubr.msk.bf16.gmra.mrb[88].mxu0 %vm581_vm1, %v12471_v51 }
  0xcb   : > { %12181 = vmatprep.mubr.msk.bf16.mxu0 %vm581_vm1, %v12472_v52 }
  0xd2   : > { %12182 = vmatmul.mubr.msk.bf16.gmra.mrb[92].mxu0 %vm581_vm1, %v12473_v53 }
  0xd3   : > { %12185 = vmatprep.mubr.msk.bf16.mxu0 %vm581_vm1, %v12474_v54 }
  0xda   : > { %12186 = vmatmul.mubr.msk.bf16.gmra.mrb[96].mxu0 %vm581_vm1, %v12475_v55 }
  0xed   : > { %v12091_v6 = vpop.f32.mrb[0].mxu0 }
  0xee   : > { %v779_v11 = vadd.f32 %v12091_v6, %v12679_v1  ;;  %v770_v15 = vpop.f32.mrb[1].mxu0 }
  0xef   : > { %v771_v17 = vadd.f32 %v12679_v1, %v770_v15  ;;  %v12092_v18 = vpop.f32.mrb[2].mxu0 }
  0xf0   : > { %v1171_v20 = vmax.f32 %v779_v11, 0.0  ;;  %v782_v21 = vadd.f32 %v12092_v18, %v12679_v1  ;;  %v773_v22 = vpop.f32.mrb[3].mxu0 }
  0xf1   : > { %v1169_v25 = vmax.f32 %v771_v17, 0.0  ;;  %v774_v26 = vadd.f32 %v12679_v1, %v773_v22 }
  0xf2   : > { %v12712_v29 = vmul.f32 %v12685_v7, %v1171_v20  ;;  %v12715_v30 = vmul.f32 %v12690_v12, %v1171_v20  ;;  %v12718_v31 = vmul.f32 %v12692_v13, %v1171_v20  ;;  %v2638_v32 = vmul.f32 %v12694_v14, %v1171_v20 }
  0xf3   : > { %v3221_v33 = vmul.f32 %v12696_v16, %v1171_v20  ;;  %v1273_v34 = vmul.f32 %v12685_v7, %v1169_v25  ;;  %v1469_v35 = vmul.f32 %v12690_v12, %v1169_v25  ;;  %v2053_v36 = vmul.f32 %v12692_v13, %v1169_v25 }
  0xf4   : > { %v1667_v37 = vrot.slane %v12715_v30, 1  ;;  %v2251_v38 = vrot.slane %v12718_v31, 2  ;;  %v2832_v39 = vrot.slane %v2638_v32, 6  ;;  %v12727_v40 = vmax.f32 %v782_v21, 0.0 }
  0xf5   : > { %v1664_v41 = vrot.slane %v1469_v35, 1  ;;  %v2248_v42 = vrot.slane %v2053_v36, 2  ;;  %v1170_v43 = vmax.f32 %v774_v26, 0.0  ;;  %v12095_v44 = vpop.f32.mrb[4].mxu0  ;;  %v3416_v45 = vrot.slane %v3221_v33, 7 }
  0xf6   : > { %v795_v46 = vadd.f32 %v12095_v44, %v12679_v1  ;;  %v786_v47 = vpop.f32.mrb[5].mxu0  ;;  %v12732_v48 = vmul.f32 %v12694_v14, %v12727_v40  ;;  %v12736_v49 = vmul.f32 %v12696_v16, %v12727_v40  ;;  %v3804_v50 = vmul.f32 %v12699_v19, %v1171_v20 }
  0xf7   : > { %v1274_v51 = vmul.f32 %v12685_v7, %v1170_v43  ;;  %v1470_v52 = vmul.f32 %v12690_v12, %v1170_v43  ;;  %v2054_v53 = vmul.f32 %v12692_v13, %v1170_v43  ;;  %v2637_v54 = vmul.f32 %v12694_v14, %v1170_v43  ;;  %v12096_v55 = vpop.f32.mrb[6].mxu0 }
  0xf8   : > { %v3220_v56 = vmul.f32 %v12696_v16, %v1170_v43  ;;  %v12744_v58 = vmax.f32 %v795_v46, 0.0  ;;  %v787_v59 = vadd.f32 %v12679_v1, %v786_v47  ;;  %v798_v60 = vadd.f32 %v12096_v55, %v12679_v1  ;;  %v789_v61 = vpop.f32.mrb[7].mxu0 }
  0xf9   : > { %v1665_v62 = vrot.slane %v1470_v52, 1  ;;  %v2249_v63 = vrot.slane %v2054_v53, 2  ;;  %v2831_v0 = vrot.slane %v2637_v54, 6  ;;  %v790_v2 = vadd.f32 %v12679_v1, %v789_v61 }
  0xfa   : > { %v3415_v3 = vrot.slane %v3220_v56, 7  ;;  %v12749_v4 = vmax.f32 %v787_v59, 0.0  ;;  %v12751_v5 = vmax.f32 %v798_v60, 0.0  ;;  %v2834_v6 = vrot.slane %v12732_v48, 6 }
  0xfb   : > { %v1666_v8 = vsel %vm1663_vm2, %v1664_v41, %v1665_v62  ;;  %v1668_v9 = vsel %vm1663_vm2, %v1665_v62, %v1667_v37  ;;  %v2250_v11 = vsel %vm2247_vm3, %v2248_v42, %v2249_v63  ;;  %v2252_v15 = vsel %vm2247_vm3, %v2249_v63, %v2251_v38  ;;  %v12796_v62 = vld [vmem:[%s20216_s3 + $0x8] ss:$0 sm:$0xff] }
  0xfc   : > { %v1953_v17 = vadd.f32 %v1666_v8, %v1273_v34  ;;  %v1954_v18 = vadd.f32 %v1668_v9, %v1274_v51  ;;  %v12762_v20 = vmax.f32 %v790_v2, 0.0  ;;  %v2833_v21 = vsel %vm732_vm0, %v2831_v0, %v2832_v39 }
  0xfd   : > { %v12099_v22 = vpop.f32.mrb[8].mxu0  ;;  %v2835_v25 = vsel %vm732_vm0, %v2832_v39, %v2834_v6  ;;  %v3417_v26 = vsel %vm3414_vm4, %v3415_v3, %v3416_v45  ;;  %v3418_v32 = vrot.slane %v12736_v49, 7  ;;  %v3805_v33 = vmul.f32 %v12699_v19, %v12727_v40 }
  0xfe   : > { %v2538_v35 = vadd.f32 %v2252_v15, %v1954_v18  ;;  %v811_v34 = vadd.f32 %v12099_v22, %v12679_v1  ;;  %v802_v36 = vpop.f32.mrb[9].mxu0  ;;  %v2537_v41 = vadd.f32 %v2250_v11, %v1953_v17  ;;  %v4000_v42 = vmul.f32 %v12702_v23, %v12727_v40 }
  0xff   : > { %v803_v43 = vadd.f32 %v12679_v1, %v802_v36  ;;  %v12100_v44 = vpop.f32.mrb[10].mxu0  ;;  %v3419_v39 = vsel %vm3414_vm4, %v3416_v45, %v3418_v32  ;;  %v4001_v46 = vmul.f32 %v12702_v23, %v12749_v4  ;;  %v12783_v47 = vmul.f32 %v12702_v23, %v12762_v20 }
 0x100   : > { %v12785_v51 = vmax.f32 %v811_v34, 0.0  ;;  %v814_v52 = vadd.f32 %v12100_v44, %v12679_v1  ;;  %v805_v53 = vpop.f32.mrb[11].mxu0  ;;  %v3120_v54 = vadd.f32 %v2833_v21, %v2537_v41  ;;  %v3121_v55 = vadd.f32 %v2835_v25, %v2538_v35 }
 0x101   : > { %v12788_v56 = vmax.f32 %v803_v43, 0.0  ;;  %v806_v59 = vadd.f32 %v12679_v1, %v805_v53  ;;  %v4195_v60 = vrot.slane %v4000_v42, 4  ;;  %v4196_v45 = vrot.slane %v4001_v46, 4 }
 0x102   : > { %v12791_v61 = vmax.f32 %v814_v52, 0.0  ;;  %v3704_v63 = vadd.f32 %v3417_v26, %v3120_v54  ;;  %v3705_v0 = vadd.f32 %v3419_v39, %v3121_v55  ;;  %v4198_v2 = vrot.slane %v12783_v47, 4 }
 0x103   : > { %v12799_v3 = vmax.f32 %v806_v59, 0.0  ;;  %v4197_v8 = vsel %vm4194_vm5, %v4195_v60, %v4196_v45  ;;  %v4584_v9 = vmul.f32 %v12704_v24, %v12727_v40  ;;  %v4585_v11 = vmul.f32 %v12704_v24, %v12749_v4 }
 0x104   : > { %v3900_v15 = vadd.f32 %v3804_v50, %v3704_v63  ;;  %v3901_v17 = vadd.f32 %v3805_v33, %v3705_v0  ;;  %v4199_v18 = vsel %vm4194_vm5, %v4196_v45, %v4198_v2  ;;  %v12811_v21 = vmul.f32 %v12704_v24, %v12762_v20 }
 0x105   : > { %v12103_v22 = vpop.f32.mrb[12].mxu0  ;;  %v4779_v25 = vrot.slane %v4584_v9, 5  ;;  %v4780_v26 = vrot.slane %v4585_v11, 5  ;;  %v5168_v35 = vmul.f32 %v12796_v62, %v12727_v40  ;;  %v5169_v34 = vmul.f32 %v12796_v62, %v12749_v4 }
 0x106   : > { %v827_v50 = vadd.f32 %v12103_v22, %v12679_v1  ;;  %v818_v33 = vpop.f32.mrb[13].mxu0  ;;  %v4484_v36 = vadd.f32 %v4197_v8, %v3900_v15  ;;  %v4485_v41 = vadd.f32 %v4199_v18, %v3901_v17  ;;  %v4782_v42 = vrot.slane %v12811_v21, 5  ;;  %v12846_v22 = vld [vmem:[%s20216_s3 + $0xa] ss:$0 sm:$0xff] }
 0x107   : > { %v819_v43 = vadd.f32 %v12679_v1, %v818_v33  ;;  %v12104_v44 = vpop.f32.mrb[14].mxu0  ;;  %v4781_v39 = vsel %vm4778_vm6, %v4779_v25, %v4780_v26  ;;  %v12823_v46 = vmul.f32 %v12796_v62, %v12762_v20  ;;  %v5362_v52 = vrot.slane %v5168_v35, 6 }
 0x108   : > { %v12825_v53 = vmax.f32 %v827_v50, 0.0  ;;  %v830_v54 = vadd.f32 %v12104_v44, %v12679_v1  ;;  %v821_v55 = vpop.f32.mrb[15].mxu0  ;;  %v4783_v59 = vsel %vm4778_vm6, %v4780_v26, %v4782_v42  ;;  %v5068_v60 = vadd.f32 %v4781_v39, %v4484_v36 }
 0x109   : > { %v12831_v45 = vmax.f32 %v819_v43, 0.0  ;;  %v822_v63 = vadd.f32 %v12679_v1, %v821_v55  ;;  %v5069_v0 = vadd.f32 %v4783_v59, %v4485_v41  ;;  %v5363_v8 = vrot.slane %v5169_v34, 6 }
 0x10a   : > { %v12834_v9 = vmax.f32 %v830_v54, 0.0  ;;  %v20218_v11 = vrot.slane %v12823_v46, 6  ;;  %v1276_v15 = vmul.f32 %v12685_v7, %v12727_v40  ;;  %v1472_v17 = vmul.f32 %v12690_v12, %v12727_v40 }
 0x10b   : > { %v12841_v18 = vmax.f32 %v822_v63, 0.0  ;;  %v5364_v25 = vsel %vm732_vm0, %v5362_v52, %v5363_v8  ;;  %v12851_v26 = vmul.f32 %v12690_v12, %v12749_v4  ;;  %v2056_v35 = vmul.f32 %v12692_v13, %v12727_v40 }
 0x10c   : > { %v5366_v34 = vsel %vm732_vm0, %v5363_v8, %v20218_v11  ;;  %v5651_v50 = vadd.f32 %v5364_v25, %v5068_v60  ;;  %v1669_v33 = vrot.slane %v1472_v17, 1  ;;  %v12860_v36 = vmul.f32 %v12692_v13, %v12749_v4 }
 0x10d   : > { %v12107_v41 = vpop.f32.mrb[16].mxu0  ;;  %v5652_v43 = vadd.f32 %v5366_v34, %v5069_v0  ;;  %v20220_v44 = vrot.slane %v12851_v26, 1  ;;  %v2253_v39 = vrot.slane %v2056_v35, 2  ;;  %v2640_v52 = vmul.f32 %v12694_v14, %v12749_v4 }
 0x10e   : > { %v843_v40 = vadd.f32 %v12107_v41, %v12679_v1  ;;  %v834_v54 = vpop.f32.mrb[17].mxu0  ;;  %v5751_v55 = vadd.f32 %v12846_v22, %v5651_v50  ;;  %v1670_v59 = vsel %vm1663_vm2, %v1667_v37, %v1669_v33  ;;  %v20219_v60 = vrot.slane %v12860_v36, 2 }
 0x10f   : > { %v835_v63 = vadd.f32 %v12679_v1, %v834_v54  ;;  %v12108_v0 = vpop.f32.mrb[18].mxu0  ;;  %v5752_v8 = vadd.f32 %v12846_v22, %v5652_v43  ;;  %v1672_v17 = vsel %vm1663_vm2, %v1669_v33, %v20220_v44  ;;  %v1955_v25 = vadd.f32 %v1670_v59, %v12712_v29 }
 0x110   : > { %v12877_v35 = vmax.f32 %v843_v40, 0.0  ;;  %v846_v34 = vadd.f32 %v12108_v0, %v12679_v1  ;;  %v837_v30 = vpop.f32.mrb[19].mxu0  ;;  %v5847_v50 = vmax.f32 %v5751_v55, 0.0  ;;  %v1956_v37 = vadd.f32 %v1672_v17, %v1276_v15 }
 0x111   : > { %v12880_v41 = vmax.f32 %v835_v63, 0.0  ;;  %v838_v54 = vadd.f32 %v12679_v1, %v837_v30  ;;  %v5848_v28 = vmax.f32 %v5752_v8, 0.0  ;;  %v2254_v43 = vsel %vm2247_vm3, %v2251_v38, %v2253_v39 }
 0x112   : > { %v12886_v11 = vmax.f32 %v846_v34, 0.0  ;;  %v2256_v29 = vsel %vm2247_vm3, %v2253_v39, %v20219_v60  ;;  %v2539_v33 = vadd.f32 %v2254_v43, %v1955_v25  ;;  %v12893_v40 = vmul.f32 %v12694_v14, %v12762_v20 }
 0x113   : > { %v12895_v15 = vmax.f32 %v838_v54, 0.0  ;;  %v5943_v55 = vpack.c.bf16 %v5848_v28, %v5847_v50  ;;  %v2540_v59 = vadd.f32 %v2256_v29, %v1956_v37  ;;  %v2836_v63 = vrot.slane %v2640_v52, 6 }
 0x114   : > { %v20225_v31 = vrot.slane %v12893_v40, 6  ;;  %v3223_v38 = vmul.f32 %v12696_v16, %v12749_v4  ;;  %v12902_v0 = vmul.f32 %v12696_v16, %v12762_v20  ;;  %v3806_v39 = vmul.f32 %v12699_v19, %v12749_v4 }
 0x115   : > { %12193 = vmatprep.mubr.msk.bf16.mxu1 %vm6011_vm7, %v5943_v55  ;;  %v12111_v8 = vpop.f32.mrb[20].mxu0  ;;  %v2837_v28 = vsel %vm732_vm0, %v2834_v6, %v2836_v63  ;;  %v3807_v52 = vmul.f32 %v12699_v19, %v12762_v20  ;;  %v4003_v17 = vmul.f32 %v12702_v23, %v12744_v58  ;;  %v12916_v25 = vmul.f32 %v12702_v23, %v12751_v5 }
 0x116   : > { %v859_v34 = vadd.f32 %v12111_v8, %v12679_v1  ;;  %v850_v30 = vpop.f32.mrb[21].mxu0  ;;  %v2839_v50 = vsel %vm732_vm0, %v2836_v63, %v20225_v31  ;;  %v3122_v48 = vadd.f32 %v2837_v28, %v2539_v33  ;;  %v3420_v37 = vrot.slane %v3223_v38, 7 }
 0x117   : > { %v851_v6 = vadd.f32 %v12679_v1, %v850_v30  ;;  %v3123_v54 = vadd.f32 %v2839_v50, %v2540_v59  ;;  %v20224_v43 = vrot.slane %v12902_v0, 7  ;;  %v4200_v29 = vrot.slane %v4003_v17, 4  ;;  %v12112_v55 = vpop.f32.mrb[22].mxu0 }
 0x118   : > { %v12924_v60 = vmax.f32 %v859_v34, 0.0  ;;  %v3421_v8 = vsel %vm3414_vm4, %v3418_v32, %v3420_v37  ;;  %v20221_v44 = vrot.slane %v12916_v25, 4  ;;  %v4587_v63 = vmul.f32 %v12704_v24, %v12744_v58  ;;  %v853_v33 = vpop.f32.mrb[23].mxu0 }
 0x119   : > { %v12932_v38 = vmax.f32 %v851_v6, 0.0  ;;  %v3423_v59 = vsel %vm3414_vm4, %v3420_v37, %v20224_v43  ;;  %v3706_v28 = vadd.f32 %v3421_v8, %v3122_v48  ;;  %v4201_v17 = vsel %vm4194_vm5, %v4198_v2, %v4200_v29 }
 0x11a   : > { %20580 = vst [vmem:[#allocation5_spill] sm:$0xff] %v12924_v60  ;;  %v3707_v49 = vadd.f32 %v3423_v59, %v3123_v54  ;;  %v4203_v32 = vsel %vm4194_vm5, %v4200_v29, %v20221_v44  ;;  %v12945_v34 = vmul.f32 %v12704_v24, %v12751_v5  ;;  %v4784_v30 = vrot.slane %v4587_v63, 5 }
 0x11b   : > { %20581 = vst [vmem:[#allocation6_spill] sm:$0xff] %v12932_v38  ;;  %v3902_v50 = vadd.f32 %v3806_v39, %v3706_v28  ;;  %v5171_v6 = vmul.f32 %v12796_v62, %v12744_v58  ;;  %v12951_v48 = vmul.f32 %v12796_v62, %v12751_v5  ;;  %v862_v47 = vadd.f32 %v12112_v55, %v12679_v1 }
 0x11c   : > { %v3903_v2 = vadd.f32 %v3807_v52, %v3707_v49  ;;  %v4785_v37 = vsel %vm4778_vm6, %v4782_v42, %v4784_v30  ;;  %v20223_v54 = vrot.slane %v12945_v34, 5  ;;  %v854_v29 = vadd.f32 %v12679_v1, %v853_v33 }
 0x11d   : > { %v4486_v8 = vadd.f32 %v4201_v17, %v3902_v50  ;;  %v5367_v39 = vrot.slane %v5171_v6, 6  ;;  %v20222_v63 = vrot.slane %v12951_v48, 6  ;;  %v12960_v59 = vmax.f32 %v862_v47, 0.0  ;;  %v12962_v28 = vpop.f32.mrb[24].mxu0 }
 0x11e   : > { %v4487_v44 = vadd.f32 %v4203_v32, %v3903_v2  ;;  %v4787_v52 = vsel %vm4778_vm6, %v4784_v30, %v20223_v54  ;;  %v12967_v21 = vmax.f32 %v854_v29, 0.0  ;;  %v1277_v42 = vmul.f32 %v12685_v7, %v12749_v4  ;;  %v12971_v55 = vpop.f32.mrb[25].mxu0 }
 0x11f   : > { %20582 = vst [vmem:[#allocation7_spill] sm:$0xff] %v12960_v59  ;;  %v5070_v33 = vadd.f32 %v4785_v37, %v4486_v8  ;;  %v20584_v17 = vrot.slane %v12823_v46, 6  ;;  %v5370_v32 = vsel %vm732_vm0, %v5367_v39, %v20222_v63  ;;  %v1278_v50 = vmul.f32 %v12685_v7, %v12762_v20  ;;  %v12981_v30 = vpop.f32.mrb[26].mxu0 }
 0x120   : > { %20583 = vst [vmem:[#allocation8_spill] sm:$0xff] %v12967_v21  ;;  %v5071_v6 = vadd.f32 %v4787_v52, %v4487_v44  ;;  %v1474_v4 = vmul.f32 %v12690_v12, %v12762_v20  ;;  %v12987_v47 = vmul.f32 %v12690_v12, %v12744_v58  ;;  %v2058_v46 = vmul.f32 %v12692_v13, %v12762_v20  ;;  %v12991_v2 = vpop.f32.mrb[27].mxu0 }
 0x121   : > { %v5368_v49 = vsel %vm732_vm0, %v20584_v17, %v5367_v39  ;;  %v12995_v29 = vmul.f32 %v12692_v13, %v12744_v58  ;;  %v2642_v44 = vmul.f32 %v12694_v14, %v12744_v58  ;;  %v13001_v8 = vmul.f32 %v12694_v14, %v12751_v5 }
 0x122   : > { %v5653_v37 = vadd.f32 %v5368_v49, %v5070_v33  ;;  %v5654_v39 = vadd.f32 %v5370_v32, %v5071_v6  ;;  %v1673_v52 = vrot.slane %v1474_v4, 1  ;;  %v20228_v17 = vrot.slane %v12987_v47, 1 }
 0x123   : > { %v2257_v63 = vrot.slane %v2058_v46, 2  ;;  %v2840_v49 = vrot.slane %v2642_v44, 6  ;;  %v20585_v31 = vrot.slane %v12851_v26, 1  ;;  %v20586_v6 = vrot.slane %v12860_v36, 2 }
 0x124   : > { %v5753_v20 = vadd.f32 %v12846_v22, %v5653_v37  ;;  %v5754_v43 = vadd.f32 %v12846_v22, %v5654_v39  ;;  %v1676_v32 = vsel %vm1663_vm2, %v1673_v52, %v20228_v17  ;;  %v20587_v44 = vrot.slane %v12995_v29, 2 }
 0x125   : > { %v1674_v10 = vsel %vm1663_vm2, %v20585_v31, %v1673_v52  ;;  %v2258_v4 = vsel %vm2247_vm3, %v20586_v6, %v2257_v63  ;;  %v1958_v33 = vadd.f32 %v1676_v32, %v1278_v50  ;;  %v13020_v39 = vpop.f32.mrb[28].mxu0  ;;  %v20588_v31 = vrot.slane %v12893_v40, 6 }
 0x126   : > { %v5849_v46 = vmax.f32 %v5753_v20, 0.0  ;;  %v1957_v37 = vadd.f32 %v1674_v10, %v1277_v42  ;;  %v2260_v54 = vsel %vm2247_vm3, %v2257_v63, %v20587_v44  ;;  %v5850_v26 = vmax.f32 %v5754_v43, 0.0  ;;  %v13030_v10 = vpop.f32.mrb[29].mxu0 }
 0x127   : > { %v2841_v57 = vsel %vm732_vm0, %v20588_v31, %v2840_v49  ;;  %v20589_v52 = vrot.slane %v13001_v8, 6  ;;  %v3225_v20 = vmul.f32 %v12696_v16, %v12744_v58  ;;  %v2542_v50 = vadd.f32 %v2260_v54, %v1958_v33  ;;  %v13038_v43 = vpop.f32.mrb[30].mxu0 }
 0x128   : > { %v2541_v42 = vadd.f32 %v2258_v4, %v1957_v37  ;;  %v13034_v63 = vmul.f32 %v12696_v16, %v12751_v5  ;;  %v3808_v40 = vmul.f32 %v12699_v19, %v12744_v58  ;;  %v5944_v32 = vpack.c.bf16 %v5850_v26, %v5849_v46  ;;  %v13044_v31 = vpop.f32.mrb[31].mxu0 }
 0x129   : > { %v2843_v36 = vsel %vm732_vm0, %v2840_v49, %v20589_v52  ;;  %v3424_v6 = vrot.slane %v3225_v20, 7  ;;  %v3809_v49 = vmul.f32 %v12699_v19, %v12751_v5  ;;  %v4005_v44 = vmul.f32 %v12702_v23, %v12788_v56 }
 0x12a   : > { %v3124_v54 = vadd.f32 %v2841_v57, %v2541_v42  ;;  %v3125_v33 = vadd.f32 %v2843_v36, %v2542_v50  ;;  %v20235_v4 = vrot.slane %v13034_v63, 7  ;;  %v13049_v37 = vmul.f32 %v12702_v23, %v12799_v3  ;;  %12194 = vmatmul.mubr.msk.bf16.vlgmr.msra.gmra.mrb[0].mxu1 %vm6011_vm7, %v5944_v32 }
 0x12b   : > { %v20590_v46 = vrot.slane %v12902_v0, 7  ;;  %v4204_v52 = vrot.slane %v4005_v44, 4  ;;  %v4589_v20 = vmul.f32 %v12704_v24, %v12788_v56  ;;  %v13059_v57 = vmul.f32 %v12704_v24, %v12799_v3 }
 0x12c   : > { %v3427_v36 = vsel %vm3414_vm4, %v3424_v6, %v20235_v4  ;;  %v20232_v50 = vrot.slane %v13049_v37, 4  ;;  %v5173_v0 = vmul.f32 %v12796_v62, %v12788_v56  ;;  %v20591_v44 = vrot.slane %v12916_v25, 4 }
 0x12d   : > { %v3425_v26 = vsel %vm3414_vm4, %v20590_v46, %v3424_v6  ;;  %v3709_v32 = vadd.f32 %v3427_v36, %v3125_v33  ;;  %v4788_v17 = vrot.slane %v4589_v20, 5  ;;  %v20234_v27 = vrot.slane %v13059_v57, 5 }
 0x12e   : > { %v3708_v42 = vadd.f32 %v3425_v26, %v3124_v54  ;;  %v4205_v46 = vsel %vm4194_vm5, %v20591_v44, %v4204_v52  ;;  %v4207_v60 = vsel %vm4194_vm5, %v4204_v52, %v20232_v50  ;;  %v13076_v6 = vmul.f32 %v12796_v62, %v12799_v3  ;;  %v13078_v26 = vpop.f32.mrb[32].mxu0 }
 0x12f   : > { %v5371_v54 = vrot.slane %v5173_v0, 6  ;;  %v3905_v33 = vadd.f32 %v3809_v49, %v3709_v32  ;;  %v20592_v25 = vrot.slane %v12945_v34, 5  ;;  %v875_v20 = vadd.f32 %v12962_v28, %v12679_v1  ;;  %v13088_v52 = vpop.f32.mrb[33].mxu0 }
 0x130   : > { %v3904_v59 = vadd.f32 %v3808_v40, %v3708_v42  ;;  %v4791_v40 = vsel %vm4778_vm6, %v4788_v17, %v20234_v27  ;;  %v20593_v44 = vrot.slane %v12951_v48, 6  ;;  %v20233_v49 = vrot.slane %v13076_v6, 6  ;;  %v13096_v32 = vpop.f32.mrb[34].mxu0 }
 0x131   : > { %v4789_v36 = vsel %vm4778_vm6, %v20592_v25, %v4788_v17  ;;  %v867_v34 = vadd.f32 %v12679_v1, %v12971_v55  ;;  %v4489_v25 = vadd.f32 %v4207_v60, %v3905_v33  ;;  %v13098_v50 = vmax.f32 %v875_v20, 0.0  ;;  %v13104_v17 = vpop.f32.mrb[35].mxu0 }
 0x132   : > { %v4488_v42 = vadd.f32 %v4205_v46, %v3904_v59  ;;  %v5372_v0 = vsel %vm732_vm0, %v20593_v44, %v5371_v54  ;;  %v1279_v28 = vmul.f32 %v12685_v7, %v12744_v58  ;;  %v1280_v59 = vmul.f32 %v12685_v7, %v12751_v5 }
 0x133   : > { %20594 = vst [vmem:[#allocation9_spill] sm:$0xff] %v13098_v50  ;;  %v5374_v46 = vsel %vm732_vm0, %v5371_v54, %v20233_v49  ;;  %v13109_v44 = vmax.f32 %v867_v34, 0.0  ;;  %v1476_v60 = vmul.f32 %v12690_v12, %v12751_v5  ;;  %v5073_v55 = vadd.f32 %v4791_v40, %v4489_v25 }
 0x134   : > { %v5072_v48 = vadd.f32 %v4789_v36, %v4488_v42  ;;  %v13115_v33 = vmul.f32 %v12690_v12, %v12788_v56  ;;  %v2060_v58 = vmul.f32 %v12692_v13, %v12751_v5  ;;  %v13121_v36 = vmul.f32 %v12692_v13, %v12788_v56 }
 0x135   : > { %20595 = vst [vmem:[#allocation10_spill] sm:$0xff] %v13109_v44  ;;  %v1677_v42 = vrot.slane %v1476_v60, 1  ;;  %v2644_v54 = vmul.f32 %v12694_v14, %v12788_v56  ;;  %v13127_v34 = vmul.f32 %v12694_v14, %v12799_v3  ;;  %v5656_v40 = vadd.f32 %v5374_v46, %v5073_v55  ;;  %v13136_v50 = vpop.f32.mrb[36].mxu0 }
 0x136   : > { %v5655_v20 = vadd.f32 %v5372_v0, %v5072_v48  ;;  %v20240_v25 = vrot.slane %v13115_v33, 1  ;;  %v2261_v49 = vrot.slane %v2060_v58, 2  ;;  %v20596_v4 = vrot.slane %v12987_v47, 1  ;;  %20597 = vst [vmem:[#allocation11_spill] sm:$0xff] %v13136_v50  ;;  %v13145_v27 = vpop.f32.mrb[37].mxu0 }
 0x137   : > { %v2844_v48 = vrot.slane %v2644_v54, 6  ;;  %v5756_v44 = vadd.f32 %v12846_v22, %v5656_v40  ;;  %v20598_v58 = vrot.slane %v12995_v29, 2  ;;  %v20599_v54 = vrot.slane %v13121_v36, 2 }
 0x138   : > { %v5755_v5 = vadd.f32 %v12846_v22, %v5655_v20  ;;  %v1678_v0 = vsel %vm1663_vm2, %v20596_v4, %v1677_v42  ;;  %v1680_v46 = vsel %vm1663_vm2, %v1677_v42, %v20240_v25  ;;  %v20600_v50 = vrot.slane %v13001_v8, 6 }
 0x139   : > { %v1959_v55 = vadd.f32 %v1678_v0, %v1279_v28  ;;  %v2262_v20 = vsel %vm2247_vm3, %v20598_v58, %v2261_v49  ;;  %v1960_v4 = vadd.f32 %v1680_v46, %v1280_v59  ;;  %v2264_v60 = vsel %vm2247_vm3, %v2261_v49, %v20599_v54  ;;  %v13158_v0 = vpop.f32.mrb[38].mxu0 }
 0x13a   : > { %v5851_v47 = vmax.f32 %v5755_v5, 0.0  ;;  %v2845_v40 = vsel %vm732_vm0, %v20600_v50, %v2844_v48  ;;  %v5852_v21 = vmax.f32 %v5756_v44, 0.0  ;;  %v20601_v28 = vrot.slane %v13127_v34, 6  ;;  %v13168_v49 = vpop.f32.mrb[39].mxu0 }
 0x13b   : > { %v2543_v38 = vadd.f32 %v2262_v20, %v1959_v55  ;;  %v3227_v42 = vmul.f32 %v12696_v16, %v12788_v56  ;;  %v2544_v59 = vadd.f32 %v2264_v60, %v1960_v4  ;;  %v13162_v5 = vmul.f32 %v12696_v16, %v12799_v3  ;;  %20602 = vst [vmem:[#allocation12_spill] sm:$0xff] %v13168_v49 }
 0x13c   : > { %v2847_v29 = vsel %vm732_vm0, %v2844_v48, %v20601_v28  ;;  %v3810_v8 = vmul.f32 %v12699_v19, %v12788_v56  ;;  %v3811_v50 = vmul.f32 %v12699_v19, %v12799_v3  ;;  %v5945_v44 = vpack.c.bf16 %v5852_v21, %v5851_v47 }
 0x13d   : > { %v3126_v48 = vadd.f32 %v2845_v40, %v2543_v38  ;;  %v3428_v46 = vrot.slane %v3227_v42, 7  ;;  %v4007_v55 = vmul.f32 %v12702_v23, %v12785_v51  ;;  %v3127_v58 = vadd.f32 %v2847_v29, %v2544_v59 }
 0x13e   : > { %v3430_v60 = vrot.slane %v13162_v5, 7  ;;  %v13175_v20 = vmul.f32 %v12702_v23, %v12791_v61  ;;  %v4591_v4 = vmul.f32 %v12704_v24, %v12785_v51  ;;  %12197 = vmatprep.mubr.msk.bf16.mxu1 %vm6011_vm7, %v5945_v44  ;;  %v20603_v54 = vrot.slane %v13034_v63, 7 }
 0x13f   : > { %v4208_v21 = vrot.slane %v4007_v55, 4  ;;  %v13185_v47 = vmul.f32 %v12704_v24, %v12791_v61  ;;  %v5175_v40 = vmul.f32 %v12796_v62, %v12785_v51  ;;  %v20604_v63 = vrot.slane %v13049_v37, 4 }
 0x140   : > { %v3429_v38 = vsel %vm3414_vm4, %v20603_v54, %v3428_v46  ;;  %v3431_v28 = vsel %vm3414_vm4, %v3428_v46, %v3430_v60  ;;  %v20243_v42 = vrot.slane %v13175_v20, 4  ;;  %v4792_v59 = vrot.slane %v4591_v4, 5 }
 0x141   : > { %v3710_v29 = vadd.f32 %v3429_v38, %v3126_v48  ;;  %v3711_v44 = vadd.f32 %v3431_v28, %v3127_v58  ;;  %v4209_v55 = vsel %vm4194_vm5, %v20604_v63, %v4208_v21  ;;  %v20242_v54 = vrot.slane %v13185_v47, 5 }
 0x142   : > { %v13199_v25 = vmul.f32 %v12796_v62, %v12791_v61  ;;  %v4211_v46 = vsel %vm4194_vm5, %v4208_v21, %v20243_v42  ;;  %v20605_v48 = vrot.slane %v13059_v57, 5  ;;  %v5375_v58 = vrot.slane %v5175_v40, 6 }
 0x143   : > { %v3906_v49 = vadd.f32 %v3810_v8, %v3710_v29  ;;  %v3907_v38 = vadd.f32 %v3811_v50, %v3711_v44  ;;  %v4795_v37 = vsel %vm4778_vm6, %v4792_v59, %v20242_v54  ;;  %v878_v63 = vadd.f32 %v12981_v30, %v12679_v1 }
 0x144   : > { %v4793_v4 = vsel %vm4778_vm6, %v20605_v48, %v4792_v59  ;;  %v20241_v28 = vrot.slane %v13199_v25, 6  ;;  %v20606_v29 = vrot.slane %v13076_v6, 6  ;;  %v870_v57 = vadd.f32 %v12679_v1, %v12991_v2 }
 0x145   : > { %v4490_v8 = vadd.f32 %v4209_v55, %v3906_v49  ;;  %v1281_v50 = vmul.f32 %v12685_v7, %v12788_v56  ;;  %v4491_v40 = vadd.f32 %v4211_v46, %v3907_v38  ;;  %v13223_v44 = vmax.f32 %v878_v63, 0.0 }
 0x146   : > { %v5376_v21 = vsel %vm732_vm0, %v20606_v29, %v5375_v58  ;;  %v5378_v59 = vsel %vm732_vm0, %v5375_v58, %v20241_v28  ;;  %v1282_v30 = vmul.f32 %v12685_v7, %v12799_v3  ;;  %v13227_v6 = vmax.f32 %v870_v57, 0.0 }
 0x147   : > { %20607 = vst [vmem:[#allocation13_spill] sm:$0xff] %v13223_v44  ;;  %v5074_v49 = vadd.f32 %v4793_v4, %v4490_v8  ;;  %v1478_v55 = vmul.f32 %v12690_v12, %v12799_v3  ;;  %v13233_v2 = vmul.f32 %v12690_v12, %v12785_v51  ;;  %v5075_v56 = vadd.f32 %v4795_v37, %v4491_v40 }
 0x148   : > { %v2062_v46 = vmul.f32 %v12692_v13, %v12799_v3  ;;  %v13239_v48 = vmul.f32 %v12692_v13, %v12785_v51  ;;  %v2646_v4 = vmul.f32 %v12694_v14, %v12785_v51  ;;  %v13246_v8 = vmul.f32 %v12694_v14, %v12791_v61 }
 0x149   : > { %v5657_v58 = vadd.f32 %v5376_v21, %v5074_v49  ;;  %v1681_v38 = vrot.slane %v1478_v55, 1  ;;  %v20246_v63 = vrot.slane %v13233_v2, 1  ;;  %v5658_v29 = vadd.f32 %v5378_v59, %v5075_v56 }
 0x14a   : > { %v2265_v37 = vrot.slane %v2062_v46, 2  ;;  %v20245_v57 = vrot.slane %v13239_v48, 2  ;;  %v2848_v3 = vrot.slane %v2646_v4, 6  ;;  %v20608_v28 = vrot.slane %v13115_v33, 1 }
 0x14b   : > { %v5757_v40 = vadd.f32 %v12846_v22, %v5657_v58  ;;  %v1684_v21 = vsel %vm1663_vm2, %v1681_v38, %v20246_v63  ;;  %v20244_v49 = vrot.slane %v13246_v8, 6  ;;  %v5758_v55 = vadd.f32 %v12846_v22, %v5658_v29 }
 0x14c   : > { %v1682_v54 = vsel %vm1663_vm2, %v20608_v28, %v1681_v38  ;;  %v1962_v59 = vadd.f32 %v1684_v21, %v1282_v30  ;;  %v20609_v56 = vrot.slane %v13121_v36, 2  ;;  %v2268_v33 = vsel %vm2247_vm3, %v2265_v37, %v20245_v57  ;;  %v13272_v30 = vpop.f32.mrb[40].mxu0 }
 0x14d   : > { %v1961_v42 = vadd.f32 %v1682_v54, %v1281_v50  ;;  %v5853_v4 = vmax.f32 %v5757_v40, 0.0  ;;  %v20610_v28 = vrot.slane %v13127_v34, 6  ;;  %v2851_v38 = vsel %vm732_vm0, %v2848_v3, %v20244_v49  ;;  %20611 = vst [vmem:[#allocation14_spill] sm:$0xff] %v13272_v30 }
 0x14e   : > { %v2266_v46 = vsel %vm2247_vm3, %v20609_v56, %v2265_v37  ;;  %v5854_v29 = vmax.f32 %v5758_v55, 0.0  ;;  %v2546_v50 = vadd.f32 %v2268_v33, %v1962_v59  ;;  %v3229_v36 = vmul.f32 %v12696_v16, %v12785_v51 }
 0x14f   : > { %v2849_v58 = vsel %vm732_vm0, %v20610_v28, %v2848_v3  ;;  %v2545_v54 = vadd.f32 %v2266_v46, %v1961_v42  ;;  %v13276_v40 = vmul.f32 %v12696_v16, %v12791_v61  ;;  %v3812_v34 = vmul.f32 %v12699_v19, %v12785_v51  ;;  %v13284_v42 = vpop.f32.mrb[41].mxu0 }
 0x150   : > { %v3813_v37 = vmul.f32 %v12699_v19, %v12791_v61  ;;  %v4009_v3 = vmul.f32 %v12702_v23, %v12831_v45  ;;  %20612 = vst [vmem:[#allocation15_spill] sm:$0xff] %v13284_v42  ;;  %v5946_v21 = vpack.c.bf16 %v5854_v29, %v5853_v4  ;;  %v3129_v59 = vadd.f32 %v2851_v38, %v2546_v50 }
 0x151   : > { %v3128_v55 = vadd.f32 %v2849_v58, %v2545_v54  ;;  %v3432_v56 = vrot.slane %v3229_v36, 7  ;;  %v3434_v46 = vrot.slane %v13276_v40, 7  ;;  %v13289_v33 = vmul.f32 %v12702_v23, %v12841_v18 }
 0x152   : > { %v4212_v28 = vrot.slane %v4009_v3, 4  ;;  %v4593_v49 = vmul.f32 %v12704_v24, %v12831_v45  ;;  %12198 = vmatmul.mubr.msk.bf16.gmra.mrb[4].mxu1 %vm6011_vm7, %v5946_v21  ;;  %v13299_v4 = vmul.f32 %v12704_v24, %v12841_v18  ;;  %v5177_v58 = vmul.f32 %v12796_v62, %v12831_v45 }
 0x153   : > { %v3433_v57 = vsel %vm3414_vm4, %v3430_v60, %v3432_v56  ;;  %v13305_v38 = vmul.f32 %v12796_v62, %v12841_v18  ;;  %v3435_v29 = vsel %vm3414_vm4, %v3432_v56, %v3434_v46  ;;  %v20613_v5 = vrot.slane %v13175_v20, 4 }
 0x154   : > { %v3712_v54 = vadd.f32 %v3433_v57, %v3128_v55  ;;  %v4214_v50 = vrot.slane %v13289_v33, 4  ;;  %v3713_v36 = vadd.f32 %v3435_v29, %v3129_v59  ;;  %v4796_v3 = vrot.slane %v4593_v49, 5 }
 0x155   : > { %v4213_v60 = vsel %vm4194_vm5, %v20613_v5, %v4212_v28  ;;  %v4798_v21 = vrot.slane %v13299_v4, 5  ;;  %v5379_v63 = vrot.slane %v5177_v58, 6  ;;  %v5381_v30 = vrot.slane %v13305_v38, 6 }
 0x156   : > { %v3908_v44 = vadd.f32 %v3812_v34, %v3712_v54  ;;  %v4215_v42 = vsel %vm4194_vm5, %v4212_v28, %v4214_v50  ;;  %v891_v57 = vadd.f32 %v13020_v39, %v12679_v1  ;;  %v3909_v20 = vadd.f32 %v3813_v37, %v3713_v36 }
 0x157   : > { %v20614_v55 = vrot.slane %v13185_v47, 5  ;;  %v4799_v49 = vsel %vm4778_vm6, %v4796_v3, %v4798_v21  ;;  %v20615_v34 = vrot.slane %v13199_v25, 6  ;;  %v5382_v28 = vsel %vm732_vm0, %v5379_v63, %v5381_v30 }
 0x158   : > { %v4492_v58 = vadd.f32 %v4213_v60, %v3908_v44  ;;  %v13333_v29 = vmax.f32 %v891_v57, 0.0  ;;  %v883_v39 = vadd.f32 %v12679_v1, %v13030_v10  ;;  %v4493_v47 = vadd.f32 %v4215_v42, %v3909_v20 }
 0x159   : > { %v4797_v56 = vsel %vm4778_vm6, %v20614_v55, %v4796_v3  ;;  %v5380_v59 = vsel %vm732_vm0, %v20615_v34, %v5379_v63  ;;  %v1283_v37 = vmul.f32 %v12685_v7, %v12785_v51  ;;  %v1284_v54 = vmul.f32 %v12685_v7, %v12791_v61 }
 0x15a   : > { %v1480_v25 = vmul.f32 %v12690_v12, %v12791_v61  ;;  %v5076_v44 = vadd.f32 %v4797_v56, %v4492_v58  ;;  %v13343_v5 = vmax.f32 %v883_v39, 0.0  ;;  %v13347_v63 = vmul.f32 %v12690_v12, %v12831_v45 }
 0x15b   : > { %v2064_v1 = vmul.f32 %v12692_v13, %v12791_v61  ;;  %v5077_v10 = vadd.f32 %v4799_v49, %v4493_v47  ;;  %v13353_v51 = vmul.f32 %v12692_v13, %v12831_v45  ;;  %v2648_v60 = vmul.f32 %v12694_v14, %v12831_v45 }
 0x15c   : > { %v1685_v42 = vrot.slane %v1480_v25, 1  ;;  %v5659_v36 = vadd.f32 %v5380_v59, %v5076_v44  ;;  %v1687_v3 = vrot.slane %v13347_v63, 1  ;;  %v13360_v20 = vmul.f32 %v12694_v14, %v12841_v18 }
 0x15d   : > { %v2269_v57 = vrot.slane %v2064_v1, 2  ;;  %v5660_v55 = vadd.f32 %v5382_v28, %v5077_v10  ;;  %v20616_v61 = vrot.slane %v13233_v2, 1  ;;  %v20249_v49 = vrot.slane %v13353_v51, 2 }
 0x15e   : > { %v2852_v34 = vrot.slane %v2648_v60, 6  ;;  %v5759_v58 = vadd.f32 %v12846_v22, %v5659_v36  ;;  %v1688_v59 = vsel %vm1663_vm2, %v1685_v42, %v1687_v3  ;;  %v20617_v47 = vrot.slane %v13239_v48, 2 }
 0x15f   : > { %v1686_v56 = vsel %vm1663_vm2, %v20616_v61, %v1685_v42  ;;  %v5760_v28 = vadd.f32 %v12846_v22, %v5660_v55  ;;  %v1964_v44 = vadd.f32 %v1688_v59, %v1284_v54  ;;  %v2272_v2 = vsel %vm2247_vm3, %v2269_v57, %v20249_v49  ;;  %v13389_v55 = vpop.f32.mrb[42].mxu0 }
 0x160   : > { %v1963_v39 = vadd.f32 %v1686_v56, %v1283_v37  ;;  %v2270_v25 = vsel %vm2247_vm3, %v20617_v47, %v2269_v57  ;;  %v20618_v1 = vrot.slane %v13246_v8, 6  ;;  %v5855_v60 = vmax.f32 %v5759_v58, 0.0 }
 0x161   : > { %v20248_v42 = vrot.slane %v13360_v20, 6  ;;  %v3231_v48 = vmul.f32 %v12696_v16, %v12831_v45  ;;  %v5856_v37 = vmax.f32 %v5760_v28, 0.0  ;;  %v2548_v61 = vadd.f32 %v2272_v2, %v1964_v44 }
 0x162   : > { %v2853_v10 = vsel %vm732_vm0, %v20618_v1, %v2852_v34  ;;  %v2547_v36 = vadd.f32 %v2270_v25, %v1963_v39  ;;  %v13385_v54 = vmul.f32 %v12696_v16, %v12841_v18  ;;  %v3814_v57 = vmul.f32 %v12699_v19, %v12831_v45  ;;  %v13396_v39 = vpop.f32.mrb[43].mxu0 }
 0x163   : > { %v2855_v8 = vsel %vm732_vm0, %v2852_v34, %v20248_v42  ;;  %v3436_v58 = vrot.slane %v3231_v48, 7  ;;  %v3815_v59 = vmul.f32 %v12699_v19, %v12841_v18  ;;  %v5947_v47 = vpack.c.bf16 %v5856_v37, %v5855_v60 }
 0x164   : > { %v3130_v56 = vadd.f32 %v2853_v10, %v2547_v36  ;;  %v3131_v25 = vadd.f32 %v2855_v8, %v2548_v61  ;;  %v3438_v28 = vrot.slane %v13385_v54, 7  ;;  %v4011_v44 = vmul.f32 %v12702_v23, %v12825_v53 }
 0x165   : > { %v3437_v2 = vsel %vm3414_vm4, %v3434_v46, %v3436_v58  ;;  %v13406_v34 = vmul.f32 %v12702_v23, %v12834_v9  ;;  %v4595_v1 = vmul.f32 %v12704_v24, %v12825_v53  ;;  %v13412_v10 = vmul.f32 %v12704_v24, %v12834_v9  ;;  %12201 = vmatprep.mubr.msk.bf16.mxu1 %vm6011_vm7, %v5947_v47 }
 0x166   : > { %v3439_v60 = vsel %vm3414_vm4, %v3436_v58, %v3438_v28  ;;  %v3714_v40 = vadd.f32 %v3437_v2, %v3130_v56  ;;  %v4216_v36 = vrot.slane %v4011_v44, 4  ;;  %v5179_v46 = vmul.f32 %v12796_v62, %v12825_v53 }
 0x167   : > { %v3715_v48 = vadd.f32 %v3439_v60, %v3131_v25  ;;  %v4218_v37 = vrot.slane %v13406_v34, 4  ;;  %v4800_v61 = vrot.slane %v4595_v1, 5  ;;  %v4802_v8 = vrot.slane %v13412_v10, 5 }
 0x168   : > { %v3910_v42 = vadd.f32 %v3814_v57, %v3714_v40  ;;  %v4217_v47 = vsel %vm4194_vm5, %v4214_v50, %v4216_v36  ;;  %v13427_v49 = vmul.f32 %v12796_v62, %v12834_v9  ;;  %v5383_v56 = vrot.slane %v5179_v46, 6 }
 0x169   : > { %v3911_v58 = vadd.f32 %v3815_v59, %v3715_v48  ;;  %v4219_v25 = vsel %vm4194_vm5, %v4216_v36, %v4218_v37  ;;  %v4801_v44 = vsel %vm4778_vm6, %v4798_v21, %v4800_v61  ;;  %v4803_v33 = vsel %vm4778_vm6, %v4800_v61, %v4802_v8  ;;  %v13445_v59 = vld [vmem:[%s20216_s3 + $0x9] ss:$0 sm:$0xff] }
 0x16a   : > { %v4494_v57 = vadd.f32 %v4217_v47, %v3910_v42  ;;  %v5384_v50 = vsel %vm732_vm0, %v5381_v30, %v5383_v56  ;;  %v20250_v2 = vrot.slane %v13427_v49, 6  ;;  %v894_v4 = vadd.f32 %v13445_v59, %v13038_v43 }
 0x16b   : > { %v4495_v21 = vadd.f32 %v4219_v25, %v3911_v58  ;;  %v886_v1 = vadd.f32 %v13445_v59, %v13044_v31  ;;  %v1285_v42 = vmul.f32 %v12685_v7, %v12831_v45  ;;  %v1286_v30 = vmul.f32 %v12685_v7, %v12841_v18 }
 0x16c   : > { %v5078_v38 = vadd.f32 %v4801_v44, %v4494_v57  ;;  %v5386_v60 = vsel %vm732_vm0, %v5383_v56, %v20250_v2  ;;  %v13458_v40 = vmax.f32 %v894_v4, 0.0  ;;  %v1482_v43 = vmul.f32 %v12690_v12, %v12841_v18 }
 0x16d   : > { %v5079_v36 = vadd.f32 %v4803_v33, %v4495_v21  ;;  %v13462_v46 = vmax.f32 %v886_v1, 0.0  ;;  %v13466_v31 = vmul.f32 %v12690_v12, %v12825_v53  ;;  %v2066_v45 = vmul.f32 %v12692_v13, %v12841_v18 }
 0x16e   : > { %v5661_v48 = vadd.f32 %v5384_v50, %v5078_v38  ;;  %v1689_v61 = vrot.slane %v1482_v43, 1  ;;  %v13472_v47 = vmul.f32 %v12692_v13, %v12825_v53  ;;  %v2650_v56 = vmul.f32 %v12694_v14, %v12825_v53 }
 0x16f   : > { %v5662_v58 = vadd.f32 %v5386_v60, %v5079_v36  ;;  %v1691_v25 = vrot.slane %v13466_v31, 1  ;;  %v2273_v44 = vrot.slane %v2066_v45, 2  ;;  %v13479_v33 = vmul.f32 %v12694_v14, %v12834_v9 }
 0x170   : > { %v5761_v57 = vadd.f32 %v12846_v22, %v5661_v48  ;;  %v1690_v18 = vsel %vm1663_vm2, %v1687_v3, %v1689_v61  ;;  %v20252_v50 = vrot.slane %v13472_v47, 2  ;;  %v2856_v4 = vrot.slane %v2650_v56, 6 }
 0x171   : > { %v5762_v21 = vadd.f32 %v12846_v22, %v5662_v58  ;;  %v1692_v1 = vsel %vm1663_vm2, %v1689_v61, %v1691_v25  ;;  %v1965_v38 = vadd.f32 %v1690_v18, %v1285_v42  ;;  %v20619_v60 = vrot.slane %v13353_v51, 2 }
 0x172   : > { %v5857_v36 = vmax.f32 %v5761_v57, 0.0  ;;  %v1966_v45 = vadd.f32 %v1692_v1, %v1286_v30  ;;  %v2276_v63 = vsel %vm2247_vm3, %v2273_v44, %v20252_v50  ;;  %v20620_v3 = vrot.slane %v13360_v20, 6 }
 0x173   : > { %v2274_v43 = vsel %vm2247_vm3, %v20619_v60, %v2273_v44  ;;  %v5858_v56 = vmax.f32 %v5762_v21, 0.0  ;;  %v20251_v2 = vrot.slane %v13479_v33, 6  ;;  %v3233_v42 = vmul.f32 %v12696_v16, %v12825_v53  ;;  %v13510_v44 = vpop.f32.mrb[44].mxu0 }
 0x174   : > { %v2857_v48 = vsel %vm732_vm0, %v20620_v3, %v2856_v4  ;;  %v2549_v58 = vadd.f32 %v2274_v43, %v1965_v38  ;;  %v2550_v51 = vadd.f32 %v2276_v63, %v1966_v45  ;;  %v13504_v61 = vmul.f32 %v12696_v16, %v12834_v9  ;;  %v13515_v38 = vpop.f32.mrb[45].mxu0 }
 0x175   : > { %v3816_v30 = vmul.f32 %v12699_v19, %v12825_v53  ;;  %v3817_v20 = vmul.f32 %v12699_v19, %v12834_v9  ;;  %v5948_v57 = vpack.c.bf16 %v5858_v56, %v5857_v36  ;;  %v2859_v18 = vsel %vm732_vm0, %v2856_v4, %v20251_v2 }
 0x176   : > { %v3132_v21 = vadd.f32 %v2857_v48, %v2549_v58  ;;  %v3440_v1 = vrot.slane %v3233_v42, 7  ;;  %v3133_v60 = vadd.f32 %v2859_v18, %v2550_v51  ;;  %v3442_v43 = vrot.slane %v13504_v61, 7 }
 0x177   : > { %v4013_v45 = vmul.f32 %v12702_v23, %v12880_v41  ;;  %v13522_v63 = vmul.f32 %v12702_v23, %v12895_v15  ;;  %12202 = vmatmul.mubr.msk.bf16.gmra.mrb[8].mxu1 %vm6011_vm7, %v5948_v57  ;;  %v4597_v36 = vmul.f32 %v12704_v24, %v12880_v41  ;;  %v13532_v3 = vmul.f32 %v12704_v24, %v12895_v15 }
 0x178   : > { %v3441_v4 = vsel %vm3414_vm4, %v3438_v28, %v3440_v1  ;;  %v5181_v48 = vmul.f32 %v12796_v62, %v12880_v41  ;;  %v3443_v56 = vsel %vm3414_vm4, %v3440_v1, %v3442_v43  ;;  %v13543_v18 = vmul.f32 %v12796_v62, %v12895_v15 }
 0x179   : > { %v3716_v58 = vadd.f32 %v3441_v4, %v3132_v21  ;;  %v4220_v42 = vrot.slane %v4013_v45, 4  ;;  %v4222_v54 = vrot.slane %v13522_v63, 4  ;;  %v3717_v51 = vadd.f32 %v3443_v56, %v3133_v60 }
 0x17a   : > { %v4804_v28 = vrot.slane %v4597_v36, 5  ;;  %v4806_v57 = vrot.slane %v13532_v3, 5  ;;  %v5387_v1 = vrot.slane %v5181_v48, 6  ;;  %v20621_v34 = vrot.slane %v13427_v49, 6 }
 0x17b   : > { %v3912_v2 = vadd.f32 %v3816_v30, %v3716_v58  ;;  %v4221_v50 = vsel %vm4194_vm5, %v4218_v37, %v4220_v42  ;;  %v4223_v21 = vsel %vm4194_vm5, %v4220_v42, %v4222_v54  ;;  %v3913_v45 = vadd.f32 %v3817_v20, %v3717_v51 }
 0x17c   : > { %v4805_v60 = vsel %vm4778_vm6, %v4802_v8, %v4804_v28  ;;  %v4807_v62 = vsel %vm4778_vm6, %v4804_v28, %v4806_v57  ;;  %v5389_v30 = vrot.slane %v13543_v18, 6  ;;  %v5388_v37 = vsel %vm732_vm0, %v20621_v34, %v5387_v1 }
 0x17d   : > { %v4496_v4 = vadd.f32 %v4221_v50, %v3912_v2  ;;  %v907_v36 = vadd.f32 %v13445_v59, %v13078_v26  ;;  %v899_v20 = vadd.f32 %v13445_v59, %v13088_v52  ;;  %v4497_v10 = vadd.f32 %v4223_v21, %v3913_v45 }
 0x17e   : > { %v5390_v8 = vsel %vm732_vm0, %v5387_v1, %v5389_v30  ;;  %v1287_v48 = vmul.f32 %v12685_v7, %v12825_v53  ;;  %v1288_v2 = vmul.f32 %v12685_v7, %v12834_v9  ;;  %v1484_v26 = vmul.f32 %v12690_v12, %v12834_v9 }
 0x17f   : > { %v5080_v49 = vadd.f32 %v4805_v60, %v4496_v4  ;;  %v13572_v50 = vmax.f32 %v907_v36, 0.0  ;;  %v13574_v56 = vmax.f32 %v899_v20, 0.0  ;;  %v5081_v52 = vadd.f32 %v4807_v62, %v4497_v10 }
 0x180   : > { %v13580_v58 = vmul.f32 %v12690_v12, %v12880_v41  ;;  %v2068_v42 = vmul.f32 %v12692_v13, %v12834_v9  ;;  %v13586_v53 = vmul.f32 %v12692_v13, %v12880_v41  ;;  %v1693_v28 = vrot.slane %v1484_v26, 1 }
 0x181   : > { %20622 = vst [vmem:[#allocation16_spill] sm:$0xff] %v13572_v50  ;;  %v5663_v51 = vadd.f32 %v5388_v37, %v5080_v49  ;;  %v2652_v21 = vmul.f32 %v12694_v14, %v12880_v41  ;;  %v13592_v1 = vmul.f32 %v12694_v14, %v12895_v15  ;;  %v5664_v45 = vadd.f32 %v5390_v8, %v5081_v52 }
 0x182   : > { %v1695_v60 = vrot.slane %v13580_v58, 1  ;;  %v2277_v62 = vrot.slane %v2068_v42, 2  ;;  %v2279_v4 = vrot.slane %v13586_v53, 2  ;;  %v1694_v34 = vsel %vm1663_vm2, %v1691_v25, %v1693_v28 }
 0x183   : > { %v5763_v9 = vadd.f32 %v12846_v22, %v5663_v51  ;;  %v2860_v37 = vrot.slane %v2652_v21, 6  ;;  %v20253_v36 = vrot.slane %v13592_v1, 6  ;;  %v5764_v20 = vadd.f32 %v12846_v22, %v5664_v45 }
 0x184   : > { %v1696_v10 = vsel %vm1663_vm2, %v1693_v28, %v1695_v60  ;;  %v1967_v8 = vadd.f32 %v1694_v34, %v1287_v48  ;;  %v20623_v49 = vrot.slane %v13472_v47, 2  ;;  %v2280_v31 = vsel %vm2247_vm3, %v2277_v62, %v2279_v4  ;;  %v13619_v28 = vpop.f32.mrb[46].mxu0 }
 0x185   : > { %v5859_v52 = vmax.f32 %v5763_v9, 0.0  ;;  %v1968_v42 = vadd.f32 %v1696_v10, %v1288_v2  ;;  %v20624_v25 = vrot.slane %v13479_v33, 6  ;;  %v5860_v22 = vmax.f32 %v5764_v20, 0.0  ;;  %v13629_v9 = vpop.f32.mrb[47].mxu0 }
 0x186   : > { %v2278_v26 = vsel %vm2247_vm3, %v20623_v49, %v2277_v62  ;;  %v2863_v48 = vsel %vm732_vm0, %v2860_v37, %v20253_v36  ;;  %v3235_v47 = vmul.f32 %v12696_v16, %v12880_v41  ;;  %v13623_v45 = vmul.f32 %v12696_v16, %v12895_v15 }
 0x187   : > { %v2861_v51 = vsel %vm732_vm0, %v20624_v25, %v2860_v37  ;;  %v2551_v21 = vadd.f32 %v2278_v26, %v1967_v8  ;;  %v2552_v2 = vadd.f32 %v2280_v31, %v1968_v42  ;;  %v3818_v33 = vmul.f32 %v12699_v19, %v12880_v41 }
 0x188   : > { %v3819_v62 = vmul.f32 %v12699_v19, %v12895_v15  ;;  %v5949_v34 = vpack.c.bf16 %v5860_v22, %v5859_v52  ;;  %v3444_v20 = vrot.slane %v3235_v47, 7  ;;  %v4015_v10 = vmul.f32 %v12702_v23, %v12877_v35 }
 0x189   : > { %v3134_v37 = vadd.f32 %v2861_v51, %v2551_v21  ;;  %v3135_v8 = vadd.f32 %v2863_v48, %v2552_v2  ;;  %v3446_v49 = vrot.slane %v13623_v45, 7  ;;  %v13636_v26 = vmul.f32 %v12702_v23, %v12886_v11  ;;  %v13651_v51 = vld [vmem:[%s20216_s3 + $0x8] ss:$0 sm:$0xff] }
 0x18a   : > { %v4599_v42 = vmul.f32 %v12704_v24, %v12877_v35  ;;  %12205 = vmatprep.mubr.msk.bf16.mxu1 %vm6011_vm7, %v5949_v34  ;;  %v3445_v52 = vsel %vm3414_vm4, %v3442_v43, %v3444_v20  ;;  %v4224_v31 = vrot.slane %v4015_v10, 4  ;;  %v13646_v25 = vmul.f32 %v12704_v24, %v12886_v11 }
 0x18b   : > { %v5183_v22 = vmul.f32 %v13651_v51, %v12877_v35  ;;  %v3447_v21 = vsel %vm3414_vm4, %v3444_v20, %v3446_v49  ;;  %v3718_v61 = vadd.f32 %v3445_v52, %v3134_v37  ;;  %v4226_v43 = vrot.slane %v13636_v26, 4 }
 0x18c   : > { %v4808_v48 = vrot.slane %v4599_v42, 5  ;;  %v3719_v47 = vadd.f32 %v3447_v21, %v3135_v8  ;;  %v4225_v2 = vsel %vm4194_vm5, %v4222_v54, %v4224_v31  ;;  %v20258_v34 = vrot.slane %v13646_v25, 5 }
 0x18d   : > { %v13665_v10 = vmul.f32 %v13651_v51, %v12886_v11  ;;  %v3914_v36 = vadd.f32 %v3818_v33, %v3718_v61  ;;  %v4227_v20 = vsel %vm4194_vm5, %v4224_v31, %v4226_v43  ;;  %v5391_v8 = vrot.slane %v5183_v22, 6 }
 0x18e   : > { %v4809_v37 = vsel %vm4778_vm6, %v4806_v57, %v4808_v48  ;;  %v3915_v42 = vadd.f32 %v3819_v62, %v3719_v47  ;;  %v4811_v63 = vsel %vm4778_vm6, %v4808_v48, %v20258_v34  ;;  %v910_v52 = vadd.f32 %v13445_v59, %v13096_v32 }
 0x18f   : > { %v20257_v54 = vrot.slane %v13665_v10, 6  ;;  %v4498_v33 = vadd.f32 %v4225_v2, %v3914_v36  ;;  %v5392_v31 = vsel %vm732_vm0, %v5389_v30, %v5391_v8  ;;  %v902_v3 = vadd.f32 %v13445_v59, %v13104_v17 }
 0x190   : > { %v1289_v57 = vmul.f32 %v12685_v7, %v12880_v41  ;;  %v4499_v62 = vadd.f32 %v4227_v20, %v3915_v42  ;;  %v13689_v21 = vmax.f32 %v910_v52, 0.0  ;;  %v1290_v32 = vmul.f32 %v12685_v7, %v12895_v15 }
 0x191   : > { %v5394_v22 = vsel %vm732_vm0, %v5391_v8, %v20257_v54  ;;  %v5082_v36 = vadd.f32 %v4809_v37, %v4498_v33  ;;  %v13693_v18 = vmax.f32 %v902_v3, 0.0  ;;  %v1486_v30 = vmul.f32 %v12690_v12, %v12895_v15  ;;  %v13718_v33 = vld [vmem:[%s20216_s3 + $0xa] ss:$0 sm:$0xff] }
 0x192   : > { %20625 = vst [vmem:[#allocation17_spill] sm:$0xff] %v13689_v21  ;;  %v13699_v17 = vmul.f32 %v12690_v12, %v12877_v35  ;;  %v5083_v41 = vadd.f32 %v4811_v63, %v4499_v62  ;;  %v2070_v61 = vmul.f32 %v12692_v13, %v12895_v15  ;;  %v13705_v48 = vmul.f32 %v12692_v13, %v12877_v35 }
 0x193   : > { %v2654_v47 = vmul.f32 %v12694_v14, %v12877_v35  ;;  %v5665_v2 = vadd.f32 %v5392_v31, %v5082_v36  ;;  %v1697_v20 = vrot.slane %v1486_v30, 1  ;;  %v13712_v8 = vmul.f32 %v12694_v14, %v12886_v11 }
 0x194   : > { %v20256_v37 = vrot.slane %v13699_v17, 1  ;;  %v5666_v42 = vadd.f32 %v5394_v22, %v5083_v41  ;;  %v2281_v63 = vrot.slane %v2070_v61, 2  ;;  %v20255_v52 = vrot.slane %v13705_v48, 2 }
 0x195   : > { %v2864_v15 = vrot.slane %v2654_v47, 6  ;;  %v5765_v3 = vadd.f32 %v13718_v33, %v5665_v2  ;;  %v1698_v31 = vsel %vm1663_vm2, %v1695_v60, %v1697_v20  ;;  %v20254_v22 = vrot.slane %v13712_v8, 6 }
 0x196   : > { %v1700_v62 = vsel %vm1663_vm2, %v1697_v20, %v20256_v37  ;;  %v5766_v36 = vadd.f32 %v13718_v33, %v5666_v42  ;;  %v1969_v30 = vadd.f32 %v1698_v31, %v1289_v57  ;;  %v2282_v61 = vsel %vm2247_vm3, %v2279_v4, %v2281_v63  ;;  %v13743_v4 = vpop.f32.mrb[48].mxu0  ;;  %v20627_v31 = vld [vmem:[#allocation6_spill] sm:$0xff] }
 0x197   : > { %v1970_v41 = vadd.f32 %v1700_v62, %v1290_v32  ;;  %v5861_v47 = vmax.f32 %v5765_v3, 0.0  ;;  %v2284_v58 = vsel %vm2247_vm3, %v2281_v63, %v20255_v52  ;;  %v20626_v60 = vrot.slane %v13592_v1, 6  ;;  %v13755_v62 = vpop.f32.mrb[49].mxu0 }
 0x198   : > { %v2867_v20 = vsel %vm732_vm0, %v2864_v15, %v20254_v22  ;;  %v5862_v42 = vmax.f32 %v5766_v36, 0.0  ;;  %v2553_v57 = vadd.f32 %v2282_v61, %v1969_v30  ;;  %v3237_v53 = vmul.f32 %v12696_v16, %v12877_v35 }
 0x199   : > { %v2865_v2 = vsel %vm732_vm0, %v20626_v60, %v2864_v15  ;;  %v2554_v32 = vadd.f32 %v2284_v58, %v1970_v41  ;;  %v13747_v3 = vmul.f32 %v12696_v16, %v12886_v11  ;;  %v3820_v1 = vmul.f32 %v12699_v19, %v12877_v35  ;;  %v20628_v60 = vld [vmem:[#allocation8_spill] sm:$0xff] }
 0x19a   : > { %v3821_v63 = vmul.f32 %v12699_v19, %v12886_v11  ;;  %v4017_v15 = vmul.f32 %v12702_v23, %v20627_v31  ;;  %v5950_v36 = vpack.c.bf16 %v5862_v42, %v5861_v47  ;;  %v3136_v30 = vadd.f32 %v2865_v2, %v2553_v57 }
 0x19b   : > { %v3137_v41 = vadd.f32 %v2867_v20, %v2554_v32  ;;  %v3448_v61 = vrot.slane %v3237_v53, 7  ;;  %v3450_v58 = vrot.slane %v13747_v3, 7  ;;  %v13760_v22 = vmul.f32 %v12702_v23, %v20628_v60 }
 0x19c   : > { %v4228_v52 = vrot.slane %v4017_v15, 4  ;;  %v4601_v37 = vmul.f32 %v12704_v24, %v20627_v31  ;;  %12206 = vmatmul.mubr.msk.bf16.gmra.mrb[12].mxu1 %vm6011_vm7, %v5950_v36  ;;  %v13770_v47 = vmul.f32 %v12704_v24, %v20628_v60  ;;  %v5185_v2 = vmul.f32 %v13651_v51, %v20627_v31 }
 0x19d   : > { %v3449_v54 = vsel %vm3414_vm4, %v3446_v49, %v3448_v61  ;;  %v13776_v20 = vmul.f32 %v13651_v51, %v20628_v60  ;;  %v3451_v42 = vsel %vm3414_vm4, %v3448_v61, %v3450_v58  ;;  %v4230_v49 = vrot.slane %v13760_v22, 4  ;;  %v20629_v61 = vld [vmem:[#allocation11_spill] sm:$0xff] }
 0x19e   : > { %v3720_v57 = vadd.f32 %v3449_v54, %v3136_v30  ;;  %v4229_v45 = vsel %vm4194_vm5, %v4226_v43, %v4228_v52  ;;  %v3721_v32 = vadd.f32 %v3451_v42, %v3137_v41  ;;  %v4812_v53 = vrot.slane %v4601_v37, 5 }
 0x19f   : > { %v20265_v15 = vrot.slane %v13770_v47, 5  ;;  %v5395_v36 = vrot.slane %v5185_v2, 6  ;;  %v4231_v21 = vsel %vm4194_vm5, %v4228_v52, %v4230_v49  ;;  %v20261_v50 = vrot.slane %v13776_v20, 6 }
 0x1a0   : > { %v3916_v34 = vadd.f32 %v3820_v1, %v3720_v57  ;;  %v923_v54 = vadd.f32 %v13445_v59, %v20629_v61  ;;  %v3917_v26 = vadd.f32 %v3821_v63, %v3721_v32  ;;  %v20630_v43 = vrot.slane %v13646_v25, 5 }
 0x1a1   : > { %v4815_v37 = vsel %vm4778_vm6, %v4812_v53, %v20265_v15  ;;  %v20631_v1 = vrot.slane %v13665_v10, 6  ;;  %v5398_v52 = vsel %vm732_vm0, %v5395_v36, %v20261_v50  ;;  %v915_v25 = vadd.f32 %v13445_v59, %v13145_v27 }
 0x1a2   : > { %v4813_v30 = vsel %vm4778_vm6, %v20630_v43, %v4812_v53  ;;  %v4500_v2 = vadd.f32 %v4229_v45, %v3916_v34  ;;  %v13804_v42 = vmax.f32 %v923_v54, 0.0  ;;  %v4501_v63 = vadd.f32 %v4231_v21, %v3917_v26 }
 0x1a3   : > { %v5396_v41 = vsel %vm732_vm0, %v20631_v1, %v5395_v36  ;;  %v1291_v57 = vmul.f32 %v12685_v7, %v12877_v35  ;;  %v1292_v32 = vmul.f32 %v12685_v7, %v12886_v11  ;;  %v1488_v10 = vmul.f32 %v12690_v12, %v12886_v11 }
 0x1a4   : > { %20632 = vst [vmem:[#allocation6_spill] sm:$0xff] %v13804_v42  ;;  %v5084_v34 = vadd.f32 %v4813_v30, %v4500_v2  ;;  %v13814_v45 = vmax.f32 %v915_v25, 0.0  ;;  %v13818_v53 = vmul.f32 %v12690_v12, %v20627_v31  ;;  %v2072_v27 = vmul.f32 %v12692_v13, %v12886_v11 }
 0x1a5   : > { %v5085_v21 = vadd.f32 %v4815_v37, %v4501_v63  ;;  %v1701_v36 = vrot.slane %v1488_v10, 1  ;;  %v13824_v35 = vmul.f32 %v12692_v13, %v20627_v31  ;;  %v2656_v61 = vmul.f32 %v12694_v14, %v20627_v31 }
 0x1a6   : > { %v5667_v54 = vadd.f32 %v5396_v41, %v5084_v34  ;;  %v20263_v26 = vrot.slane %v13818_v53, 1  ;;  %v2285_v43 = vrot.slane %v2072_v27, 2  ;;  %v13831_v30 = vmul.f32 %v12694_v14, %v20628_v60 }
 0x1a7   : > { %v5668_v1 = vadd.f32 %v5398_v52, %v5085_v21  ;;  %v20633_v11 = vrot.slane %v13699_v17, 1  ;;  %v20262_v2 = vrot.slane %v13824_v35, 2  ;;  %v2868_v25 = vrot.slane %v2656_v61, 6 }
 0x1a8   : > { %v5767_v63 = vadd.f32 %v13718_v33, %v5667_v54  ;;  %v1704_v41 = vsel %vm1663_vm2, %v1701_v36, %v20263_v26  ;;  %v20634_v34 = vrot.slane %v13705_v48, 2  ;;  %v20635_v61 = vrot.slane %v13712_v8, 6  ;;  %v20637_v26 = vld [vmem:[#allocation7_spill] sm:$0xff] }
 0x1a9   : > { %v1702_v37 = vsel %vm1663_vm2, %v20633_v11, %v1701_v36  ;;  %v5768_v52 = vadd.f32 %v13718_v33, %v5668_v1  ;;  %v1972_v21 = vadd.f32 %v1704_v41, %v1292_v32  ;;  %v2288_v17 = vsel %vm2247_vm3, %v2285_v43, %v20262_v2  ;;  %v13860_v1 = vpop.f32.mrb[50].mxu0 }
 0x1aa   : > { %v1971_v10 = vadd.f32 %v1702_v37, %v1291_v57  ;;  %v2286_v27 = vsel %vm2247_vm3, %v20634_v34, %v2285_v43  ;;  %v2869_v54 = vsel %vm732_vm0, %v20635_v61, %v2868_v25  ;;  %v5863_v11 = vmax.f32 %v5767_v63, 0.0  ;;  %v13867_v34 = vpop.f32.mrb[51].mxu0 }
 0x1ab   : > { %v20264_v36 = vrot.slane %v13831_v30, 6  ;;  %v3239_v48 = vmul.f32 %v12696_v16, %v20627_v31  ;;  %v5864_v57 = vmax.f32 %v5768_v52, 0.0  ;;  %v2556_v37 = vadd.f32 %v2288_v17, %v1972_v21  ;;  %v20636_v17 = vld [vmem:[#allocation5_spill] sm:$0xff] }
 0x1ac   : > { %v2555_v50 = vadd.f32 %v2286_v27, %v1971_v10  ;;  %v13856_v32 = vmul.f32 %v12696_v16, %v20628_v60  ;;  %v3822_v43 = vmul.f32 %v12699_v19, %v20627_v31  ;;  %v3823_v10 = vmul.f32 %v12699_v19, %v20628_v60 }
 0x1ad   : > { %v2871_v8 = vsel %vm732_vm0, %v2868_v25, %v20264_v36  ;;  %v3452_v41 = vrot.slane %v3239_v48, 7  ;;  %v5951_v27 = vpack.c.bf16 %v5864_v57, %v5863_v11  ;;  %v4019_v61 = vmul.f32 %v12702_v23, %v20636_v17 }
 0x1ae   : > { %v3138_v63 = vadd.f32 %v2869_v54, %v2555_v50  ;;  %v3139_v52 = vadd.f32 %v2871_v8, %v2556_v37  ;;  %v20270_v21 = vrot.slane %v13856_v32, 7  ;;  %v13877_v50 = vmul.f32 %v12702_v23, %v20637_v26 }
 0x1af   : > { %v3453_v2 = vsel %vm3414_vm4, %v3450_v58, %v3452_v41  ;;  %v4603_v25 = vmul.f32 %v12704_v24, %v20636_v17  ;;  %v13883_v54 = vmul.f32 %v12704_v24, %v20637_v26  ;;  %12209 = vmatprep.mubr.msk.bf16.mxu1 %vm6011_vm7, %v5951_v27  ;;  %v4232_v48 = vrot.slane %v4019_v61, 4 }
 0x1b0   : > { %v3455_v11 = vsel %vm3414_vm4, %v3452_v41, %v20270_v21  ;;  %v3722_v3 = vadd.f32 %v3453_v2, %v3138_v63  ;;  %v5187_v58 = vmul.f32 %v13651_v51, %v20636_v17  ;;  %v20269_v37 = vrot.slane %v13877_v50, 4 }
 0x1b1   : > { %v3723_v57 = vadd.f32 %v3455_v11, %v3139_v52  ;;  %v4816_v8 = vrot.slane %v4603_v25, 5  ;;  %v20268_v36 = vrot.slane %v13883_v54, 5  ;;  %v4233_v27 = vsel %vm4194_vm5, %v4230_v49, %v4232_v48 }
 0x1b2   : > { %v3918_v15 = vadd.f32 %v3822_v43, %v3722_v3  ;;  %v13898_v42 = vmul.f32 %v13651_v51, %v20637_v26  ;;  %v5399_v2 = vrot.slane %v5187_v58, 6  ;;  %v4235_v41 = vsel %vm4194_vm5, %v4232_v48, %v20269_v37  ;;  %v20640_v48 = vld [vmem:[#allocation12_spill] sm:$0xff] }
 0x1b3   : > { %v3919_v63 = vadd.f32 %v3823_v10, %v3723_v57  ;;  %v20638_v52 = vrot.slane %v13770_v47, 5  ;;  %v4819_v22 = vsel %vm4778_vm6, %v4816_v8, %v20268_v36  ;;  %v20639_v49 = vrot.slane %v13776_v20, 6 }
 0x1b4   : > { %v4502_v43 = vadd.f32 %v4233_v27, %v3918_v15  ;;  %v20267_v11 = vrot.slane %v13898_v42, 6  ;;  %v926_v10 = vadd.f32 %v13445_v59, %v13158_v0  ;;  %v918_v47 = vadd.f32 %v13445_v59, %v20640_v48 }
 0x1b5   : > { %v4817_v61 = vsel %vm4778_vm6, %v20638_v52, %v4816_v8  ;;  %v5400_v25 = vsel %vm732_vm0, %v20639_v49, %v5399_v2  ;;  %v4503_v3 = vadd.f32 %v4235_v41, %v3919_v63  ;;  %v1293_v58 = vmul.f32 %v12685_v7, %v20627_v31 }
 0x1b6   : > { %v1294_v57 = vmul.f32 %v12685_v7, %v20628_v60  ;;  %v5086_v15 = vadd.f32 %v4817_v61, %v4502_v43  ;;  %v5402_v20 = vsel %vm732_vm0, %v5399_v2, %v20267_v11  ;;  %v13924_v8 = vmax.f32 %v926_v10, 0.0 }
 0x1b7   : > { %v1490_v0 = vmul.f32 %v12690_v12, %v20628_v60  ;;  %v5087_v27 = vadd.f32 %v4819_v22, %v4503_v3  ;;  %v13928_v63 = vmax.f32 %v918_v47, 0.0  ;;  %v13932_v41 = vmul.f32 %v12690_v12, %v20636_v17 }
 0x1b8   : > { %20641 = vst [vmem:[#allocation8_spill] sm:$0xff] %v13924_v8  ;;  %v2074_v31 = vmul.f32 %v12692_v13, %v20628_v60  ;;  %v5669_v52 = vadd.f32 %v5400_v25, %v5086_v15  ;;  %v13938_v2 = vmul.f32 %v12692_v13, %v20636_v17  ;;  %v2658_v43 = vmul.f32 %v12694_v14, %v20636_v17 }
 0x1b9   : > { %v1705_v61 = vrot.slane %v1490_v0, 1  ;;  %v5670_v49 = vadd.f32 %v5402_v20, %v5087_v27  ;;  %v20273_v22 = vrot.slane %v13932_v41, 1  ;;  %v13945_v3 = vmul.f32 %v12694_v14, %v20637_v26 }
 0x1ba   : > { %v2289_v10 = vrot.slane %v2074_v31, 2  ;;  %v5769_v48 = vadd.f32 %v13718_v33, %v5669_v52  ;;  %v20642_v60 = vrot.slane %v13818_v53, 1  ;;  %v20272_v47 = vrot.slane %v13938_v2, 2 }
 0x1bb   : > { %v2872_v15 = vrot.slane %v2658_v43, 6  ;;  %v5770_v0 = vadd.f32 %v13718_v33, %v5670_v49  ;;  %v1708_v20 = vsel %vm1663_vm2, %v1705_v61, %v20273_v22  ;;  %v20643_v31 = vrot.slane %v13824_v35, 2 }
 0x1bc   : > { %v1706_v25 = vsel %vm1663_vm2, %v20642_v60, %v1705_v61  ;;  %v5865_v36 = vmax.f32 %v5769_v48, 0.0  ;;  %v1974_v52 = vadd.f32 %v1708_v20, %v1294_v57  ;;  %v2292_v53 = vsel %vm2247_vm3, %v2289_v10, %v20272_v47 }
 0x1bd   : > { %v1973_v27 = vadd.f32 %v1706_v25, %v1293_v58  ;;  %v2290_v11 = vsel %vm2247_vm3, %v20643_v31, %v2289_v10  ;;  %v20644_v60 = vrot.slane %v13831_v30, 6  ;;  %v5866_v49 = vmax.f32 %v5770_v0, 0.0  ;;  %v13976_v10 = vpop.f32.mrb[52].mxu0 }
 0x1be   : > { %v20271_v21 = vrot.slane %v13945_v3, 6  ;;  %v3241_v58 = vmul.f32 %v12696_v16, %v20636_v17  ;;  %v2558_v35 = vadd.f32 %v2292_v53, %v1974_v52  ;;  %v13970_v61 = vmul.f32 %v12696_v16, %v20637_v26  ;;  %v13981_v20 = vpop.f32.mrb[53].mxu0  ;;  %v20646_v52 = vld [vmem:[#allocation10_spill] sm:$0xff] }
 0x1bf   : > { %v2873_v43 = vsel %vm732_vm0, %v20644_v60, %v2872_v15  ;;  %v2557_v37 = vadd.f32 %v2290_v11, %v1973_v27  ;;  %v3824_v57 = vmul.f32 %v12699_v19, %v20636_v17  ;;  %v3825_v30 = vmul.f32 %v12699_v19, %v20637_v26  ;;  %20645 = vst [vmem:[#allocation11_spill] sm:$0xff] %v13981_v20 }
 0x1c0   : > { %v5952_v48 = vpack.c.bf16 %v5866_v49, %v5865_v36  ;;  %v2875_v11 = vsel %vm732_vm0, %v2872_v15, %v20271_v21  ;;  %v3456_v0 = vrot.slane %v3241_v58, 7  ;;  %v20278_v31 = vrot.slane %v13970_v61, 7 }
 0x1c1   : > { %v3140_v25 = vadd.f32 %v2873_v43, %v2557_v37  ;;  %v3141_v27 = vadd.f32 %v2875_v11, %v2558_v35  ;;  %v4021_v53 = vmul.f32 %v12702_v23, %v20646_v52  ;;  %v13988_v60 = vmul.f32 %v12702_v23, %v13227_v6 }
 0x1c2   : > { %12210 = vmatmul.mubr.msk.bf16.gmra.mrb[16].mxu1 %vm6011_vm7, %v5952_v48  ;;  %v20647_v36 = vrot.slane %v13856_v32, 7  ;;  %v4605_v37 = vmul.f32 %v12704_v24, %v20646_v52  ;;  %v13998_v43 = vmul.f32 %v12704_v24, %v13227_v6  ;;  %v5189_v49 = vmul.f32 %v13651_v51, %v20646_v52 }
 0x1c3   : > { %v3459_v58 = vsel %vm3414_vm4, %v3456_v0, %v20278_v31  ;;  %v4236_v48 = vrot.slane %v4021_v53, 4  ;;  %v20277_v32 = vrot.slane %v13988_v60, 4  ;;  %v14009_v47 = vmul.f32 %v13651_v51, %v13227_v6 }
 0x1c4   : > { %v3457_v15 = vsel %vm3414_vm4, %v20647_v36, %v3456_v0  ;;  %v3725_v11 = vadd.f32 %v3459_v58, %v3141_v27  ;;  %v4820_v36 = vrot.slane %v4605_v37, 5  ;;  %v20276_v21 = vrot.slane %v13998_v43, 5 }
 0x1c5   : > { %v3724_v35 = vadd.f32 %v3457_v15, %v3140_v25  ;;  %v20648_v8 = vrot.slane %v13877_v50, 4  ;;  %v4239_v25 = vsel %vm4194_vm5, %v4236_v48, %v20277_v32  ;;  %v5403_v0 = vrot.slane %v5189_v49, 6  ;;  %v20652_v49 = vld [vmem:[#allocation15_spill] sm:$0xff] }
 0x1c6   : > { %v3921_v53 = vadd.f32 %v3825_v30, %v3725_v11  ;;  %v20649_v27 = vrot.slane %v13883_v54, 5  ;;  %v4823_v37 = vsel %vm4778_vm6, %v4820_v36, %v20276_v21  ;;  %v20650_v50 = vrot.slane %v13898_v42, 6 }
 0x1c7   : > { %v3920_v22 = vadd.f32 %v3824_v57, %v3724_v35  ;;  %v4237_v20 = vsel %vm4194_vm5, %v20648_v8, %v4236_v48  ;;  %v20275_v57 = vrot.slane %v14009_v47, 6  ;;  %v20651_v35 = vld [vmem:[#allocation14_spill] sm:$0xff]  ;;  %v931_v30 = vadd.f32 %v13445_v59, %v20652_v49 }
 0x1c8   : > { %v4821_v15 = vsel %vm4778_vm6, %v20649_v27, %v4820_v36  ;;  %v5404_v8 = vsel %vm732_vm0, %v20650_v50, %v5403_v0  ;;  %v939_v48 = vadd.f32 %v13445_v59, %v20651_v35  ;;  %v4505_v54 = vadd.f32 %v4239_v25, %v3921_v53 }
 0x1c9   : > { %v4504_v58 = vadd.f32 %v4237_v20, %v3920_v22  ;;  %v5406_v11 = vsel %vm732_vm0, %v5403_v0, %v20275_v57  ;;  %v1295_v36 = vmul.f32 %v12685_v7, %v20636_v17  ;;  %v1296_v22 = vmul.f32 %v12685_v7, %v20637_v26 }
 0x1ca   : > { %v14038_v20 = vmax.f32 %v939_v48, 0.0  ;;  %v14040_v27 = vmax.f32 %v931_v30, 0.0  ;;  %v1492_v50 = vmul.f32 %v12690_v12, %v20637_v26  ;;  %v5089_v35 = vadd.f32 %v4823_v37, %v4505_v54 }
 0x1cb   : > { %v5088_v42 = vadd.f32 %v4821_v15, %v4504_v58  ;;  %v14046_v25 = vmul.f32 %v12690_v12, %v20646_v52  ;;  %v2076_v0 = vmul.f32 %v12692_v13, %v20637_v26  ;;  %v14052_v17 = vmul.f32 %v12692_v13, %v20646_v52 }
 0x1cc   : > { %20653 = vst [vmem:[#allocation5_spill] sm:$0xff] %v14038_v20  ;;  %20654 = vst [vmem:[#allocation7_spill] sm:$0xff] %v14040_v27  ;;  %v1709_v15 = vrot.slane %v1492_v50, 1  ;;  %v2660_v58 = vmul.f32 %v12694_v14, %v20646_v52  ;;  %v14058_v48 = vmul.f32 %v12694_v14, %v13227_v6  ;;  %v5672_v37 = vadd.f32 %v5406_v11, %v5089_v35 }
 0x1cd   : > { %v5671_v53 = vadd.f32 %v5404_v8, %v5088_v42  ;;  %v20281_v49 = vrot.slane %v14046_v25, 1  ;;  %v2293_v30 = vrot.slane %v2076_v0, 2  ;;  %v20280_v54 = vrot.slane %v14052_v17, 2 }
 0x1ce   : > { %v20655_v57 = vrot.slane %v13932_v41, 1  ;;  %v2876_v42 = vrot.slane %v2660_v58, 6  ;;  %v5772_v21 = vadd.f32 %v13718_v33, %v5672_v37  ;;  %v20656_v0 = vrot.slane %v13938_v2, 2 }
 0x1cf   : > { %v5771_v26 = vadd.f32 %v13718_v33, %v5671_v53  ;;  %v1712_v11 = vsel %vm1663_vm2, %v1709_v15, %v20281_v49  ;;  %v2296_v41 = vsel %vm2247_vm3, %v2293_v30, %v20280_v54  ;;  %v20658_v20 = vrot.slane %v14058_v48, 6 }
 0x1d0   : > { %v1710_v8 = vsel %vm1663_vm2, %v20655_v57, %v1709_v15  ;;  %v2294_v32 = vsel %vm2247_vm3, %v20656_v0, %v2293_v30  ;;  %v1976_v53 = vadd.f32 %v1712_v11, %v1296_v22  ;;  %v20657_v57 = vrot.slane %v13945_v3, 6  ;;  %v14085_v15 = vpop.f32.mrb[54].mxu0 }
 0x1d1   : > { %v1975_v35 = vadd.f32 %v1710_v8, %v1295_v36  ;;  %v5867_v31 = vmax.f32 %v5771_v26, 0.0  ;;  %v5868_v37 = vmax.f32 %v5772_v21, 0.0  ;;  %v2879_v36 = vsel %vm732_vm0, %v2876_v42, %v20658_v20 }
 0x1d2   : > { %v2877_v58 = vsel %vm732_vm0, %v20657_v57, %v2876_v42  ;;  %v3243_v2 = vmul.f32 %v12696_v16, %v20646_v52  ;;  %v2560_v22 = vadd.f32 %v2296_v41, %v1976_v53  ;;  %v14089_v26 = vmul.f32 %v12696_v16, %v13227_v6  ;;  %v20660_v42 = vld [vmem:[#allocation9_spill] sm:$0xff] }
 0x1d3   : > { %v2559_v50 = vadd.f32 %v2294_v32, %v1975_v35  ;;  %v3826_v3 = vmul.f32 %v12699_v19, %v20646_v52  ;;  %v3827_v21 = vmul.f32 %v12699_v19, %v13227_v6  ;;  %v14095_v32 = vpop.f32.mrb[55].mxu0  ;;  %v5953_v30 = vpack.c.bf16 %v5868_v37, %v5867_v31  ;;  %v20661_v53 = vld [vmem:[#allocation13_spill] sm:$0xff] }
 0x1d4   : > { %20659 = vst [vmem:[#allocation12_spill] sm:$0xff] %v14095_v32  ;;  %v3460_v8 = vrot.slane %v3243_v2, 7  ;;  %v4023_v11 = vmul.f32 %v12702_v23, %v20660_v42  ;;  %v3143_v35 = vadd.f32 %v2879_v36, %v2560_v22  ;;  %v3462_v0 = vrot.slane %v14089_v26, 7 }
 0x1d5   : > { %v3142_v20 = vadd.f32 %v2877_v58, %v2559_v50  ;;  %v14102_v41 = vmul.f32 %v12702_v23, %v20661_v53  ;;  %v4607_v57 = vmul.f32 %v12704_v24, %v20660_v42  ;;  %12213 = vmatprep.mubr.msk.bf16.mxu1 %vm6011_vm7, %v5953_v30  ;;  %v20662_v54 = vrot.slane %v13970_v61, 7 }
 0x1d6   : > { %v4240_v50 = vrot.slane %v4023_v11, 4  ;;  %v14112_v58 = vmul.f32 %v12704_v24, %v20661_v53  ;;  %v5191_v37 = vmul.f32 %v13651_v51, %v20660_v42  ;;  %v3463_v36 = vsel %vm3414_vm4, %v3460_v8, %v3462_v0 }
 0x1d7   : > { %v3461_v31 = vsel %vm3414_vm4, %v20662_v54, %v3460_v8  ;;  %v4242_v22 = vrot.slane %v14102_v41, 4  ;;  %v4824_v30 = vrot.slane %v4607_v57, 5  ;;  %v3727_v49 = vadd.f32 %v3463_v36, %v3143_v35  ;;  %v14249_v41 = vld [vmem:[%s20216_s3 + $0x9] ss:$0 sm:$0xff] }
 0x1d8   : > { %v3726_v2 = vadd.f32 %v3461_v31, %v3142_v20  ;;  %v20663_v61 = vrot.slane %v13988_v60, 4  ;;  %v20284_v11 = vrot.slane %v14112_v58, 5  ;;  %v14126_v27 = vmul.f32 %v13651_v51, %v20661_v53 }
 0x1d9   : > { %v4243_v8 = vsel %vm4194_vm5, %v4240_v50, %v4242_v22  ;;  %v20664_v20 = vrot.slane %v13998_v43, 5  ;;  %v5407_v35 = vrot.slane %v5191_v37, 6  ;;  %v3923_v31 = vadd.f32 %v3827_v21, %v3727_v49 }
 0x1da   : > { %v4241_v54 = vsel %vm4194_vm5, %v20663_v61, %v4240_v50  ;;  %v3922_v32 = vadd.f32 %v3826_v3, %v3726_v2  ;;  %v4827_v60 = vsel %vm4778_vm6, %v4824_v30, %v20284_v11  ;;  %v20283_v36 = vrot.slane %v14126_v27, 6 }
 0x1db   : > { %v4825_v57 = vsel %vm4778_vm6, %v20664_v20, %v4824_v30  ;;  %v942_v61 = vadd.f32 %v13445_v59, %v13389_v55  ;;  %v20665_v2 = vrot.slane %v14009_v47, 6  ;;  %v934_v43 = vadd.f32 %v13445_v59, %v13396_v39 }
 0x1dc   : > { %v4506_v3 = vadd.f32 %v4241_v54, %v3922_v32  ;;  %v1297_v49 = vmul.f32 %v12685_v7, %v20646_v52  ;;  %v4507_v21 = vadd.f32 %v4243_v8, %v3923_v31  ;;  %v5410_v37 = vsel %vm732_vm0, %v5407_v35, %v20283_v36 }
 0x1dd   : > { %v5408_v50 = vsel %vm732_vm0, %v20665_v2, %v5407_v35  ;;  %v14150_v30 = vmax.f32 %v942_v61, 0.0  ;;  %v1298_v55 = vmul.f32 %v12685_v7, %v13227_v6  ;;  %v14154_v47 = vmax.f32 %v934_v43, 0.0 }
 0x1de   : > { %v5090_v32 = vadd.f32 %v4825_v57, %v4506_v3  ;;  %v1494_v54 = vmul.f32 %v12690_v12, %v13227_v6  ;;  %v14160_v39 = vmul.f32 %v12690_v12, %v20660_v42  ;;  %v5091_v59 = vadd.f32 %v4827_v60, %v4507_v21 }
 0x1df   : > { %20666 = vst [vmem:[#allocation10_spill] sm:$0xff] %v14150_v30  ;;  %v2078_v52 = vmul.f32 %v12692_v13, %v13227_v6  ;;  %v14166_v8 = vmul.f32 %v12692_v13, %v20660_v42  ;;  %v2662_v20 = vmul.f32 %v12694_v14, %v20660_v42  ;;  %v14173_v61 = vmul.f32 %v12694_v14, %v20661_v53 }
 0x1e0   : > { %v5673_v57 = vadd.f32 %v5408_v50, %v5090_v32  ;;  %v1713_v35 = vrot.slane %v1494_v54, 1  ;;  %v20287_v31 = vrot.slane %v14160_v39, 1  ;;  %v5674_v3 = vadd.f32 %v5410_v37, %v5091_v59 }
 0x1e1   : > { %v2297_v60 = vrot.slane %v2078_v52, 2  ;;  %v20286_v2 = vrot.slane %v14166_v8, 2  ;;  %v2880_v6 = vrot.slane %v2662_v20, 6  ;;  %v20667_v21 = vrot.slane %v14046_v25, 1 }
 0x1e2   : > { %v5773_v43 = vadd.f32 %v13718_v33, %v5673_v57  ;;  %v1716_v50 = vsel %vm1663_vm2, %v1713_v35, %v20287_v31  ;;  %v20285_v32 = vrot.slane %v14173_v61, 6  ;;  %v5774_v54 = vadd.f32 %v13718_v33, %v5674_v3 }
 0x1e3   : > { %v1714_v36 = vsel %vm1663_vm2, %v20667_v21, %v1713_v35  ;;  %v1978_v37 = vadd.f32 %v1716_v50, %v1298_v55  ;;  %v20668_v59 = vrot.slane %v14052_v17, 2  ;;  %v2300_v25 = vsel %vm2247_vm3, %v2297_v60, %v20286_v2  ;;  %v14199_v55 = vpop.f32.mrb[56].mxu0 }
 0x1e4   : > { %v1977_v11 = vadd.f32 %v1714_v36, %v1297_v49  ;;  %v5869_v20 = vmax.f32 %v5773_v43, 0.0  ;;  %v20669_v57 = vrot.slane %v14058_v48, 6  ;;  %v2883_v35 = vsel %vm732_vm0, %v2880_v6, %v20285_v32 }
 0x1e5   : > { %v2298_v52 = vsel %vm2247_vm3, %v20668_v59, %v2297_v60  ;;  %v5870_v3 = vmax.f32 %v5774_v54, 0.0  ;;  %v2562_v49 = vadd.f32 %v2300_v25, %v1978_v37  ;;  %v3245_v17 = vmul.f32 %v12696_v16, %v20660_v42 }
 0x1e6   : > { %v2881_v21 = vsel %vm732_vm0, %v20669_v57, %v2880_v6  ;;  %v2561_v36 = vadd.f32 %v2298_v52, %v1977_v11  ;;  %v14203_v43 = vmul.f32 %v12696_v16, %v20661_v53  ;;  %v3828_v48 = vmul.f32 %v12699_v19, %v20660_v42  ;;  %v14211_v11 = vpop.f32.mrb[57].mxu0 }
 0x1e7   : > { %v3829_v60 = vmul.f32 %v12699_v19, %v20661_v53  ;;  %v4025_v6 = vmul.f32 %v12702_v23, %v13343_v5  ;;  %20670 = vst [vmem:[#allocation14_spill] sm:$0xff] %v14211_v11  ;;  %v5954_v50 = vpack.c.bf16 %v5870_v3, %v5869_v20  ;;  %v3145_v37 = vadd.f32 %v2883_v35, %v2562_v49 }
 0x1e8   : > { %v3144_v54 = vadd.f32 %v2881_v21, %v2561_v36  ;;  %v3464_v59 = vrot.slane %v3245_v17, 7  ;;  %v3466_v52 = vrot.slane %v14203_v43, 7  ;;  %v14216_v25 = vmul.f32 %v12702_v23, %v13462_v46 }
 0x1e9   : > { %v4244_v57 = vrot.slane %v4025_v6, 4  ;;  %v4609_v32 = vmul.f32 %v12704_v24, %v13343_v5  ;;  %12214 = vmatmul.mubr.msk.bf16.gmra.mrb[20].mxu1 %vm6011_vm7, %v5954_v50  ;;  %v14226_v20 = vmul.f32 %v12704_v24, %v13462_v46  ;;  %v5193_v21 = vmul.f32 %v13651_v51, %v13343_v5 }
 0x1ea   : > { %v3465_v2 = vsel %vm3414_vm4, %v3462_v0, %v3464_v59  ;;  %v14232_v35 = vmul.f32 %v13651_v51, %v13462_v46  ;;  %v3467_v3 = vsel %vm3414_vm4, %v3464_v59, %v3466_v52  ;;  %v4246_v0 = vrot.slane %v14216_v25, 4 }
 0x1eb   : > { %v3728_v36 = vadd.f32 %v3465_v2, %v3144_v54  ;;  %v4245_v26 = vsel %vm4194_vm5, %v4242_v22, %v4244_v57  ;;  %v3729_v49 = vadd.f32 %v3467_v3, %v3145_v37  ;;  %v4828_v17 = vrot.slane %v4609_v32, 5 }
 0x1ec   : > { %v4830_v6 = vrot.slane %v14226_v20, 5  ;;  %v5411_v50 = vrot.slane %v5193_v21, 6  ;;  %v4247_v30 = vsel %vm4194_vm5, %v4244_v57, %v4246_v0  ;;  %v20289_v11 = vrot.slane %v14232_v35, 6 }
 0x1ed   : > { %v3924_v31 = vadd.f32 %v3828_v48, %v3728_v36  ;;  %v955_v22 = vadd.f32 %v14249_v41, %v13510_v44  ;;  %v3925_v2 = vadd.f32 %v3829_v60, %v3729_v49  ;;  %v20671_v32 = vrot.slane %v14112_v58, 5 }
 0x1ee   : > { %v4831_v48 = vsel %vm4778_vm6, %v4828_v17, %v4830_v6  ;;  %v20672_v37 = vrot.slane %v14126_v27, 6  ;;  %v5414_v21 = vsel %vm732_vm0, %v5411_v50, %v20289_v11  ;;  %v947_v44 = vadd.f32 %v14249_v41, %v13515_v38 }
 0x1ef   : > { %v4829_v54 = vsel %vm4778_vm6, %v20671_v32, %v4828_v17  ;;  %v4508_v57 = vadd.f32 %v4245_v26, %v3924_v31  ;;  %v14265_v3 = vmax.f32 %v955_v22, 0.0  ;;  %v4509_v58 = vadd.f32 %v4247_v30, %v3925_v2 }
 0x1f0   : > { %v5412_v59 = vsel %vm732_vm0, %v20672_v37, %v5411_v50  ;;  %v1299_v60 = vmul.f32 %v12685_v7, %v20660_v42  ;;  %v1300_v36 = vmul.f32 %v12685_v7, %v20661_v53  ;;  %v1496_v27 = vmul.f32 %v12690_v12, %v20661_v53 }
 0x1f1   : > { %v5092_v31 = vadd.f32 %v4829_v54, %v4508_v57  ;;  %v14275_v26 = vmax.f32 %v947_v44, 0.0  ;;  %v14279_v49 = vmul.f32 %v12690_v12, %v13343_v5  ;;  %v2080_v38 = vmul.f32 %v12692_v13, %v20661_v53 }
 0x1f2   : > { %v5093_v30 = vadd.f32 %v4831_v48, %v4509_v58  ;;  %v1717_v17 = vrot.slane %v1496_v27, 1  ;;  %v14285_v42 = vmul.f32 %v12692_v13, %v13343_v5  ;;  %v2664_v50 = vmul.f32 %v12694_v14, %v13343_v5 }
 0x1f3   : > { %v5675_v22 = vadd.f32 %v5412_v59, %v5092_v31  ;;  %v20292_v2 = vrot.slane %v14279_v49, 1  ;;  %v2301_v32 = vrot.slane %v2080_v38, 2  ;;  %v14292_v54 = vmul.f32 %v12694_v14, %v13462_v46 }
 0x1f4   : > { %v5676_v37 = vadd.f32 %v5414_v21, %v5093_v30  ;;  %v20673_v53 = vrot.slane %v14160_v39, 1  ;;  %v20291_v57 = vrot.slane %v14285_v42, 2  ;;  %v2884_v44 = vrot.slane %v2664_v50, 6 }
 0x1f5   : > { %v5775_v58 = vadd.f32 %v13718_v33, %v5675_v22  ;;  %v1720_v59 = vsel %vm1663_vm2, %v1717_v17, %v20292_v2  ;;  %v20674_v31 = vrot.slane %v14166_v8, 2  ;;  %v20675_v50 = vrot.slane %v14173_v61, 6 }
 0x1f6   : > { %v1718_v48 = vsel %vm1663_vm2, %v20673_v53, %v1717_v17  ;;  %v5776_v21 = vadd.f32 %v13718_v33, %v5676_v37  ;;  %v1980_v30 = vadd.f32 %v1720_v59, %v1300_v36  ;;  %v2304_v39 = vsel %vm2247_vm3, %v2301_v32, %v20291_v57  ;;  %v14321_v37 = vpop.f32.mrb[58].mxu0 }
 0x1f7   : > { %v1979_v27 = vadd.f32 %v1718_v48, %v1299_v60  ;;  %v2302_v38 = vsel %vm2247_vm3, %v20674_v31, %v2301_v32  ;;  %v2885_v22 = vsel %vm732_vm0, %v20675_v50, %v2884_v44  ;;  %v5871_v53 = vmax.f32 %v5775_v58, 0.0  ;;  %v14328_v31 = vpop.f32.mrb[59].mxu0 }
 0x1f8   : > { %v20290_v17 = vrot.slane %v14292_v54, 6  ;;  %v3247_v8 = vmul.f32 %v12696_v16, %v13343_v5  ;;  %v5872_v60 = vmax.f32 %v5776_v21, 0.0  ;;  %v2564_v48 = vadd.f32 %v2304_v39, %v1980_v30 }
 0x1f9   : > { %v2563_v11 = vadd.f32 %v2302_v38, %v1979_v27  ;;  %v14317_v36 = vmul.f32 %v12696_v16, %v13462_v46  ;;  %v3830_v32 = vmul.f32 %v12699_v19, %v13343_v5  ;;  %v3831_v27 = vmul.f32 %v12699_v19, %v13462_v46 }
 0x1fa   : > { %v2887_v61 = vsel %vm732_vm0, %v2884_v44, %v20290_v17  ;;  %v3468_v59 = vrot.slane %v3247_v8, 7  ;;  %v5955_v38 = vpack.c.bf16 %v5872_v60, %v5871_v53  ;;  %v4027_v39 = vmul.f32 %v12702_v23, %v13333_v29 }
 0x1fb   : > { %v3146_v58 = vadd.f32 %v2885_v22, %v2563_v11  ;;  %v3147_v21 = vadd.f32 %v2887_v61, %v2564_v48  ;;  %v3470_v30 = vrot.slane %v14317_v36, 7  ;;  %v14338_v11 = vmul.f32 %v12702_v23, %v13458_v40 }
 0x1fc   : > { %v3469_v50 = vsel %vm3414_vm4, %v3466_v52, %v3468_v59  ;;  %v4611_v44 = vmul.f32 %v12704_v24, %v13333_v29  ;;  %v14344_v22 = vmul.f32 %v12704_v24, %v13458_v40  ;;  %12217 = vmatprep.mubr.msk.bf16.mxu1 %vm6011_vm7, %v5955_v38  ;;  %v4248_v8 = vrot.slane %v4027_v39, 4 }
 0x1fd   : > { %v3471_v53 = vsel %vm3414_vm4, %v3468_v59, %v3470_v30  ;;  %v3730_v43 = vadd.f32 %v3469_v50, %v3146_v58  ;;  %v5195_v52 = vmul.f32 %v13651_v51, %v13333_v29  ;;  %v4250_v48 = vrot.slane %v14338_v11, 4 }
 0x1fe   : > { %v3731_v60 = vadd.f32 %v3471_v53, %v3147_v21  ;;  %v4832_v61 = vrot.slane %v4611_v44, 5  ;;  %v4834_v17 = vrot.slane %v14344_v22, 5  ;;  %v4249_v38 = vsel %vm4194_vm5, %v4246_v0, %v4248_v8 }
 0x1ff   : > { %v3926_v57 = vadd.f32 %v3830_v32, %v3730_v43  ;;  %v14359_v2 = vmul.f32 %v13651_v51, %v13458_v40  ;;  %v5415_v58 = vrot.slane %v5195_v52, 6  ;;  %v4251_v21 = vsel %vm4194_vm5, %v4248_v8, %v4250_v48 }
 0x200   : > { %v3927_v59 = vadd.f32 %v3831_v27, %v3731_v60  ;;  %v4833_v39 = vsel %vm4778_vm6, %v4830_v6, %v4832_v61  ;;  %v4835_v25 = vsel %vm4778_vm6, %v4832_v61, %v4834_v17  ;;  %v20676_v0 = vrot.slane %v14232_v35, 6 }
 0x201   : > { %v4510_v32 = vadd.f32 %v4249_v38, %v3926_v57  ;;  %v5417_v50 = vrot.slane %v14359_v2, 6  ;;  %v958_v27 = vadd.f32 %v14249_v41, %v13619_v28  ;;  %v950_v20 = vadd.f32 %v14249_v41, %v13629_v9 }
 0x202   : > { %v5416_v51 = vsel %vm732_vm0, %v20676_v0, %v5415_v58  ;;  %v4511_v44 = vadd.f32 %v4251_v21, %v3927_v59  ;;  %v1301_v6 = vmul.f32 %v12685_v7, %v13343_v5  ;;  %v1302_v53 = vmul.f32 %v12685_v7, %v13462_v46 }
 0x203   : > { %v5094_v57 = vadd.f32 %v4833_v39, %v4510_v32  ;;  %v5418_v35 = vsel %vm732_vm0, %v5415_v58, %v5417_v50  ;;  %v14385_v43 = vmax.f32 %v958_v27, 0.0  ;;  %v1498_v28 = vmul.f32 %v12690_v12, %v13462_v46 }
 0x204   : > { %v5095_v8 = vadd.f32 %v4835_v25, %v4511_v44  ;;  %v14389_v52 = vmax.f32 %v950_v20, 0.0  ;;  %v14393_v9 = vmul.f32 %v12690_v12, %v13333_v29  ;;  %v2082_v5 = vmul.f32 %v12692_v13, %v13462_v46 }
 0x205   : > { %v5677_v60 = vadd.f32 %v5416_v51, %v5094_v57  ;;  %v1721_v61 = vrot.slane %v1498_v28, 1  ;;  %v14399_v38 = vmul.f32 %v12692_v13, %v13333_v29  ;;  %v2666_v58 = vmul.f32 %v12694_v14, %v13333_v29 }
 0x206   : > { %v5678_v59 = vadd.f32 %v5418_v35, %v5095_v8  ;;  %v20295_v21 = vrot.slane %v14393_v9, 1  ;;  %v2305_v39 = vrot.slane %v2082_v5, 2  ;;  %v14406_v25 = vmul.f32 %v12694_v14, %v13458_v40 }
 0x207   : > { %v5777_v32 = vadd.f32 %v13718_v33, %v5677_v60  ;;  %v20677_v46 = vrot.slane %v14279_v49, 1  ;;  %v20294_v51 = vrot.slane %v14399_v38, 2  ;;  %v2888_v27 = vrot.slane %v2666_v58, 6 }
 0x208   : > { %v5778_v44 = vadd.f32 %v13718_v33, %v5678_v59  ;;  %v1724_v20 = vsel %vm1663_vm2, %v1721_v61, %v20295_v21  ;;  %v20678_v35 = vrot.slane %v14285_v42, 2  ;;  %v20679_v60 = vrot.slane %v14292_v54, 6 }
 0x209   : > { %v1722_v0 = vsel %vm1663_vm2, %v20677_v46, %v1721_v61  ;;  %v5873_v8 = vmax.f32 %v5777_v32, 0.0  ;;  %v1982_v5 = vadd.f32 %v1724_v20, %v1302_v53  ;;  %v2308_v49 = vsel %vm2247_vm3, %v2305_v39, %v20294_v51 }
 0x20a   : > { %v1981_v57 = vadd.f32 %v1722_v0, %v1301_v6  ;;  %v2306_v28 = vsel %vm2247_vm3, %v20678_v35, %v2305_v39  ;;  %v2889_v58 = vsel %vm732_vm0, %v20679_v60, %v2888_v27  ;;  %v5874_v33 = vmax.f32 %v5778_v44, 0.0  ;;  %v14437_v39 = vpop.f32.mrb[60].mxu0 }
 0x20b   : > { %v20293_v46 = vrot.slane %v14406_v25, 6  ;;  %v3249_v6 = vmul.f32 %v12696_v16, %v13333_v29  ;;  %v2566_v42 = vadd.f32 %v2308_v49, %v1982_v5  ;;  %v14431_v61 = vmul.f32 %v12696_v16, %v13458_v40 }
 0x20c   : > { %v2565_v59 = vadd.f32 %v2306_v28, %v1981_v57  ;;  %v3832_v53 = vmul.f32 %v12699_v19, %v13333_v29  ;;  %v3833_v54 = vmul.f32 %v12699_v19, %v13458_v40  ;;  %v5956_v32 = vpack.c.bf16 %v5874_v33, %v5873_v8  ;;  %v14442_v57 = vpop.f32.mrb[61].mxu0 }
 0x20d   : > { %v2891_v0 = vsel %vm732_vm0, %v2888_v27, %v20293_v46  ;;  %v3472_v20 = vrot.slane %v3249_v6, 7  ;;  %v3474_v28 = vrot.slane %v14431_v61, 7  ;;  %v4029_v5 = vmul.f32 %v12702_v23, %v13574_v56 }
 0x20e   : > { %v3148_v44 = vadd.f32 %v2889_v58, %v2565_v59  ;;  %v3149_v35 = vadd.f32 %v2891_v0, %v2566_v42  ;;  %v14449_v49 = vmul.f32 %v12702_v23, %v13693_v18  ;;  %12218 = vmatmul.mubr.msk.bf16.gmra.mrb[24].mxu1 %vm6011_vm7, %v5956_v32  ;;  %v4613_v8 = vmul.f32 %v12704_v24, %v13574_v56  ;;  %v14464_v58 = vld [vmem:[%s20216_s3 + $0x8] ss:$0 sm:$0xff] }
 0x20f   : > { %v3473_v27 = vsel %vm3414_vm4, %v3470_v30, %v3472_v20  ;;  %v14459_v60 = vmul.f32 %v12704_v24, %v13693_v18  ;;  %v5197_v33 = vmul.f32 %v14464_v58, %v13574_v56  ;;  %v3475_v36 = vsel %vm3414_vm4, %v3472_v20, %v3474_v28 }
 0x210   : > { %v3732_v30 = vadd.f32 %v3473_v27, %v3148_v44  ;;  %v4252_v59 = vrot.slane %v4029_v5, 4  ;;  %v4254_v6 = vrot.slane %v14449_v49, 4  ;;  %v3733_v42 = vadd.f32 %v3475_v36, %v3149_v35 }
 0x211   : > { %v4836_v32 = vrot.slane %v4613_v8, 5  ;;  %v20297_v0 = vrot.slane %v14459_v60, 5  ;;  %v14475_v46 = vmul.f32 %v14464_v58, %v13693_v18  ;;  %v5419_v20 = vrot.slane %v5197_v33, 6 }
 0x212   : > { %v3928_v51 = vadd.f32 %v3832_v53, %v3732_v30  ;;  %v4253_v21 = vsel %vm4194_vm5, %v4250_v48, %v4252_v59  ;;  %v4255_v44 = vsel %vm4194_vm5, %v4252_v59, %v4254_v6  ;;  %v3929_v5 = vadd.f32 %v3833_v54, %v3733_v42 }
 0x213   : > { %v4837_v35 = vsel %vm4778_vm6, %v4834_v17, %v4836_v32  ;;  %v4839_v27 = vsel %vm4778_vm6, %v4836_v32, %v20297_v0  ;;  %v20296_v53 = vrot.slane %v14475_v46, 6  ;;  %v5420_v11 = vsel %vm732_vm0, %v5417_v50, %v5419_v20 }
 0x214   : > { %v4512_v8 = vadd.f32 %v4253_v21, %v3928_v51  ;;  %v971_v48 = vadd.f32 %v14249_v41, %v13743_v4  ;;  %v963_v54 = vadd.f32 %v14249_v41, %v13755_v62  ;;  %v4513_v22 = vadd.f32 %v4255_v44, %v3929_v5 }
 0x215   : > { %v5422_v17 = vsel %vm732_vm0, %v5419_v20, %v20296_v53  ;;  %v1303_v33 = vmul.f32 %v12685_v7, %v13333_v29  ;;  %v1304_v21 = vmul.f32 %v12685_v7, %v13458_v40  ;;  %v1500_v4 = vmul.f32 %v12690_v12, %v13458_v40 }
 0x216   : > { %v5096_v2 = vadd.f32 %v4837_v35, %v4512_v8  ;;  %v14504_v51 = vmax.f32 %v971_v48, 0.0  ;;  %v14506_v50 = vmax.f32 %v963_v54, 0.0  ;;  %v5097_v62 = vadd.f32 %v4839_v27, %v4513_v22 }
 0x217   : > { %v14512_v36 = vmul.f32 %v12690_v12, %v13574_v56  ;;  %v2084_v30 = vmul.f32 %v12692_v13, %v13458_v40  ;;  %v14518_v29 = vmul.f32 %v12692_v13, %v13574_v56  ;;  %v1725_v42 = vrot.slane %v1500_v4, 1  ;;  %v14531_v40 = vld [vmem:[%s20216_s3 + $0xa] ss:$0 sm:$0xff] }
 0x218   : > { %20680 = vst [vmem:[#allocation15_spill] sm:$0xff] %v14504_v51  ;;  %v5679_v59 = vadd.f32 %v5420_v11, %v5096_v2  ;;  %v2668_v32 = vmul.f32 %v12694_v14, %v13574_v56  ;;  %v14524_v44 = vmul.f32 %v12694_v14, %v13693_v18  ;;  %v5680_v20 = vadd.f32 %v5422_v17, %v5097_v62 }
 0x219   : > { %v20300_v5 = vrot.slane %v14512_v36, 1  ;;  %v2309_v35 = vrot.slane %v2084_v30, 2  ;;  %v20299_v27 = vrot.slane %v14518_v29, 2  ;;  %v20681_v11 = vrot.slane %v14393_v9, 1 }
 0x21a   : > { %v5779_v8 = vadd.f32 %v14531_v40, %v5679_v59  ;;  %v2892_v54 = vrot.slane %v2668_v32, 6  ;;  %v20298_v22 = vrot.slane %v14524_v44, 6  ;;  %v5780_v17 = vadd.f32 %v14531_v40, %v5680_v20 }
 0x21b   : > { %v1726_v48 = vsel %vm1663_vm2, %v20681_v11, %v1725_v42  ;;  %v1728_v2 = vsel %vm1663_vm2, %v1725_v42, %v20300_v5  ;;  %v20682_v62 = vrot.slane %v14399_v38, 2  ;;  %v2312_v9 = vsel %vm2247_vm3, %v2309_v35, %v20299_v27  ;;  %v14556_v42 = vpop.f32.mrb[62].mxu0 }
 0x21c   : > { %v1983_v4 = vadd.f32 %v1726_v48, %v1303_v33  ;;  %v5875_v53 = vmax.f32 %v5779_v8, 0.0  ;;  %v1984_v59 = vadd.f32 %v1728_v2, %v1304_v21  ;;  %v20683_v32 = vrot.slane %v14406_v25, 6  ;;  %v14566_v48 = vpop.f32.mrb[63].mxu0 }
 0x21d   : > { %v2310_v30 = vsel %vm2247_vm3, %v20682_v62, %v2309_v35  ;;  %v5876_v20 = vmax.f32 %v5780_v17, 0.0  ;;  %v2895_v33 = vsel %vm732_vm0, %v2892_v54, %v20298_v22  ;;  %v3251_v38 = vmul.f32 %v12696_v16, %v13574_v56 }
 0x21e   : > { %v2893_v11 = vsel %vm732_vm0, %v20683_v32, %v2892_v54  ;;  %v2567_v0 = vadd.f32 %v2310_v30, %v1983_v4  ;;  %v2568_v21 = vadd.f32 %v2312_v9, %v1984_v59  ;;  %v14560_v8 = vmul.f32 %v12696_v16, %v13693_v18  ;;  %v20684_v4 = vld [vmem:[#allocation16_spill] sm:$0xff]  ;;  %v20685_v9 = vld [vmem:[#allocation17_spill] sm:$0xff] }
 0x21f   : > { %v3834_v25 = vmul.f32 %v12699_v19, %v13574_v56  ;;  %v3835_v35 = vmul.f32 %v12699_v19, %v13693_v18  ;;  %v5957_v17 = vpack.c.bf16 %v5876_v20, %v5875_v53  ;;  %v3476_v2 = vrot.slane %v3251_v38, 7 }
 0x220   : > { %v3150_v54 = vadd.f32 %v2893_v11, %v2567_v0  ;;  %v4031_v62 = vmul.f32 %v12702_v23, %v20684_v4  ;;  %v3151_v30 = vadd.f32 %v2895_v33, %v2568_v21  ;;  %v3478_v59 = vrot.slane %v14560_v8, 7 }
 0x221   : > { %v14573_v32 = vmul.f32 %v12702_v23, %v20685_v9  ;;  %v4615_v22 = vmul.f32 %v12704_v24, %v20684_v4  ;;  %12221 = vmatprep.mubr.msk.bf16.mxu1 %vm6011_vm7, %v5957_v17  ;;  %v3477_v0 = vsel %vm3414_vm4, %v3474_v28, %v3476_v2  ;;  %v14583_v11 = vmul.f32 %v12704_v24, %v20685_v9 }
 0x222   : > { %v4256_v53 = vrot.slane %v4031_v62, 4  ;;  %v5199_v20 = vmul.f32 %v14464_v58, %v20684_v4  ;;  %v3479_v33 = vsel %vm3414_vm4, %v3476_v2, %v3478_v59  ;;  %v3734_v38 = vadd.f32 %v3477_v0, %v3150_v54 }
 0x223   : > { %v20303_v21 = vrot.slane %v14573_v32, 4  ;;  %v4840_v17 = vrot.slane %v4615_v22, 5  ;;  %v3735_v27 = vadd.f32 %v3479_v33, %v3151_v30  ;;  %v20302_v28 = vrot.slane %v14583_v11, 5 }
 0x224   : > { %v4257_v61 = vsel %vm4194_vm5, %v4254_v6, %v4256_v53  ;;  %v14597_v62 = vmul.f32 %v14464_v58, %v20685_v9  ;;  %v3930_v5 = vadd.f32 %v3834_v25, %v3734_v38  ;;  %v20686_v54 = vrot.slane %v14459_v60, 5 }
 0x225   : > { %v4259_v2 = vsel %vm4194_vm5, %v4256_v53, %v20303_v21  ;;  %v5423_v30 = vrot.slane %v5199_v20, 6  ;;  %v3931_v0 = vadd.f32 %v3835_v35, %v3735_v27  ;;  %v4843_v49 = vsel %vm4778_vm6, %v4840_v17, %v20302_v28 }
 0x226   : > { %v4841_v22 = vsel %vm4778_vm6, %v20686_v54, %v4840_v17  ;;  %v20301_v6 = vrot.slane %v14597_v62, 6  ;;  %v974_v33 = vadd.f32 %v14249_v41, %v13860_v1  ;;  %v4514_v25 = vadd.f32 %v4257_v61, %v3930_v5 }
 0x227   : > { %v20687_v38 = vrot.slane %v14475_v46, 6  ;;  %v966_v60 = vadd.f32 %v14249_v41, %v13867_v34  ;;  %v1305_v27 = vmul.f32 %v12685_v7, %v13574_v56  ;;  %v4515_v35 = vadd.f32 %v4259_v2, %v3931_v0 }
 0x228   : > { %v5426_v20 = vsel %vm732_vm0, %v5423_v30, %v20301_v6  ;;  %v14621_v17 = vmax.f32 %v974_v33, 0.0  ;;  %v1306_v1 = vmul.f32 %v12685_v7, %v13693_v18  ;;  %v5098_v5 = vadd.f32 %v4841_v22, %v4514_v25 }
 0x229   : > { %v5424_v53 = vsel %vm732_vm0, %v20687_v38, %v5423_v30  ;;  %v14625_v46 = vmax.f32 %v966_v60, 0.0  ;;  %v1502_v61 = vmul.f32 %v12690_v12, %v13693_v18  ;;  %v14631_v34 = vmul.f32 %v12690_v12, %v20684_v4 }
 0x22a   : > { %20688 = vst [vmem:[#allocation9_spill] sm:$0xff] %v14621_v17  ;;  %v5099_v56 = vadd.f32 %v4843_v49, %v4515_v35  ;;  %v2086_v2 = vmul.f32 %v12692_v13, %v13693_v18  ;;  %v14637_v54 = vmul.f32 %v12692_v13, %v20684_v4  ;;  %v2670_v22 = vmul.f32 %v12694_v14, %v20684_v4 }
 0x22b   : > { %v5681_v30 = vadd.f32 %v5424_v53, %v5098_v5  ;;  %v1729_v0 = vrot.slane %v1502_v61, 1  ;;  %v20306_v33 = vrot.slane %v14631_v34, 1  ;;  %v14644_v25 = vmul.f32 %v12694_v14, %v20685_v9 }
 0x22c   : > { %v5682_v38 = vadd.f32 %v5426_v20, %v5099_v56  ;;  %v2313_v49 = vrot.slane %v2086_v2, 2  ;;  %v20305_v60 = vrot.slane %v14637_v54, 2  ;;  %v2896_v18 = vrot.slane %v2670_v22, 6 }
 0x22d   : > { %v5781_v35 = vadd.f32 %v14531_v40, %v5681_v30  ;;  %v20689_v6 = vrot.slane %v14512_v36, 1  ;;  %v1732_v53 = vsel %vm1663_vm2, %v1729_v0, %v20306_v33  ;;  %v20304_v5 = vrot.slane %v14644_v25, 6 }
 0x22e   : > { %v5782_v61 = vadd.f32 %v14531_v40, %v5682_v38  ;;  %v1986_v20 = vadd.f32 %v1732_v53, %v1306_v1  ;;  %v20690_v56 = vrot.slane %v14518_v29, 2  ;;  %v2316_v36 = vsel %vm2247_vm3, %v2313_v49, %v20305_v60  ;;  %v14670_v1 = vpop.f32.mrb[64].mxu0 }
 0x22f   : > { %v1730_v28 = vsel %vm1663_vm2, %v20689_v6, %v1729_v0  ;;  %v5877_v22 = vmax.f32 %v5781_v35, 0.0  ;;  %v20691_v6 = vrot.slane %v14524_v44, 6  ;;  %v2899_v0 = vsel %vm732_vm0, %v2896_v18, %v20304_v5 }
 0x230   : > { %v1985_v21 = vadd.f32 %v1730_v28, %v1305_v27  ;;  %v2314_v2 = vsel %vm2247_vm3, %v20690_v56, %v2313_v49  ;;  %v5878_v38 = vmax.f32 %v5782_v61, 0.0  ;;  %v2570_v27 = vadd.f32 %v2316_v36, %v1986_v20 }
 0x231   : > { %v2897_v30 = vsel %vm732_vm0, %v20691_v6, %v2896_v18  ;;  %v3253_v29 = vmul.f32 %v12696_v16, %v20684_v4  ;;  %v14674_v35 = vmul.f32 %v12696_v16, %v20685_v9  ;;  %v3836_v44 = vmul.f32 %v12699_v19, %v20684_v4 }
 0x232   : > { %v2569_v28 = vadd.f32 %v2314_v2, %v1985_v21  ;;  %v3837_v49 = vmul.f32 %v12699_v19, %v20685_v9  ;;  %v4033_v18 = vmul.f32 %v12702_v23, %v13814_v45  ;;  %v14682_v21 = vpop.f32.mrb[65].mxu0  ;;  %v5958_v53 = vpack.c.bf16 %v5878_v38, %v5877_v22 }
 0x233   : > { %20692 = vst [vmem:[#allocation13_spill] sm:$0xff] %v14682_v21  ;;  %v3153_v20 = vadd.f32 %v2899_v0, %v2570_v27  ;;  %v3480_v56 = vrot.slane %v3253_v29, 7  ;;  %v3482_v2 = vrot.slane %v14674_v35, 7  ;;  %v14687_v36 = vmul.f32 %v12702_v23, %v13928_v63 }
 0x234   : > { %v3152_v61 = vadd.f32 %v2897_v30, %v2569_v28  ;;  %v4260_v6 = vrot.slane %v4033_v18, 4  ;;  %v4617_v5 = vmul.f32 %v12704_v24, %v13814_v45  ;;  %12222 = vmatmul.mubr.msk.bf16.gmra.mrb[28].mxu1 %vm6011_vm7, %v5958_v53  ;;  %v14697_v22 = vmul.f32 %v12704_v24, %v13928_v63 }
 0x235   : > { %v3481_v60 = vsel %vm3414_vm4, %v3478_v59, %v3480_v56  ;;  %v5201_v30 = vmul.f32 %v14464_v58, %v13814_v45  ;;  %v14703_v0 = vmul.f32 %v14464_v58, %v13928_v63  ;;  %v3483_v38 = vsel %vm3414_vm4, %v3480_v56, %v3482_v2 }
 0x236   : > { %v3736_v28 = vadd.f32 %v3481_v60, %v3152_v61  ;;  %v20693_v8 = vrot.slane %v14573_v32, 4  ;;  %v4262_v27 = vrot.slane %v14687_v36, 4  ;;  %v3737_v29 = vadd.f32 %v3483_v38, %v3153_v20 }
 0x237   : > { %v4844_v18 = vrot.slane %v4617_v5, 5  ;;  %v20313_v53 = vrot.slane %v14697_v22, 5  ;;  %v5427_v33 = vrot.slane %v5201_v30, 6  ;;  %v20309_v21 = vrot.slane %v14703_v0, 6 }
 0x238   : > { %v4261_v59 = vsel %vm4194_vm5, %v20693_v8, %v4260_v6  ;;  %v3932_v17 = vadd.f32 %v3836_v44, %v3736_v28  ;;  %v4263_v51 = vsel %vm4194_vm5, %v4260_v6, %v4262_v27  ;;  %v987_v60 = vadd.f32 %v14249_v41, %v13976_v10  ;;  %v20697_v10 = vld [vmem:[#allocation11_spill] sm:$0xff] }
 0x239   : > { %v3933_v32 = vadd.f32 %v3837_v49, %v3737_v29  ;;  %v20694_v61 = vrot.slane %v14583_v11, 5  ;;  %v4847_v5 = vsel %vm4778_vm6, %v4844_v18, %v20313_v53  ;;  %v20695_v44 = vrot.slane %v14597_v62, 6 }
 0x23a   : > { %v4516_v30 = vadd.f32 %v4261_v59, %v3932_v17  ;;  %v5430_v6 = vsel %vm732_vm0, %v5427_v33, %v20309_v21  ;;  %v14731_v38 = vmax.f32 %v987_v60, 0.0  ;;  %v979_v11 = vadd.f32 %v14249_v41, %v20697_v10 }
 0x23b   : > { %v4845_v56 = vsel %vm4778_vm6, %v20694_v61, %v4844_v18  ;;  %v5428_v20 = vsel %vm732_vm0, %v20695_v44, %v5427_v33  ;;  %v4517_v49 = vadd.f32 %v4263_v51, %v3933_v32  ;;  %v1307_v28 = vmul.f32 %v12685_v7, %v20684_v4 }
 0x23c   : > { %20696 = vst [vmem:[#allocation16_spill] sm:$0xff] %v14731_v38  ;;  %v1308_v8 = vmul.f32 %v12685_v7, %v20685_v9  ;;  %v1504_v62 = vmul.f32 %v12690_v12, %v20685_v9  ;;  %v5100_v17 = vadd.f32 %v4845_v56, %v4516_v30  ;;  %v14741_v59 = vmax.f32 %v979_v11, 0.0 }
 0x23d   : > { %v14745_v33 = vmul.f32 %v12690_v12, %v13814_v45  ;;  %v2088_v29 = vmul.f32 %v12692_v13, %v20685_v9  ;;  %v5101_v51 = vadd.f32 %v4847_v5, %v4517_v49  ;;  %v14751_v4 = vmul.f32 %v12692_v13, %v13814_v45 }
 0x23e   : > { %v1733_v18 = vrot.slane %v1504_v62, 1  ;;  %v2672_v60 = vmul.f32 %v12694_v14, %v13814_v45  ;;  %v5683_v32 = vadd.f32 %v5428_v20, %v5100_v17  ;;  %v14758_v44 = vmul.f32 %v12694_v14, %v13928_v63 }
 0x23f   : > { %v20311_v61 = vrot.slane %v14745_v33, 1  ;;  %v2317_v56 = vrot.slane %v2088_v29, 2  ;;  %v5684_v30 = vadd.f32 %v5430_v6, %v5101_v51  ;;  %v20698_v9 = vrot.slane %v14631_v34, 1 }
 0x240   : > { %v20310_v10 = vrot.slane %v14751_v4, 2  ;;  %v2900_v11 = vrot.slane %v2672_v60, 6  ;;  %v5783_v49 = vadd.f32 %v14531_v40, %v5683_v32  ;;  %v20699_v17 = vrot.slane %v14637_v54, 2 }
 0x241   : > { %v1734_v5 = vsel %vm1663_vm2, %v20698_v9, %v1733_v18  ;;  %v1736_v20 = vsel %vm1663_vm2, %v1733_v18, %v20311_v61  ;;  %v5784_v6 = vadd.f32 %v14531_v40, %v5684_v30  ;;  %v20700_v60 = vrot.slane %v14644_v25, 6  ;;  %v14787_v30 = vpop.f32.mrb[66].mxu0  ;;  %v20702_v61 = vld [vmem:[#allocation8_spill] sm:$0xff] }
 0x242   : > { %v1987_v62 = vadd.f32 %v1734_v5, %v1307_v28  ;;  %v2318_v29 = vsel %vm2247_vm3, %v20699_v17, %v2317_v56  ;;  %v1988_v51 = vadd.f32 %v1736_v20, %v1308_v8  ;;  %v2320_v34 = vsel %vm2247_vm3, %v2317_v56, %v20310_v10  ;;  %v14794_v17 = vpop.f32.mrb[67].mxu0 }
 0x243   : > { %v2901_v32 = vsel %vm732_vm0, %v20700_v60, %v2900_v11  ;;  %v5879_v9 = vmax.f32 %v5783_v49, 0.0  ;;  %v20312_v18 = vrot.slane %v14758_v44, 6  ;;  %v3255_v54 = vmul.f32 %v12696_v16, %v13814_v45 }
 0x244   : > { %v2571_v21 = vadd.f32 %v2318_v29, %v1987_v62  ;;  %v5880_v28 = vmax.f32 %v5784_v6, 0.0  ;;  %v2572_v5 = vadd.f32 %v2320_v34, %v1988_v51  ;;  %v14783_v8 = vmul.f32 %v12696_v16, %v13928_v63  ;;  %v20701_v34 = vld [vmem:[#allocation6_spill] sm:$0xff] }
 0x245   : > { %v3838_v56 = vmul.f32 %v12699_v19, %v13814_v45  ;;  %v2903_v25 = vsel %vm732_vm0, %v2900_v11, %v20312_v18  ;;  %v3484_v20 = vrot.slane %v3255_v54, 7  ;;  %v3839_v62 = vmul.f32 %v12699_v19, %v13928_v63 }
 0x246   : > { %v3154_v49 = vadd.f32 %v2901_v32, %v2571_v21  ;;  %v5959_v29 = vpack.c.bf16 %v5880_v28, %v5879_v9  ;;  %v3155_v6 = vadd.f32 %v2903_v25, %v2572_v5  ;;  %v20318_v51 = vrot.slane %v14783_v8, 7 }
 0x247   : > { %v4035_v60 = vmul.f32 %v12702_v23, %v20701_v34  ;;  %v3485_v10 = vsel %vm3414_vm4, %v3482_v2, %v3484_v20  ;;  %v14804_v21 = vmul.f32 %v12702_v23, %v20702_v61  ;;  %v4619_v11 = vmul.f32 %v12704_v24, %v20701_v34 }
 0x248   : > { %v14810_v32 = vmul.f32 %v12704_v24, %v20702_v61  ;;  %12225 = vmatprep.mubr.msk.bf16.mxu1 %vm6011_vm7, %v5959_v29  ;;  %v3487_v9 = vsel %vm3414_vm4, %v3484_v20, %v20318_v51  ;;  %v3738_v35 = vadd.f32 %v3485_v10, %v3154_v49  ;;  %v5203_v2 = vmul.f32 %v14464_v58, %v20701_v34 }
 0x249   : > { %v4264_v54 = vrot.slane %v4035_v60, 4  ;;  %v3739_v28 = vadd.f32 %v3487_v9, %v3155_v6  ;;  %v20317_v5 = vrot.slane %v14804_v21, 4  ;;  %v4848_v25 = vrot.slane %v4619_v11, 5 }
 0x24a   : > { %v20316_v18 = vrot.slane %v14810_v32, 5  ;;  %v3934_v53 = vadd.f32 %v3838_v56, %v3738_v35  ;;  %v14825_v38 = vmul.f32 %v14464_v58, %v20702_v61  ;;  %v5431_v10 = vrot.slane %v5203_v2, 6 }
 0x24b   : > { %v4265_v29 = vsel %vm4194_vm5, %v4262_v27, %v4264_v54  ;;  %v3935_v49 = vadd.f32 %v3839_v62, %v3739_v28  ;;  %v4267_v20 = vsel %vm4194_vm5, %v4264_v54, %v20317_v5  ;;  %v20703_v6 = vrot.slane %v14697_v22, 5  ;;  %v20705_v54 = vld [vmem:[#allocation12_spill] sm:$0xff] }
 0x24c   : > { %v4851_v36 = vsel %vm4778_vm6, %v4848_v25, %v20316_v18  ;;  %v4518_v56 = vadd.f32 %v4265_v29, %v3934_v53  ;;  %v20704_v27 = vrot.slane %v14703_v0, 6  ;;  %v20315_v9 = vrot.slane %v14825_v38, 6 }
 0x24d   : > { %v4849_v60 = vsel %vm4778_vm6, %v20703_v6, %v4848_v25  ;;  %v990_v62 = vadd.f32 %v14249_v41, %v14085_v15  ;;  %v4519_v35 = vadd.f32 %v4267_v20, %v3935_v49  ;;  %v982_v22 = vadd.f32 %v14249_v41, %v20705_v54 }
 0x24e   : > { %v5432_v11 = vsel %vm732_vm0, %v20704_v27, %v5431_v10  ;;  %v1309_v2 = vmul.f32 %v12685_v7, %v13814_v45  ;;  %v1310_v28 = vmul.f32 %v12685_v7, %v13928_v63  ;;  %v5102_v53 = vadd.f32 %v4849_v60, %v4518_v56 }
 0x24f   : > { %v5434_v0 = vsel %vm732_vm0, %v5431_v10, %v20315_v9  ;;  %v14851_v25 = vmax.f32 %v990_v62, 0.0  ;;  %v1506_v15 = vmul.f32 %v12690_v12, %v13928_v63  ;;  %v5103_v29 = vadd.f32 %v4851_v36, %v4519_v35 }
 0x250   : > { %v14855_v49 = vmax.f32 %v982_v22, 0.0  ;;  %v14859_v20 = vmul.f32 %v12690_v12, %v20701_v34  ;;  %v2090_v45 = vmul.f32 %v12692_v13, %v13928_v63  ;;  %v5685_v6 = vadd.f32 %v5432_v11, %v5102_v53 }
 0x251   : > { %20706 = vst [vmem:[#allocation17_spill] sm:$0xff] %v14851_v25  ;;  %v1737_v60 = vrot.slane %v1506_v15, 1  ;;  %v14865_v10 = vmul.f32 %v12692_v13, %v20701_v34  ;;  %v2674_v56 = vmul.f32 %v12694_v14, %v20701_v34  ;;  %v5686_v27 = vadd.f32 %v5434_v0, %v5103_v29 }
 0x252   : > { %v20321_v36 = vrot.slane %v14859_v20, 1  ;;  %v2321_v62 = vrot.slane %v2090_v45, 2  ;;  %v14872_v35 = vmul.f32 %v12694_v14, %v20702_v61  ;;  %v5785_v54 = vadd.f32 %v14531_v40, %v5685_v6 }
 0x253   : > { %v20707_v63 = vrot.slane %v14745_v33, 1  ;;  %v20320_v22 = vrot.slane %v14865_v10, 2  ;;  %v2904_v53 = vrot.slane %v2674_v56, 6  ;;  %v5786_v15 = vadd.f32 %v14531_v40, %v5686_v27 }
 0x254   : > { %v1740_v0 = vsel %vm1663_vm2, %v1737_v60, %v20321_v36  ;;  %v20708_v45 = vrot.slane %v14751_v4, 2  ;;  %v5881_v18 = vmax.f32 %v5785_v54, 0.0  ;;  %v20319_v51 = vrot.slane %v14872_v35, 6 }
 0x255   : > { %v1738_v11 = vsel %vm1663_vm2, %v20707_v63, %v1737_v60  ;;  %v1990_v6 = vadd.f32 %v1740_v0, %v1310_v28  ;;  %v2324_v33 = vsel %vm2247_vm3, %v2321_v62, %v20320_v22  ;;  %v20709_v63 = vrot.slane %v14758_v44, 6 }
 0x256   : > { %v1989_v29 = vadd.f32 %v1738_v11, %v1309_v2  ;;  %v2322_v9 = vsel %vm2247_vm3, %v20708_v45, %v2321_v62  ;;  %v5882_v27 = vmax.f32 %v5786_v15, 0.0  ;;  %v3257_v2 = vmul.f32 %v12696_v16, %v20701_v34  ;;  %v14903_v62 = vpop.f32.mrb[68].mxu0 }
 0x257   : > { %v2905_v56 = vsel %vm732_vm0, %v20709_v63, %v2904_v53  ;;  %v2574_v4 = vadd.f32 %v2324_v33, %v1990_v6  ;;  %v14897_v60 = vmul.f32 %v12696_v16, %v20702_v61  ;;  %v3840_v28 = vmul.f32 %v12699_v19, %v20701_v34  ;;  %v14908_v0 = vpop.f32.mrb[69].mxu0  ;;  %v20711_v6 = vld [vmem:[#allocation7_spill] sm:$0xff] }
 0x258   : > { %v2573_v5 = vadd.f32 %v2322_v9, %v1989_v29  ;;  %v3841_v44 = vmul.f32 %v12699_v19, %v20702_v61  ;;  %v5960_v54 = vpack.c.bf16 %v5882_v27, %v5881_v18  ;;  %v2907_v9 = vsel %vm732_vm0, %v2904_v53, %v20319_v51  ;;  %20710 = vst [vmem:[#allocation11_spill] sm:$0xff] %v14908_v0 }
 0x259   : > { %v3488_v15 = vrot.slane %v3257_v2, 7  ;;  %v3157_v29 = vadd.f32 %v2907_v9, %v2574_v4  ;;  %v3490_v45 = vrot.slane %v14897_v60, 7  ;;  %v4037_v33 = vmul.f32 %v12702_v23, %v20711_v6 }
 0x25a   : > { %v3156_v11 = vadd.f32 %v2905_v56, %v2573_v5  ;;  %v14915_v63 = vmul.f32 %v12702_v23, %v14154_v47  ;;  %12226 = vmatmul.mubr.msk.bf16.gmra.mrb[32].mxu1 %vm6011_vm7, %v5960_v54  ;;  %v20712_v18 = vrot.slane %v14783_v8, 7  ;;  %v4621_v5 = vmul.f32 %v12704_v24, %v20711_v6 }
 0x25b   : > { %v14925_v56 = vmul.f32 %v12704_v24, %v14154_v47  ;;  %v5205_v27 = vmul.f32 %v14464_v58, %v20711_v6  ;;  %v3491_v2 = vsel %vm3414_vm4, %v3488_v15, %v3490_v45  ;;  %v4268_v54 = vrot.slane %v4037_v33, 4 }
 0x25c   : > { %v3489_v53 = vsel %vm3414_vm4, %v20712_v18, %v3488_v15  ;;  %v20325_v8 = vrot.slane %v14915_v63, 4  ;;  %v3741_v9 = vadd.f32 %v3491_v2, %v3157_v29  ;;  %v4852_v18 = vrot.slane %v4621_v5, 5 }
 0x25d   : > { %v3740_v4 = vadd.f32 %v3489_v53, %v3156_v11  ;;  %v20324_v51 = vrot.slane %v14925_v56, 5  ;;  %v14936_v22 = vmul.f32 %v14464_v58, %v14154_v47  ;;  %v20713_v25 = vrot.slane %v14804_v21, 4 }
 0x25e   : > { %v4271_v11 = vsel %vm4194_vm5, %v4268_v54, %v20325_v8  ;;  %v5435_v15 = vrot.slane %v5205_v27, 6  ;;  %v3937_v33 = vadd.f32 %v3841_v44, %v3741_v9  ;;  %v20714_v29 = vrot.slane %v14810_v32, 5  ;;  %v20716_v27 = vld [vmem:[#allocation14_spill] sm:$0xff] }
 0x25f   : > { %v3936_v36 = vadd.f32 %v3840_v28, %v3740_v4  ;;  %v4269_v0 = vsel %vm4194_vm5, %v20713_v25, %v4268_v54  ;;  %v4855_v5 = vsel %vm4778_vm6, %v4852_v18, %v20324_v51  ;;  %v20323_v28 = vrot.slane %v14936_v22, 6 }
 0x260   : > { %v4853_v53 = vsel %vm4778_vm6, %v20714_v29, %v4852_v18  ;;  %v20715_v21 = vrot.slane %v14825_v38, 6  ;;  %v1003_v4 = vadd.f32 %v14249_v41, %v14199_v55  ;;  %v995_v44 = vadd.f32 %v14249_v41, %v20716_v27 }
 0x261   : > { %v4520_v2 = vadd.f32 %v4269_v0, %v3936_v36  ;;  %v4521_v32 = vadd.f32 %v4271_v11, %v3937_v33  ;;  %v5438_v54 = vsel %vm732_vm0, %v5435_v15, %v20323_v28  ;;  %v1311_v9 = vmul.f32 %v12685_v7, %v20701_v34 }
 0x262   : > { %v5436_v25 = vsel %vm732_vm0, %v20715_v21, %v5435_v15  ;;  %v1312_v36 = vmul.f32 %v12685_v7, %v20702_v61  ;;  %v14965_v0 = vmax.f32 %v1003_v4, 0.0  ;;  %v14967_v18 = vmax.f32 %v995_v44, 0.0 }
 0x263   : > { %v5104_v38 = vadd.f32 %v4853_v53, %v4520_v2  ;;  %v1508_v55 = vmul.f32 %v12690_v12, %v20702_v61  ;;  %v5105_v41 = vadd.f32 %v4855_v5, %v4521_v32  ;;  %v14973_v11 = vmul.f32 %v12690_v12, %v20711_v6 }
 0x264   : > { %20717 = vst [vmem:[#allocation6_spill] sm:$0xff] %v14965_v0  ;;  %v2092_v15 = vmul.f32 %v12692_v13, %v20702_v61  ;;  %v14979_v34 = vmul.f32 %v12692_v13, %v20711_v6  ;;  %v2676_v53 = vmul.f32 %v12694_v14, %v20711_v6  ;;  %v14985_v2 = vmul.f32 %v12694_v14, %v14154_v47 }
 0x265   : > { %v5687_v33 = vadd.f32 %v5436_v25, %v5104_v38  ;;  %v1741_v29 = vrot.slane %v1508_v55, 1  ;;  %v5688_v5 = vadd.f32 %v5438_v54, %v5105_v41  ;;  %v20328_v21 = vrot.slane %v14973_v11, 1 }
 0x266   : > { %v2325_v4 = vrot.slane %v2092_v15, 2  ;;  %v20327_v27 = vrot.slane %v14979_v34, 2  ;;  %v20718_v44 = vrot.slane %v14859_v20, 1  ;;  %v2908_v32 = vrot.slane %v2676_v53, 6 }
 0x267   : > { %v5787_v61 = vadd.f32 %v14531_v40, %v5687_v33  ;;  %v20326_v38 = vrot.slane %v14985_v2, 6  ;;  %v5788_v55 = vadd.f32 %v14531_v40, %v5688_v5  ;;  %v1744_v54 = vsel %vm1663_vm2, %v1741_v29, %v20328_v21 }
 0x268   : > { %v1742_v25 = vsel %vm1663_vm2, %v20718_v44, %v1741_v29  ;;  %v20719_v15 = vrot.slane %v14865_v10, 2  ;;  %v1992_v33 = vadd.f32 %v1744_v54, %v1312_v36  ;;  %v2328_v20 = vsel %vm2247_vm3, %v2325_v4, %v20327_v27  ;;  %v15012_v29 = vpop.f32.mrb[70].mxu0  ;;  %v20721_v54 = vld [vmem:[#allocation5_spill] sm:$0xff] }
 0x269   : > { %v1991_v41 = vadd.f32 %v1742_v25, %v1311_v9  ;;  %v5883_v51 = vmax.f32 %v5787_v61, 0.0  ;;  %v20720_v53 = vrot.slane %v14872_v35, 6  ;;  %v5884_v5 = vmax.f32 %v5788_v55, 0.0 }
 0x26a   : > { %v2326_v28 = vsel %vm2247_vm3, %v20719_v15, %v2325_v4  ;;  %v2911_v9 = vsel %vm732_vm0, %v2908_v32, %v20326_v38  ;;  %v3259_v10 = vmul.f32 %v12696_v16, %v20711_v6  ;;  %v2576_v36 = vadd.f32 %v2328_v20, %v1992_v33  ;;  %v15022_v4 = vpop.f32.mrb[71].mxu0  ;;  %v20722_v20 = vld [vmem:[#allocation10_spill] sm:$0xff] }
 0x26b   : > { %v2909_v44 = vsel %vm732_vm0, %v20720_v53, %v2908_v32  ;;  %v2575_v8 = vadd.f32 %v2326_v28, %v1991_v41  ;;  %v15016_v61 = vmul.f32 %v12696_v16, %v14154_v47  ;;  %v3842_v35 = vmul.f32 %v12699_v19, %v20711_v6 }
 0x26c   : > { %v3843_v28 = vmul.f32 %v12699_v19, %v14154_v47  ;;  %v5961_v25 = vpack.c.bf16 %v5884_v5, %v5883_v51  ;;  %v3492_v55 = vrot.slane %v3259_v10, 7  ;;  %v4039_v41 = vmul.f32 %v12702_v23, %v20721_v54 }
 0x26d   : > { %v3158_v32 = vadd.f32 %v2909_v44, %v2575_v8  ;;  %v3159_v15 = vadd.f32 %v2911_v9, %v2576_v36  ;;  %v20333_v33 = vrot.slane %v15016_v61, 7  ;;  %v15029_v53 = vmul.f32 %v12702_v23, %v20722_v20 }
 0x26e   : > { %v4623_v38 = vmul.f32 %v12704_v24, %v20721_v54  ;;  %12229 = vmatprep.mubr.msk.bf16.mxu1 %vm6011_vm7, %v5961_v25  ;;  %v3493_v51 = vsel %vm3414_vm4, %v3490_v45, %v3492_v55  ;;  %v4272_v8 = vrot.slane %v4039_v41, 4  ;;  %v15039_v44 = vmul.f32 %v12704_v24, %v20722_v20 }
 0x26f   : > { %v5207_v5 = vmul.f32 %v14464_v58, %v20721_v54  ;;  %v3495_v9 = vsel %vm3414_vm4, %v3492_v55, %v20333_v33  ;;  %v3742_v10 = vadd.f32 %v3493_v51, %v3158_v32  ;;  %v20332_v36 = vrot.slane %v15029_v53, 4 }
 0x270   : > { %v4856_v25 = vrot.slane %v4623_v38, 5  ;;  %v3743_v27 = vadd.f32 %v3495_v9, %v3159_v15  ;;  %v20723_v60 = vrot.slane %v14915_v63, 4  ;;  %v20331_v41 = vrot.slane %v15039_v44, 5 }
 0x271   : > { %v15053_v21 = vmul.f32 %v14464_v58, %v20722_v20  ;;  %v3938_v0 = vadd.f32 %v3842_v35, %v3742_v10  ;;  %v4275_v55 = vsel %vm4194_vm5, %v4272_v8, %v20332_v36  ;;  %v20724_v32 = vrot.slane %v14925_v56, 5  ;;  %v15068_v35 = vld [vmem:[%s20216_s3 + $0x9] ss:$0 sm:$0xff] }
 0x272   : > { %v4273_v45 = vsel %vm4194_vm5, %v20723_v60, %v4272_v8  ;;  %v5439_v15 = vrot.slane %v5207_v5, 6  ;;  %v3939_v51 = vadd.f32 %v3843_v28, %v3743_v27  ;;  %v4859_v63 = vsel %vm4778_vm6, %v4856_v25, %v20331_v41 }
 0x273   : > { %v4857_v38 = vsel %vm4778_vm6, %v20724_v32, %v4856_v25  ;;  %v20330_v9 = vrot.slane %v15053_v21, 6  ;;  %v1006_v8 = vadd.f32 %v15068_v35, %v14321_v37  ;;  %v4522_v10 = vadd.f32 %v4273_v45, %v3938_v0 }
 0x274   : > { %v20725_v56 = vrot.slane %v14936_v22, 6  ;;  %v998_v27 = vadd.f32 %v15068_v35, %v14328_v31  ;;  %v1313_v28 = vmul.f32 %v12685_v7, %v20711_v6  ;;  %v4523_v25 = vadd.f32 %v4275_v55, %v3939_v51 }
 0x275   : > { %v5442_v60 = vsel %vm732_vm0, %v5439_v15, %v20330_v9  ;;  %v15082_v32 = vmax.f32 %v1006_v8, 0.0  ;;  %v1314_v37 = vmul.f32 %v12685_v7, %v14154_v47  ;;  %v5106_v0 = vadd.f32 %v4857_v38, %v4522_v10 }
 0x276   : > { %v5440_v5 = vsel %vm732_vm0, %v20725_v56, %v5439_v15  ;;  %v15086_v22 = vmax.f32 %v998_v27, 0.0  ;;  %v1510_v45 = vmul.f32 %v12690_v12, %v14154_v47  ;;  %v15092_v31 = vmul.f32 %v12690_v12, %v20721_v54 }
 0x277   : > { %20726 = vst [vmem:[#allocation8_spill] sm:$0xff] %v15082_v32  ;;  %v5107_v6 = vadd.f32 %v4859_v63, %v4523_v25  ;;  %v2094_v55 = vmul.f32 %v12692_v13, %v14154_v47  ;;  %v15098_v15 = vmul.f32 %v12692_v13, %v20721_v54  ;;  %v2678_v38 = vmul.f32 %v12694_v14, %v20721_v54 }
 0x278   : > { %v5689_v51 = vadd.f32 %v5440_v5, %v5106_v0  ;;  %v1745_v8 = vrot.slane %v1510_v45, 1  ;;  %v20336_v10 = vrot.slane %v15092_v31, 1  ;;  %v15105_v56 = vmul.f32 %v12694_v14, %v20722_v20 }
 0x279   : > { %v5690_v27 = vadd.f32 %v5442_v60, %v5107_v6  ;;  %v2329_v63 = vrot.slane %v2094_v55, 2  ;;  %v20335_v25 = vrot.slane %v15098_v15, 2  ;;  %v2912_v47 = vrot.slane %v2678_v38, 6 }
 0x27a   : > { %v5789_v9 = vadd.f32 %v14531_v40, %v5689_v51  ;;  %v20727_v41 = vrot.slane %v14973_v11, 1  ;;  %v1748_v5 = vsel %vm1663_vm2, %v1745_v8, %v20336_v10  ;;  %v20334_v0 = vrot.slane %v15105_v56, 6 }
 0x27b   : > { %v5790_v45 = vadd.f32 %v14531_v40, %v5690_v27  ;;  %v1994_v60 = vadd.f32 %v1748_v5, %v1314_v37  ;;  %v20728_v6 = vrot.slane %v14979_v34, 2  ;;  %v2332_v11 = vsel %vm2247_vm3, %v2329_v63, %v20335_v25  ;;  %v15131_v37 = vpop.f32.mrb[72].mxu0 }
 0x27c   : > { %v1746_v36 = vsel %vm1663_vm2, %v20727_v41, %v1745_v8  ;;  %v5885_v38 = vmax.f32 %v5789_v9, 0.0  ;;  %v20729_v41 = vrot.slane %v14985_v2, 6  ;;  %v2915_v8 = vsel %vm732_vm0, %v2912_v47, %v20334_v0  ;;  %20730 = vst [vmem:[#allocation12_spill] sm:$0xff] %v15131_v37 }
 0x27d   : > { %v1993_v33 = vadd.f32 %v1746_v36, %v1313_v28  ;;  %v2330_v55 = vsel %vm2247_vm3, %v20728_v6, %v2329_v63  ;;  %v5886_v27 = vmax.f32 %v5790_v45, 0.0  ;;  %v2578_v28 = vadd.f32 %v2332_v11, %v1994_v60 }
 0x27e   : > { %v2913_v51 = vsel %vm732_vm0, %v20729_v41, %v2912_v47  ;;  %v3261_v34 = vmul.f32 %v12696_v16, %v20721_v54  ;;  %v15135_v9 = vmul.f32 %v12696_v16, %v20722_v20  ;;  %v3844_v2 = vmul.f32 %v12699_v19, %v20721_v54 }
 0x27f   : > { %v2577_v36 = vadd.f32 %v2330_v55, %v1993_v33  ;;  %v3845_v63 = vmul.f32 %v12699_v19, %v20722_v20  ;;  %v4041_v47 = vmul.f32 %v12702_v23, %v14275_v26  ;;  %v15143_v33 = vpop.f32.mrb[73].mxu0  ;;  %v5962_v5 = vpack.c.bf16 %v5886_v27, %v5885_v38 }
 0x280   : > { %20731 = vst [vmem:[#allocation7_spill] sm:$0xff] %v15143_v33  ;;  %v3161_v60 = vadd.f32 %v2915_v8, %v2578_v28  ;;  %v3496_v6 = vrot.slane %v3261_v34, 7  ;;  %v3498_v55 = vrot.slane %v15135_v9, 7  ;;  %v15148_v11 = vmul.f32 %v12702_v23, %v14389_v52 }
 0x281   : > { %v3160_v45 = vadd.f32 %v2913_v51, %v2577_v36  ;;  %v4276_v41 = vrot.slane %v4041_v47, 4  ;;  %v4625_v0 = vmul.f32 %v12704_v24, %v14275_v26  ;;  %12230 = vmatmul.mubr.msk.bf16.gmra.mrb[36].mxu1 %vm6011_vm7, %v5962_v5  ;;  %v20732_v25 = vrot.slane %v15016_v61, 7 }
 0x282   : > { %v15158_v38 = vmul.f32 %v12704_v24, %v14389_v52  ;;  %v5209_v51 = vmul.f32 %v14464_v58, %v14275_v26  ;;  %v15164_v8 = vmul.f32 %v14464_v58, %v14389_v52  ;;  %v3499_v27 = vsel %vm3414_vm4, %v3496_v6, %v3498_v55 }
 0x283   : > { %v3497_v10 = vsel %vm3414_vm4, %v20732_v25, %v3496_v6  ;;  %v20733_v61 = vrot.slane %v15029_v53, 4  ;;  %v4278_v28 = vrot.slane %v15148_v11, 4  ;;  %v3745_v34 = vadd.f32 %v3499_v27, %v3161_v60 }
 0x284   : > { %v3744_v36 = vadd.f32 %v3497_v10, %v3160_v45  ;;  %v4860_v47 = vrot.slane %v4625_v0, 5  ;;  %v4862_v5 = vrot.slane %v15158_v38, 5  ;;  %v5443_v32 = vrot.slane %v5209_v51, 6 }
 0x285   : > { %v4277_v25 = vsel %vm4194_vm5, %v20733_v61, %v4276_v41  ;;  %v4279_v58 = vsel %vm4194_vm5, %v4276_v41, %v4278_v28  ;;  %v5445_v37 = vrot.slane %v15164_v8, 6  ;;  %v1019_v10 = vadd.f32 %v15068_v35, %v14437_v39 }
 0x286   : > { %v3940_v33 = vadd.f32 %v3844_v2, %v3744_v36  ;;  %v3941_v53 = vadd.f32 %v3845_v63, %v3745_v34  ;;  %v20734_v45 = vrot.slane %v15039_v44, 5  ;;  %v4863_v0 = vsel %vm4778_vm6, %v4860_v47, %v4862_v5 }
 0x287   : > { %v20735_v2 = vrot.slane %v15053_v21, 6  ;;  %v5446_v41 = vsel %vm732_vm0, %v5443_v32, %v5445_v37  ;;  %v15192_v27 = vmax.f32 %v1019_v10, 0.0  ;;  %v1011_v39 = vadd.f32 %v15068_v35, %v14442_v57 }
 0x288   : > { %v4861_v6 = vsel %vm4778_vm6, %v20734_v45, %v4860_v47  ;;  %v4524_v51 = vadd.f32 %v4277_v25, %v3940_v33  ;;  %v4525_v44 = vadd.f32 %v4279_v58, %v3941_v53  ;;  %v1315_v63 = vmul.f32 %v12685_v7, %v20721_v54 }
 0x289   : > { %v5444_v60 = vsel %vm732_vm0, %v20735_v2, %v5443_v32  ;;  %v1316_v36 = vmul.f32 %v12685_v7, %v20722_v20  ;;  %v1512_v21 = vmul.f32 %v12690_v12, %v20722_v20  ;;  %v15202_v61 = vmax.f32 %v1011_v39, 0.0 }
 0x28a   : > { %v5108_v33 = vadd.f32 %v4861_v6, %v4524_v51  ;;  %v15206_v32 = vmul.f32 %v12690_v12, %v14275_v26  ;;  %v2096_v57 = vmul.f32 %v12692_v13, %v20722_v20  ;;  %v5109_v25 = vadd.f32 %v4863_v0, %v4525_v44 }
 0x28b   : > { %v1749_v34 = vrot.slane %v1512_v21, 1  ;;  %v15212_v54 = vmul.f32 %v12692_v13, %v14275_v26  ;;  %v2680_v47 = vmul.f32 %v12694_v14, %v14275_v26  ;;  %v15219_v45 = vmul.f32 %v12694_v14, %v14389_v52 }
 0x28c   : > { %v5691_v58 = vadd.f32 %v5444_v60, %v5108_v33  ;;  %v1751_v10 = vrot.slane %v15206_v32, 1  ;;  %v2333_v53 = vrot.slane %v2096_v57, 2  ;;  %v5692_v6 = vadd.f32 %v5446_v41, %v5109_v25 }
 0x28d   : > { %v20736_v20 = vrot.slane %v15092_v31, 1  ;;  %v2335_v2 = vrot.slane %v15212_v54, 2  ;;  %v2916_v51 = vrot.slane %v2680_v47, 6  ;;  %v20737_v21 = vrot.slane %v15098_v15, 2 }
 0x28e   : > { %v5791_v39 = vadd.f32 %v14531_v40, %v5691_v58  ;;  %v1752_v60 = vsel %vm1663_vm2, %v1749_v34, %v1751_v10  ;;  %v5792_v41 = vadd.f32 %v14531_v40, %v5692_v6  ;;  %v20738_v25 = vrot.slane %v15105_v56, 6 }
 0x28f   : > { %v1750_v0 = vsel %vm1663_vm2, %v20736_v20, %v1749_v34  ;;  %v2334_v33 = vsel %vm2247_vm3, %v20737_v21, %v2333_v53  ;;  %v1996_v57 = vadd.f32 %v1752_v60, %v1316_v36  ;;  %v2336_v31 = vsel %vm2247_vm3, %v2333_v53, %v2335_v2  ;;  %v15248_v53 = vpop.f32.mrb[74].mxu0 }
 0x290   : > { %v1995_v44 = vadd.f32 %v1750_v0, %v1315_v63  ;;  %v2917_v47 = vsel %vm732_vm0, %v20738_v25, %v2916_v51  ;;  %v5887_v58 = vmax.f32 %v5791_v39, 0.0  ;;  %v20338_v34 = vrot.slane %v15219_v45, 6 }
 0x291   : > { %v3263_v15 = vmul.f32 %v12696_v16, %v14275_v26  ;;  %v5888_v63 = vmax.f32 %v5792_v41, 0.0  ;;  %v2580_v0 = vadd.f32 %v2336_v31, %v1996_v57  ;;  %v15244_v40 = vmul.f32 %v12696_v16, %v14389_v52 }
 0x292   : > { %v2579_v20 = vadd.f32 %v2334_v33, %v1995_v44  ;;  %v3846_v36 = vmul.f32 %v12699_v19, %v14275_v26  ;;  %v2919_v56 = vsel %vm732_vm0, %v2916_v51, %v20338_v34  ;;  %v3847_v60 = vmul.f32 %v12699_v19, %v14389_v52  ;;  %v15255_v44 = vpop.f32.mrb[75].mxu0 }
 0x293   : > { %v3500_v39 = vrot.slane %v3263_v15, 7  ;;  %v5963_v21 = vpack.c.bf16 %v5888_v63, %v5887_v58  ;;  %v3163_v33 = vadd.f32 %v2919_v56, %v2580_v0  ;;  %v3502_v41 = vrot.slane %v15244_v40, 7 }
 0x294   : > { %v3162_v6 = vadd.f32 %v2917_v47, %v2579_v20  ;;  %v4043_v57 = vmul.f32 %v12702_v23, %v14265_v3  ;;  %v15265_v51 = vmul.f32 %v12702_v23, %v14385_v43  ;;  %v4627_v25 = vmul.f32 %v12704_v24, %v14265_v3 }
 0x295   : > { %v3501_v31 = vsel %vm3414_vm4, %v3498_v55, %v3500_v39  ;;  %v15271_v47 = vmul.f32 %v12704_v24, %v14385_v43  ;;  %12233 = vmatprep.mubr.msk.bf16.mxu1 %vm6011_vm7, %v5963_v21  ;;  %v3503_v58 = vsel %vm3414_vm4, %v3500_v39, %v3502_v41  ;;  %v15280_v55 = vld [vmem:[%s20216_s3 + $0x8] ss:$0 sm:$0xff]  ;;  %v1014_v38 = vadd.f32 %v15068_v35, %v14566_v48 }
 0x296   : > { %v3746_v9 = vadd.f32 %v3501_v31, %v3162_v6  ;;  %v4280_v20 = vrot.slane %v4043_v57, 4  ;;  %v5211_v15 = vmul.f32 %v15280_v55, %v14265_v3  ;;  %v3747_v63 = vadd.f32 %v3503_v58, %v3163_v33 }
 0x297   : > { %v4282_v0 = vrot.slane %v15265_v51, 4  ;;  %v4864_v56 = vrot.slane %v4627_v25, 5  ;;  %v20340_v21 = vrot.slane %v15271_v47, 5  ;;  %v15291_v39 = vmul.f32 %v15280_v55, %v14385_v43 }
 0x298   : > { %v3942_v34 = vadd.f32 %v3846_v36, %v3746_v9  ;;  %v4281_v6 = vsel %vm4194_vm5, %v4278_v28, %v4280_v20  ;;  %v5447_v57 = vrot.slane %v5211_v15, 6  ;;  %v3943_v31 = vadd.f32 %v3847_v60, %v3747_v63 }
 0x299   : > { %v4283_v33 = vsel %vm4194_vm5, %v4280_v20, %v4282_v0  ;;  %v4865_v25 = vsel %vm4778_vm6, %v4862_v5, %v4864_v56  ;;  %v4867_v11 = vsel %vm4778_vm6, %v4864_v56, %v20340_v21  ;;  %v20339_v58 = vrot.slane %v15291_v39, 6 }
 0x29a   : > { %v4526_v36 = vadd.f32 %v4281_v6, %v3942_v34  ;;  %v5448_v28 = vsel %vm732_vm0, %v5445_v37, %v5447_v57  ;;  %v1022_v60 = vadd.f32 %v15068_v35, %v14556_v42  ;;  %v4527_v9 = vadd.f32 %v4283_v33, %v3943_v31 }
 0x29b   : > { %v1317_v5 = vmul.f32 %v12685_v7, %v14275_v26  ;;  %v1318_v20 = vmul.f32 %v12685_v7, %v14389_v52  ;;  %v5450_v37 = vsel %vm732_vm0, %v5447_v57, %v20339_v58  ;;  %v1514_v42 = vmul.f32 %v12690_v12, %v14389_v52 }
 0x29c   : > { %v5110_v34 = vadd.f32 %v4865_v25, %v4526_v36  ;;  %v15317_v8 = vmax.f32 %v1022_v60, 0.0  ;;  %v5111_v15 = vadd.f32 %v4867_v11, %v4527_v9  ;;  %v15321_v63 = vmax.f32 %v1014_v38, 0.0 }
 0x29d   : > { %v15325_v48 = vmul.f32 %v12690_v12, %v14265_v3  ;;  %v2098_v26 = vmul.f32 %v12692_v13, %v14389_v52  ;;  %v1753_v6 = vrot.slane %v1514_v42, 1  ;;  %v15331_v57 = vmul.f32 %v12692_v13, %v14265_v3  ;;  %v15343_v52 = vld [vmem:[%s20216_s3 + $0xa] ss:$0 sm:$0xff] }
 0x29e   : > { %v5693_v56 = vadd.f32 %v5448_v28, %v5110_v34  ;;  %v2682_v31 = vmul.f32 %v12694_v14, %v14265_v3  ;;  %v5694_v33 = vadd.f32 %v5450_v37, %v5111_v15  ;;  %v15338_v36 = vmul.f32 %v12694_v14, %v14385_v43 }
 0x29f   : > { %v1755_v25 = vrot.slane %v15325_v48, 1  ;;  %v2337_v11 = vrot.slane %v2098_v26, 2  ;;  %v1754_v60 = vsel %vm1663_vm2, %v1751_v10, %v1753_v6  ;;  %v20342_v9 = vrot.slane %v15331_v57, 2 }
 0x2a0   : > { %v5793_v28 = vadd.f32 %v15343_v52, %v5693_v56  ;;  %v2920_v38 = vrot.slane %v2682_v31, 6  ;;  %v5794_v34 = vadd.f32 %v15343_v52, %v5694_v33  ;;  %v1997_v42 = vadd.f32 %v1754_v60, %v1317_v5 }
 0x2a1   : > { %v1756_v37 = vsel %vm1663_vm2, %v1753_v6, %v1755_v25  ;;  %v2338_v15 = vsel %vm2247_vm3, %v2335_v2, %v2337_v11  ;;  %v2340_v32 = vsel %vm2247_vm3, %v2337_v11, %v20342_v9  ;;  %v20739_v10 = vrot.slane %v15219_v45, 6  ;;  %v15374_v6 = vpop.f32.mrb[76].mxu0 }
 0x2a2   : > { %v5889_v26 = vmax.f32 %v5793_v28, 0.0  ;;  %v1998_v56 = vadd.f32 %v1756_v37, %v1318_v20  ;;  %v5890_v33 = vmax.f32 %v5794_v34, 0.0  ;;  %v2581_v58 = vadd.f32 %v2338_v15, %v1997_v42  ;;  %v15379_v37 = vpop.f32.mrb[77].mxu0 }
 0x2a3   : > { %v2921_v31 = vsel %vm732_vm0, %v20739_v10, %v2920_v38  ;;  %v20341_v21 = vrot.slane %v15338_v36, 6  ;;  %v3265_v5 = vmul.f32 %v12696_v16, %v14265_v3  ;;  %v15368_v2 = vmul.f32 %v12696_v16, %v14385_v43 }
 0x2a4   : > { %v2582_v54 = vadd.f32 %v2340_v32, %v1998_v56  ;;  %v3848_v20 = vmul.f32 %v12699_v19, %v14265_v3  ;;  %v3849_v45 = vmul.f32 %v12699_v19, %v14385_v43  ;;  %v5964_v11 = vpack.c.bf16 %v5890_v33, %v5889_v26 }
 0x2a5   : > { %v2923_v28 = vsel %vm732_vm0, %v2920_v38, %v20341_v21  ;;  %v3164_v60 = vadd.f32 %v2921_v31, %v2581_v58  ;;  %v3504_v34 = vrot.slane %v3265_v5, 7  ;;  %v3506_v15 = vrot.slane %v15368_v2, 7 }
 0x2a6   : > { %v3165_v42 = vadd.f32 %v2923_v28, %v2582_v54  ;;  %v4045_v56 = vmul.f32 %v12702_v23, %v14506_v50  ;;  %v15386_v32 = vmul.f32 %v12702_v23, %v14625_v46  ;;  %12234 = vmatmul.mubr.msk.bf16.gmra.mrb[40].mxu1 %vm6011_vm7, %v5964_v11  ;;  %v4629_v58 = vmul.f32 %v12704_v24, %v14506_v50 }
 0x2a7   : > { %v3505_v38 = vsel %vm3414_vm4, %v3502_v41, %v3504_v34  ;;  %v15396_v26 = vmul.f32 %v12704_v24, %v14625_v46  ;;  %v5213_v10 = vmul.f32 %v15280_v55, %v14506_v50  ;;  %v3507_v31 = vsel %vm3414_vm4, %v3504_v34, %v3506_v15 }
 0x2a8   : > { %v3748_v33 = vadd.f32 %v3505_v38, %v3164_v60  ;;  %v4284_v5 = vrot.slane %v4045_v56, 4  ;;  %v20345_v40 = vrot.slane %v15386_v32, 4  ;;  %v3749_v54 = vadd.f32 %v3507_v31, %v3165_v42 }
 0x2a9   : > { %v4868_v41 = vrot.slane %v4629_v58, 5  ;;  %v20344_v11 = vrot.slane %v15396_v26, 5  ;;  %v15407_v28 = vmul.f32 %v15280_v55, %v14625_v46  ;;  %v5451_v34 = vrot.slane %v5213_v10, 6  ;;  %v20742_v10 = vld [vmem:[#allocation13_spill] sm:$0xff] }
 0x2aa   : > { %v3944_v21 = vadd.f32 %v3848_v20, %v3748_v33  ;;  %v4285_v9 = vsel %vm4194_vm5, %v4282_v0, %v4284_v5  ;;  %v4287_v60 = vsel %vm4194_vm5, %v4284_v5, %v20345_v40  ;;  %v3945_v56 = vadd.f32 %v3849_v45, %v3749_v54 }
 0x2ab   : > { %v20740_v42 = vrot.slane %v15271_v47, 5  ;;  %v4871_v58 = vsel %vm4778_vm6, %v4868_v41, %v20344_v11  ;;  %v20343_v20 = vrot.slane %v15407_v28, 6  ;;  %v20741_v51 = vrot.slane %v15291_v39, 6 }
 0x2ac   : > { %v4528_v31 = vadd.f32 %v4285_v9, %v3944_v21  ;;  %v1035_v33 = vadd.f32 %v15068_v35, %v14670_v1  ;;  %v1027_v45 = vadd.f32 %v15068_v35, %v20742_v10  ;;  %v4529_v47 = vadd.f32 %v4287_v60, %v3945_v56 }
 0x2ad   : > { %v4869_v38 = vsel %vm4778_vm6, %v20740_v42, %v4868_v41  ;;  %v5452_v0 = vsel %vm732_vm0, %v20741_v51, %v5451_v34  ;;  %v5454_v5 = vsel %vm732_vm0, %v5451_v34, %v20343_v20  ;;  %v1319_v54 = vmul.f32 %v12685_v7, %v14265_v3 }
 0x2ae   : > { %v1320_v21 = vmul.f32 %v12685_v7, %v14385_v43  ;;  %v5112_v39 = vadd.f32 %v4869_v38, %v4528_v31  ;;  %v15436_v9 = vmax.f32 %v1035_v33, 0.0  ;;  %v15438_v41 = vmax.f32 %v1027_v45, 0.0 }
 0x2af   : > { %v1516_v1 = vmul.f32 %v12690_v12, %v14385_v43  ;;  %v5113_v42 = vadd.f32 %v4871_v58, %v4529_v47  ;;  %v15444_v60 = vmul.f32 %v12690_v12, %v14506_v50  ;;  %v2100_v34 = vmul.f32 %v12692_v13, %v14385_v43 }
 0x2b0   : > { %20743 = vst [vmem:[#allocation14_spill] sm:$0xff] %v15436_v9  ;;  %v15450_v3 = vmul.f32 %v12692_v13, %v14506_v50  ;;  %v5695_v56 = vadd.f32 %v5452_v0, %v5112_v39  ;;  %v2684_v31 = vmul.f32 %v12694_v14, %v14506_v50  ;;  %v15456_v51 = vmul.f32 %v12694_v14, %v14625_v46 }
 0x2b1   : > { %v1757_v38 = vrot.slane %v1516_v1, 1  ;;  %v5696_v58 = vadd.f32 %v5454_v5, %v5113_v42  ;;  %v20348_v33 = vrot.slane %v15444_v60, 1  ;;  %v2341_v10 = vrot.slane %v2100_v34, 2 }
 0x2b2   : > { %v20347_v45 = vrot.slane %v15450_v3, 2  ;;  %v5795_v43 = vadd.f32 %v15343_v52, %v5695_v56  ;;  %v2924_v47 = vrot.slane %v2684_v31, 6  ;;  %v20346_v39 = vrot.slane %v15456_v51, 6 }
 0x2b3   : > { %v1758_v0 = vsel %vm1663_vm2, %v1755_v25, %v1757_v38  ;;  %v5796_v1 = vadd.f32 %v15343_v52, %v5696_v58  ;;  %v1760_v5 = vsel %vm1663_vm2, %v1757_v38, %v20348_v33  ;;  %v20744_v34 = vrot.slane %v15331_v57, 2  ;;  %v15483_v38 = vpop.f32.mrb[78].mxu0 }
 0x2b4   : > { %v1999_v42 = vadd.f32 %v1758_v0, %v1319_v54  ;;  %v5891_v11 = vmax.f32 %v5795_v43, 0.0  ;;  %v2000_v56 = vadd.f32 %v1760_v5, %v1320_v21  ;;  %v2344_v48 = vsel %vm2247_vm3, %v2341_v10, %v20347_v45  ;;  %v20746_v5 = vld [vmem:[#allocation15_spill] sm:$0xff] }
 0x2b5   : > { %v2342_v20 = vsel %vm2247_vm3, %v20744_v34, %v2341_v10  ;;  %v20745_v25 = vrot.slane %v15338_v36, 6  ;;  %v5892_v58 = vmax.f32 %v5796_v1, 0.0  ;;  %v2927_v54 = vsel %vm732_vm0, %v2924_v47, %v20346_v39  ;;  %v15493_v10 = vpop.f32.mrb[79].mxu0 }
 0x2b6   : > { %v2583_v40 = vadd.f32 %v2342_v20, %v1999_v42  ;;  %v3267_v57 = vmul.f32 %v12696_v16, %v14506_v50  ;;  %v2584_v21 = vadd.f32 %v2344_v48, %v2000_v56  ;;  %v15487_v43 = vmul.f32 %v12696_v16, %v14625_v46  ;;  %v20747_v48 = vld [vmem:[#allocation9_spill] sm:$0xff] }
 0x2b7   : > { %v2925_v31 = vsel %vm732_vm0, %v20745_v25, %v2924_v47  ;;  %v3850_v36 = vmul.f32 %v12699_v19, %v14506_v50  ;;  %v3851_v20 = vmul.f32 %v12699_v19, %v14625_v46  ;;  %v5965_v0 = vpack.c.bf16 %v5892_v58, %v5891_v11 }
 0x2b8   : > { %v3166_v47 = vadd.f32 %v2925_v31, %v2583_v40  ;;  %v3508_v1 = vrot.slane %v3267_v57, 7  ;;  %v4047_v42 = vmul.f32 %v12702_v23, %v20746_v5  ;;  %v3167_v34 = vadd.f32 %v2927_v54, %v2584_v21 }
 0x2b9   : > { %v3510_v56 = vrot.slane %v15487_v43, 7  ;;  %v15500_v25 = vmul.f32 %v12702_v23, %v20747_v48  ;;  %v4631_v39 = vmul.f32 %v12704_v24, %v20746_v5  ;;  %12237 = vmatprep.mubr.msk.bf16.mxu1 %vm6011_vm7, %v5965_v0  ;;  %v15510_v31 = vmul.f32 %v12704_v24, %v20747_v48 }
 0x2ba   : > { %v3509_v40 = vsel %vm3414_vm4, %v3506_v15, %v3508_v1  ;;  %v4288_v11 = vrot.slane %v4047_v42, 4  ;;  %v5215_v58 = vmul.f32 %v15280_v55, %v20746_v5  ;;  %v20748_v2 = vrot.slane %v15386_v32, 4 }
 0x2bb   : > { %v3511_v54 = vsel %vm3414_vm4, %v3508_v1, %v3510_v56  ;;  %v3750_v57 = vadd.f32 %v3509_v40, %v3166_v47  ;;  %v20352_v21 = vrot.slane %v15500_v25, 4  ;;  %v4872_v0 = vrot.slane %v4631_v39, 5 }
 0x2bc   : > { %v3751_v45 = vadd.f32 %v3511_v54, %v3167_v34  ;;  %v4289_v15 = vsel %vm4194_vm5, %v20748_v2, %v4288_v11  ;;  %v20351_v42 = vrot.slane %v15510_v31, 5  ;;  %v15524_v33 = vmul.f32 %v15280_v55, %v20747_v48 }
 0x2bd   : > { %v3946_v9 = vadd.f32 %v3850_v36, %v3750_v57  ;;  %v4291_v1 = vsel %vm4194_vm5, %v4288_v11, %v20352_v21  ;;  %v20749_v47 = vrot.slane %v15396_v26, 5  ;;  %v5455_v34 = vrot.slane %v5215_v58, 6 }
 0x2be   : > { %v3947_v40 = vadd.f32 %v3851_v20, %v3751_v45  ;;  %v4875_v32 = vsel %vm4778_vm6, %v4872_v0, %v20351_v42  ;;  %v20350_v54 = vrot.slane %v15524_v33, 6  ;;  %v1038_v2 = vadd.f32 %v15068_v35, %v14787_v30 }
 0x2bf   : > { %v4873_v39 = vsel %vm4778_vm6, %v20749_v47, %v4872_v0  ;;  %v4530_v36 = vadd.f32 %v4289_v15, %v3946_v9  ;;  %v20750_v57 = vrot.slane %v15407_v28, 6  ;;  %v1030_v26 = vadd.f32 %v15068_v35, %v14794_v17 }
 0x2c0   : > { %v1321_v45 = vmul.f32 %v12685_v7, %v14506_v50  ;;  %v4531_v20 = vadd.f32 %v4291_v1, %v3947_v40  ;;  %v5458_v58 = vsel %vm732_vm0, %v5455_v34, %v20350_v54  ;;  %v15548_v0 = vmax.f32 %v1038_v2, 0.0 }
 0x2c1   : > { %v5456_v11 = vsel %vm732_vm0, %v20750_v57, %v5455_v34  ;;  %v1322_v30 = vmul.f32 %v12685_v7, %v14625_v46  ;;  %v5114_v9 = vadd.f32 %v4873_v39, %v4530_v36  ;;  %v15552_v28 = vmax.f32 %v1030_v26, 0.0 }
 0x2c2   : > { %20751 = vst [vmem:[#allocation5_spill] sm:$0xff] %v15548_v0  ;;  %v1518_v15 = vmul.f32 %v12690_v12, %v14625_v46  ;;  %v15558_v17 = vmul.f32 %v12690_v12, %v20746_v5  ;;  %v5115_v50 = vadd.f32 %v4875_v32, %v4531_v20  ;;  %v2102_v1 = vmul.f32 %v12692_v13, %v14625_v46 }
 0x2c3   : > { %v15564_v47 = vmul.f32 %v12692_v13, %v20746_v5  ;;  %v2686_v39 = vmul.f32 %v12694_v14, %v20746_v5  ;;  %v5697_v34 = vadd.f32 %v5456_v11, %v5114_v9  ;;  %v15571_v36 = vmul.f32 %v12694_v14, %v20747_v48 }
 0x2c4   : > { %v1761_v40 = vrot.slane %v1518_v15, 1  ;;  %v20355_v2 = vrot.slane %v15558_v17, 1  ;;  %v5698_v57 = vadd.f32 %v5458_v58, %v5115_v50  ;;  %v2345_v32 = vrot.slane %v2102_v1, 2 }
 0x2c5   : > { %v20354_v26 = vrot.slane %v15564_v47, 2  ;;  %v2928_v46 = vrot.slane %v2686_v39, 6  ;;  %v5797_v20 = vadd.f32 %v15343_v52, %v5697_v34  ;;  %v20752_v54 = vrot.slane %v15444_v60, 1 }
 0x2c6   : > { %v1764_v11 = vsel %vm1663_vm2, %v1761_v40, %v20355_v2  ;;  %v20353_v9 = vrot.slane %v15571_v36, 6  ;;  %v5798_v15 = vadd.f32 %v15343_v52, %v5698_v57  ;;  %v20753_v50 = vrot.slane %v15450_v3, 2 }
 0x2c7   : > { %v1762_v42 = vsel %vm1663_vm2, %v20752_v54, %v1761_v40  ;;  %v2002_v58 = vadd.f32 %v1764_v11, %v1322_v30  ;;  %v5893_v39 = vmax.f32 %v5797_v20, 0.0  ;;  %v2348_v60 = vsel %vm2247_vm3, %v2345_v32, %v20354_v26  ;;  %v15597_v30 = vpop.f32.mrb[80].mxu0 }
 0x2c8   : > { %v2001_v21 = vadd.f32 %v1762_v42, %v1321_v45  ;;  %v2346_v1 = vsel %vm2247_vm3, %v20753_v50, %v2345_v32  ;;  %v20754_v54 = vrot.slane %v15456_v51, 6  ;;  %v2931_v40 = vsel %vm732_vm0, %v2928_v46, %v20353_v9  ;;  %20755 = vst [vmem:[#allocation10_spill] sm:$0xff] %v15597_v30 }
 0x2c9   : > { %v5894_v57 = vmax.f32 %v5798_v15, 0.0  ;;  %v2586_v45 = vadd.f32 %v2348_v60, %v2002_v58  ;;  %v3269_v3 = vmul.f32 %v12696_v16, %v20746_v5  ;;  %v15601_v20 = vmul.f32 %v12696_v16, %v20747_v48 }
 0x2ca   : > { %v2929_v34 = vsel %vm732_vm0, %v20754_v54, %v2928_v46  ;;  %v2585_v42 = vadd.f32 %v2346_v1, %v2001_v21  ;;  %v3852_v51 = vmul.f32 %v12699_v19, %v20746_v5  ;;  %v3853_v32 = vmul.f32 %v12699_v19, %v20747_v48  ;;  %v15609_v21 = vpop.f32.mrb[81].mxu0 }
 0x2cb   : > { %v4049_v46 = vmul.f32 %v12702_v23, %v14741_v59  ;;  %20756 = vst [vmem:[#allocation13_spill] sm:$0xff] %v15609_v21  ;;  %v5966_v11 = vpack.c.bf16 %v5894_v57, %v5893_v39  ;;  %v3169_v58 = vadd.f32 %v2931_v40, %v2586_v45  ;;  %v3512_v50 = vrot.slane %v3269_v3, 7 }
 0x2cc   : > { %v3168_v15 = vadd.f32 %v2929_v34, %v2585_v42  ;;  %v3514_v1 = vrot.slane %v15601_v20, 7  ;;  %v15614_v60 = vmul.f32 %v12702_v23, %v14855_v49  ;;  %v4633_v9 = vmul.f32 %v12704_v24, %v14741_v59 }
 0x2cd   : > { %v4292_v54 = vrot.slane %v4049_v46, 4  ;;  %12238 = vmatmul.mubr.msk.bf16.gmra.mrb[44].mxu1 %vm6011_vm7, %v5966_v11  ;;  %v3513_v26 = vsel %vm3414_vm4, %v3510_v56, %v3512_v50  ;;  %v15624_v39 = vmul.f32 %v12704_v24, %v14855_v49  ;;  %v5217_v34 = vmul.f32 %v15280_v55, %v14741_v59 }
 0x2ce   : > { %v15630_v40 = vmul.f32 %v15280_v55, %v14855_v49  ;;  %v3515_v57 = vsel %vm3414_vm4, %v3512_v50, %v3514_v1  ;;  %v3752_v42 = vadd.f32 %v3513_v26, %v3168_v15  ;;  %v20757_v43 = vrot.slane %v15500_v25, 4 }
 0x2cf   : > { %v4294_v45 = vrot.slane %v15614_v60, 4  ;;  %v3753_v3 = vadd.f32 %v3515_v57, %v3169_v58  ;;  %v4876_v46 = vrot.slane %v4633_v9, 5  ;;  %v20361_v11 = vrot.slane %v15624_v39, 5 }
 0x2d0   : > { %v4293_v56 = vsel %vm4194_vm5, %v20757_v43, %v4292_v54  ;;  %v5459_v2 = vrot.slane %v5217_v34, 6  ;;  %v3948_v0 = vadd.f32 %v3852_v51, %v3752_v42  ;;  %v20357_v30 = vrot.slane %v15630_v40, 6 }
 0x2d1   : > { %v4295_v21 = vsel %vm4194_vm5, %v4292_v54, %v4294_v45  ;;  %v1051_v26 = vadd.f32 %v15068_v35, %v14903_v62  ;;  %v3949_v25 = vadd.f32 %v3853_v32, %v3753_v3  ;;  %v20758_v15 = vrot.slane %v15510_v31, 5  ;;  %v20761_v62 = vld [vmem:[#allocation11_spill] sm:$0xff] }
 0x2d2   : > { %v4879_v9 = vsel %vm4778_vm6, %v4876_v46, %v20361_v11  ;;  %v20759_v51 = vrot.slane %v15524_v33, 6  ;;  %v4532_v34 = vadd.f32 %v4293_v56, %v3948_v0  ;;  %v5462_v54 = vsel %vm732_vm0, %v5459_v2, %v20357_v30 }
 0x2d3   : > { %v4877_v50 = vsel %vm4778_vm6, %v20758_v15, %v4876_v46  ;;  %v15658_v57 = vmax.f32 %v1051_v26, 0.0  ;;  %v1043_v31 = vadd.f32 %v15068_v35, %v20761_v62  ;;  %v4533_v32 = vadd.f32 %v4295_v21, %v3949_v25 }
 0x2d4   : > { %v5460_v58 = vsel %vm732_vm0, %v20759_v51, %v5459_v2  ;;  %v1323_v42 = vmul.f32 %v12685_v7, %v20746_v5  ;;  %v1324_v43 = vmul.f32 %v12685_v7, %v20747_v48  ;;  %v1520_v33 = vmul.f32 %v12690_v12, %v20747_v48 }
 0x2d5   : > { %20760 = vst [vmem:[#allocation15_spill] sm:$0xff] %v15658_v57  ;;  %v5116_v0 = vadd.f32 %v4877_v50, %v4532_v34  ;;  %v15668_v56 = vmax.f32 %v1043_v31, 0.0  ;;  %v15672_v2 = vmul.f32 %v12690_v12, %v14741_v59  ;;  %v2104_v3 = vmul.f32 %v12692_v13, %v20747_v48 }
 0x2d6   : > { %v5117_v21 = vadd.f32 %v4879_v9, %v4533_v32  ;;  %v1765_v46 = vrot.slane %v1520_v33, 1  ;;  %v15678_v5 = vmul.f32 %v12692_v13, %v14741_v59  ;;  %v2688_v26 = vmul.f32 %v12694_v14, %v14741_v59 }
 0x2d7   : > { %v5699_v25 = vadd.f32 %v5460_v58, %v5116_v0  ;;  %v20359_v15 = vrot.slane %v15672_v2, 1  ;;  %v2349_v50 = vrot.slane %v2104_v3, 2  ;;  %v15685_v51 = vmul.f32 %v12694_v14, %v14855_v49 }
 0x2d8   : > { %v5700_v34 = vadd.f32 %v5462_v54, %v5117_v21  ;;  %v20762_v48 = vrot.slane %v15558_v17, 1  ;;  %v20358_v62 = vrot.slane %v15678_v5, 2  ;;  %v2932_v31 = vrot.slane %v2688_v26, 6 }
 0x2d9   : > { %v5799_v32 = vadd.f32 %v15343_v52, %v5699_v25  ;;  %v1768_v58 = vsel %vm1663_vm2, %v1765_v46, %v20359_v15  ;;  %v20763_v0 = vrot.slane %v15564_v47, 2  ;;  %v20764_v26 = vrot.slane %v15571_v36, 6  ;;  %v20766_v15 = vld [vmem:[#allocation17_spill] sm:$0xff] }
 0x2da   : > { %v1766_v9 = vsel %vm1663_vm2, %v20762_v48, %v1765_v46  ;;  %v5800_v54 = vadd.f32 %v15343_v52, %v5700_v34  ;;  %v2004_v21 = vadd.f32 %v1768_v58, %v1324_v43  ;;  %v2352_v17 = vsel %vm2247_vm3, %v2349_v50, %v20358_v62  ;;  %v15714_v34 = vpop.f32.mrb[82].mxu0 }
 0x2db   : > { %v2003_v33 = vadd.f32 %v1766_v9, %v1323_v42  ;;  %v2350_v3 = vsel %vm2247_vm3, %v20763_v0, %v2349_v50  ;;  %v2933_v25 = vsel %vm732_vm0, %v20764_v26, %v2932_v31  ;;  %v5895_v48 = vmax.f32 %v5799_v32, 0.0  ;;  %v15721_v0 = vpop.f32.mrb[83].mxu0 }
 0x2dc   : > { %v20360_v46 = vrot.slane %v15685_v51, 6  ;;  %v3271_v47 = vmul.f32 %v12696_v16, %v14741_v59  ;;  %v5896_v42 = vmax.f32 %v5800_v54, 0.0  ;;  %v2588_v9 = vadd.f32 %v2352_v17, %v2004_v21  ;;  %v20765_v17 = vld [vmem:[#allocation16_spill] sm:$0xff] }
 0x2dd   : > { %v2587_v30 = vadd.f32 %v2350_v3, %v2003_v33  ;;  %v15710_v43 = vmul.f32 %v12696_v16, %v14855_v49  ;;  %v3854_v50 = vmul.f32 %v12699_v19, %v14741_v59  ;;  %v3855_v33 = vmul.f32 %v12699_v19, %v14855_v49 }
 0x2de   : > { %v2935_v36 = vsel %vm732_vm0, %v2932_v31, %v20360_v46  ;;  %v3516_v58 = vrot.slane %v3271_v47, 7  ;;  %v5967_v3 = vpack.c.bf16 %v5896_v42, %v5895_v48  ;;  %v4051_v26 = vmul.f32 %v12702_v23, %v20765_v17 }
 0x2df   : > { %v3170_v32 = vadd.f32 %v2933_v25, %v2587_v30  ;;  %v3171_v54 = vadd.f32 %v2935_v36, %v2588_v9  ;;  %v3518_v21 = vrot.slane %v15710_v43, 7  ;;  %v15731_v30 = vmul.f32 %v12702_v23, %v20766_v15 }
 0x2e0   : > { %v3517_v62 = vsel %vm3414_vm4, %v3514_v1, %v3516_v58  ;;  %v4635_v31 = vmul.f32 %v12704_v24, %v20765_v17  ;;  %v15737_v25 = vmul.f32 %v12704_v24, %v20766_v15  ;;  %12241 = vmatprep.mubr.msk.bf16.mxu1 %vm6011_vm7, %v5967_v3  ;;  %v4296_v47 = vrot.slane %v4051_v26, 4 }
 0x2e1   : > { %v3519_v48 = vsel %vm3414_vm4, %v3516_v58, %v3518_v21  ;;  %v3754_v20 = vadd.f32 %v3517_v62, %v3170_v32  ;;  %v5219_v1 = vmul.f32 %v15280_v55, %v20765_v17  ;;  %v4298_v9 = vrot.slane %v15731_v30, 4 }
 0x2e2   : > { %v3755_v42 = vadd.f32 %v3519_v48, %v3171_v54  ;;  %v4880_v36 = vrot.slane %v4635_v31, 5  ;;  %v20364_v46 = vrot.slane %v15737_v25, 5  ;;  %v4297_v3 = vsel %vm4194_vm5, %v4294_v45, %v4296_v47 }
 0x2e3   : > { %v3950_v11 = vadd.f32 %v3854_v50, %v3754_v20  ;;  %v15752_v57 = vmul.f32 %v15280_v55, %v20766_v15  ;;  %v5463_v62 = vrot.slane %v5219_v1, 6  ;;  %v4299_v58 = vsel %vm4194_vm5, %v4296_v47, %v4298_v9 }
 0x2e4   : > { %v3951_v32 = vadd.f32 %v3855_v33, %v3755_v42  ;;  %v20767_v54 = vrot.slane %v15624_v39, 5  ;;  %v4883_v60 = vsel %vm4778_vm6, %v4880_v36, %v20364_v46  ;;  %v20768_v45 = vrot.slane %v15630_v40, 6 }
 0x2e5   : > { %v4534_v50 = vadd.f32 %v4297_v3, %v3950_v11  ;;  %v20363_v48 = vrot.slane %v15752_v57, 6  ;;  %v1054_v33 = vadd.f32 %v15068_v35, %v15012_v29  ;;  %v1046_v39 = vadd.f32 %v15068_v35, %v15022_v4 }
 0x2e6   : > { %v4881_v26 = vsel %vm4778_vm6, %v20767_v54, %v4880_v36  ;;  %v5464_v31 = vsel %vm732_vm0, %v20768_v45, %v5463_v62  ;;  %v4535_v20 = vadd.f32 %v4299_v58, %v3951_v32  ;;  %v1325_v47 = vmul.f32 %v12685_v7, %v14741_v59 }
 0x2e7   : > { %v1326_v1 = vmul.f32 %v12685_v7, %v14855_v49  ;;  %v5118_v11 = vadd.f32 %v4881_v26, %v4534_v50  ;;  %v5466_v40 = vsel %vm732_vm0, %v5463_v62, %v20363_v48  ;;  %v15778_v42 = vmax.f32 %v1054_v33, 0.0 }
 0x2e8   : > { %v1522_v29 = vmul.f32 %v12690_v12, %v14855_v49  ;;  %v5119_v36 = vadd.f32 %v4883_v60, %v4535_v20  ;;  %v15782_v3 = vmax.f32 %v1046_v39, 0.0  ;;  %v15786_v4 = vmul.f32 %v12690_v12, %v20765_v17 }
 0x2e9   : > { %v2106_v59 = vmul.f32 %v12692_v13, %v14855_v49  ;;  %v5701_v35 = vadd.f32 %v5464_v31, %v5118_v11  ;;  %v15792_v62 = vmul.f32 %v12692_v13, %v20765_v17  ;;  %v2690_v58 = vmul.f32 %v12694_v14, %v20765_v17 }
 0x2ea   : > { %v1769_v32 = vrot.slane %v1522_v29, 1  ;;  %v5702_v54 = vadd.f32 %v5466_v40, %v5119_v36  ;;  %v1771_v26 = vrot.slane %v15786_v4, 1  ;;  %v15799_v50 = vmul.f32 %v12694_v14, %v20766_v15 }
 0x2eb   : > { %v2353_v60 = vrot.slane %v2106_v59, 2  ;;  %v5801_v45 = vadd.f32 %v15343_v52, %v5701_v35  ;;  %v20769_v49 = vrot.slane %v15672_v2, 1  ;;  %v20366_v33 = vrot.slane %v15792_v62, 2 }
 0x2ec   : > { %v2936_v20 = vrot.slane %v2690_v58, 6  ;;  %v5802_v39 = vadd.f32 %v15343_v52, %v5702_v54  ;;  %v1772_v11 = vsel %vm1663_vm2, %v1769_v32, %v1771_v26  ;;  %v20770_v29 = vrot.slane %v15678_v5, 2 }
 0x2ed   : > { %v1770_v31 = vsel %vm1663_vm2, %v20769_v49, %v1769_v32  ;;  %v5897_v59 = vmax.f32 %v5801_v45, 0.0  ;;  %v2006_v35 = vadd.f32 %v1772_v11, %v1326_v1  ;;  %v2356_v2 = vsel %vm2247_vm3, %v2353_v60, %v20366_v33 }
 0x2ee   : > { %v2005_v40 = vadd.f32 %v1770_v31, %v1325_v47  ;;  %v2354_v36 = vsel %vm2247_vm3, %v20770_v29, %v2353_v60  ;;  %v20771_v49 = vrot.slane %v15685_v51, 6  ;;  %v5898_v54 = vmax.f32 %v5802_v39, 0.0  ;;  %v15830_v60 = vpop.f32.mrb[84].mxu0 }
 0x2ef   : > { %v20365_v46 = vrot.slane %v15799_v50, 6  ;;  %v3273_v47 = vmul.f32 %v12696_v16, %v20765_v17  ;;  %v2590_v5 = vadd.f32 %v2356_v2, %v2006_v35  ;;  %v15824_v32 = vmul.f32 %v12696_v16, %v20766_v15 }
 0x2f0   : > { %v2937_v58 = vsel %vm732_vm0, %v20771_v49, %v2936_v20  ;;  %v2589_v48 = vadd.f32 %v2354_v36, %v2005_v40  ;;  %v3856_v1 = vmul.f32 %v12699_v19, %v20765_v17  ;;  %v3857_v51 = vmul.f32 %v12699_v19, %v20766_v15  ;;  %v15835_v40 = vpop.f32.mrb[85].mxu0 }
 0x2f1   : > { %v5968_v45 = vpack.c.bf16 %v5898_v54, %v5897_v59  ;;  %v2939_v31 = vsel %vm732_vm0, %v2936_v20, %v20365_v46  ;;  %v3520_v11 = vrot.slane %v3273_v47, 7  ;;  %v20370_v36 = vrot.slane %v15824_v32, 7 }
 0x2f2   : > { %v3172_v39 = vadd.f32 %v2937_v58, %v2589_v48  ;;  %v3173_v29 = vadd.f32 %v2939_v31, %v2590_v5  ;;  %v4053_v35 = vmul.f32 %v12702_v23, %v14967_v18  ;;  %v15842_v2 = vmul.f32 %v12702_v23, %v15086_v22 }
 0x2f3   : > { %12242 = vmatmul.mubr.msk.bf16.gmra.mrb[48].mxu1 %vm6011_vm7, %v5968_v45  ;;  %v3521_v20 = vsel %vm3414_vm4, %v3518_v21, %v3520_v11  ;;  %v4637_v48 = vmul.f32 %v12704_v24, %v14967_v18  ;;  %v15852_v59 = vmul.f32 %v12704_v24, %v15086_v22  ;;  %v5221_v49 = vmul.f32 %v15280_v55, %v14967_v18 }
 0x2f4   : > { %v3523_v58 = vsel %vm3414_vm4, %v3520_v11, %v20370_v36  ;;  %v3756_v54 = vadd.f32 %v3521_v20, %v3172_v39  ;;  %v4300_v47 = vrot.slane %v4053_v35, 4  ;;  %v20369_v43 = vrot.slane %v15842_v2, 4 }
 0x2f5   : > { %v3757_v5 = vadd.f32 %v3523_v58, %v3173_v29  ;;  %v4884_v21 = vrot.slane %v4637_v48, 5  ;;  %v20368_v45 = vrot.slane %v15852_v59, 5  ;;  %v15863_v31 = vmul.f32 %v15280_v55, %v15086_v22 }
 0x2f6   : > { %v3952_v46 = vadd.f32 %v3856_v1, %v3756_v54  ;;  %v4301_v33 = vsel %vm4194_vm5, %v4298_v9, %v4300_v47  ;;  %v4303_v39 = vsel %vm4194_vm5, %v4300_v47, %v20369_v43  ;;  %v5467_v11 = vrot.slane %v5221_v49, 6  ;;  %v15884_v49 = vld [vmem:[%s20216_s3 + $0x9] ss:$0 sm:$0xff] }
 0x2f7   : > { %v3953_v35 = vadd.f32 %v3857_v51, %v3757_v5  ;;  %v20772_v29 = vrot.slane %v15737_v25, 5  ;;  %v4887_v48 = vsel %vm4778_vm6, %v4884_v21, %v20368_v45  ;;  %v20367_v1 = vrot.slane %v15863_v31, 6  ;;  %v20774_v51 = vld [vmem:[#allocation12_spill] sm:$0xff]  ;;  %v20775_v54 = vld [vmem:[#allocation7_spill] sm:$0xff] }
 0x2f8   : > { %v4536_v58 = vadd.f32 %v4301_v33, %v3952_v46  ;;  %v20773_v30 = vrot.slane %v15752_v57, 6  ;;  %v1067_v25 = vadd.f32 %v15884_v49, %v20774_v51  ;;  %v1059_v47 = vadd.f32 %v15884_v49, %v20775_v54 }
 0x2f9   : > { %v4885_v20 = vsel %vm4778_vm6, %v20772_v29, %v4884_v21  ;;  %v4537_v5 = vadd.f32 %v4303_v39, %v3953_v35  ;;  %v5470_v46 = vsel %vm732_vm0, %v5467_v11, %v20367_v1  ;;  %v1327_v57 = vmul.f32 %v12685_v7, %v20765_v17 }
 0x2fa   : > { %v5468_v9 = vsel %vm732_vm0, %v20773_v30, %v5467_v11  ;;  %v1328_v33 = vmul.f32 %v12685_v7, %v20766_v15  ;;  %v5120_v21 = vadd.f32 %v4885_v20, %v4536_v58  ;;  %v15897_v29 = vmax.f32 %v1067_v25, 0.0 }
 0x2fb   : > { %v15899_v30 = vmax.f32 %v1059_v47, 0.0  ;;  %v1524_v51 = vmul.f32 %v12690_v12, %v20766_v15  ;;  %v5121_v54 = vadd.f32 %v4887_v48, %v4537_v5  ;;  %v15905_v39 = vmul.f32 %v12690_v12, %v14967_v18 }
 0x2fc   : > { %20776 = vst [vmem:[#allocation9_spill] sm:$0xff] %v15897_v29  ;;  %v2108_v11 = vmul.f32 %v12692_v13, %v20766_v15  ;;  %v15911_v17 = vmul.f32 %v12692_v13, %v14967_v18  ;;  %v5703_v35 = vadd.f32 %v5468_v9, %v5120_v21  ;;  %v2692_v58 = vmul.f32 %v12694_v14, %v14967_v18 }
 0x2fd   : > { %20777 = vst [vmem:[#allocation11_spill] sm:$0xff] %v15899_v30  ;;  %v1773_v20 = vrot.slane %v1524_v51, 1  ;;  %v15917_v25 = vmul.f32 %v12694_v14, %v15086_v22  ;;  %v5704_v48 = vadd.f32 %v5470_v46, %v5121_v54  ;;  %v20373_v47 = vrot.slane %v15905_v39, 1 }
 0x2fe   : > { %v2357_v5 = vrot.slane %v2108_v11, 2  ;;  %v20372_v1 = vrot.slane %v15911_v17, 2  ;;  %v5803_v15 = vadd.f32 %v15343_v52, %v5703_v35  ;;  %v2940_v21 = vrot.slane %v2692_v58, 6 }
 0x2ff   : > { %v1774_v9 = vsel %vm1663_vm2, %v1771_v26, %v1773_v20  ;;  %v5804_v45 = vadd.f32 %v15343_v52, %v5704_v48  ;;  %v1776_v46 = vsel %vm1663_vm2, %v1773_v20, %v20373_v47  ;;  %v20778_v11 = vrot.slane %v15792_v62, 2  ;;  %v15944_v20 = vpop.f32.mrb[86].mxu0 }
 0x300   : > { %v2007_v54 = vadd.f32 %v1774_v9, %v1327_v57  ;;  %v5899_v36 = vmax.f32 %v5803_v15, 0.0  ;;  %v2008_v35 = vadd.f32 %v1776_v46, %v1328_v33  ;;  %v2360_v4 = vsel %vm2247_vm3, %v2357_v5, %v20372_v1 }
 0x301   : > { %v2358_v43 = vsel %vm2247_vm3, %v20778_v11, %v2357_v5  ;;  %v20779_v26 = vrot.slane %v15799_v50, 6  ;;  %v5900_v48 = vmax.f32 %v5804_v45, 0.0  ;;  %v20780_v29 = vrot.slane %v15917_v25, 6  ;;  %v15954_v45 = vpop.f32.mrb[87].mxu0 }
 0x302   : > { %v2591_v51 = vadd.f32 %v2358_v43, %v2007_v54  ;;  %v3275_v62 = vmul.f32 %v12696_v16, %v14967_v18  ;;  %v2592_v33 = vadd.f32 %v2360_v4, %v2008_v35  ;;  %v15948_v15 = vmul.f32 %v12696_v16, %v15086_v22  ;;  %20781 = vst [vmem:[#allocation16_spill] sm:$0xff] %v15954_v45  ;;  %v20783_v35 = vld [vmem:[#allocation8_spill] sm:$0xff] }
 0x303   : > { %v2941_v58 = vsel %vm732_vm0, %v20779_v26, %v2940_v21  ;;  %v2943_v57 = vsel %vm732_vm0, %v2940_v21, %v20780_v29  ;;  %v3858_v50 = vmul.f32 %v12699_v19, %v14967_v18  ;;  %v3859_v43 = vmul.f32 %v12699_v19, %v15086_v22  ;;  %v20782_v21 = vld [vmem:[#allocation6_spill] sm:$0xff] }
 0x304   : > { %v5969_v5 = vpack.c.bf16 %v5900_v48, %v5899_v36  ;;  %v3174_v29 = vadd.f32 %v2941_v58, %v2591_v51  ;;  %v3524_v9 = vrot.slane %v3275_v62, 7  ;;  %v4055_v46 = vmul.f32 %v12702_v23, %v20782_v21 }
 0x305   : > { %v3175_v54 = vadd.f32 %v2943_v57, %v2592_v33  ;;  %v3526_v11 = vrot.slane %v15948_v15, 7  ;;  %v15961_v4 = vmul.f32 %v12702_v23, %v20783_v35  ;;  %v4639_v26 = vmul.f32 %v12704_v24, %v20782_v21 }
 0x306   : > { %12245 = vmatprep.mubr.msk.bf16.mxu1 %vm6011_vm7, %v5969_v5  ;;  %v20784_v1 = vrot.slane %v15824_v32, 7  ;;  %v4304_v51 = vrot.slane %v4055_v46, 4  ;;  %v15971_v58 = vmul.f32 %v12704_v24, %v20783_v35  ;;  %v5223_v48 = vmul.f32 %v15280_v55, %v20782_v21 }
 0x307   : > { %v3527_v57 = vsel %vm3414_vm4, %v3524_v9, %v3526_v11  ;;  %v4306_v33 = vrot.slane %v15961_v4, 4  ;;  %v4888_v5 = vrot.slane %v4639_v26, 5  ;;  %v20785_v32 = vrot.slane %v15842_v2, 4 }
 0x308   : > { %v3525_v36 = vsel %vm3414_vm4, %v20784_v1, %v3524_v9  ;;  %v3759_v47 = vadd.f32 %v3527_v57, %v3175_v54  ;;  %v20376_v46 = vrot.slane %v15971_v58, 5  ;;  %v15985_v30 = vmul.f32 %v15280_v55, %v20783_v35 }
 0x309   : > { %v3758_v62 = vadd.f32 %v3525_v36, %v3174_v29  ;;  %v4305_v1 = vsel %vm4194_vm5, %v20785_v32, %v4304_v51  ;;  %v4307_v9 = vsel %vm4194_vm5, %v4304_v51, %v4306_v33  ;;  %v20786_v29 = vrot.slane %v15852_v59, 5 }
 0x30a   : > { %v5471_v54 = vrot.slane %v5223_v48, 6  ;;  %v3955_v36 = vadd.f32 %v3859_v43, %v3759_v47  ;;  %v4891_v2 = vsel %vm4778_vm6, %v4888_v5, %v20376_v46  ;;  %v20375_v57 = vrot.slane %v15985_v30, 6 }
 0x30b   : > { %v3954_v45 = vadd.f32 %v3858_v50, %v3758_v62  ;;  %v4889_v26 = vsel %vm4778_vm6, %v20786_v29, %v4888_v5  ;;  %v1070_v55 = vadd.f32 %v15884_v49, %v15248_v53  ;;  %v20787_v62 = vrot.slane %v15863_v31, 6 }
 0x30c   : > { %v1062_v59 = vadd.f32 %v15884_v49, %v15255_v44  ;;  %v1329_v47 = vmul.f32 %v12685_v7, %v14967_v18  ;;  %v4539_v43 = vadd.f32 %v4307_v9, %v3955_v36  ;;  %v5474_v48 = vsel %vm732_vm0, %v5471_v54, %v20375_v57 }
 0x30d   : > { %v4538_v50 = vadd.f32 %v4305_v1, %v3954_v45  ;;  %v5472_v51 = vsel %vm732_vm0, %v20787_v62, %v5471_v54  ;;  %v16009_v5 = vmax.f32 %v1070_v55, 0.0  ;;  %v1330_v53 = vmul.f32 %v12685_v7, %v15086_v22 }
 0x30e   : > { %v16013_v31 = vmax.f32 %v1062_v59, 0.0  ;;  %v1526_v32 = vmul.f32 %v12690_v12, %v15086_v22  ;;  %v16019_v44 = vmul.f32 %v12690_v12, %v20782_v21  ;;  %v5123_v18 = vadd.f32 %v4891_v2, %v4539_v43 }
 0x30f   : > { %20788 = vst [vmem:[#allocation17_spill] sm:$0xff] %v16009_v5  ;;  %v5122_v45 = vadd.f32 %v4889_v26, %v4538_v50  ;;  %v2110_v1 = vmul.f32 %v12692_v13, %v15086_v22  ;;  %v16025_v9 = vmul.f32 %v12692_v13, %v20782_v21  ;;  %v2694_v29 = vmul.f32 %v12694_v14, %v20782_v21 }
 0x310   : > { %v1777_v54 = vrot.slane %v1526_v32, 1  ;;  %v20379_v36 = vrot.slane %v16019_v44, 1  ;;  %v16032_v55 = vmul.f32 %v12694_v14, %v20783_v35  ;;  %v5706_v50 = vadd.f32 %v5474_v48, %v5123_v18 }
 0x311   : > { %v5705_v26 = vadd.f32 %v5472_v51, %v5122_v45  ;;  %v2361_v2 = vrot.slane %v2110_v1, 2  ;;  %v20378_v62 = vrot.slane %v16025_v9, 2  ;;  %v2944_v22 = vrot.slane %v2694_v29, 6 }
 0x312   : > { %v20789_v43 = vrot.slane %v15905_v39, 1  ;;  %v1780_v51 = vsel %vm1663_vm2, %v1777_v54, %v20379_v36  ;;  %v20377_v45 = vrot.slane %v16032_v55, 6  ;;  %v5806_v32 = vadd.f32 %v15343_v52, %v5706_v50 }
 0x313   : > { %v5805_v59 = vadd.f32 %v15343_v52, %v5705_v26  ;;  %v2010_v48 = vadd.f32 %v1780_v51, %v1330_v53  ;;  %v20790_v18 = vrot.slane %v15911_v17, 2  ;;  %v2364_v39 = vsel %vm2247_vm3, %v2361_v2, %v20378_v62  ;;  %v16058_v53 = vpop.f32.mrb[88].mxu0 }
 0x314   : > { %v1778_v57 = vsel %vm1663_vm2, %v20789_v43, %v1777_v54  ;;  %v20791_v26 = vrot.slane %v15917_v25, 6  ;;  %v2947_v54 = vsel %vm732_vm0, %v2944_v22, %v20377_v45  ;;  %v5902_v52 = vmax.f32 %v5806_v32, 0.0 }
 0x315   : > { %v2009_v46 = vadd.f32 %v1778_v57, %v1329_v47  ;;  %v2362_v1 = vsel %vm2247_vm3, %v20790_v18, %v2361_v2  ;;  %v5901_v29 = vmax.f32 %v5805_v59, 0.0  ;;  %v2594_v47 = vadd.f32 %v2364_v39, %v2010_v48 }
 0x316   : > { %v2945_v43 = vsel %vm732_vm0, %v20791_v26, %v2944_v22  ;;  %v3277_v17 = vmul.f32 %v12696_v16, %v20782_v21  ;;  %v16062_v50 = vmul.f32 %v12696_v16, %v20783_v35  ;;  %v3860_v25 = vmul.f32 %v12699_v19, %v20782_v21 }
 0x317   : > { %v2593_v57 = vadd.f32 %v2362_v1, %v2009_v46  ;;  %v3861_v2 = vmul.f32 %v12699_v19, %v20783_v35  ;;  %v4057_v22 = vmul.f32 %v12702_v23, %v15202_v61  ;;  %v16070_v46 = vpop.f32.mrb[89].mxu0  ;;  %v5970_v59 = vpack.c.bf16 %v5902_v52, %v5901_v29 }
 0x318   : > { %20792 = vst [vmem:[#allocation12_spill] sm:$0xff] %v16070_v46  ;;  %v3177_v32 = vadd.f32 %v2947_v54, %v2594_v47  ;;  %v3528_v48 = vrot.slane %v3277_v17, 7  ;;  %v3530_v18 = vrot.slane %v16062_v50, 7  ;;  %v16075_v1 = vmul.f32 %v12702_v23, %v15321_v63 }
 0x319   : > { %v3176_v51 = vadd.f32 %v2945_v43, %v2593_v57  ;;  %v4308_v39 = vrot.slane %v4057_v22, 4  ;;  %v4641_v26 = vmul.f32 %v12704_v24, %v15202_v61  ;;  %12246 = vmatmul.mubr.msk.bf16.gmra.mrb[52].mxu1 %vm6011_vm7, %v5970_v59  ;;  %v16085_v29 = vmul.f32 %v12704_v24, %v15321_v63  ;;  %v16090_v43 = vld [vmem:[%s20216_s3 + $0x8] ss:$0 sm:$0xff] }
 0x31a   : > { %v3529_v45 = vsel %vm3414_vm4, %v3526_v11, %v3528_v48  ;;  %v5225_v54 = vmul.f32 %v16090_v43, %v15202_v61  ;;  %v16096_v52 = vmul.f32 %v16090_v43, %v15321_v63  ;;  %v3531_v15 = vsel %vm3414_vm4, %v3528_v48, %v3530_v18 }
 0x31b   : > { %v3760_v11 = vadd.f32 %v3529_v45, %v3176_v51  ;;  %v4309_v57 = vsel %vm4194_vm5, %v4306_v33, %v4308_v39  ;;  %v4310_v47 = vrot.slane %v16075_v1, 4  ;;  %v3761_v17 = vadd.f32 %v3531_v15, %v3177_v32 }
 0x31c   : > { %v4892_v22 = vrot.slane %v4641_v26, 5  ;;  %v4894_v59 = vrot.slane %v16085_v29, 5  ;;  %v5475_v62 = vrot.slane %v5225_v54, 6  ;;  %v20381_v46 = vrot.slane %v16096_v52, 6 }
 0x31d   : > { %v3956_v36 = vadd.f32 %v3860_v25, %v3760_v11  ;;  %v4311_v5 = vsel %vm4194_vm5, %v4308_v39, %v4310_v47  ;;  %v1083_v45 = vadd.f32 %v15884_v49, %v15374_v6  ;;  %v3957_v4 = vadd.f32 %v3861_v2, %v3761_v17 }
 0x31e   : > { %v20793_v33 = vrot.slane %v15971_v58, 5  ;;  %v4895_v32 = vsel %vm4778_vm6, %v4892_v22, %v4894_v59  ;;  %v20794_v25 = vrot.slane %v15985_v30, 6  ;;  %v5478_v39 = vsel %vm732_vm0, %v5475_v62, %v20381_v46 }
 0x31f   : > { %v4540_v26 = vadd.f32 %v4309_v57, %v3956_v36  ;;  %v16124_v54 = vmax.f32 %v1083_v45, 0.0  ;;  %v1075_v6 = vadd.f32 %v15884_v49, %v15379_v37  ;;  %v4541_v58 = vadd.f32 %v4311_v5, %v3957_v4 }
 0x320   : > { %v4893_v51 = vsel %vm4778_vm6, %v20793_v33, %v4892_v22  ;;  %v5476_v48 = vsel %vm732_vm0, %v20794_v25, %v5475_v62  ;;  %v1331_v2 = vmul.f32 %v12685_v7, %v20782_v21  ;;  %v1332_v15 = vmul.f32 %v12685_v7, %v20783_v35 }
 0x321   : > { %v1528_v30 = vmul.f32 %v12690_v12, %v20783_v35  ;;  %v5124_v36 = vadd.f32 %v4893_v51, %v4540_v26  ;;  %v16134_v11 = vmax.f32 %v1075_v6, 0.0  ;;  %v16138_v62 = vmul.f32 %v12690_v12, %v15202_v61  ;;  %v16160_v6 = vld [vmem:[%s20216_s3 + $0xa] ss:$0 sm:$0xff] }
 0x322   : > { %v2112_v37 = vmul.f32 %v12692_v13, %v20783_v35  ;;  %v5125_v5 = vadd.f32 %v4895_v32, %v4541_v58  ;;  %v16144_v21 = vmul.f32 %v12692_v13, %v15202_v61  ;;  %v2696_v17 = vmul.f32 %v12694_v14, %v15202_v61 }
 0x323   : > { %v1781_v57 = vrot.slane %v1528_v30, 1  ;;  %v5707_v22 = vadd.f32 %v5476_v48, %v5124_v36  ;;  %v20384_v45 = vrot.slane %v16138_v62, 1  ;;  %v16151_v33 = vmul.f32 %v12694_v14, %v15321_v63 }
 0x324   : > { %v2365_v4 = vrot.slane %v2112_v37, 2  ;;  %v5708_v51 = vadd.f32 %v5478_v39, %v5125_v5  ;;  %v20795_v35 = vrot.slane %v16019_v44, 1  ;;  %v20383_v25 = vrot.slane %v16144_v21, 2 }
 0x325   : > { %v2948_v26 = vrot.slane %v2696_v17, 6  ;;  %v5807_v48 = vadd.f32 %v16160_v6, %v5707_v22  ;;  %v1784_v58 = vsel %vm1663_vm2, %v1781_v57, %v20384_v45  ;;  %v20796_v39 = vrot.slane %v16025_v9, 2 }
 0x326   : > { %v1782_v32 = vsel %vm1663_vm2, %v20795_v35, %v1781_v57  ;;  %v5808_v36 = vadd.f32 %v16160_v6, %v5708_v51  ;;  %v2012_v37 = vadd.f32 %v1784_v58, %v1332_v15  ;;  %v2368_v5 = vsel %vm2247_vm3, %v2365_v4, %v20383_v25  ;;  %v16185_v51 = vpop.f32.mrb[90].mxu0 }
 0x327   : > { %v2011_v30 = vadd.f32 %v1782_v32, %v1331_v2  ;;  %v2366_v44 = vsel %vm2247_vm3, %v20796_v39, %v2365_v4  ;;  %v20797_v17 = vrot.slane %v16032_v55, 6  ;;  %v5903_v35 = vmax.f32 %v5807_v48, 0.0  ;;  %v16192_v39 = vpop.f32.mrb[91].mxu0 }
 0x328   : > { %v20382_v57 = vrot.slane %v16151_v33, 6  ;;  %v3279_v9 = vmul.f32 %v12696_v16, %v15202_v61  ;;  %v5904_v2 = vmax.f32 %v5808_v36, 0.0  ;;  %v2596_v32 = vadd.f32 %v2368_v5, %v2012_v37 }
 0x329   : > { %v2949_v22 = vsel %vm732_vm0, %v20797_v17, %v2948_v26  ;;  %v2595_v46 = vadd.f32 %v2366_v44, %v2011_v30  ;;  %v16181_v15 = vmul.f32 %v12696_v16, %v15321_v63  ;;  %v3862_v4 = vmul.f32 %v12699_v19, %v15202_v61 }
 0x32a   : > { %v2951_v55 = vsel %vm732_vm0, %v2948_v26, %v20382_v57  ;;  %v3532_v58 = vrot.slane %v3279_v9, 7  ;;  %v3863_v30 = vmul.f32 %v12699_v19, %v15321_v63  ;;  %v5971_v44 = vpack.c.bf16 %v5904_v2, %v5903_v35 }
 0x32b   : > { %v3178_v48 = vadd.f32 %v2949_v22, %v2595_v46  ;;  %v3179_v36 = vadd.f32 %v2951_v55, %v2596_v32  ;;  %v3534_v37 = vrot.slane %v16181_v15, 7  ;;  %v4059_v5 = vmul.f32 %v12702_v23, %v15192_v27 }
 0x32c   : > { %v3533_v17 = vsel %vm3414_vm4, %v3530_v18, %v3532_v58  ;;  %v16202_v46 = vmul.f32 %v12702_v23, %v15317_v8  ;;  %v4643_v26 = vmul.f32 %v12704_v24, %v15192_v27  ;;  %v16208_v22 = vmul.f32 %v12704_v24, %v15317_v8  ;;  %12249 = vmatprep.mubr.msk.bf16.mxu1 %vm6011_vm7, %v5971_v44 }
 0x32d   : > { %v3535_v35 = vsel %vm3414_vm4, %v3532_v58, %v3534_v37  ;;  %v3762_v50 = vadd.f32 %v3533_v17, %v3178_v48  ;;  %v4312_v9 = vrot.slane %v4059_v5, 4  ;;  %v5227_v18 = vmul.f32 %v16090_v43, %v15192_v27 }
 0x32e   : > { %v3763_v2 = vadd.f32 %v3535_v35, %v3179_v36  ;;  %v4314_v32 = vrot.slane %v16202_v46, 4  ;;  %v4896_v55 = vrot.slane %v4643_v26, 5  ;;  %v20386_v57 = vrot.slane %v16208_v22, 5 }
 0x32f   : > { %v3958_v25 = vadd.f32 %v3862_v4, %v3762_v50  ;;  %v4313_v44 = vsel %vm4194_vm5, %v4310_v47, %v4312_v9  ;;  %v16223_v45 = vmul.f32 %v16090_v43, %v15317_v8  ;;  %v5479_v48 = vrot.slane %v5227_v18, 6 }
 0x330   : > { %v3959_v58 = vadd.f32 %v3863_v30, %v3763_v2  ;;  %v4315_v36 = vsel %vm4194_vm5, %v4312_v9, %v4314_v32  ;;  %v4897_v5 = vsel %vm4778_vm6, %v4894_v59, %v4896_v55  ;;  %v4899_v1 = vsel %vm4778_vm6, %v4896_v55, %v20386_v57 }
 0x331   : > { %v4542_v4 = vadd.f32 %v4313_v44, %v3958_v25  ;;  %v20798_v47 = vrot.slane %v16096_v52, 6  ;;  %v20385_v26 = vrot.slane %v16223_v45, 6  ;;  %v1086_v30 = vadd.f32 %v15884_v49, %v15483_v38 }
 0x332   : > { %v4543_v35 = vadd.f32 %v4315_v36, %v3959_v58  ;;  %v1078_v29 = vadd.f32 %v15884_v49, %v15493_v10  ;;  %v1333_v59 = vmul.f32 %v12685_v7, %v15202_v61  ;;  %v1334_v50 = vmul.f32 %v12685_v7, %v15321_v63 }
 0x333   : > { %v5480_v17 = vsel %vm732_vm0, %v20798_v47, %v5479_v48  ;;  %v5126_v25 = vadd.f32 %v4897_v5, %v4542_v4  ;;  %v5482_v52 = vsel %vm732_vm0, %v5479_v48, %v20385_v26  ;;  %v16249_v9 = vmax.f32 %v1086_v30, 0.0 }
 0x334   : > { %v1530_v38 = vmul.f32 %v12690_v12, %v15321_v63  ;;  %v5127_v18 = vadd.f32 %v4899_v1, %v4543_v35  ;;  %v16253_v2 = vmax.f32 %v1078_v29, 0.0  ;;  %v16257_v10 = vmul.f32 %v12690_v12, %v15192_v27 }
 0x335   : > { %v2114_v61 = vmul.f32 %v12692_v13, %v15321_v63  ;;  %v5709_v55 = vadd.f32 %v5480_v17, %v5126_v25  ;;  %v16263_v48 = vmul.f32 %v12692_v13, %v15192_v27  ;;  %v2698_v58 = vmul.f32 %v12694_v14, %v15192_v27 }
 0x336   : > { %v1785_v44 = vrot.slane %v1530_v38, 1  ;;  %v5710_v36 = vadd.f32 %v5482_v52, %v5127_v18  ;;  %v1787_v5 = vrot.slane %v16257_v10, 1  ;;  %v16270_v4 = vmul.f32 %v12694_v14, %v15317_v8 }
 0x337   : > { %v2369_v1 = vrot.slane %v2114_v61, 2  ;;  %v5809_v47 = vadd.f32 %v16160_v6, %v5709_v55  ;;  %v20799_v63 = vrot.slane %v16138_v62, 1  ;;  %v20388_v30 = vrot.slane %v16263_v48, 2 }
 0x338   : > { %v2952_v35 = vrot.slane %v2698_v58, 6  ;;  %v5810_v29 = vadd.f32 %v16160_v6, %v5710_v36  ;;  %v1788_v25 = vsel %vm1663_vm2, %v1785_v44, %v1787_v5  ;;  %v20800_v38 = vrot.slane %v16144_v21, 2 }
 0x339   : > { %v1786_v17 = vsel %vm1663_vm2, %v20799_v63, %v1785_v44  ;;  %v5905_v61 = vmax.f32 %v5809_v47, 0.0  ;;  %v2014_v55 = vadd.f32 %v1788_v25, %v1334_v50  ;;  %v2372_v62 = vsel %vm2247_vm3, %v2369_v1, %v20388_v30 }
 0x33a   : > { %v2013_v52 = vadd.f32 %v1786_v17, %v1333_v59  ;;  %v2370_v18 = vsel %vm2247_vm3, %v20800_v38, %v2369_v1  ;;  %v20801_v63 = vrot.slane %v16151_v33, 6  ;;  %v5906_v36 = vmax.f32 %v5810_v29, 0.0  ;;  %v16301_v1 = vpop.f32.mrb[92].mxu0 }
 0x33b   : > { %v20387_v57 = vrot.slane %v16270_v4, 6  ;;  %v3281_v59 = vmul.f32 %v12696_v16, %v15192_v27  ;;  %v2598_v21 = vadd.f32 %v2372_v62, %v2014_v55  ;;  %v16295_v44 = vmul.f32 %v12696_v16, %v15317_v8 }
 0x33c   : > { %v2953_v58 = vsel %vm732_vm0, %v20801_v63, %v2952_v35  ;;  %v2597_v26 = vadd.f32 %v2370_v18, %v2013_v52  ;;  %v3864_v50 = vmul.f32 %v12699_v19, %v15192_v27  ;;  %v3865_v33 = vmul.f32 %v12699_v19, %v15317_v8  ;;  %v16306_v52 = vpop.f32.mrb[93].mxu0 }
 0x33d   : > { %v5972_v47 = vpack.c.bf16 %v5906_v36, %v5905_v61  ;;  %v2955_v17 = vsel %vm732_vm0, %v2952_v35, %v20387_v57  ;;  %v3536_v25 = vrot.slane %v3281_v59, 7  ;;  %v20392_v18 = vrot.slane %v16295_v44, 7 }
 0x33e   : > { %v3180_v29 = vadd.f32 %v2953_v58, %v2597_v26  ;;  %v3181_v38 = vadd.f32 %v2955_v17, %v2598_v21  ;;  %v4061_v55 = vmul.f32 %v12702_v23, %v15438_v41  ;;  %v16313_v62 = vmul.f32 %v12702_v23, %v15552_v28 }
 0x33f   : > { %12250 = vmatmul.mubr.msk.bf16.gmra.mrb[56].mxu1 %vm6011_vm7, %v5972_v47  ;;  %v3537_v35 = vsel %vm3414_vm4, %v3534_v37, %v3536_v25  ;;  %v4645_v26 = vmul.f32 %v12704_v24, %v15438_v41  ;;  %v16323_v61 = vmul.f32 %v12704_v24, %v15552_v28  ;;  %v5229_v63 = vmul.f32 %v16090_v43, %v15438_v41 }
 0x340   : > { %v3539_v58 = vsel %vm3414_vm4, %v3536_v25, %v20392_v18  ;;  %v3764_v36 = vadd.f32 %v3537_v35, %v3180_v29  ;;  %v4316_v59 = vrot.slane %v4061_v55, 4  ;;  %v20391_v15 = vrot.slane %v16313_v62, 4 }
 0x341   : > { %v3765_v21 = vadd.f32 %v3539_v58, %v3181_v38  ;;  %v4900_v37 = vrot.slane %v4645_v26, 5  ;;  %v20390_v47 = vrot.slane %v16323_v61, 5  ;;  %v16334_v17 = vmul.f32 %v16090_v43, %v15552_v28 }
 0x342   : > { %v3960_v57 = vadd.f32 %v3864_v50, %v3764_v36  ;;  %v4317_v30 = vsel %vm4194_vm5, %v4314_v32, %v4316_v59  ;;  %v4319_v29 = vsel %vm4194_vm5, %v4316_v59, %v20391_v15  ;;  %v5483_v25 = vrot.slane %v5229_v63, 6  ;;  %v20804_v36 = vld [vmem:[#allocation10_spill] sm:$0xff]  ;;  %v20805_v63 = vld [vmem:[#allocation13_spill] sm:$0xff] }
 0x343   : > { %v3961_v55 = vadd.f32 %v3865_v33, %v3765_v21  ;;  %v20802_v38 = vrot.slane %v16208_v22, 5  ;;  %v4903_v26 = vsel %vm4778_vm6, %v4900_v37, %v20390_v47  ;;  %v20389_v50 = vrot.slane %v16334_v17, 6 }
 0x344   : > { %v4544_v58 = vadd.f32 %v4317_v30, %v3960_v57  ;;  %v20803_v46 = vrot.slane %v16223_v45, 6  ;;  %v1099_v59 = vadd.f32 %v15884_v49, %v20804_v36  ;;  %v1091_v33 = vadd.f32 %v15884_v49, %v20805_v63 }
 0x345   : > { %v4901_v35 = vsel %vm4778_vm6, %v20802_v38, %v4900_v37  ;;  %v4545_v22 = vadd.f32 %v4319_v29, %v3961_v55  ;;  %v5486_v21 = vsel %vm732_vm0, %v5483_v25, %v20389_v50  ;;  %v1335_v37 = vmul.f32 %v12685_v7, %v15192_v27 }
 0x346   : > { %v5484_v32 = vsel %vm732_vm0, %v20803_v46, %v5483_v25  ;;  %v1336_v57 = vmul.f32 %v12685_v7, %v15317_v8  ;;  %v5128_v45 = vadd.f32 %v4901_v35, %v4544_v58  ;;  %v16363_v30 = vmax.f32 %v1099_v59, 0.0 }
 0x347   : > { %v16365_v38 = vmax.f32 %v1091_v33, 0.0  ;;  %v1532_v46 = vmul.f32 %v12690_v12, %v15317_v8  ;;  %v5129_v36 = vadd.f32 %v4903_v26, %v4545_v22  ;;  %v16371_v29 = vmul.f32 %v12690_v12, %v15438_v41 }
 0x348   : > { %20806 = vst [vmem:[#allocation7_spill] sm:$0xff] %v16363_v30  ;;  %v2116_v25 = vmul.f32 %v12692_v13, %v15317_v8  ;;  %v16377_v27 = vmul.f32 %v12692_v13, %v15438_v41  ;;  %v5711_v55 = vadd.f32 %v5484_v32, %v5128_v45  ;;  %v2700_v58 = vmul.f32 %v12694_v14, %v15438_v41 }
 0x349   : > { %20807 = vst [vmem:[#allocation6_spill] sm:$0xff] %v16365_v38  ;;  %v1789_v35 = vrot.slane %v1532_v46, 1  ;;  %v16383_v59 = vmul.f32 %v12694_v14, %v15552_v28  ;;  %v5712_v26 = vadd.f32 %v5486_v21, %v5129_v36  ;;  %v20395_v63 = vrot.slane %v16371_v29, 1 }
 0x34a   : > { %v2373_v33 = vrot.slane %v2116_v25, 2  ;;  %v20394_v22 = vrot.slane %v16377_v27, 2  ;;  %v5811_v8 = vadd.f32 %v16160_v6, %v5711_v55  ;;  %v2956_v45 = vrot.slane %v2700_v58, 6 }
 0x34b   : > { %v1790_v32 = vsel %vm1663_vm2, %v1787_v5, %v1789_v35  ;;  %v20393_v46 = vrot.slane %v16383_v59, 6  ;;  %v5812_v50 = vadd.f32 %v16160_v6, %v5712_v26  ;;  %v1792_v21 = vsel %vm1663_vm2, %v1789_v35, %v20395_v63  ;;  %v16410_v35 = vpop.f32.mrb[94].mxu0 }
 0x34c   : > { %v2015_v36 = vadd.f32 %v1790_v32, %v1335_v37  ;;  %v20808_v25 = vrot.slane %v16263_v48, 2  ;;  %v5907_v15 = vmax.f32 %v5811_v8, 0.0  ;;  %v2016_v55 = vadd.f32 %v1792_v21, %v1336_v57  ;;  %v20810_v21 = vld [vmem:[#allocation14_spill] sm:$0xff] }
 0x34d   : > { %v2376_v10 = vsel %vm2247_vm3, %v2373_v33, %v20394_v22  ;;  %v20809_v5 = vrot.slane %v16270_v4, 6  ;;  %v5908_v26 = vmax.f32 %v5812_v50, 0.0  ;;  %v2959_v37 = vsel %vm732_vm0, %v2956_v45, %v20393_v46  ;;  %v16420_v50 = vpop.f32.mrb[95].mxu0 }
 0x34e   : > { %v2374_v47 = vsel %vm2247_vm3, %v20808_v25, %v2373_v33  ;;  %v3283_v48 = vmul.f32 %v12696_v16, %v15438_v41  ;;  %v2600_v57 = vadd.f32 %v2376_v10, %v2016_v55  ;;  %v16414_v8 = vmul.f32 %v12696_v16, %v15552_v28  ;;  %v20811_v10 = vld [vmem:[#allocation5_spill] sm:$0xff] }
 0x34f   : > { %v2957_v58 = vsel %vm732_vm0, %v20809_v5, %v2956_v45  ;;  %v2599_v18 = vadd.f32 %v2374_v47, %v2015_v36  ;;  %v3866_v4 = vmul.f32 %v12699_v19, %v15438_v41  ;;  %v3867_v47 = vmul.f32 %v12699_v19, %v15552_v28 }
 0x350   : > { %v5973_v33 = vpack.c.bf16 %v5908_v26, %v5907_v15  ;;  %v3540_v45 = vrot.slane %v3283_v48, 7  ;;  %v4063_v36 = vmul.f32 %v12702_v23, %v20810_v21  ;;  %v3183_v25 = vadd.f32 %v2959_v37, %v2600_v57 }
 0x351   : > { %v3182_v32 = vadd.f32 %v2957_v58, %v2599_v18  ;;  %v3542_v55 = vrot.slane %v16414_v8, 7  ;;  %v16427_v5 = vmul.f32 %v12702_v23, %v20811_v10  ;;  %v4647_v46 = vmul.f32 %v12704_v24, %v20810_v21 }
 0x352   : > { %12253 = vmatprep.mubr.msk.bf16.mxu1 %vm6011_vm7, %v5973_v33  ;;  %v20812_v22 = vrot.slane %v16295_v44, 7  ;;  %v4320_v15 = vrot.slane %v4063_v36, 4  ;;  %v16437_v58 = vmul.f32 %v12704_v24, %v20811_v10  ;;  %v5231_v26 = vmul.f32 %v16090_v43, %v20810_v21 }
 0x353   : > { %v3543_v37 = vsel %vm3414_vm4, %v3540_v45, %v3542_v55  ;;  %v20400_v57 = vrot.slane %v16427_v5, 4  ;;  %v4904_v33 = vrot.slane %v4647_v46, 5  ;;  %v20813_v44 = vrot.slane %v16313_v62, 4 }
 0x354   : > { %v3541_v18 = vsel %vm3414_vm4, %v20812_v22, %v3540_v45  ;;  %v3767_v63 = vadd.f32 %v3543_v37, %v3183_v25  ;;  %v20399_v36 = vrot.slane %v16437_v58, 5  ;;  %v16451_v30 = vmul.f32 %v16090_v43, %v20811_v10 }
 0x355   : > { %v3766_v48 = vadd.f32 %v3541_v18, %v3182_v32  ;;  %v4321_v22 = vsel %vm4194_vm5, %v20813_v44, %v4320_v15  ;;  %v4323_v45 = vsel %vm4194_vm5, %v4320_v15, %v20400_v57  ;;  %v20814_v32 = vrot.slane %v16323_v61, 5 }
 0x356   : > { %v5487_v25 = vrot.slane %v5231_v26, 6  ;;  %v3963_v18 = vadd.f32 %v3867_v47, %v3767_v63  ;;  %v4907_v62 = vsel %vm4778_vm6, %v4904_v33, %v20399_v36  ;;  %v20398_v37 = vrot.slane %v16451_v30, 6 }
 0x357   : > { %v3962_v38 = vadd.f32 %v3866_v4, %v3766_v48  ;;  %v4905_v46 = vsel %vm4778_vm6, %v20814_v32, %v4904_v33  ;;  %v1102_v44 = vadd.f32 %v15884_v49, %v15714_v34  ;;  %v20815_v48 = vrot.slane %v16334_v17, 6 }
 0x358   : > { %v1094_v61 = vadd.f32 %v15884_v49, %v15721_v0  ;;  %v1337_v63 = vmul.f32 %v12685_v7, %v15438_v41  ;;  %v4547_v47 = vadd.f32 %v4323_v45, %v3963_v18  ;;  %v5490_v26 = vsel %vm732_vm0, %v5487_v25, %v20398_v37 }
 0x359   : > { %v4546_v4 = vadd.f32 %v4321_v22, %v3962_v38  ;;  %v5488_v15 = vsel %vm732_vm0, %v20815_v48, %v5487_v25  ;;  %v16475_v33 = vmax.f32 %v1102_v44, 0.0  ;;  %v1338_v34 = vmul.f32 %v12685_v7, %v15552_v28 }
 0x35a   : > { %v16479_v17 = vmax.f32 %v1094_v61, 0.0  ;;  %v1534_v22 = vmul.f32 %v12690_v12, %v15552_v28  ;;  %v16485_v0 = vmul.f32 %v12690_v12, %v20810_v21  ;;  %v5131_v41 = vadd.f32 %v4907_v62, %v4547_v47 }
 0x35b   : > { %20816 = vst [vmem:[#allocation8_spill] sm:$0xff] %v16475_v33  ;;  %v5130_v38 = vadd.f32 %v4905_v46, %v4546_v4  ;;  %v2118_v45 = vmul.f32 %v12692_v13, %v15552_v28  ;;  %v16491_v32 = vmul.f32 %v12692_v13, %v20810_v21  ;;  %v2702_v46 = vmul.f32 %v12694_v14, %v20810_v21 }
 0x35c   : > { %v1793_v18 = vrot.slane %v1534_v22, 1  ;;  %v20403_v44 = vrot.slane %v16485_v0, 1  ;;  %v16498_v4 = vmul.f32 %v12694_v14, %v20811_v10  ;;  %v5714_v48 = vadd.f32 %v5490_v26, %v5131_v41 }
 0x35d   : > { %v5713_v25 = vadd.f32 %v5488_v15, %v5130_v38  ;;  %v2377_v62 = vrot.slane %v2118_v45, 2  ;;  %v20402_v61 = vrot.slane %v16491_v32, 2  ;;  %v2960_v28 = vrot.slane %v2702_v46, 6 }
 0x35e   : > { %v20817_v37 = vrot.slane %v16371_v29, 1  ;;  %v1796_v15 = vsel %vm1663_vm2, %v1793_v18, %v20403_v44  ;;  %v20401_v38 = vrot.slane %v16498_v4, 6  ;;  %v5814_v22 = vadd.f32 %v16160_v6, %v5714_v48 }
 0x35f   : > { %v5813_v47 = vadd.f32 %v16160_v6, %v5713_v25  ;;  %v2018_v26 = vadd.f32 %v1796_v15, %v1338_v34  ;;  %v20818_v41 = vrot.slane %v16377_v27, 2  ;;  %v2380_v29 = vsel %vm2247_vm3, %v2377_v62, %v20402_v61  ;;  %v16524_v34 = vpop.f32.mrb[96].mxu0 }
 0x360   : > { %v1794_v36 = vsel %vm1663_vm2, %v20817_v37, %v1793_v18  ;;  %v20819_v37 = vrot.slane %v16383_v59, 6  ;;  %v2963_v18 = vsel %vm732_vm0, %v2960_v28, %v20401_v38  ;;  %v5910_v48 = vmax.f32 %v5814_v22, 0.0  ;;  %20820 = vst [vmem:[#allocation10_spill] sm:$0xff] %v16524_v34 }
 0x361   : > { %v2017_v57 = vadd.f32 %v1794_v36, %v1337_v63  ;;  %v2378_v45 = vsel %vm2247_vm3, %v20818_v41, %v2377_v62  ;;  %v5909_v46 = vmax.f32 %v5813_v47, 0.0  ;;  %v2602_v63 = vadd.f32 %v2380_v29, %v2018_v26 }
 0x362   : > { %v2961_v25 = vsel %vm732_vm0, %v20819_v37, %v2960_v28  ;;  %v3285_v27 = vmul.f32 %v12696_v16, %v20810_v21  ;;  %v16528_v47 = vmul.f32 %v12696_v16, %v20811_v10  ;;  %v3868_v59 = vmul.f32 %v12699_v19, %v20810_v21 }
 0x363   : > { %v2601_v36 = vadd.f32 %v2378_v45, %v2017_v57  ;;  %v3869_v62 = vmul.f32 %v12699_v19, %v20811_v10  ;;  %v4065_v28 = vmul.f32 %v12702_v23, %v15668_v56  ;;  %v16536_v57 = vpop.f32.mrb[97].mxu0  ;;  %v5974_v15 = vpack.c.bf16 %v5910_v48, %v5909_v46 }
 0x364   : > { %20821 = vst [vmem:[#allocation13_spill] sm:$0xff] %v16536_v57  ;;  %v3185_v26 = vadd.f32 %v2963_v18, %v2602_v63  ;;  %v3544_v41 = vrot.slane %v3285_v27, 7  ;;  %v3546_v45 = vrot.slane %v16528_v47, 7  ;;  %v16541_v29 = vmul.f32 %v12702_v23, %v15782_v3 }
 0x365   : > { %v3184_v22 = vadd.f32 %v2961_v25, %v2601_v36  ;;  %v4324_v37 = vrot.slane %v4065_v28, 4  ;;  %v4649_v38 = vmul.f32 %v12704_v24, %v15668_v56  ;;  %12254 = vmatmul.mubr.msk.bf16.gmra.mrb[60].mxu1 %vm6011_vm7, %v5974_v15  ;;  %v16551_v46 = vmul.f32 %v12704_v24, %v15782_v3 }
 0x366   : > { %v3545_v61 = vsel %vm3414_vm4, %v3542_v55, %v3544_v41  ;;  %v5233_v25 = vmul.f32 %v16090_v43, %v15668_v56  ;;  %v16557_v18 = vmul.f32 %v16090_v43, %v15782_v3  ;;  %v3547_v48 = vsel %vm3414_vm4, %v3544_v41, %v3546_v45 }
 0x367   : > { %v3768_v36 = vadd.f32 %v3545_v61, %v3184_v22  ;;  %v20822_v8 = vrot.slane %v16427_v5, 4  ;;  %v4326_v63 = vrot.slane %v16541_v29, 4  ;;  %v3769_v27 = vadd.f32 %v3547_v48, %v3185_v26 }
 0x368   : > { %v4908_v28 = vrot.slane %v4649_v38, 5  ;;  %v4910_v15 = vrot.slane %v16551_v46, 5  ;;  %v5491_v44 = vrot.slane %v5233_v25, 6  ;;  %v5493_v34 = vrot.slane %v16557_v18, 6 }
 0x369   : > { %v4325_v55 = vsel %vm4194_vm5, %v20822_v8, %v4324_v37  ;;  %v3964_v33 = vadd.f32 %v3868_v59, %v3768_v36  ;;  %v4327_v57 = vsel %vm4194_vm5, %v4324_v37, %v4326_v63  ;;  %v1115_v61 = vadd.f32 %v15884_v49, %v15830_v60 }
 0x36a   : > { %v3965_v5 = vadd.f32 %v3869_v62, %v3769_v27  ;;  %v20823_v22 = vrot.slane %v16437_v58, 5  ;;  %v4911_v38 = vsel %vm4778_vm6, %v4908_v28, %v4910_v15  ;;  %v20824_v59 = vrot.slane %v16451_v30, 6 }
 0x36b   : > { %v4548_v25 = vadd.f32 %v4325_v55, %v3964_v33  ;;  %v5494_v37 = vsel %vm732_vm0, %v5491_v44, %v5493_v34  ;;  %v16585_v48 = vmax.f32 %v1115_v61, 0.0  ;;  %v1107_v60 = vadd.f32 %v15884_v49, %v15835_v40 }
 0x36c   : > { %v4909_v41 = vsel %vm4778_vm6, %v20823_v22, %v4908_v28  ;;  %v5492_v26 = vsel %vm732_vm0, %v20824_v59, %v5491_v44  ;;  %v4549_v58 = vadd.f32 %v4327_v57, %v3965_v5  ;;  %v1339_v62 = vmul.f32 %v12685_v7, %v20810_v21 }
 0x36d   : > { %v1340_v36 = vmul.f32 %v12685_v7, %v20811_v10  ;;  %v1536_v30 = vmul.f32 %v12690_v12, %v20811_v10  ;;  %v5132_v33 = vadd.f32 %v4909_v41, %v4548_v25  ;;  %v16595_v8 = vmax.f32 %v1107_v60, 0.0 }
 0x36e   : > { %v16599_v44 = vmul.f32 %v12690_v12, %v15668_v56  ;;  %v2120_v40 = vmul.f32 %v12692_v13, %v20811_v10  ;;  %v5133_v49 = vadd.f32 %v4911_v38, %v4549_v58  ;;  %v16605_v21 = vmul.f32 %v12692_v13, %v15668_v56 }
 0x36f   : > { %v1797_v57 = vrot.slane %v1536_v30, 1  ;;  %v2704_v55 = vmul.f32 %v12694_v14, %v15668_v56  ;;  %v5715_v27 = vadd.f32 %v5492_v26, %v5132_v33  ;;  %v16612_v5 = vmul.f32 %v12694_v14, %v15782_v3 }
 0x370   : > { %v20407_v28 = vrot.slane %v16599_v44, 1  ;;  %v2381_v61 = vrot.slane %v2120_v40, 2  ;;  %v5716_v22 = vadd.f32 %v5494_v37, %v5133_v49  ;;  %v20825_v10 = vrot.slane %v16485_v0, 1 }
 0x371   : > { %v20406_v38 = vrot.slane %v16605_v21, 2  ;;  %v2964_v59 = vrot.slane %v2704_v55, 6  ;;  %v5815_v25 = vadd.f32 %v16160_v6, %v5715_v27  ;;  %v20826_v58 = vrot.slane %v16491_v32, 2 }
 0x372   : > { %v1798_v41 = vsel %vm1663_vm2, %v20825_v10, %v1797_v57  ;;  %v1800_v26 = vsel %vm1663_vm2, %v1797_v57, %v20407_v28  ;;  %v5816_v37 = vadd.f32 %v16160_v6, %v5716_v22  ;;  %v20827_v40 = vrot.slane %v16498_v4, 6 }
 0x373   : > { %v2019_v60 = vadd.f32 %v1798_v41, %v1339_v62  ;;  %v2382_v30 = vsel %vm2247_vm3, %v20826_v58, %v2381_v61  ;;  %v2020_v33 = vadd.f32 %v1800_v26, %v1340_v36  ;;  %v2384_v0 = vsel %vm2247_vm3, %v2381_v61, %v20406_v38  ;;  %v16646_v26 = vpop.f32.mrb[98].mxu0 }
 0x374   : > { %v2965_v49 = vsel %vm732_vm0, %v20827_v40, %v2964_v59  ;;  %v5911_v55 = vmax.f32 %v5815_v25, 0.0  ;;  %v20405_v57 = vrot.slane %v16612_v5, 6  ;;  %v3287_v32 = vmul.f32 %v12696_v16, %v15668_v56 }
 0x375   : > { %v2603_v27 = vadd.f32 %v2382_v30, %v2019_v60  ;;  %v5912_v62 = vmax.f32 %v5816_v37, 0.0  ;;  %v2604_v10 = vadd.f32 %v2384_v0, %v2020_v33  ;;  %v16637_v36 = vmul.f32 %v12696_v16, %v15782_v3  ;;  %v20828_v37 = vld [vmem:[#allocation15_spill] sm:$0xff]  ;;  %v16651_v0 = vpop.f32.mrb[99].mxu0 }
 0x376   : > { %v3870_v61 = vmul.f32 %v12699_v19, %v15668_v56  ;;  %v2967_v4 = vsel %vm732_vm0, %v2964_v59, %v20405_v57  ;;  %v3548_v41 = vrot.slane %v3287_v32, 7  ;;  %v3871_v25 = vmul.f32 %v12699_v19, %v15782_v3 }
 0x377   : > { %v3186_v22 = vadd.f32 %v2965_v49, %v2603_v27  ;;  %v5975_v60 = vpack.c.bf16 %v5912_v62, %v5911_v55  ;;  %v3187_v58 = vadd.f32 %v2967_v4, %v2604_v10  ;;  %v3550_v30 = vrot.slane %v16637_v36, 7 }
 0x378   : > { %v4067_v33 = vmul.f32 %v12702_v23, %v20828_v37  ;;  %v3549_v59 = vsel %vm3414_vm4, %v3546_v45, %v3548_v41  ;;  %v16658_v40 = vmul.f32 %v12702_v23, %v15778_v42  ;;  %v4651_v49 = vmul.f32 %v12704_v24, %v20828_v37 }
 0x379   : > { %v16664_v55 = vmul.f32 %v12704_v24, %v15778_v42  ;;  %12257 = vmatprep.mubr.msk.bf16.mxu1 %vm6011_vm7, %v5975_v60  ;;  %v3551_v27 = vsel %vm3414_vm4, %v3548_v41, %v3550_v30  ;;  %v3770_v47 = vadd.f32 %v3549_v59, %v3186_v22  ;;  %v5235_v45 = vmul.f32 %v16090_v43, %v20828_v37 }
 0x37a   : > { %v4328_v32 = vrot.slane %v4067_v33, 4  ;;  %v3771_v62 = vadd.f32 %v3551_v27, %v3187_v58  ;;  %v20410_v10 = vrot.slane %v16658_v40, 4  ;;  %v4912_v4 = vrot.slane %v4651_v49, 5  ;;  %v20829_v49 = vld [vmem:[#allocation16_spill] sm:$0xff] }
 0x37b   : > { %v20409_v57 = vrot.slane %v16664_v55, 5  ;;  %v3966_v38 = vadd.f32 %v3870_v61, %v3770_v47  ;;  %v16679_v28 = vmul.f32 %v16090_v43, %v15778_v42  ;;  %v5495_v22 = vrot.slane %v5235_v45, 6 }
 0x37c   : > { %v4329_v60 = vsel %vm4194_vm5, %v4326_v63, %v4328_v32  ;;  %v3967_v41 = vadd.f32 %v3871_v25, %v3771_v62  ;;  %v4331_v58 = vsel %vm4194_vm5, %v4328_v32, %v20410_v10  ;;  %v4913_v33 = vsel %vm4778_vm6, %v4910_v15, %v4912_v4  ;;  %v16697_v25 = vld [vmem:[%s20216_s3 + $0x9] ss:$0 sm:$0xff] }
 0x37d   : > { %v4915_v29 = vsel %vm4778_vm6, %v4912_v4, %v20409_v57  ;;  %v4550_v61 = vadd.f32 %v4329_v60, %v3966_v38  ;;  %v5496_v63 = vsel %vm732_vm0, %v5493_v34, %v5495_v22  ;;  %v20408_v59 = vrot.slane %v16679_v28, 6 }
 0x37e   : > { %v1118_v46 = vadd.f32 %v16697_v25, %v15944_v20  ;;  %v4551_v15 = vadd.f32 %v4331_v58, %v3967_v41  ;;  %v1110_v27 = vadd.f32 %v16697_v25, %v20829_v49  ;;  %v1341_v38 = vmul.f32 %v12685_v7, %v15668_v56 }
 0x37f   : > { %v1342_v34 = vmul.f32 %v12685_v7, %v15782_v3  ;;  %v5134_v18 = vadd.f32 %v4913_v33, %v4550_v61  ;;  %v5498_v47 = vsel %vm732_vm0, %v5495_v22, %v20408_v59  ;;  %v1538_v20 = vmul.f32 %v12690_v12, %v15782_v3 }
 0x380   : > { %v16710_v32 = vmax.f32 %v1118_v46, 0.0  ;;  %v5135_v45 = vadd.f32 %v4915_v29, %v4551_v15  ;;  %v16714_v62 = vmax.f32 %v1110_v27, 0.0  ;;  %v16718_v4 = vmul.f32 %v12690_v12, %v20828_v37 }
 0x381   : > { %v2122_v56 = vmul.f32 %v12692_v13, %v15782_v3  ;;  %v5717_v60 = vadd.f32 %v5496_v63, %v5134_v18  ;;  %v1801_v41 = vrot.slane %v1538_v20, 1  ;;  %v16724_v22 = vmul.f32 %v12692_v13, %v20828_v37 }
 0x382   : > { %v2706_v58 = vmul.f32 %v12694_v14, %v20828_v37  ;;  %v5718_v33 = vadd.f32 %v5498_v47, %v5135_v45  ;;  %v1803_v29 = vrot.slane %v16718_v4, 1  ;;  %v16731_v46 = vmul.f32 %v12694_v14, %v15778_v42 }
 0x383   : > { %v2385_v61 = vrot.slane %v2122_v56, 2  ;;  %v5817_v15 = vadd.f32 %v16160_v6, %v5717_v60  ;;  %v20830_v3 = vrot.slane %v16599_v44, 1  ;;  %v20412_v49 = vrot.slane %v16724_v22, 2 }
 0x384   : > { %v2968_v27 = vrot.slane %v2706_v58, 6  ;;  %v5818_v18 = vadd.f32 %v16160_v6, %v5718_v33  ;;  %v1804_v47 = vsel %vm1663_vm2, %v1801_v41, %v1803_v29  ;;  %v20831_v45 = vrot.slane %v16605_v21, 2 }
 0x385   : > { %v1802_v63 = vsel %vm1663_vm2, %v20830_v3, %v1801_v41  ;;  %v5913_v59 = vmax.f32 %v5817_v15, 0.0  ;;  %v2022_v60 = vadd.f32 %v1804_v47, %v1342_v34  ;;  %v2388_v44 = vsel %vm2247_vm3, %v2385_v61, %v20412_v49 }
 0x386   : > { %v2021_v20 = vadd.f32 %v1802_v63, %v1341_v38  ;;  %v2386_v56 = vsel %vm2247_vm3, %v20831_v45, %v2385_v61  ;;  %v20832_v3 = vrot.slane %v16612_v5, 6  ;;  %v5914_v33 = vmax.f32 %v5818_v18, 0.0  ;;  %v20833_v45 = vld [vmem:[#allocation11_spill] sm:$0xff] }
 0x387   : > { %v20411_v10 = vrot.slane %v16731_v46, 6  ;;  %v3289_v38 = vmul.f32 %v12696_v16, %v20828_v37  ;;  %v2606_v21 = vadd.f32 %v2388_v44, %v2022_v60  ;;  %v16756_v41 = vmul.f32 %v12696_v16, %v15778_v42 }
 0x388   : > { %v2969_v58 = vsel %vm732_vm0, %v20832_v3, %v2968_v27  ;;  %v2605_v57 = vadd.f32 %v2386_v56, %v2021_v20  ;;  %v3872_v34 = vmul.f32 %v12699_v19, %v20828_v37  ;;  %v3873_v5 = vmul.f32 %v12699_v19, %v15778_v42 }
 0x389   : > { %v5976_v61 = vpack.c.bf16 %v5914_v33, %v5913_v59  ;;  %v2971_v15 = vsel %vm732_vm0, %v2968_v27, %v20411_v10  ;;  %v3552_v18 = vrot.slane %v3289_v38, 7  ;;  %v3554_v20 = vrot.slane %v16756_v41, 7 }
 0x38a   : > { %v3188_v63 = vadd.f32 %v2969_v58, %v2605_v57  ;;  %v3189_v47 = vadd.f32 %v2971_v15, %v2606_v21  ;;  %v4069_v56 = vmul.f32 %v12702_v23, %v20833_v45  ;;  %v16770_v60 = vmul.f32 %v12702_v23, %v16013_v31 }
 0x38b   : > { %12258 = vmatmul.mubr.msk.bf16.gmra.mrb[64].mxu1 %vm6011_vm7, %v5976_v61  ;;  %v3553_v59 = vsel %vm3414_vm4, %v3550_v30, %v3552_v18  ;;  %v4653_v57 = vmul.f32 %v12704_v24, %v20833_v45  ;;  %v16780_v27 = vmul.f32 %v12704_v24, %v16013_v31  ;;  %v5237_v44 = vmul.f32 %v16090_v43, %v20833_v45 }
 0x38c   : > { %v3555_v3 = vsel %vm3414_vm4, %v3552_v18, %v3554_v20  ;;  %v3772_v58 = vadd.f32 %v3553_v59, %v3188_v63  ;;  %v4332_v33 = vrot.slane %v4069_v56, 4  ;;  %v4334_v36 = vrot.slane %v16770_v60, 4 }
 0x38d   : > { %v3773_v38 = vadd.f32 %v3555_v3, %v3189_v47  ;;  %v4916_v30 = vrot.slane %v4653_v57, 5  ;;  %v4918_v21 = vrot.slane %v16780_v27, 5  ;;  %v16791_v61 = vmul.f32 %v16090_v43, %v16013_v31 }
 0x38e   : > { %v3968_v15 = vadd.f32 %v3872_v34, %v3772_v58  ;;  %v20834_v10 = vrot.slane %v16658_v40, 4  ;;  %v4335_v63 = vsel %vm4194_vm5, %v4332_v33, %v4334_v36  ;;  %v5499_v18 = vrot.slane %v5237_v44, 6  ;;  %v20837_v44 = vld [vmem:[#allocation12_spill] sm:$0xff] }
 0x38f   : > { %v3969_v56 = vadd.f32 %v3873_v5, %v3773_v38  ;;  %v20835_v47 = vrot.slane %v16664_v55, 5  ;;  %v4919_v43 = vsel %vm4778_vm6, %v4916_v30, %v4918_v21  ;;  %v20413_v34 = vrot.slane %v16791_v61, 6 }
 0x390   : > { %v4333_v49 = vsel %vm4194_vm5, %v20834_v10, %v4332_v33  ;;  %v20836_v40 = vrot.slane %v16679_v28, 6  ;;  %v1131_v3 = vadd.f32 %v16697_v25, %v16058_v53  ;;  %v1123_v5 = vadd.f32 %v16697_v25, %v20837_v44 }
 0x391   : > { %v4917_v59 = vsel %vm4778_vm6, %v20835_v47, %v4916_v30  ;;  %v4552_v57 = vadd.f32 %v4333_v49, %v3968_v15  ;;  %v4553_v55 = vadd.f32 %v4335_v63, %v3969_v56  ;;  %v5502_v58 = vsel %vm732_vm0, %v5499_v18, %v20413_v34 }
 0x392   : > { %v5500_v10 = vsel %vm732_vm0, %v20836_v40, %v5499_v18  ;;  %v1343_v33 = vmul.f32 %v12685_v7, %v20828_v37  ;;  %v1344_v49 = vmul.f32 %v12685_v7, %v15778_v42  ;;  %v16820_v38 = vmax.f32 %v1131_v3, 0.0 }
 0x393   : > { %v5136_v28 = vadd.f32 %v4917_v59, %v4552_v57  ;;  %v16822_v30 = vmax.f32 %v1123_v5, 0.0  ;;  %v1540_v53 = vmul.f32 %v12690_v12, %v15778_v42  ;;  %v5137_v15 = vadd.f32 %v4919_v43, %v4553_v55 }
 0x394   : > { %v16828_v63 = vmul.f32 %v12690_v12, %v20833_v45  ;;  %v2124_v18 = vmul.f32 %v12692_v13, %v15778_v42  ;;  %v16834_v37 = vmul.f32 %v12692_v13, %v20833_v45  ;;  %v2708_v59 = vmul.f32 %v12694_v14, %v20833_v45 }
 0x395   : > { %v5719_v56 = vadd.f32 %v5500_v10, %v5136_v28  ;;  %v1805_v47 = vrot.slane %v1540_v53, 1  ;;  %v16840_v57 = vmul.f32 %v12694_v14, %v16013_v31  ;;  %v5720_v43 = vadd.f32 %v5502_v58, %v5137_v15 }
 0x396   : > { %v1807_v40 = vrot.slane %v16828_v63, 1  ;;  %v2389_v3 = vrot.slane %v2124_v18, 2  ;;  %v20415_v44 = vrot.slane %v16834_v37, 2  ;;  %v2972_v5 = vrot.slane %v2708_v59, 6 }
 0x397   : > { %v5819_v42 = vadd.f32 %v16160_v6, %v5719_v56  ;;  %v1806_v10 = vsel %vm1663_vm2, %v1803_v29, %v1805_v47  ;;  %v20414_v55 = vrot.slane %v16840_v57, 6  ;;  %v5820_v28 = vadd.f32 %v16160_v6, %v5720_v43 }
 0x398   : > { %v1808_v58 = vsel %vm1663_vm2, %v1805_v47, %v1807_v40  ;;  %v2023_v53 = vadd.f32 %v1806_v10, %v1343_v33  ;;  %v20838_v15 = vrot.slane %v16724_v22, 2  ;;  %v2392_v4 = vsel %vm2247_vm3, %v2389_v3, %v20415_v44 }
 0x399   : > { %v5915_v34 = vmax.f32 %v5819_v42, 0.0  ;;  %v2024_v56 = vadd.f32 %v1808_v58, %v1344_v49  ;;  %v20839_v29 = vrot.slane %v16731_v46, 6  ;;  %v5916_v6 = vmax.f32 %v5820_v28, 0.0  ;;  %v20840_v58 = vld [vmem:[#allocation9_spill] sm:$0xff] }
 0x39a   : > { %v2390_v18 = vsel %vm2247_vm3, %v20838_v15, %v2389_v3  ;;  %v2975_v33 = vsel %vm732_vm0, %v2972_v5, %v20414_v55  ;;  %v3291_v22 = vmul.f32 %v12696_v16, %v20833_v45  ;;  %v16869_v49 = vmul.f32 %v12696_v16, %v16013_v31 }
 0x39b   : > { %v2973_v59 = vsel %vm732_vm0, %v20839_v29, %v2972_v5  ;;  %v2607_v43 = vadd.f32 %v2390_v18, %v2023_v53  ;;  %v2608_v47 = vadd.f32 %v2392_v4, %v2024_v56  ;;  %v3874_v3 = vmul.f32 %v12699_v19, %v20833_v45  ;;  %v20841_v18 = vld [vmem:[#allocation17_spill] sm:$0xff] }
 0x39c   : > { %v3875_v46 = vmul.f32 %v12699_v19, %v16013_v31  ;;  %v5977_v42 = vpack.c.bf16 %v5916_v6, %v5915_v34  ;;  %v3556_v28 = vrot.slane %v3291_v22, 7  ;;  %v4071_v5 = vmul.f32 %v12702_v23, %v20840_v58  ;;  %v16895_v6 = vld [vmem:[%s20216_s3 + $0x8] ss:$0 sm:$0xff] }
 0x39d   : > { %v3190_v10 = vadd.f32 %v2973_v59, %v2607_v43  ;;  %v3191_v53 = vadd.f32 %v2975_v33, %v2608_v47  ;;  %v3558_v15 = vrot.slane %v16869_v49, 7  ;;  %v16880_v56 = vmul.f32 %v12702_v23, %v20841_v18 }
 0x39e   : > { %v4655_v4 = vmul.f32 %v12704_v24, %v20840_v58  ;;  %12261 = vmatprep.mubr.msk.bf16.mxu1 %vm6011_vm7, %v5977_v42  ;;  %v3557_v34 = vsel %vm3414_vm4, %v3554_v20, %v3556_v28  ;;  %v4336_v29 = vrot.slane %v4071_v5, 4  ;;  %v16890_v59 = vmul.f32 %v12704_v24, %v20841_v18 }
 0x39f   : > { %v5239_v43 = vmul.f32 %v16895_v6, %v20840_v58  ;;  %v3559_v33 = vsel %vm3414_vm4, %v3556_v28, %v3558_v15  ;;  %v3774_v41 = vadd.f32 %v3557_v34, %v3190_v10  ;;  %v4338_v20 = vrot.slane %v16880_v56, 4 }
 0x3a0   : > { %v4920_v22 = vrot.slane %v4655_v4, 5  ;;  %v3775_v47 = vadd.f32 %v3559_v33, %v3191_v53  ;;  %v4337_v42 = vsel %vm4194_vm5, %v4334_v36, %v4336_v29  ;;  %v20417_v5 = vrot.slane %v16890_v59, 5 }
 0x3a1   : > { %v16909_v55 = vmul.f32 %v16895_v6, %v20841_v18  ;;  %v3970_v44 = vadd.f32 %v3874_v3, %v3774_v41  ;;  %v4339_v28 = vsel %vm4194_vm5, %v4336_v29, %v4338_v20  ;;  %v5503_v53 = vrot.slane %v5239_v43, 6 }
 0x3a2   : > { %v4921_v10 = vsel %vm4778_vm6, %v4918_v21, %v4920_v22  ;;  %v3971_v4 = vadd.f32 %v3875_v46, %v3775_v47  ;;  %v4923_v60 = vsel %vm4778_vm6, %v4920_v22, %v20417_v5  ;;  %v1134_v34 = vadd.f32 %v16697_v25, %v16185_v51 }
 0x3a3   : > { %v20416_v36 = vrot.slane %v16909_v55, 6  ;;  %v4554_v3 = vadd.f32 %v4337_v42, %v3970_v44  ;;  %v20842_v33 = vrot.slane %v16791_v61, 6  ;;  %v1126_v27 = vadd.f32 %v16697_v25, %v16192_v39 }
 0x3a4   : > { %v1345_v21 = vmul.f32 %v12685_v7, %v20833_v45  ;;  %v4555_v46 = vadd.f32 %v4339_v28, %v3971_v4  ;;  %v16933_v41 = vmax.f32 %v1134_v34, 0.0  ;;  %v1346_v51 = vmul.f32 %v12685_v7, %v16013_v31 }
 0x3a5   : > { %v5504_v29 = vsel %vm732_vm0, %v20842_v33, %v5503_v53  ;;  %v5506_v43 = vsel %vm732_vm0, %v5503_v53, %v20416_v36  ;;  %v5138_v44 = vadd.f32 %v4921_v10, %v4554_v3  ;;  %v16937_v61 = vmax.f32 %v1126_v27, 0.0  ;;  %v16962_v27 = vld [vmem:[%s20216_s3 + $0xa] ss:$0 sm:$0xff] }
 0x3a6   : > { %v1542_v22 = vmul.f32 %v12690_v12, %v16013_v31  ;;  %v16943_v39 = vmul.f32 %v12690_v12, %v20840_v58  ;;  %v5139_v45 = vadd.f32 %v4923_v60, %v4555_v46  ;;  %v2126_v47 = vmul.f32 %v12692_v13, %v16013_v31 }
 0x3a7   : > { %v16949_v42 = vmul.f32 %v12692_v13, %v20840_v58  ;;  %v2710_v28 = vmul.f32 %v12694_v14, %v20840_v58  ;;  %v5721_v10 = vadd.f32 %v5504_v29, %v5138_v44  ;;  %v16956_v34 = vmul.f32 %v12694_v14, %v20841_v18 }
 0x3a8   : > { %v1809_v53 = vrot.slane %v1542_v22, 1  ;;  %v20420_v4 = vrot.slane %v16943_v39, 1  ;;  %v5722_v3 = vadd.f32 %v5506_v43, %v5139_v45  ;;  %v2393_v60 = vrot.slane %v2126_v47, 2 }
 0x3a9   : > { %v20419_v33 = vrot.slane %v16949_v42, 2  ;;  %v2976_v31 = vrot.slane %v2710_v28, 6  ;;  %v5821_v46 = vadd.f32 %v16962_v27, %v5721_v10  ;;  %v20418_v43 = vrot.slane %v16956_v34, 6 }
 0x3aa   : > { %v1810_v29 = vsel %vm1663_vm2, %v1807_v40, %v1809_v53  ;;  %v1812_v44 = vsel %vm1663_vm2, %v1809_v53, %v20420_v4  ;;  %v5822_v22 = vadd.f32 %v16962_v27, %v5722_v3  ;;  %v20843_v28 = vrot.slane %v16834_v37, 2 }
 0x3ab   : > { %v2025_v45 = vadd.f32 %v1810_v29, %v1345_v21  ;;  %v2026_v47 = vadd.f32 %v1812_v44, %v1346_v51  ;;  %v5917_v5 = vmax.f32 %v5821_v46, 0.0  ;;  %v2396_v63 = vsel %vm2247_vm3, %v2393_v60, %v20419_v33 }
 0x3ac   : > { %v2394_v36 = vsel %vm2247_vm3, %v20843_v28, %v2393_v60  ;;  %v20844_v40 = vrot.slane %v16840_v57, 6  ;;  %v2979_v53 = vsel %vm732_vm0, %v2976_v31, %v20418_v43  ;;  %v5918_v3 = vmax.f32 %v5822_v22, 0.0 }
 0x3ad   : > { %v2609_v21 = vadd.f32 %v2394_v36, %v2025_v45  ;;  %v2610_v51 = vadd.f32 %v2396_v63, %v2026_v47  ;;  %v3293_v37 = vmul.f32 %v12696_v16, %v20840_v58  ;;  %v16989_v46 = vmul.f32 %v12696_v16, %v20841_v18 }
 0x3ae   : > { %v2977_v10 = vsel %vm732_vm0, %v20844_v40, %v2976_v31  ;;  %v3876_v60 = vmul.f32 %v12699_v19, %v20840_v58  ;;  %v3877_v57 = vmul.f32 %v12699_v19, %v20841_v18  ;;  %v4073_v29 = vmul.f32 %v12702_v23, %v16134_v11 }
 0x3af   : > { %v5978_v31 = vpack.c.bf16 %v5918_v3, %v5917_v5  ;;  %v3192_v44 = vadd.f32 %v2977_v10, %v2609_v21  ;;  %v3193_v36 = vadd.f32 %v2979_v53, %v2610_v51  ;;  %v3560_v22 = vrot.slane %v3293_v37, 7 }
 0x3b0   : > { %v3562_v45 = vrot.slane %v16989_v46, 7  ;;  %v17000_v47 = vmul.f32 %v12702_v23, %v16253_v2  ;;  %v4340_v28 = vrot.slane %v4073_v29, 4  ;;  %v4657_v63 = vmul.f32 %v12704_v24, %v16134_v11 }
 0x3b1   : > { %12262 = vmatmul.mubr.msk.bf16.gmra.mrb[68].mxu1 %vm6011_vm7, %v5978_v31  ;;  %v3561_v40 = vsel %vm3414_vm4, %v3558_v15, %v3560_v22  ;;  %v17010_v5 = vmul.f32 %v12704_v24, %v16253_v2  ;;  %v5241_v10 = vmul.f32 %v16895_v6, %v16134_v11  ;;  %v17016_v53 = vmul.f32 %v16895_v6, %v16253_v2 }
 0x3b2   : > { %v3563_v3 = vsel %vm3414_vm4, %v3560_v22, %v3562_v45  ;;  %v3776_v21 = vadd.f32 %v3561_v40, %v3192_v44  ;;  %v4341_v49 = vsel %vm4194_vm5, %v4338_v20, %v4340_v28  ;;  %v4342_v15 = vrot.slane %v17000_v47, 4 }
 0x3b3   : > { %v3777_v51 = vadd.f32 %v3563_v3, %v3193_v36  ;;  %v4924_v37 = vrot.slane %v4657_v63, 5  ;;  %v4926_v29 = vrot.slane %v17010_v5, 5  ;;  %v5507_v31 = vrot.slane %v5241_v10, 6 }
 0x3b4   : > { %v3972_v43 = vadd.f32 %v3876_v60, %v3776_v21  ;;  %v4343_v33 = vsel %vm4194_vm5, %v4340_v28, %v4342_v15  ;;  %v5509_v4 = vrot.slane %v17016_v53, 6  ;;  %v1147_v44 = vadd.f32 %v16697_v25, %v16301_v1 }
 0x3b5   : > { %v3973_v56 = vadd.f32 %v3877_v57, %v3777_v51  ;;  %v20845_v20 = vrot.slane %v16890_v59, 5  ;;  %v4927_v36 = vsel %vm4778_vm6, %v4924_v37, %v4926_v29  ;;  %v20846_v60 = vrot.slane %v16909_v55, 6 }
 0x3b6   : > { %v4556_v40 = vadd.f32 %v4341_v49, %v3972_v43  ;;  %v5510_v28 = vsel %vm732_vm0, %v5507_v31, %v5509_v4  ;;  %v17044_v10 = vmax.f32 %v1147_v44, 0.0  ;;  %v1139_v1 = vadd.f32 %v16697_v25, %v16306_v52 }
 0x3b7   : > { %v4925_v22 = vsel %vm4778_vm6, %v20845_v20, %v4924_v37  ;;  %v5508_v63 = vsel %vm732_vm0, %v20846_v60, %v5507_v31  ;;  %v4557_v59 = vadd.f32 %v4343_v33, %v3973_v56  ;;  %v1347_v57 = vmul.f32 %v12685_v7, %v20840_v58 }
 0x3b8   : > { %v1348_v3 = vmul.f32 %v12685_v7, %v20841_v18  ;;  %v1544_v55 = vmul.f32 %v12690_v12, %v20841_v18  ;;  %v5140_v43 = vadd.f32 %v4925_v22, %v4556_v40  ;;  %v17054_v21 = vmax.f32 %v1139_v1, 0.0 }
 0x3b9   : > { %v17058_v49 = vmul.f32 %v12690_v12, %v16134_v11  ;;  %v2128_v52 = vmul.f32 %v12692_v13, %v20841_v18  ;;  %v5141_v33 = vadd.f32 %v4927_v36, %v4557_v59  ;;  %v17064_v58 = vmul.f32 %v12692_v13, %v16134_v11 }
 0x3ba   : > { %v1813_v51 = vrot.slane %v1544_v55, 1  ;;  %v2712_v37 = vmul.f32 %v12694_v14, %v16134_v11  ;;  %v5723_v31 = vadd.f32 %v5508_v63, %v5140_v43  ;;  %v17071_v20 = vmul.f32 %v12694_v14, %v16253_v2 }
 0x3bb   : > { %v1815_v44 = vrot.slane %v17058_v49, 1  ;;  %v2397_v56 = vrot.slane %v2128_v52, 2  ;;  %v5724_v22 = vadd.f32 %v5510_v28, %v5141_v33  ;;  %v20847_v18 = vrot.slane %v16943_v39, 1 }
 0x3bc   : > { %v2399_v60 = vrot.slane %v17064_v58, 2  ;;  %v2980_v40 = vrot.slane %v2712_v37, 6  ;;  %v5823_v1 = vadd.f32 %v16962_v27, %v5723_v31  ;;  %v20848_v55 = vrot.slane %v16949_v42, 2 }
 0x3bd   : > { %v1814_v36 = vsel %vm1663_vm2, %v20847_v18, %v1813_v51  ;;  %v1816_v63 = vsel %vm1663_vm2, %v1813_v51, %v1815_v44  ;;  %v5824_v28 = vadd.f32 %v16962_v27, %v5724_v22  ;;  %v20849_v33 = vrot.slane %v16956_v34, 6 }
 0x3be   : > { %v2027_v59 = vadd.f32 %v1814_v36, %v1347_v57  ;;  %v2398_v43 = vsel %vm2247_vm3, %v20848_v55, %v2397_v56  ;;  %v2028_v52 = vadd.f32 %v1816_v63, %v1348_v3  ;;  %v2400_v39 = vsel %vm2247_vm3, %v2397_v56, %v2399_v60 }
 0x3bf   : > { %v2981_v37 = vsel %vm732_vm0, %v20849_v33, %v2980_v40  ;;  %v5919_v31 = vmax.f32 %v5823_v1, 0.0  ;;  %v20421_v51 = vrot.slane %v17071_v20, 6  ;;  %v3295_v42 = vmul.f32 %v12696_v16, %v16134_v11 }
 0x3c0   : > { %v2611_v18 = vadd.f32 %v2398_v43, %v2027_v59  ;;  %v5920_v57 = vmax.f32 %v5824_v28, 0.0  ;;  %v2612_v36 = vadd.f32 %v2400_v39, %v2028_v52  ;;  %v17096_v3 = vmul.f32 %v12696_v16, %v16253_v2 }
 0x3c1   : > { %v3878_v56 = vmul.f32 %v12699_v19, %v16134_v11  ;;  %v2983_v34 = vsel %vm732_vm0, %v2980_v40, %v20421_v51  ;;  %v3564_v1 = vrot.slane %v3295_v42, 7  ;;  %v3879_v63 = vmul.f32 %v12699_v19, %v16253_v2 }
 0x3c2   : > { %v3194_v22 = vadd.f32 %v2981_v37, %v2611_v18  ;;  %v5979_v59 = vpack.c.bf16 %v5920_v57, %v5919_v31  ;;  %v3195_v55 = vadd.f32 %v2983_v34, %v2612_v36  ;;  %v3566_v43 = vrot.slane %v17096_v3, 7 }
 0x3c3   : > { %v4075_v28 = vmul.f32 %v12702_v23, %v16124_v54  ;;  %v3565_v52 = vsel %vm3414_vm4, %v3562_v45, %v3564_v1  ;;  %v17113_v39 = vmul.f32 %v12702_v23, %v16249_v9  ;;  %v4659_v40 = vmul.f32 %v12704_v24, %v16124_v54 }
 0x3c4   : > { %v17119_v33 = vmul.f32 %v12704_v24, %v16249_v9  ;;  %12265 = vmatprep.mubr.msk.bf16.mxu1 %vm6011_vm7, %v5979_v59  ;;  %v3567_v37 = vsel %vm3414_vm4, %v3564_v1, %v3566_v43  ;;  %v3778_v46 = vadd.f32 %v3565_v52, %v3194_v22  ;;  %v5243_v45 = vmul.f32 %v16895_v6, %v16124_v54 }
 0x3c5   : > { %v4344_v31 = vrot.slane %v4075_v28, 4  ;;  %v3779_v18 = vadd.f32 %v3567_v37, %v3195_v55  ;;  %v4346_v42 = vrot.slane %v17113_v39, 4  ;;  %v4928_v57 = vrot.slane %v4659_v40, 5 }
 0x3c6   : > { %v4930_v36 = vrot.slane %v17119_v33, 5  ;;  %v3974_v34 = vadd.f32 %v3878_v56, %v3778_v46  ;;  %v17134_v51 = vmul.f32 %v16895_v6, %v16249_v9  ;;  %v5511_v22 = vrot.slane %v5243_v45, 6 }
 0x3c7   : > { %v4345_v59 = vsel %vm4194_vm5, %v4342_v15, %v4344_v31  ;;  %v3975_v1 = vadd.f32 %v3879_v63, %v3779_v18  ;;  %v4347_v55 = vsel %vm4194_vm5, %v4344_v31, %v4346_v42  ;;  %v4929_v28 = vsel %vm4778_vm6, %v4926_v29, %v4928_v57 }
 0x3c8   : > { %v4931_v47 = vsel %vm4778_vm6, %v4928_v57, %v4930_v36  ;;  %v4558_v56 = vadd.f32 %v4345_v59, %v3974_v34  ;;  %v5512_v15 = vsel %vm732_vm0, %v5509_v4, %v5511_v22  ;;  %v5513_v52 = vrot.slane %v17134_v51, 6 }
 0x3c9   : > { %v1150_v63 = vadd.f32 %v16697_v25, %v16410_v35  ;;  %v4559_v40 = vadd.f32 %v4347_v55, %v3975_v1  ;;  %v1142_v5 = vadd.f32 %v16697_v25, %v16420_v50  ;;  %v1349_v29 = vmul.f32 %v12685_v7, %v16134_v11 }
 0x3ca   : > { %v1350_v37 = vmul.f32 %v12685_v7, %v16253_v2  ;;  %v5142_v46 = vadd.f32 %v4929_v28, %v4558_v56  ;;  %v5514_v4 = vsel %vm732_vm0, %v5511_v22, %v5513_v52  ;;  %v1546_v35 = vmul.f32 %v12690_v12, %v16253_v2 }
 0x3cb   : > { %v17160_v53 = vmax.f32 %v1150_v63, 0.0  ;;  %v5143_v31 = vadd.f32 %v4931_v47, %v4559_v40  ;;  %v17164_v45 = vmax.f32 %v1142_v5, 0.0  ;;  %v17168_v50 = vmul.f32 %v12690_v12, %v16124_v54 }
 0x3cc   : > { %v2130_v11 = vmul.f32 %v12692_v13, %v16253_v2  ;;  %v5725_v18 = vadd.f32 %v5512_v15, %v5142_v46  ;;  %v1817_v57 = vrot.slane %v1546_v35, 1  ;;  %v17174_v34 = vmul.f32 %v12692_v13, %v16124_v54 }
 0x3cd   : > { %v2714_v59 = vmul.f32 %v12694_v14, %v16124_v54  ;;  %v5726_v22 = vadd.f32 %v5514_v4, %v5143_v31  ;;  %v1819_v1 = vrot.slane %v17168_v50, 1  ;;  %v17181_v28 = vmul.f32 %v12694_v14, %v16249_v9 }
 0x3ce   : > { %v2401_v55 = vrot.slane %v2130_v11, 2  ;;  %v5825_v47 = vadd.f32 %v16962_v27, %v5725_v18  ;;  %v1818_v2 = vsel %vm1663_vm2, %v1815_v44, %v1817_v57  ;;  %v2403_v56 = vrot.slane %v17174_v34, 2 }
 0x3cf   : > { %v2984_v15 = vrot.slane %v2714_v59, 6  ;;  %v5826_v63 = vadd.f32 %v16962_v27, %v5726_v22  ;;  %v1820_v40 = vsel %vm1663_vm2, %v1817_v57, %v1819_v1  ;;  %v2029_v5 = vadd.f32 %v1818_v2, %v1349_v29 }
 0x3d0   : > { %v2402_v46 = vsel %vm2247_vm3, %v2399_v60, %v2401_v55  ;;  %v5921_v4 = vmax.f32 %v5825_v47, 0.0  ;;  %v2030_v35 = vadd.f32 %v1820_v40, %v1350_v37  ;;  %v2404_v49 = vsel %vm2247_vm3, %v2401_v55, %v2403_v56  ;;  %v20851_v40 = vld [vmem:[#allocation6_spill] sm:$0xff] }
 0x3d1   : > { %v20850_v44 = vrot.slane %v17071_v20, 6  ;;  %v5922_v11 = vmax.f32 %v5826_v63, 0.0  ;;  %v2613_v18 = vadd.f32 %v2402_v46, %v2029_v5  ;;  %v2986_v59 = vrot.slane %v17181_v28, 6 }
 0x3d2   : > { %v3297_v29 = vmul.f32 %v12696_v16, %v16124_v54  ;;  %v2614_v58 = vadd.f32 %v2404_v49, %v2030_v35  ;;  %v17206_v60 = vmul.f32 %v12696_v16, %v16249_v9  ;;  %v3880_v37 = vmul.f32 %v12699_v19, %v16124_v54 }
 0x3d3   : > { %v2985_v31 = vsel %vm732_vm0, %v20850_v44, %v2984_v15  ;;  %v3881_v20 = vmul.f32 %v12699_v19, %v16249_v9  ;;  %v5980_v57 = vpack.c.bf16 %v5922_v11, %v5921_v4  ;;  %v2987_v22 = vsel %vm732_vm0, %v2984_v15, %v2986_v59 }
 0x3d4   : > { %v3196_v55 = vadd.f32 %v2985_v31, %v2613_v18  ;;  %v3568_v47 = vrot.slane %v3297_v29, 7  ;;  %v3197_v2 = vadd.f32 %v2987_v22, %v2614_v58  ;;  %v3570_v63 = vrot.slane %v17206_v60, 7 }
 0x3d5   : > { %v4077_v5 = vmul.f32 %v12702_v23, %v20851_v40  ;;  %v17220_v46 = vmul.f32 %v12702_v23, %v16479_v17  ;;  %12266 = vmatmul.mubr.msk.bf16.gmra.mrb[72].mxu1 %vm6011_vm7, %v5980_v57  ;;  %v4661_v15 = vmul.f32 %v12704_v24, %v20851_v40  ;;  %v17230_v35 = vmul.f32 %v12704_v24, %v16479_v17 }
 0x3d6   : > { %v3569_v4 = vsel %vm3414_vm4, %v3566_v43, %v3568_v47  ;;  %v5245_v49 = vmul.f32 %v16895_v6, %v20851_v40  ;;  %v3571_v44 = vsel %vm3414_vm4, %v3568_v47, %v3570_v63  ;;  %v17241_v58 = vmul.f32 %v16895_v6, %v16479_v17 }
 0x3d7   : > { %v3780_v31 = vadd.f32 %v3569_v4, %v3196_v55  ;;  %v4348_v11 = vrot.slane %v4077_v5, 4  ;;  %v4350_v3 = vrot.slane %v17220_v46, 4  ;;  %v3781_v18 = vadd.f32 %v3571_v44, %v3197_v2 }
 0x3d8   : > { %v4932_v43 = vrot.slane %v4661_v15, 5  ;;  %v20426_v29 = vrot.slane %v17230_v35, 5  ;;  %v5515_v47 = vrot.slane %v5245_v49, 6  ;;  %v20853_v49 = vld [vmem:[#allocation13_spill] sm:$0xff]  ;;  %v17313_v50 = vmul.f32 %v12694_v14, %v16479_v17 }
 0x3d9   : > { %v3976_v57 = vadd.f32 %v3880_v37, %v3780_v31  ;;  %v4349_v22 = vsel %vm4194_vm5, %v4346_v42, %v4348_v11  ;;  %v4351_v55 = vsel %vm4194_vm5, %v4348_v11, %v4350_v3  ;;  %v3977_v5 = vadd.f32 %v3881_v20, %v3781_v18  ;;  %v20852_v42 = vld [vmem:[#allocation10_spill] sm:$0xff] }
 0x3da   : > { %v4933_v2 = vsel %vm4778_vm6, %v4930_v36, %v4932_v43  ;;  %v4935_v4 = vsel %vm4778_vm6, %v4932_v43, %v20426_v29  ;;  %v20425_v37 = vrot.slane %v17241_v58, 6  ;;  %v5516_v39 = vsel %vm732_vm0, %v5513_v52, %v5515_v47 }
 0x3db   : > { %v4560_v15 = vadd.f32 %v4349_v22, %v3976_v57  ;;  %v1163_v44 = vadd.f32 %v16697_v25, %v20852_v42  ;;  %v1155_v20 = vadd.f32 %v16697_v25, %v20853_v49  ;;  %v4561_v33 = vadd.f32 %v4351_v55, %v3977_v5 }
 0x3dc   : > { %v5518_v36 = vsel %vm732_vm0, %v5515_v47, %v20425_v37  ;;  %v1351_v31 = vmul.f32 %v12685_v7, %v16124_v54  ;;  %v1352_v11 = vmul.f32 %v12685_v7, %v16249_v9  ;;  %v1548_v43 = vmul.f32 %v12690_v12, %v16249_v9 }
 0x3dd   : > { %v5144_v51 = vadd.f32 %v4933_v2, %v4560_v15  ;;  %v1267_v18 = vmax.f32 %v1163_v44, 0.0  ;;  %v17270_v52 = vmax.f32 %v1155_v20, 0.0  ;;  %v5145_v57 = vadd.f32 %v4935_v4, %v4561_v33 }
 0x3de   : > { %v17276_v22 = vmul.f32 %v12690_v12, %v20851_v40  ;;  %v2132_v55 = vmul.f32 %v12692_v13, %v16249_v9  ;;  %v17282_v54 = vmul.f32 %v12692_v13, %v20851_v40  ;;  %v1821_v42 = vrot.slane %v1548_v43, 1 }
 0x3df   : > { %v5727_v47 = vadd.f32 %v5516_v39, %v5144_v51  ;;  %v17285_v5 = vmul.f32 %v12702_v23, %v1267_v18  ;;  %v17288_v2 = vmul.f32 %v12704_v24, %v1267_v18  ;;  %v17291_v4 = vmul.f32 %v16895_v6, %v1267_v18 }
 0x3e0   : > { %v5728_v15 = vadd.f32 %v5518_v36, %v5145_v57  ;;  %v20422_v44 = vrot.slane %v17276_v22, 1  ;;  %v2405_v49 = vrot.slane %v2132_v55, 2  ;;  %v1822_v18 = vsel %vm1663_vm2, %v1819_v1, %v1821_v42 }
 0x3e1   : > { %v5827_v9 = vadd.f32 %v16962_v27, %v5727_v47  ;;  %v2031_v55 = vadd.f32 %v1822_v18, %v1351_v31  ;;  %v20424_v39 = vrot.slane %v17282_v54, 2  ;;  %v3299_v1 = vmul.f32 %v12696_v16, %v20851_v40 }
 0x3e2   : > { %v5828_v51 = vadd.f32 %v16962_v27, %v5728_v15  ;;  %v1824_v36 = vsel %vm1663_vm2, %v1821_v42, %v20422_v44  ;;  %v2406_v43 = vsel %vm2247_vm3, %v2403_v56, %v2405_v49  ;;  %v2716_v15 = vmul.f32 %v12694_v14, %v20851_v40 }
 0x3e3   : > { %v5923_v57 = vmax.f32 %v5827_v9, 0.0  ;;  %v2032_v47 = vadd.f32 %v1824_v36, %v1352_v11  ;;  %v2408_v34 = vsel %vm2247_vm3, %v2405_v49, %v20424_v39  ;;  %v2615_v56 = vadd.f32 %v2406_v43, %v2031_v55  ;;  %v20854_v49 = vld [vmem:[#allocation7_spill] sm:$0xff] }
 0x3e4   : > { %v5924_v33 = vmax.f32 %v5828_v51, 0.0  ;;  %v17322_v31 = vmul.f32 %v12696_v16, %v16479_v17  ;;  %v3882_v11 = vmul.f32 %v12699_v19, %v20851_v40  ;;  %v2988_v51 = vrot.slane %v2716_v15, 6 }
 0x3e5   : > { %v2616_v9 = vadd.f32 %v2408_v34, %v2032_v47  ;;  %v20423_v18 = vrot.slane %v17313_v50, 6  ;;  %v3572_v36 = vrot.slane %v3299_v1, 7  ;;  %v3883_v20 = vmul.f32 %v12699_v19, %v16479_v17 }
 0x3e6   : > { %v5981_v42 = vpack.c.bf16 %v5924_v33, %v5923_v57  ;;  %v20430_v44 = vrot.slane %v17322_v31, 7  ;;  %v4079_v43 = vmul.f32 %v12702_v23, %v20854_v49  ;;  %v2989_v55 = vsel %vm732_vm0, %v2986_v59, %v2988_v51  ;;  %v20855_v57 = vld [vmem:[#allocation8_spill] sm:$0xff] }
 0x3e7   : > { %v2991_v33 = vsel %vm732_vm0, %v2988_v51, %v20423_v18  ;;  %v17341_v47 = vmul.f32 %v12702_v23, %v20855_v57  ;;  %v4663_v15 = vmul.f32 %v12704_v24, %v20854_v49  ;;  %v3198_v1 = vadd.f32 %v2989_v55, %v2615_v56 }
 0x3e8   : > { %12269 = vmatprep.mubr.msk.bf16.mxu1 %vm6011_vm7, %v5981_v42  ;;  %v3199_v34 = vadd.f32 %v2991_v33, %v2616_v9  ;;  %v3573_v42 = vsel %vm3414_vm4, %v3570_v63, %v3572_v36  ;;  %v3575_v28 = vsel %vm3414_vm4, %v3572_v36, %v20430_v44  ;;  %v4352_v59 = vrot.slane %v4079_v43, 4 }
 0x3e9   : > { %v20429_v51 = vrot.slane %v17341_v47, 4  ;;  %v17354_v18 = vmul.f32 %v12704_v24, %v20855_v57  ;;  %v4936_v39 = vrot.slane %v4663_v15, 5  ;;  %v3782_v37 = vadd.f32 %v3573_v42, %v3198_v1 }
 0x3ea   : > { %v3783_v29 = vadd.f32 %v3575_v28, %v3199_v34  ;;  %v5247_v56 = vmul.f32 %v16895_v6, %v20854_v49  ;;  %v17360_v60 = vmul.f32 %v16895_v6, %v20855_v57  ;;  %v4353_v63 = vsel %vm4194_vm5, %v4350_v3, %v4352_v59 }
 0x3eb   : > { %v4355_v9 = vsel %vm4194_vm5, %v4352_v59, %v20429_v51  ;;  %v20856_v36 = vrot.slane %v17230_v35, 5  ;;  %v20428_v55 = vrot.slane %v17354_v18, 5  ;;  %v3978_v33 = vadd.f32 %v3882_v11, %v3782_v37 }
 0x3ec   : > { %v3979_v15 = vadd.f32 %v3883_v20, %v3783_v29  ;;  %v5519_v1 = vrot.slane %v5247_v56, 6  ;;  %v20427_v34 = vrot.slane %v17360_v60, 6  ;;  %v1166_v3 = vadd.f32 %v16697_v25, %v16646_v26 }
 0x3ed   : > { %v4937_v43 = vsel %vm4778_vm6, %v20856_v36, %v4936_v39  ;;  %v4939_v46 = vsel %vm4778_vm6, %v4936_v39, %v20428_v55  ;;  %v1158_v42 = vadd.f32 %v16697_v25, %v16651_v0  ;;  %v1353_v35 = vmul.f32 %v12685_v7, %v20851_v40 }
 0x3ee   : > { %v4562_v28 = vadd.f32 %v4353_v63, %v3978_v33  ;;  %v4563_v59 = vadd.f32 %v4355_v9, %v3979_v15  ;;  %v20857_v29 = vrot.slane %v17241_v58, 6  ;;  %v5522_v20 = vsel %vm732_vm0, %v5519_v1, %v20427_v34 }
 0x3ef   : > { %v1268_v39 = vmax.f32 %v1166_v3, 0.0  ;;  %v17388_v11 = vmax.f32 %v1158_v42, 0.0  ;;  %v1354_v26 = vmul.f32 %v12685_v7, %v16479_v17  ;;  %v1550_v0 = vmul.f32 %v12690_v12, %v16479_v17 }
 0x3f0   : > { %v5520_v37 = vsel %vm732_vm0, %v20857_v29, %v5519_v1  ;;  %v5146_v25 = vadd.f32 %v4937_v43, %v4562_v28  ;;  %v5147_v40 = vadd.f32 %v4939_v46, %v4563_v59  ;;  %v17396_v58 = vmul.f32 %v12690_v12, %v20854_v49 }
 0x3f1   : > { %v2134_v56 = vmul.f32 %v12692_v13, %v16479_v17  ;;  %v4096_v63 = vmul.f32 %v12702_v23, %v1268_v39  ;;  %v4680_v9 = vmul.f32 %v12704_v24, %v1268_v39  ;;  %v5264_v36 = vmul.f32 %v16895_v6, %v1268_v39 }
 0x3f2   : > { %v17405_v33 = vmul.f32 %v12694_v14, %v17388_v11  ;;  %v5729_v15 = vadd.f32 %v5520_v37, %v5146_v25  ;;  %v5730_v43 = vadd.f32 %v5522_v20, %v5147_v40  ;;  %v17409_v1 = vmul.f32 %v12696_v16, %v17388_v11 }
 0x3f3   : > { %v17413_v46 = vmul.f32 %v12699_v19, %v17388_v11  ;;  %v4386_v17 = vrot.slane %v4096_v63, 4  ;;  %v4970_v3 = vrot.slane %v4680_v9, 5  ;;  %v5553_v42 = vrot.slane %v5264_v36, 6 }
 0x3f4   : > { %v5829_v59 = vadd.f32 %v16962_v27, %v5729_v15  ;;  %v5830_v29 = vadd.f32 %v16962_v27, %v5730_v43  ;;  %v17421_v20 = vmul.f32 %v12702_v23, %v17388_v11  ;;  %v20859_v39 = vrot.slane %v17285_v5, 4 }
 0x3f5   : > { %20858 = vst [vmem:[#allocation14_spill] sm:$0xff] %v17413_v46  ;;  %v20861_v40 = vrot.slane %v17288_v2, 5  ;;  %v20863_v9 = vrot.slane %v17291_v4, 6  ;;  %v17440_v15 = vmul.f32 %v12704_v24, %v17388_v11  ;;  %v20865_v34 = vrot.slane %v17276_v22, 1 }
 0x3f6   : > { %v17426_v25 = vsel %vm4194_vm5, %v20859_v39, %v4386_v17  ;;  %v5925_v43 = vmax.f32 %v5829_v59, 0.0  ;;  %v5926_v37 = vmax.f32 %v5830_v29, 0.0  ;;  %v1825_v17 = vrot.slane %v1550_v0, 1 }
 0x3f7   : > { %20860 = vst [vmem:[#allocation5_spill] sm:$0xff] %v17426_v25  ;;  %v17431_v63 = vsel %vm4778_vm6, %v20861_v40, %v4970_v3  ;;  %v17436_v36 = vsel %vm732_vm0, %v20863_v9, %v5553_v42  ;;  %v20431_v39 = vrot.slane %v17396_v58, 1  ;;  %v17446_v3 = vmul.f32 %v12692_v13, %v20854_v49 }
 0x3f8   : > { %20862 = vst [vmem:[#allocation15_spill] sm:$0xff] %v17431_v63  ;;  %20864 = vst [vmem:[#allocation16_spill] sm:$0xff] %v17436_v36  ;;  %v2409_v40 = vrot.slane %v2134_v56, 2  ;;  %v2718_v42 = vmul.f32 %v12694_v14, %v20854_v49  ;;  %v5982_v9 = vpack.c.bf16 %v5926_v37, %v5925_v43  ;;  %v1826_v55 = vsel %vm1663_vm2, %v20865_v34, %v1825_v17 }
 0x3f9   : > { %v17455_v59 = vmul.f32 %v12694_v14, %v20855_v57  ;;  %v3301_v0 = vmul.f32 %v12696_v16, %v20854_v49  ;;  %v1828_v29 = vsel %vm1663_vm2, %v1825_v17, %v20431_v39  ;;  %v2033_v56 = vadd.f32 %v1826_v55, %v1353_v35 }
 0x3fa   : > { %v20866_v28 = vrot.slane %v17282_v54, 2  ;;  %v20434_v22 = vrot.slane %v17446_v3, 2  ;;  %12270 = vmatmul.mubr.msk.bf16.gmra.mrb[76].mxu1 %vm6011_vm7, %v5982_v9  ;;  %v2034_v34 = vadd.f32 %v1828_v29, %v1354_v26  ;;  %v2992_v43 = vrot.slane %v2718_v42, 6 }
 0x3fb   : > { %v20433_v51 = vrot.slane %v17455_v59, 6  ;;  %v17470_v44 = vmul.f32 %v12696_v16, %v20855_v57  ;;  %v3576_v54 = vrot.slane %v3301_v0, 7  ;;  %v20867_v9 = vrot.slane %v17313_v50, 6 }
 0x3fc   : > { %v2410_v37 = vsel %vm2247_vm3, %v20866_v28, %v2409_v40  ;;  %v2412_v55 = vsel %vm2247_vm3, %v2409_v40, %v20434_v22  ;;  %v3884_v28 = vmul.f32 %v12699_v19, %v20854_v49  ;;  %v20868_v36 = vrot.slane %v17322_v31, 7 }
 0x3fd   : > { %v2617_v35 = vadd.f32 %v2410_v37, %v2033_v56  ;;  %v2618_v17 = vadd.f32 %v2412_v55, %v2034_v34  ;;  %v2993_v26 = vsel %vm732_vm0, %v20867_v9, %v2992_v43  ;;  %v2995_v42 = vsel %vm732_vm0, %v2992_v43, %v20433_v51 }
 0x3fe   : > { %v20432_v29 = vrot.slane %v17470_v44, 7  ;;  %v3577_v40 = vsel %vm3414_vm4, %v20868_v36, %v3576_v54  ;;  %v3885_v0 = vmul.f32 %v12699_v19, %v20855_v57  ;;  %v4081_v56 = vmul.f32 %v12702_v23, %v16595_v8 }
 0x3ff   : > { %v3200_v39 = vadd.f32 %v2993_v26, %v2617_v35  ;;  %v3201_v50 = vadd.f32 %v2995_v42, %v2618_v17  ;;  %v17496_v34 = vmul.f32 %v12702_v23, %v16714_v62  ;;  %v4665_v31 = vmul.f32 %v12704_v24, %v16595_v8 }
 0x400   : > { %v3579_v37 = vsel %vm3414_vm4, %v3576_v54, %v20432_v29  ;;  %v4356_v36 = vrot.slane %v4081_v56, 4  ;;  %v17502_v55 = vmul.f32 %v12704_v24, %v16714_v62  ;;  %v5249_v35 = vmul.f32 %v16895_v6, %v16595_v8 }
 0x401   : > { %v3784_v43 = vadd.f32 %v3577_v40, %v3200_v39  ;;  %v3785_v17 = vadd.f32 %v3579_v37, %v3201_v50  ;;  %v20437_v9 = vrot.slane %v17496_v34, 4  ;;  %v4940_v54 = vrot.slane %v4665_v31, 5 }
 0x402   : > { %v17509_v26 = vmul.f32 %v16895_v6, %v16714_v62  ;;  %v20869_v29 = vrot.slane %v17341_v47, 4  ;;  %v20436_v40 = vrot.slane %v17502_v55, 5  ;;  %v5523_v56 = vrot.slane %v5249_v35, 6 }
 0x403   : > { %v3980_v42 = vadd.f32 %v3884_v28, %v3784_v43  ;;  %v3981_v51 = vadd.f32 %v3885_v0, %v3785_v17  ;;  %v4359_v50 = vsel %vm4194_vm5, %v4356_v36, %v20437_v9  ;;  %v20870_v37 = vrot.slane %v17354_v18, 5  ;;  %v17530_v43 = vpop.f32.mrb[0].mxu1 }
 0x404   : > { %v4357_v39 = vsel %vm4194_vm5, %v20869_v29, %v4356_v36  ;;  %v20435_v22 = vrot.slane %v17509_v26, 6  ;;  %v4943_v47 = vsel %vm4778_vm6, %v4940_v54, %v20436_v40  ;;  %v20871_v28 = vrot.slane %v17360_v60, 6 }
 0x405   : > { %v4941_v31 = vsel %vm4778_vm6, %v20870_v37, %v4940_v54  ;;  %v4564_v63 = vadd.f32 %v4357_v39, %v3980_v42  ;;  %v1355_v0 = vmul.f32 %v12685_v7, %v20854_v49  ;;  %v4565_v36 = vadd.f32 %v4359_v50, %v3981_v51  ;;  %v17539_v54 = vpop.f32.mrb[1].mxu1 }
 0x406   : > { %v5524_v29 = vsel %vm732_vm0, %v20871_v28, %v5523_v56  ;;  %v5526_v18 = vsel %vm732_vm0, %v5523_v56, %v20435_v22  ;;  %v1356_v35 = vmul.f32 %v12685_v7, %v20855_v57  ;;  %v1552_v17 = vmul.f32 %v12690_v12, %v20855_v57  ;;  %v17551_v39 = vpop.f32.mrb[2].mxu1 }
 0x407   : > { %v5148_v60 = vadd.f32 %v4941_v31, %v4564_v63  ;;  %v17543_v42 = vmul.f32 %v12690_v12, %v16595_v8  ;;  %v2136_v49 = vmul.f32 %v12692_v13, %v20855_v57  ;;  %v17549_v51 = vmul.f32 %v12692_v13, %v16595_v8  ;;  %20872 = vst [vmem:[#allocation11_spill] sm:$0xff] %v17551_v39  ;;  %v17559_v31 = vpop.f32.mrb[3].mxu1 }
 0x408   : > { %v5149_v56 = vadd.f32 %v4943_v47, %v4565_v36  ;;  %v1829_v50 = vrot.slane %v1552_v17, 1  ;;  %v2720_v37 = vmul.f32 %v12694_v14, %v16595_v8  ;;  %v17557_v63 = vmul.f32 %v12694_v14, %v16714_v62  ;;  %20873 = vst [vmem:[#allocation12_spill] sm:$0xff] %v17559_v31  ;;  %v17563_v9 = vpop.f32.mrb[4].mxu1 }
 0x409   : > { %v5731_v28 = vadd.f32 %v5524_v29, %v5148_v60  ;;  %v20439_v57 = vrot.slane %v17543_v42, 1  ;;  %v2413_v22 = vrot.slane %v2136_v49, 2  ;;  %v20438_v40 = vrot.slane %v17549_v51, 2  ;;  %v17569_v39 = vpop.f32.mrb[5].mxu1 }
 0x40a   : > { %v5732_v25 = vadd.f32 %v5526_v18, %v5149_v56  ;;  %v20874_v47 = vrot.slane %v17396_v58, 1  ;;  %v2996_v17 = vrot.slane %v2720_v37, 6  ;;  %20875 = vst [vmem:[#allocation9_spill] sm:$0xff] %v17569_v39  ;;  %v20876_v49 = vrot.slane %v17446_v3, 2 }
 0x40b   : > { %v5831_v31 = vadd.f32 %v16962_v27, %v5731_v28  ;;  %v1832_v29 = vsel %vm1663_vm2, %v1829_v50, %v20439_v57  ;;  %v2416_v37 = vsel %vm2247_vm3, %v2413_v22, %v20438_v40  ;;  %v3303_v3 = vmul.f32 %v12696_v16, %v16595_v8 }
 0x40c   : > { %v1830_v36 = vsel %vm1663_vm2, %v20874_v47, %v1829_v50  ;;  %v2414_v18 = vsel %vm2247_vm3, %v20876_v49, %v2413_v22  ;;  %v5832_v58 = vadd.f32 %v16962_v27, %v5732_v25  ;;  %v2036_v56 = vadd.f32 %v1832_v29, %v1356_v35  ;;  %v17596_v22 = vpop.f32.mrb[6].mxu1 }
 0x40d   : > { %v2035_v60 = vadd.f32 %v1830_v36, %v1355_v0  ;;  %v20877_v47 = vrot.slane %v17455_v59, 6  ;;  %v5927_v46 = vmax.f32 %v5831_v31, 0.0  ;;  %v20878_v50 = vrot.slane %v17557_v63, 6  ;;  %v17602_v49 = vpop.f32.mrb[7].mxu1 }
 0x40e   : > { %v5928_v36 = vmax.f32 %v5832_v58, 0.0  ;;  %v2620_v25 = vadd.f32 %v2416_v37, %v2036_v56  ;;  %v17592_v35 = vmul.f32 %v12696_v16, %v16714_v62  ;;  %v3886_v59 = vmul.f32 %v12699_v19, %v16595_v8  ;;  %20879 = vst [vmem:[#allocation17_spill] sm:$0xff] %v17602_v49  ;;  %v17629_v49 = vpop.f32.mrb[8].mxu1 }
 0x40f   : > { %v2997_v28 = vsel %vm732_vm0, %v20877_v47, %v2996_v17  ;;  %v2619_v39 = vadd.f32 %v2414_v18, %v2035_v60  ;;  %v2999_v0 = vsel %vm732_vm0, %v2996_v17, %v20878_v50  ;;  %v3580_v29 = vrot.slane %v3303_v3, 7 }
 0x410   : > { %v3887_v60 = vmul.f32 %v12699_v19, %v16714_v62  ;;  %v4083_v17 = vmul.f32 %v12702_v23, %v16585_v48  ;;  %v5983_v18 = vpack.c.bf16 %v5928_v36, %v5927_v46  ;;  %v3203_v58 = vadd.f32 %v2999_v0, %v2620_v25 }
 0x411   : > { %v3202_v31 = vadd.f32 %v2997_v28, %v2619_v39  ;;  %v20442_v56 = vrot.slane %v17592_v35, 7  ;;  %v17607_v37 = vmul.f32 %v12702_v23, %v16710_v32  ;;  %v20880_v47 = vrot.slane %v17470_v44, 7 }
 0x412   : > { %v4360_v28 = vrot.slane %v4083_v17, 4  ;;  %v4667_v50 = vmul.f32 %v12704_v24, %v16585_v48  ;;  %v17616_v3 = vmul.f32 %v12704_v24, %v16710_v32  ;;  %12273 = vmatprep.mubr.msk.bf16.mxu1 %vm6011_vm7, %v5983_v18  ;;  %v5251_v44 = vmul.f32 %v16895_v6, %v16585_v48 }
 0x413   : > { %v3581_v39 = vsel %vm3414_vm4, %v20880_v47, %v3580_v29  ;;  %v3583_v46 = vsel %vm3414_vm4, %v3580_v29, %v20442_v56  ;;  %v20441_v36 = vrot.slane %v17607_v37, 4  ;;  %v20881_v17 = vrot.slane %v17496_v34, 4 }
 0x414   : > { %v3786_v0 = vadd.f32 %v3581_v39, %v3202_v31  ;;  %v3787_v25 = vadd.f32 %v3583_v46, %v3203_v58  ;;  %v4944_v40 = vrot.slane %v4667_v50, 5  ;;  %v20440_v57 = vrot.slane %v17616_v3, 5  ;;  %v17638_v58 = vpop.f32.mrb[9].mxu1 }
 0x415   : > { %v4361_v47 = vsel %vm4194_vm5, %v20881_v17, %v4360_v28  ;;  %v4363_v31 = vsel %vm4194_vm5, %v4360_v28, %v20441_v36  ;;  %v17636_v29 = vmul.f32 %v16895_v6, %v16710_v32  ;;  %v5527_v39 = vrot.slane %v5251_v44, 6  ;;  %20882 = vst [vmem:[#allocation6_spill] sm:$0xff] %v17638_v58  ;;  %v17648_v28 = vpop.f32.mrb[10].mxu1 }
 0x416   : > { %v3982_v18 = vadd.f32 %v3886_v59, %v3786_v0  ;;  %v3983_v34 = vadd.f32 %v3887_v60, %v3787_v25  ;;  %v20883_v46 = vrot.slane %v17502_v55, 5  ;;  %v4947_v59 = vsel %vm4778_vm6, %v4944_v40, %v20440_v57  ;;  %20884 = vst [vmem:[#allocation10_spill] sm:$0xff] %v17648_v28  ;;  %v17656_v25 = vpop.f32.mrb[11].mxu1 }
 0x417   : > { %v1357_v0 = vmul.f32 %v12685_v7, %v16595_v8  ;;  %v20885_v6 = vrot.slane %v17509_v26, 6  ;;  %v20443_v60 = vrot.slane %v17636_v29, 6  ;;  %v1358_v55 = vmul.f32 %v12685_v7, %v16714_v62  ;;  %20886 = vst [vmem:[#allocation13_spill] sm:$0xff] %v17656_v25 }
 0x418   : > { %v4945_v50 = vsel %vm4778_vm6, %v20883_v46, %v4944_v40  ;;  %v4566_v17 = vadd.f32 %v4361_v47, %v3982_v18  ;;  %v4567_v46 = vadd.f32 %v4363_v31, %v3983_v34  ;;  %v1554_v40 = vmul.f32 %v12690_v12, %v16714_v62 }
 0x419   : > { %v5528_v44 = vsel %vm732_vm0, %v20885_v6, %v5527_v39  ;;  %v17662_v8 = vmul.f32 %v12690_v12, %v16585_v48  ;;  %v2138_v26 = vmul.f32 %v12692_v13, %v16714_v62  ;;  %v5530_v18 = vsel %vm732_vm0, %v5527_v39, %v20443_v60 }
 0x41a   : > { %v5150_v47 = vadd.f32 %v4945_v50, %v4566_v17  ;;  %v17671_v6 = vmul.f32 %v12692_v13, %v16585_v48  ;;  %v2722_v31 = vmul.f32 %v12694_v14, %v16585_v48  ;;  %v5151_v34 = vadd.f32 %v4947_v59, %v4567_v46  ;;  %v17681_v17 = vpop.f32.mrb[12].mxu1 }
 0x41b   : > { %v1833_v57 = vrot.slane %v1554_v40, 1  ;;  %v20444_v36 = vrot.slane %v17662_v8, 1  ;;  %v2417_v56 = vrot.slane %v2138_v26, 2  ;;  %v17679_v50 = vmul.f32 %v12694_v14, %v16710_v32  ;;  %20887 = vst [vmem:[#allocation7_spill] sm:$0xff] %v17681_v17  ;;  %v17692_v40 = vpop.f32.mrb[13].mxu1 }
 0x41c   : > { %v5733_v25 = vadd.f32 %v5528_v44, %v5150_v47  ;;  %v20447_v62 = vrot.slane %v17671_v6, 2  ;;  %v3000_v39 = vrot.slane %v2722_v31, 6  ;;  %v5734_v60 = vadd.f32 %v5530_v18, %v5151_v34  ;;  %20890 = vst [vmem:[#allocation8_spill] sm:$0xff] %v17692_v40 }
 0x41d   : > { %v20888_v28 = vrot.slane %v17543_v42, 1  ;;  %v1836_v59 = vsel %vm1663_vm2, %v1833_v57, %v20444_v36  ;;  %v20889_v44 = vrot.slane %v17549_v51, 2  ;;  %v20891_v18 = vrot.slane %v17557_v63, 6 }
 0x41e   : > { %v5833_v26 = vadd.f32 %v16962_v27, %v5733_v25  ;;  %v2038_v31 = vadd.f32 %v1836_v59, %v1358_v55  ;;  %v2420_v42 = vsel %vm2247_vm3, %v2417_v56, %v20447_v62  ;;  %v20446_v51 = vrot.slane %v17679_v50, 6 }
 0x41f   : > { %v1834_v58 = vsel %vm1663_vm2, %v20888_v28, %v1833_v57  ;;  %v2418_v46 = vsel %vm2247_vm3, %v20889_v44, %v2417_v56  ;;  %v5834_v28 = vadd.f32 %v16962_v27, %v5734_v60  ;;  %v3001_v57 = vsel %vm732_vm0, %v20891_v18, %v3000_v39 }
 0x420   : > { %v2037_v47 = vadd.f32 %v1834_v58, %v1357_v0  ;;  %v3305_v34 = vmul.f32 %v12696_v16, %v16585_v48  ;;  %v5929_v44 = vmax.f32 %v5833_v26, 0.0  ;;  %v2622_v25 = vadd.f32 %v2420_v42, %v2038_v31 }
 0x421   : > { %v17707_v58 = vmul.f32 %v12696_v16, %v16710_v32  ;;  %v5930_v0 = vmax.f32 %v5834_v28, 0.0  ;;  %v3003_v27 = vsel %vm732_vm0, %v3000_v39, %v20446_v51  ;;  %v3888_v56 = vmul.f32 %v12699_v19, %v16585_v48 }
 0x422   : > { %v2621_v36 = vadd.f32 %v2418_v46, %v2037_v47  ;;  %v3584_v63 = vrot.slane %v3305_v34, 7  ;;  %v3205_v55 = vadd.f32 %v3003_v27, %v2622_v25  ;;  %v3889_v46 = vmul.f32 %v12699_v19, %v16710_v32 }
 0x423   : > { %v20445_v59 = vrot.slane %v17707_v58, 7  ;;  %v5984_v26 = vpack.c.bf16 %v5930_v0, %v5929_v44  ;;  %v20892_v47 = vrot.slane %v17592_v35, 7  ;;  %v4085_v42 = vmul.f32 %v12702_v23, %v16822_v30  ;;  %v17742_v0 = vld [vmem:[%s20216_s3 + $0x8] ss:$0 sm:$0xff] }
 0x424   : > { %v3204_v60 = vadd.f32 %v3001_v57, %v2621_v36  ;;  %v17724_v39 = vmul.f32 %v12702_v23, %v16937_v61  ;;  %v4669_v18 = vmul.f32 %v12704_v24, %v16822_v30  ;;  %v17733_v35 = vmul.f32 %v12704_v24, %v16937_v61  ;;  %v17735_v57 = vpop.f32.mrb[14].mxu1 }
 0x425   : > { %v3585_v31 = vsel %vm3414_vm4, %v20892_v47, %v3584_v63  ;;  %v3587_v36 = vsel %vm3414_vm4, %v3584_v63, %v20445_v59  ;;  %20893 = vst [vmem:[#allocation18_spill] sm:$0xff] %v17735_v57  ;;  %12274 = vmatmul.mubr.msk.bf16.gmra.mrb[80].mxu1 %vm6011_vm7, %v5984_v26  ;;  %v4364_v44 = vrot.slane %v4085_v42, 4  ;;  %v5253_v27 = vmul.f32 %v17742_v0, %v16822_v30  ;;  %v17746_v63 = vpop.f32.mrb[15].mxu1 }
 0x426   : > { %v3788_v28 = vadd.f32 %v3585_v31, %v3204_v60  ;;  %v3789_v34 = vadd.f32 %v3587_v36, %v3205_v55  ;;  %v20450_v25 = vrot.slane %v17724_v39, 4  ;;  %20894 = vst [vmem:[#allocation19_spill] sm:$0xff] %v17746_v63  ;;  %v4948_v47 = vrot.slane %v4669_v18, 5 }
 0x427   : > { %v20449_v31 = vrot.slane %v17733_v35, 5  ;;  %v17751_v55 = vmul.f32 %v17742_v0, %v16937_v61  ;;  %v20895_v42 = vrot.slane %v17607_v37, 4  ;;  %v5531_v51 = vrot.slane %v5253_v27, 6 }
 0x428   : > { %v3984_v60 = vadd.f32 %v3888_v56, %v3788_v28  ;;  %v3985_v26 = vadd.f32 %v3889_v46, %v3789_v34  ;;  %v4367_v59 = vsel %vm4194_vm5, %v4364_v44, %v20450_v25  ;;  %v20896_v56 = vrot.slane %v17616_v3, 5  ;;  %v17773_v3 = vpop.f32.mrb[16].mxu1 }
 0x429   : > { %v4365_v36 = vsel %vm4194_vm5, %v20895_v42, %v4364_v44  ;;  %v4951_v18 = vsel %vm4778_vm6, %v4948_v47, %v20449_v31  ;;  %v20448_v46 = vrot.slane %v17751_v55, 6  ;;  %v20897_v37 = vrot.slane %v17636_v29, 6  ;;  %20898 = vst [vmem:[#allocation20_spill] sm:$0xff] %v17773_v3 }
 0x42a   : > { %v4568_v62 = vadd.f32 %v4365_v36, %v3984_v60  ;;  %v4949_v28 = vsel %vm4778_vm6, %v20896_v56, %v4948_v47  ;;  %v4569_v34 = vadd.f32 %v4367_v59, %v3985_v26  ;;  %v1359_v44 = vmul.f32 %v12685_v7, %v16585_v48  ;;  %v17784_v26 = vpop.f32.mrb[17].mxu1 }
 0x42b   : > { %v5532_v42 = vsel %vm732_vm0, %v20897_v37, %v5531_v51  ;;  %v1360_v27 = vmul.f32 %v12685_v7, %v16710_v32  ;;  %v5534_v47 = vsel %vm732_vm0, %v5531_v51, %v20448_v46  ;;  %v1556_v59 = vmul.f32 %v12690_v12, %v16710_v32  ;;  %20899 = vst [vmem:[#allocation21_spill] sm:$0xff] %v17784_v26  ;;  %v17794_v56 = vpop.f32.mrb[18].mxu1  ;;  %v17805_v26 = vld [vmem:[%s20216_s3 + $0xa] ss:$0 sm:$0xff] }
 0x42c   : > { %v5152_v60 = vadd.f32 %v4949_v28, %v4568_v62  ;;  %v17782_v29 = vmul.f32 %v12690_v12, %v16822_v30  ;;  %v5153_v48 = vadd.f32 %v4951_v18, %v4569_v34  ;;  %v2140_v36 = vmul.f32 %v12692_v13, %v16710_v32  ;;  %20900 = vst [vmem:[#allocation22_spill] sm:$0xff] %v17794_v56  ;;  %v17819_v63 = vpop.f32.mrb[19].mxu1 }
 0x42d   : > { %v17790_v62 = vmul.f32 %v12692_v13, %v16822_v30  ;;  %v2724_v51 = vmul.f32 %v12694_v14, %v16822_v30  ;;  %v1837_v37 = vrot.slane %v1556_v59, 1  ;;  %v17799_v31 = vmul.f32 %v12694_v14, %v16937_v61  ;;  %20903 = vst [vmem:[#allocation23_spill] sm:$0xff] %v17819_v63 }
 0x42e   : > { %v5735_v28 = vadd.f32 %v5532_v42, %v5152_v60  ;;  %v20452_v46 = vrot.slane %v17782_v29, 1  ;;  %v5736_v18 = vadd.f32 %v5534_v47, %v5153_v48  ;;  %v2421_v34 = vrot.slane %v2140_v36, 2 }
 0x42f   : > { %v3004_v25 = vrot.slane %v2724_v51, 6  ;;  %v20901_v42 = vrot.slane %v17662_v8, 1  ;;  %v20451_v47 = vrot.slane %v17799_v31, 6  ;;  %v20902_v32 = vrot.slane %v17671_v6, 2 }
 0x430   : > { %v5835_v56 = vadd.f32 %v17805_v26, %v5735_v28  ;;  %v1840_v59 = vsel %vm1663_vm2, %v1837_v37, %v20452_v46  ;;  %v5836_v48 = vadd.f32 %v17805_v26, %v5736_v18  ;;  %v20904_v8 = vrot.slane %v17790_v62, 2 }
 0x431   : > { %v1838_v60 = vsel %vm1663_vm2, %v20901_v42, %v1837_v37  ;;  %v2040_v51 = vadd.f32 %v1840_v59, %v1360_v27  ;;  %v2422_v3 = vsel %vm2247_vm3, %v20902_v32, %v2421_v34  ;;  %v20905_v57 = vrot.slane %v17679_v50, 6  ;;  %v12215_v27 = vpop.f32.mrb[20].mxu1 }
 0x432   : > { %v2039_v36 = vadd.f32 %v1838_v60, %v1359_v44  ;;  %v5931_v28 = vmax.f32 %v5835_v56, 0.0  ;;  %v2424_v42 = vsel %vm2247_vm3, %v2421_v34, %v20904_v8  ;;  %v3007_v44 = vsel %vm732_vm0, %v3004_v25, %v20451_v47  ;;  %v17849_v27 = vpop.f32.mrb[21].mxu1 }
 0x433   : > { %v3005_v37 = vsel %vm732_vm0, %v20905_v57, %v3004_v25  ;;  %v5932_v18 = vmax.f32 %v5836_v48, 0.0  ;;  %v2624_v60 = vadd.f32 %v2424_v42, %v2040_v51  ;;  %v3307_v32 = vmul.f32 %v12696_v16, %v16822_v30  ;;  %20906 = vst [vmem:[#allocation24_spill] sm:$0xff] %v17849_v27 }
 0x434   : > { %v2623_v6 = vadd.f32 %v2422_v3, %v2039_v36  ;;  %v17834_v56 = vmul.f32 %v12696_v16, %v16937_v61  ;;  %v3890_v50 = vmul.f32 %v12699_v19, %v16822_v30  ;;  %v3891_v57 = vmul.f32 %v12699_v19, %v16937_v61 }
 0x435   : > { %v4087_v25 = vmul.f32 %v12702_v23, %v16820_v38  ;;  %v5985_v34 = vpack.c.bf16 %v5932_v18, %v5931_v28  ;;  %v3207_v3 = vadd.f32 %v3007_v44, %v2624_v60  ;;  %v3588_v48 = vrot.slane %v3307_v32, 7 }
 0x436   : > { %v3206_v59 = vadd.f32 %v3005_v37, %v2623_v6  ;;  %v20456_v36 = vrot.slane %v17834_v56, 7  ;;  %v17845_v51 = vmul.f32 %v12702_v23, %v16933_v41  ;;  %v4671_v42 = vmul.f32 %v12704_v24, %v16820_v38  ;;  %v12216_v6 = vpop.f32.mrb[22].mxu1 }
 0x437   : > { %v4368_v8 = vrot.slane %v4087_v25, 4  ;;  %12277 = vmatprep.mubr.msk.bf16.mxu1 %vm6011_vm7, %v5985_v34  ;;  %v20907_v47 = vrot.slane %v17707_v58, 7  ;;  %v17857_v37 = vmul.f32 %v12704_v24, %v16933_v41  ;;  %v5255_v44 = vmul.f32 %v17742_v0, %v16820_v38  ;;  %v6273_v34 = vpop.f32.mrb[23].mxu1 }
 0x438   : > { %v17863_v18 = vmul.f32 %v17742_v0, %v16933_v41  ;;  %v3591_v60 = vsel %vm3414_vm4, %v3588_v48, %v20456_v36  ;;  %v20908_v58 = vrot.slane %v17724_v39, 4  ;;  %v20455_v25 = vrot.slane %v17845_v51, 4  ;;  %v17873_v17 = vpop.f32.mrb[24].mxu1 }
 0x439   : > { %v3589_v28 = vsel %vm3414_vm4, %v20907_v47, %v3588_v48  ;;  %v3791_v46 = vadd.f32 %v3591_v60, %v3207_v3  ;;  %v4952_v27 = vrot.slane %v4671_v42, 5  ;;  %v20454_v63 = vrot.slane %v17857_v37, 5 }
 0x43a   : > { %v3790_v32 = vadd.f32 %v3589_v28, %v3206_v59  ;;  %v4369_v47 = vsel %vm4194_vm5, %v20908_v58, %v4368_v8  ;;  %v5535_v40 = vrot.slane %v5255_v44, 6  ;;  %v4371_v48 = vsel %vm4194_vm5, %v4368_v8, %v20455_v25  ;;  %v6283_v28 = vpop.f32.mrb[25].mxu1 }
 0x43b   : > { %v20453_v59 = vrot.slane %v17863_v18, 6  ;;  %v1361_v39 = vmul.f32 %v12685_v7, %v16822_v30  ;;  %v3987_v58 = vadd.f32 %v3891_v57, %v3791_v46  ;;  %v20909_v3 = vrot.slane %v17733_v35, 5  ;;  %v17890_v8 = vpop.f32.mrb[26].mxu1 }
 0x43c   : > { %v3986_v6 = vadd.f32 %v3890_v50, %v3790_v32  ;;  %v4955_v44 = vsel %vm4778_vm6, %v4952_v27, %v20454_v63  ;;  %v20910_v50 = vrot.slane %v17751_v55, 6  ;;  %v1362_v35 = vmul.f32 %v12685_v7, %v16937_v61  ;;  %v17899_v57 = vpop.f32.mrb[27].mxu1 }
 0x43d   : > { %v4953_v42 = vsel %vm4778_vm6, %v20909_v3, %v4952_v27  ;;  %v5538_v30 = vsel %vm732_vm0, %v5535_v40, %v20453_v59  ;;  %v1558_v46 = vmul.f32 %v12690_v12, %v16937_v61  ;;  %20911 = vst [vmem:[#allocation25_spill] sm:$0xff] %v17899_v57  ;;  %v4571_v27 = vadd.f32 %v4371_v48, %v3987_v58 }
 0x43e   : > { %v5536_v60 = vsel %vm732_vm0, %v20910_v50, %v5535_v40  ;;  %v4570_v32 = vadd.f32 %v4369_v47, %v3986_v6  ;;  %v17903_v55 = vmul.f32 %v12690_v12, %v16820_v38  ;;  %v2142_v47 = vmul.f32 %v12692_v13, %v16937_v61 }
 0x43f   : > { %v17909_v34 = vmul.f32 %v12692_v13, %v16820_v38  ;;  %v1841_v6 = vrot.slane %v1558_v46, 1  ;;  %v2726_v28 = vmul.f32 %v12694_v14, %v16820_v38  ;;  %v17915_v3 = vmul.f32 %v12694_v14, %v16933_v41 }
 0x440   : > { %v5154_v40 = vadd.f32 %v4953_v42, %v4570_v32  ;;  %v5155_v48 = vadd.f32 %v4955_v44, %v4571_v27  ;;  %v1843_v58 = vrot.slane %v17903_v55, 1  ;;  %v2425_v50 = vrot.slane %v2142_v47, 2 }
 0x441   : > { %v20458_v59 = vrot.slane %v17909_v34, 2  ;;  %v20912_v63 = vrot.slane %v17782_v29, 1  ;;  %v3008_v42 = vrot.slane %v2726_v28, 6  ;;  %v20457_v32 = vrot.slane %v17915_v3, 6 }
 0x442   : > { %v5737_v61 = vadd.f32 %v5536_v60, %v5154_v40  ;;  %v5738_v46 = vadd.f32 %v5538_v30, %v5155_v48  ;;  %v1844_v36 = vsel %vm1663_vm2, %v1841_v6, %v1843_v58  ;;  %v20913_v44 = vrot.slane %v17790_v62, 2 }
 0x443   : > { %v1842_v25 = vsel %vm1663_vm2, %v20912_v63, %v1841_v6  ;;  %v2042_v60 = vadd.f32 %v1844_v36, %v1362_v35  ;;  %v2428_v63 = vsel %vm2247_vm3, %v2425_v50, %v20458_v59  ;;  %v20914_v29 = vrot.slane %v17799_v31, 6 }
 0x444   : > { %v2041_v57 = vadd.f32 %v1842_v25, %v1361_v39  ;;  %v2426_v27 = vsel %vm2247_vm3, %v20913_v44, %v2425_v50  ;;  %v5837_v47 = vadd.f32 %v17805_v26, %v5737_v61  ;;  %v5838_v40 = vadd.f32 %v17805_v26, %v5738_v46 }
 0x445   : > { %v3009_v30 = vsel %vm732_vm0, %v20914_v29, %v3008_v42  ;;  %v3011_v62 = vsel %vm732_vm0, %v3008_v42, %v20457_v32  ;;  %v3309_v25 = vmul.f32 %v12696_v16, %v16820_v38  ;;  %v2626_v36 = vadd.f32 %v2428_v63, %v2042_v60 }
 0x446   : > { %v2625_v28 = vadd.f32 %v2426_v27, %v2041_v57  ;;  %v5933_v39 = vmax.f32 %v5837_v47, 0.0  ;;  %v17944_v35 = vmul.f32 %v12696_v16, %v16933_v41  ;;  %v3892_v31 = vmul.f32 %v12699_v19, %v16820_v38 }
 0x447   : > { %v5934_v6 = vmax.f32 %v5838_v40, 0.0  ;;  %v3592_v50 = vrot.slane %v3309_v25, 7  ;;  %v3893_v57 = vmul.f32 %v12699_v19, %v16933_v41  ;;  %v3209_v61 = vadd.f32 %v3011_v62, %v2626_v36 }
 0x448   : > { %v3208_v48 = vadd.f32 %v3009_v30, %v2625_v28  ;;  %v20462_v42 = vrot.slane %v17944_v35, 7  ;;  %v4089_v46 = vmul.f32 %v12702_v23, %v17054_v21  ;;  %v17955_v44 = vmul.f32 %v12702_v23, %v17164_v45  ;;  %v17966_v30 = vpop.f32.mrb[28].mxu1 }
 0x449   : > { %v5986_v27 = vpack.c.bf16 %v5934_v6, %v5933_v39  ;;  %v20915_v47 = vrot.slane %v17834_v56, 7  ;;  %v4673_v63 = vmul.f32 %v12704_v24, %v17054_v21  ;;  %v17964_v29 = vmul.f32 %v12704_v24, %v17164_v45  ;;  %v17972_v56 = vpop.f32.mrb[29].mxu1 }
 0x44a   : > { %v3595_v40 = vsel %vm3414_vm4, %v3592_v50, %v20462_v42  ;;  %v4372_v62 = vrot.slane %v4089_v46, 4  ;;  %v20461_v25 = vrot.slane %v17955_v44, 4  ;;  %v20916_v59 = vrot.slane %v17845_v51, 4 }
 0x44b   : > { %v3593_v60 = vsel %vm3414_vm4, %v20915_v47, %v3592_v50  ;;  %12278 = vmatmul.mubr.msk.bf16.gmra.mrb[84].mxu1 %vm6011_vm7, %v5986_v27  ;;  %v3793_v39 = vadd.f32 %v3595_v40, %v3209_v61  ;;  %v4956_v36 = vrot.slane %v4673_v63, 5  ;;  %v20460_v6 = vrot.slane %v17964_v29, 5 }
 0x44c   : > { %v3792_v28 = vadd.f32 %v3593_v60, %v3208_v48  ;;  %v5257_v47 = vmul.f32 %v17742_v0, %v17054_v21  ;;  %v4373_v50 = vsel %vm4194_vm5, %v20916_v59, %v4372_v62  ;;  %v4375_v48 = vsel %vm4194_vm5, %v4372_v62, %v20461_v25 }
 0x44d   : > { %v17986_v46 = vmul.f32 %v17742_v0, %v17164_v45  ;;  %v3989_v61 = vadd.f32 %v3893_v57, %v3793_v39  ;;  %v20917_v27 = vrot.slane %v17857_v37, 5  ;;  %v1363_v40 = vmul.f32 %v12685_v7, %v16820_v38 }
 0x44e   : > { %v3988_v32 = vadd.f32 %v3892_v31, %v3792_v28  ;;  %v4959_v31 = vsel %vm4778_vm6, %v4956_v36, %v20460_v6  ;;  %v5539_v51 = vrot.slane %v5257_v47, 6  ;;  %v1364_v28 = vmul.f32 %v12685_v7, %v16933_v41 }
 0x44f   : > { %v4957_v60 = vsel %vm4778_vm6, %v20917_v27, %v4956_v36  ;;  %v20459_v59 = vrot.slane %v17986_v46, 6  ;;  %v4573_v62 = vadd.f32 %v4375_v48, %v3989_v61  ;;  %v20918_v57 = vrot.slane %v17863_v18, 6 }
 0x450   : > { %v4572_v63 = vadd.f32 %v4373_v50, %v3988_v32  ;;  %v1560_v39 = vmul.f32 %v12690_v12, %v16933_v41  ;;  %v18006_v36 = vmul.f32 %v12690_v12, %v17054_v21  ;;  %v2144_v47 = vmul.f32 %v12692_v13, %v16933_v41  ;;  %v18017_v50 = vpop.f32.mrb[30].mxu1 }
 0x451   : > { %v5540_v37 = vsel %vm732_vm0, %v20918_v57, %v5539_v51  ;;  %v5542_v38 = vsel %vm732_vm0, %v5539_v51, %v20459_v59  ;;  %v18015_v18 = vmul.f32 %v12692_v13, %v17054_v21  ;;  %v5157_v48 = vadd.f32 %v4959_v31, %v4573_v62 }
 0x452   : > { %v5156_v32 = vadd.f32 %v4957_v60, %v4572_v63  ;;  %v1845_v61 = vrot.slane %v1560_v39, 1  ;;  %v20464_v27 = vrot.slane %v18006_v36, 1  ;;  %v2728_v60 = vmul.f32 %v12694_v14, %v17054_v21  ;;  %v18022_v63 = vpop.f32.mrb[31].mxu1 }
 0x453   : > { %v2429_v51 = vrot.slane %v2144_v47, 2  ;;  %v18027_v41 = vmul.f32 %v12694_v14, %v17164_v45  ;;  %v5740_v6 = vadd.f32 %v5542_v38, %v5157_v48  ;;  %v20919_v47 = vrot.slane %v17909_v34, 2 }
 0x454   : > { %v5739_v57 = vadd.f32 %v5540_v37, %v5156_v32  ;;  %v1846_v31 = vsel %vm1663_vm2, %v1843_v58, %v1845_v61  ;;  %v1848_v62 = vsel %vm1663_vm2, %v1845_v61, %v20464_v27  ;;  %v3012_v39 = vrot.slane %v2728_v60, 6 }
 0x455   : > { %v2043_v37 = vadd.f32 %v1846_v31, %v1363_v40  ;;  %v2044_v32 = vadd.f32 %v1848_v62, %v1364_v28  ;;  %v2430_v42 = vsel %vm2247_vm3, %v20919_v47, %v2429_v51  ;;  %v5840_v59 = vadd.f32 %v17805_v26, %v5740_v6 }
 0x456   : > { %v5839_v25 = vadd.f32 %v17805_v26, %v5739_v57  ;;  %v20920_v38 = vrot.slane %v18015_v18, 2  ;;  %v20921_v58 = vrot.slane %v17915_v3, 6  ;;  %v20463_v61 = vrot.slane %v18027_v41, 6 }
 0x457   : > { %v2627_v57 = vadd.f32 %v2430_v42, %v2043_v37  ;;  %v3311_v34 = vmul.f32 %v12696_v16, %v17054_v21  ;;  %v5936_v28 = vmax.f32 %v5840_v59, 0.0  ;;  %v3894_v3 = vmul.f32 %v12699_v19, %v17054_v21 }
 0x458   : > { %v2432_v55 = vsel %vm2247_vm3, %v2429_v51, %v20920_v38  ;;  %v3013_v48 = vsel %vm732_vm0, %v20921_v58, %v3012_v39  ;;  %v5935_v60 = vmax.f32 %v5839_v25, 0.0  ;;  %v3015_v6 = vsel %vm732_vm0, %v3012_v39, %v20463_v61 }
 0x459   : > { %v2628_v40 = vadd.f32 %v2432_v55, %v2044_v32  ;;  %v18054_v51 = vmul.f32 %v12696_v16, %v17164_v45  ;;  %v3210_v31 = vadd.f32 %v3013_v48, %v2627_v57  ;;  %v3596_v25 = vrot.slane %v3311_v34, 7 }
 0x45a   : > { %v3895_v42 = vmul.f32 %v12699_v19, %v17164_v45  ;;  %v5987_v37 = vpack.c.bf16 %v5936_v28, %v5935_v60  ;;  %v4091_v32 = vmul.f32 %v12702_v23, %v17044_v10  ;;  %v18065_v39 = vmul.f32 %v12702_v23, %v17160_v53 }
 0x45b   : > { %v3211_v62 = vadd.f32 %v3015_v6, %v2628_v40  ;;  %v20468_v59 = vrot.slane %v18054_v51, 7  ;;  %v20922_v47 = vrot.slane %v17944_v35, 7  ;;  %v4675_v55 = vmul.f32 %v12704_v24, %v17044_v10 }
 0x45c   : > { %v18074_v58 = vmul.f32 %v12704_v24, %v17160_v53  ;;  %v5259_v48 = vmul.f32 %v17742_v0, %v17044_v10  ;;  %12281 = vmatprep.mubr.msk.bf16.mxu1 %vm6011_vm7, %v5987_v37  ;;  %v4376_v35 = vrot.slane %v4091_v32, 4  ;;  %v20467_v40 = vrot.slane %v18065_v39, 4 }
 0x45d   : > { %v3597_v38 = vsel %vm3414_vm4, %v20922_v47, %v3596_v25  ;;  %v3599_v60 = vsel %vm3414_vm4, %v3596_v25, %v20468_v59  ;;  %v4960_v28 = vrot.slane %v4675_v55, 5  ;;  %v18086_v47 = vmul.f32 %v17742_v0, %v17160_v53 }
 0x45e   : > { %v3794_v57 = vadd.f32 %v3597_v38, %v3210_v31  ;;  %v3795_v34 = vadd.f32 %v3599_v60, %v3211_v62  ;;  %v20466_v6 = vrot.slane %v18074_v58, 5  ;;  %v20923_v27 = vrot.slane %v17955_v44, 4  ;;  %v18101_v60 = vpop.f32.mrb[32].mxu1 }
 0x45f   : > { %v4379_v31 = vsel %vm4194_vm5, %v4376_v35, %v20467_v40  ;;  %v5543_v25 = vrot.slane %v5259_v48, 6  ;;  %v20924_v62 = vrot.slane %v17964_v29, 5  ;;  %20925 = vst [vmem:[#allocation26_spill] sm:$0xff] %v18101_v60  ;;  %v1366_v29 = vmul.f32 %v12685_v7, %v17164_v45  ;;  %v18110_v48 = vpop.f32.mrb[33].mxu1 }
 0x460   : > { %v3990_v61 = vadd.f32 %v3894_v3, %v3794_v57  ;;  %v4377_v37 = vsel %vm4194_vm5, %v20923_v27, %v4376_v35  ;;  %v3991_v32 = vadd.f32 %v3895_v42, %v3795_v34  ;;  %v4963_v55 = vsel %vm4778_vm6, %v4960_v28, %v20466_v6  ;;  %20927 = vst [vmem:[#allocation27_spill] sm:$0xff] %v18110_v48  ;;  %v18135_v6 = vpop.f32.mrb[34].mxu1 }
 0x461   : > { %v4961_v38 = vsel %vm4778_vm6, %v20924_v62, %v4960_v28  ;;  %v20465_v3 = vrot.slane %v18086_v47, 6  ;;  %v20926_v27 = vrot.slane %v17986_v46, 6  ;;  %v1365_v42 = vmul.f32 %v12685_v7, %v17054_v21  ;;  %20928 = vst [vmem:[#allocation28_spill] sm:$0xff] %v18135_v6 }
 0x462   : > { %v4574_v44 = vadd.f32 %v4377_v37, %v3990_v61  ;;  %v4575_v35 = vadd.f32 %v4379_v31, %v3991_v32  ;;  %v1562_v61 = vmul.f32 %v12690_v12, %v17164_v45  ;;  %v18119_v46 = vmul.f32 %v12690_v12, %v17044_v10 }
 0x463   : > { %v5544_v57 = vsel %vm732_vm0, %v20926_v27, %v5543_v25  ;;  %v5546_v34 = vsel %vm732_vm0, %v5543_v25, %v20465_v3  ;;  %v2146_v21 = vmul.f32 %v12692_v13, %v17164_v45  ;;  %v18125_v37 = vmul.f32 %v12692_v13, %v17044_v10 }
 0x464   : > { %v5158_v28 = vadd.f32 %v4961_v38, %v4574_v44  ;;  %v2730_v31 = vmul.f32 %v12694_v14, %v17044_v10  ;;  %v5159_v32 = vadd.f32 %v4963_v55, %v4575_v35  ;;  %v1849_v25 = vrot.slane %v1562_v61, 1  ;;  %v18144_v61 = vpop.f32.mrb[35].mxu1 }
 0x465   : > { %v20469_v62 = vrot.slane %v18119_v46, 1  ;;  %v18132_v27 = vmul.f32 %v12694_v14, %v17160_v53  ;;  %v2433_v38 = vrot.slane %v2146_v21, 2  ;;  %v20471_v44 = vrot.slane %v18125_v37, 2  ;;  %20930 = vst [vmem:[#allocation29_spill] sm:$0xff] %v18144_v61 }
 0x466   : > { %v5741_v3 = vadd.f32 %v5544_v57, %v5158_v28  ;;  %v3016_v45 = vrot.slane %v2730_v31, 6  ;;  %v5742_v40 = vadd.f32 %v5546_v34, %v5159_v32  ;;  %v20929_v59 = vrot.slane %v18006_v36, 1  ;;  %v18150_v32 = vpop.f32.mrb[36].mxu1 }
 0x467   : > { %v1852_v55 = vsel %vm1663_vm2, %v1849_v25, %v20469_v62  ;;  %v20470_v35 = vrot.slane %v18132_v27, 6  ;;  %v20931_v31 = vrot.slane %v18015_v18, 2  ;;  %20932 = vst [vmem:[#allocation30_spill] sm:$0xff] %v18150_v32 }
 0x468   : > { %v1850_v48 = vsel %vm1663_vm2, %v20929_v59, %v1849_v25  ;;  %v5841_v57 = vadd.f32 %v17805_v26, %v5741_v3  ;;  %v2046_v21 = vadd.f32 %v1852_v55, %v1366_v29  ;;  %v5842_v36 = vadd.f32 %v17805_v26, %v5742_v40 }
 0x469   : > { %v2045_v28 = vadd.f32 %v1850_v48, %v1365_v42  ;;  %v2434_v34 = vsel %vm2247_vm3, %v20931_v31, %v2433_v38  ;;  %v2436_v59 = vsel %vm2247_vm3, %v2433_v38, %v20471_v44  ;;  %v20933_v25 = vrot.slane %v18027_v41, 6  ;;  %v18162_v42 = vpop.f32.mrb[37].mxu1 }
 0x46a   : > { %v3019_v3 = vsel %vm732_vm0, %v3016_v45, %v20470_v35  ;;  %20934 = vst [vmem:[#allocation31_spill] sm:$0xff] %v18162_v42  ;;  %v5937_v18 = vmax.f32 %v5841_v57, 0.0  ;;  %v2630_v48 = vadd.f32 %v2436_v59, %v2046_v21  ;;  %v3313_v40 = vmul.f32 %v12696_v16, %v17044_v10 }
 0x46b   : > { %v3017_v62 = vsel %vm732_vm0, %v20933_v25, %v3016_v45  ;;  %v2629_v29 = vadd.f32 %v2434_v34, %v2045_v28  ;;  %v5938_v55 = vmax.f32 %v5842_v36, 0.0  ;;  %v18168_v38 = vmul.f32 %v12696_v16, %v17160_v53 }
 0x46c   : > { %v3896_v41 = vmul.f32 %v12699_v19, %v17044_v10  ;;  %v3897_v31 = vmul.f32 %v12699_v19, %v17160_v53  ;;  %v3213_v25 = vadd.f32 %v3019_v3, %v2630_v48  ;;  %v3600_v35 = vrot.slane %v3313_v40, 7 }
 0x46d   : > { %v3212_v45 = vadd.f32 %v3017_v62, %v2629_v29  ;;  %v4093_v57 = vmul.f32 %v12702_v23, %v17270_v52  ;;  %v5988_v28 = vpack.c.bf16 %v5938_v55, %v5937_v18  ;;  %v3602_v21 = vrot.slane %v18168_v38, 7 }
 0x46e   : > { %v4677_v34 = vmul.f32 %v12704_v24, %v17270_v52  ;;  %v4966_v36 = vrot.slane %v17440_v15, 5  ;;  %v20935_v59 = vrot.slane %v18054_v51, 7  ;;  %v5261_v62 = vmul.f32 %v17742_v0, %v17270_v52 }
 0x46f   : > { %v4380_v42 = vrot.slane %v4093_v57, 4  ;;  %v18187_v3 = vmul.f32 %v17742_v0, %v17388_v11  ;;  %12282 = vmatmul.mubr.msk.bf16.gmra.mrb[88].mxu1 %vm6011_vm7, %v5988_v28  ;;  %v3603_v23 = vsel %vm3414_vm4, %v3600_v35, %v3602_v21  ;;  %v1367_v51 = vmul.f32 %v12685_v7, %v17044_v10 }
 0x470   : > { %v3601_v44 = vsel %vm3414_vm4, %v20935_v59, %v3600_v35  ;;  %v4964_v18 = vrot.slane %v4677_v34, 5  ;;  %v3797_v29 = vadd.f32 %v3603_v23, %v3213_v25  ;;  %v20936_v48 = vrot.slane %v18065_v39, 4 }
 0x471   : > { %v3796_v24 = vadd.f32 %v3601_v44, %v3212_v45  ;;  %v20937_v55 = vrot.slane %v17421_v20, 4  ;;  %v5547_v0 = vrot.slane %v5261_v62, 6  ;;  %v20938_v28 = vrot.slane %v18074_v58, 5  ;;  %v18215_v58 = vpop.f32.mrb[38].mxu1 }
 0x472   : > { %v4381_v40 = vsel %vm4194_vm5, %v20936_v48, %v4380_v42  ;;  %v4967_v44 = vsel %vm4778_vm6, %v4964_v18, %v4966_v36  ;;  %v5549_v10 = vrot.slane %v18187_v3, 6  ;;  %v3993_v45 = vadd.f32 %v3897_v31, %v3797_v29  ;;  %20940 = vst [vmem:[#allocation32_spill] sm:$0xff] %v18215_v58 }
 0x473   : > { %v4383_v11 = vsel %vm4194_vm5, %v4380_v42, %v20937_v55  ;;  %v3992_v57 = vadd.f32 %v3896_v41, %v3796_v24  ;;  %v4965_v35 = vsel %vm4778_vm6, %v20938_v28, %v4964_v18  ;;  %v20939_v39 = vrot.slane %v18086_v47, 6  ;;  %v18222_v47 = vpop.f32.mrb[39].mxu1 }
 0x474   : > { %v1368_v42 = vmul.f32 %v12685_v7, %v17160_v53  ;;  %v1564_v41 = vmul.f32 %v12690_v12, %v17160_v53  ;;  %v5550_v59 = vsel %vm732_vm0, %v5547_v0, %v5549_v10  ;;  %v1565_v62 = vmul.f32 %v12690_v12, %v17270_v52  ;;  %20941 = vst [vmem:[#allocation33_spill] sm:$0xff] %v18222_v47  ;;  %v18230_v12 = vpop.f32.mrb[40].mxu1 }
 0x475   : > { %v5548_v25 = vsel %vm732_vm0, %v20939_v39, %v5547_v0  ;;  %v4576_v34 = vadd.f32 %v4381_v40, %v3992_v57  ;;  %v2148_v31 = vmul.f32 %v12692_v13, %v17160_v53  ;;  %v4577_v3 = vadd.f32 %v4383_v11, %v3993_v45  ;;  %20942 = vst [vmem:[#allocation34_spill] sm:$0xff] %v18230_v12  ;;  %v18235_v28 = vpop.f32.mrb[41].mxu1 }
 0x476   : > { %v1853_v23 = vrot.slane %v1564_v41, 1  ;;  %v2149_v7 = vmul.f32 %v12692_v13, %v17270_v52  ;;  %v2732_v24 = vmul.f32 %v12694_v14, %v17270_v52  ;;  %v1855_v29 = vrot.slane %v1565_v62, 1  ;;  %20944 = vst [vmem:[#allocation35_spill] sm:$0xff] %v18235_v28  ;;  %v18245_v62 = vpop.f32.mrb[42].mxu1 }
 0x477   : > { %v5160_v18 = vadd.f32 %v4965_v35, %v4576_v34  ;;  %v2437_v48 = vrot.slane %v2148_v31, 2  ;;  %v3315_v40 = vmul.f32 %v12696_v16, %v17270_v52  ;;  %v5161_v55 = vadd.f32 %v4967_v44, %v4577_v3  ;;  %20947 = vst [vmem:[#allocation36_spill] sm:$0xff] %v18245_v62 }
 0x478   : > { %v20943_v53 = vrot.slane %v18119_v46, 1  ;;  %v2439_v0 = vrot.slane %v2149_v7, 2  ;;  %v3020_v57 = vrot.slane %v2732_v24, 6  ;;  %v1856_v14 = vsel %vm1663_vm2, %v1853_v23, %v1855_v29 }
 0x479   : > { %v5743_v13 = vadd.f32 %v5548_v25, %v5160_v18  ;;  %v20945_v45 = vrot.slane %v18125_v37, 2  ;;  %v5744_v16 = vadd.f32 %v5550_v59, %v5161_v55  ;;  %v2048_v41 = vadd.f32 %v1856_v14, %v1368_v42 }
 0x47a   : > { %v1854_v11 = vsel %vm1663_vm2, %v20943_v53, %v1853_v23  ;;  %v2440_v44 = vsel %vm2247_vm3, %v2437_v48, %v2439_v0  ;;  %v20946_v46 = vrot.slane %v18132_v27, 6  ;;  %v20948_v3 = vrot.slane %v17405_v33, 6  ;;  %v18251_v23 = vpop.f32.mrb[43].mxu1  ;;  %v18264_v33 = vld [vmem:[%s20216_s3 + $0xb] ss:$0 sm:$0xff] }
 0x47b   : > { %v2047_v35 = vadd.f32 %v1854_v11, %v1367_v51  ;;  %v2438_v39 = vsel %vm2247_vm3, %v20945_v45, %v2437_v48  ;;  %v5843_v31 = vadd.f32 %v17805_v26, %v5743_v13  ;;  %v3604_v37 = vrot.slane %v3315_v40, 7  ;;  %20949 = vst [vmem:[#allocation37_spill] sm:$0xff] %v18251_v23  ;;  %v12239_v29 = vpop.f32.mrb[44].mxu1  ;;  %v20956_v45 = vld [vmem:[#allocation12_spill] sm:$0xff] }
 0x47c   : > { %v3021_v34 = vsel %vm732_vm0, %v20946_v46, %v3020_v57  ;;  %v3023_v51 = vsel %vm732_vm0, %v3020_v57, %v20948_v3  ;;  %v5844_v42 = vadd.f32 %v17805_v26, %v5744_v16  ;;  %v2632_v59 = vadd.f32 %v2440_v44, %v2048_v41  ;;  %v18290_v41 = vpop.f32.mrb[45].mxu1 }
 0x47d   : > { %v2631_v25 = vadd.f32 %v2438_v39, %v2047_v35  ;;  %v3898_v27 = vmul.f32 %v12699_v19, %v17270_v52  ;;  %v20950_v7 = vrot.slane %v17285_v5, 4  ;;  %v20951_v24 = vrot.slane %v17421_v20, 4  ;;  %v12240_v46 = vpop.f32.mrb[46].mxu1 }
 0x47e   : > { %v5939_v48 = vmax.f32 %v5843_v31, 0.0  ;;  %v3605_v55 = vsel %vm3414_vm4, %v3602_v21, %v3604_v37  ;;  %v20952_v19 = vrot.slane %v17409_v1, 7  ;;  %v5940_v5 = vmax.f32 %v5844_v42, 0.0  ;;  %v20955_v21 = vld [vmem:[#allocation11_spill] sm:$0xff] }
 0x47f   : > { %v4385_v18 = vsel %vm4194_vm5, %v20951_v24, %v20950_v7  ;;  %v3214_v40 = vadd.f32 %v3021_v34, %v2631_v25  ;;  %v3215_v20 = vadd.f32 %v3023_v51, %v2632_v59  ;;  %v20953_v53 = vrot.slane %v17288_v2, 5  ;;  %20957 = vst [vmem:[#allocation11_spill] sm:$0xff] %v18290_v41  ;;  %v20959_v25 = vld [vmem:[#allocation4_spill] sm:$0xff]  ;;  %v20961_v42 = vld [vmem:[#allocation3_spill] sm:$0xff] }
 0x480   : > { %v3607_v52 = vsel %vm3414_vm4, %v3604_v37, %v20952_v19  ;;  %v20954_v0 = vrot.slane %v17291_v4, 6  ;;  %v6199_v38 = vadd.f32 %v17530_v43, %v18264_v33  ;;  %v6191_v1 = vadd.f32 %v18264_v33, %v17539_v54  ;;  %v20958_v43 = vld [vmem:[#allocation14_spill] sm:$0xff] }
 0x481   : > { %v4969_v11 = vsel %vm4778_vm6, %v4966_v36, %v20953_v53  ;;  %v3798_v13 = vadd.f32 %v3605_v55, %v3214_v40  ;;  %v6202_v14 = vadd.f32 %v20955_v21, %v18264_v33  ;;  %v5989_v35 = vpack.c.bf16 %v5940_v5, %v5939_v48  ;;  %v20960_v37 = vld [vmem:[#allocation2_spill] sm:$0xff]  ;;  %v18302_v48 = vpop.f32.mrb[47].mxu1 }
 0x482   : > { %v5552_v57 = vsel %vm732_vm0, %v5549_v10, %v20954_v0  ;;  %v3799_v2 = vadd.f32 %v3607_v52, %v3215_v20  ;;  %v6194_v15 = vadd.f32 %v18264_v33, %v20956_v45  ;;  %v6215_v4 = vadd.f32 %v17563_v9, %v18264_v33  ;;  %20964 = vst [vmem:[#allocation12_spill] sm:$0xff] %v18302_v48  ;;  %v20965_v52 = vld [vmem:[#allocation15_spill] sm:$0xff] }
 0x483   : > { %v3994_v36 = vadd.f32 %v3898_v27, %v3798_v13  ;;  %v6563_v10 = vmax.f32 %v6199_v38, 0.0  ;;  %v6561_v39 = vmax.f32 %v6191_v1, 0.0  ;;  %v6564_v16 = vmax.f32 %v6202_v14, 0.0  ;;  %12285 = vmatprep.mubr.msk.bf16.mxu1 %vm6011_vm7, %v5989_v35  ;;  %v20963_v27 = vld [vmem:[#allocation5_spill] sm:$0xff]  ;;  %v18307_v13 = vpop.f32.mrb[48].mxu1 }
 0x484   : > { %v3995_v54 = vadd.f32 %v20958_v43, %v3799_v2  ;;  %v6562_v44 = vmax.f32 %v6194_v15, 0.0  ;;  %v20962_v9 = vunpack.c.0.s8 %v20961_v42  ;;  %v6567_v29 = vmax.f32 %v6215_v4, 0.0  ;;  %20966 = vst [vmem:[#allocation14_spill] sm:$0xff] %v18307_v13  ;;  %v6376_v35 = vpop.f32.mrb[49].mxu1  ;;  %v20968_v4 = vld [vmem:[#allocation9_spill] sm:$0xff] }
 0x485   : > { %v4578_v34 = vadd.f32 %v4385_v18, %v3994_v36  ;;  %v6700_v31 = vcombine.high %v6563_v10, %v6563_v10  ;;  %v6707_v3 = vrot.slane %v6563_v10, %v20959_v25  ;;  %v6666_v51 = vcombine.high %v6561_v39, %v6561_v39  ;;  %v18316_v10 = vpop.f32.mrb[50].mxu1  ;;  %v20976_v35 = vld [vmem:[#allocation6_spill] sm:$0xff] }
 0x486   : > { %v18298_v59 = vsub.s32 %v20962_v9, %v20960_v37  ;;  %v4579_v7 = vadd.f32 %v20963_v27, %v3995_v54  ;;  %v6673_v24 = vrot.slane %v6561_v39, %v20959_v25  ;;  %v6717_v19 = vcombine.high %v6564_v16, %v6564_v16  ;;  %20969 = vst [vmem:[#allocation4_spill] sm:$0xff] %v18316_v10  ;;  %v6378_v46 = vpop.f32.mrb[51].mxu1 }
 0x487   : > { %v5162_v40 = vadd.f32 %v4969_v11, %v4578_v34  ;;  %v6715_v55 = vcombine.high %v6707_v3, %v6707_v3  ;;  %v6680_v18 = vrot.slane %v6666_v51, %v20959_v25  ;;  %v6714_v20 = vrot.slane %v6700_v31, %v20959_v25  ;;  %v20967_v11 = vld [vmem:[#allocation16_spill] sm:$0xff] }
 0x488   : > { %v5163_v5 = vadd.f32 %v20965_v52, %v4579_v7  ;;  %v6681_v53 = vcombine.high %v6673_v24, %v6673_v24  ;;  %v6683_v0 = vcombine.high %v6562_v44, %v6562_v44  ;;  %v6690_v14 = vrot.slane %v6562_v44, %v20959_v25 }
 0x489   : > { %v5745_v38 = vadd.f32 %v5552_v57, %v5162_v40  ;;  %v6682_v1 = vcombine.high %v6680_v18, %v6680_v18  ;;  %v18309_v21 = vcombine.low %v6680_v18, %v6715_v55  ;;  %v6207_v36 = vadd.f32 %v18264_v33, %v20968_v4  ;;  %v18323_v40 = vpop.f32.mrb[52].mxu1 }
 0x48a   : > { %v5746_v2 = vadd.f32 %v20967_v11, %v5163_v5  ;;  %v7143_v45 = vcombine.low %v6681_v53, %v6707_v3  ;;  %v6697_v15 = vrot.slane %v6683_v0, %v20959_v25  ;;  %v6724_v57 = vrot.slane %v6564_v16, %v20959_v25  ;;  %20970 = vst [vmem:[#allocation2_spill] sm:$0xff] %v18323_v40  ;;  %v18327_v52 = vpop.f32.mrb[53].mxu1  ;;  %v20996_v40 = vld [vmem:[#allocation21_spill] sm:$0xff] }
 0x48b   : > { %v5845_v39 = vadd.f32 %v17805_v26, %v5745_v38  ;;  %v7251_v43 = vcombine.low %v6682_v1, %v6714_v20  ;;  %v6698_v54 = vcombine.high %v6690_v14, %v6690_v14  ;;  %v6731_v34 = vrot.slane %v6717_v19, %v20959_v25  ;;  %20971 = vst [vmem:[#allocation3_spill] sm:$0xff] %v18327_v52  ;;  %v20973_v38 = vld [vmem:[#allocation17_spill] sm:$0xff] }
 0x48c   : > { %v5846_v44 = vadd.f32 %v17805_v26, %v5746_v2  ;;  %v6699_v31 = vcombine.high %v6697_v15, %v6697_v15  ;;  %v6716_v3 = vcombine.high %v6714_v20, %v6714_v20  ;;  %v6774_v7 = vrot.slane %v6567_v29, %v20959_v25 }
 0x48d   : > { %v5941_v51 = vmax.f32 %v5845_v39, 0.0  ;;  %v7359_v37 = vcombine.low %v6698_v54, %v6724_v57  ;;  %v6767_v55 = vcombine.high %v6567_v29, %v6567_v29  ;;  %v6565_v18 = vmax.f32 %v6207_v36, 0.0  ;;  %v20978_v57 = vld [vmem:[#allocation10_spill] sm:$0xff] }
 0x48e   : > { %v5942_v42 = vmax.f32 %v5846_v44, 0.0  ;;  %v7089_v9 = vcombine.low %v6673_v24, %v6699_v31  ;;  %v7305_v27 = vcombine.low %v6690_v14, %v6716_v3  ;;  %v6218_v16 = vadd.f32 %v17596_v22, %v18264_v33 }
 0x48f   : > { %v18330_v19 = vrot.slane %v7143_v45, %v18298_v59  ;;  %v6732_v5 = vcombine.high %v6731_v34, %v6731_v34  ;;  %v6782_v20 = vcombine.high %v6774_v7, %v6774_v7  ;;  %v6733_v53 = vcombine.high %v6565_v18, %v6565_v18 }
 0x490   : > { %v5990_v26 = vpack.c.bf16 %v5942_v42, %v5941_v51  ;;  %v6740_v24 = vrot.slane %v6565_v18, %v20959_v25  ;;  %v6568_v0 = vmax.f32 %v6218_v16, 0.0  ;;  %v6210_v1 = vadd.f32 %v18264_v33, %v20973_v38 }
 0x491   : > { %20972 = vst [vmem:[#allocation5_spill] sm:$0xff] %v18330_v19  ;;  %v18337_v29 = vrot.slane %v7251_v43, %v18298_v59  ;;  %v18340_v22 = vrot.slane %v7359_v37, %v18298_v59  ;;  %v6231_v14 = vadd.f32 %v17629_v49, %v18264_v33  ;;  %v6223_v11 = vadd.f32 %v18264_v33, %v20976_v35  ;;  %v18356_v49 = vpop.f32.mrb[54].mxu1  ;;  %v20988_v35 = vld [vmem:[#allocation8_spill] sm:$0xff] }
 0x492   : > { %12286 = vmatmul.mubr.msk.bf16.gmra.mrb[92].mxu1 %vm6011_vm7, %v5990_v26  ;;  %v18347_v2 = vrot.slane %v7089_v9, %v18298_v59  ;;  %v6781_v45 = vrot.slane %v6767_v55, %v20959_v25  ;;  %v6747_v15 = vrot.slane %v6733_v53, %v20959_v25  ;;  %v6748_v4 = vcombine.high %v6740_v24, %v6740_v24  ;;  %v20980_v9 = vld [vmem:[#allocation13_spill] sm:$0xff]  ;;  %v18368_v53 = vpop.f32.mrb[55].mxu1 }
 0x493   : > { %20974 = vst [vmem:[#allocation15_spill] sm:$0xff] %v18337_v29  ;;  %20975 = vst [vmem:[#allocation16_spill] sm:$0xff] %v18340_v22  ;;  %v18352_v36 = vrot.slane %v7305_v27, %v18298_v59  ;;  %v6783_v39 = vcombine.high %v6568_v0, %v6568_v0  ;;  %v6566_v43 = vmax.f32 %v6210_v1, 0.0  ;;  %v6234_v54 = vadd.f32 %v20978_v57, %v18264_v33 }
 0x494   : > { %20979 = vst [vmem:[#allocation17_spill] sm:$0xff] %v18356_v49  ;;  %v6749_v46 = vcombine.high %v6747_v15, %v6747_v15  ;;  %v7260_v44 = vcombine.low %v6748_v4, %v6774_v7  ;;  %v7314_v31 = vcombine.low %v6747_v15, %v6782_v20  ;;  %v6569_v3 = vmax.f32 %v6223_v11, 0.0  ;;  %20983 = vst [vmem:[#allocation13_spill] sm:$0xff] %v18368_v53 }
 0x495   : > { %20977 = vst [vmem:[#allocation9_spill] sm:$0xff] %v18352_v36  ;;  %v6750_v51 = vcombine.high %v6566_v43, %v6566_v43  ;;  %v6757_v37 = vrot.slane %v6566_v43, %v20959_v25  ;;  %v6571_v42 = vmax.f32 %v6231_v14, 0.0  ;;  %v6226_v55 = vadd.f32 %v18264_v33, %v20980_v9 }
 0x496   : > { %v18362_v27 = vrot.slane %v7260_v44, %v18298_v59  ;;  %v18365_v18 = vrot.slane %v7314_v31, %v18298_v59  ;;  %v7368_v16 = vcombine.low %v6749_v46, %v6781_v45  ;;  %v6790_v26 = vrot.slane %v6568_v0, %v20959_v25 }
 0x497   : > { %v6797_v7 = vrot.slane %v6783_v39, %v20959_v25  ;;  %v6764_v20 = vrot.slane %v6750_v51, %v20959_v25  ;;  %v6765_v38 = vcombine.high %v6757_v37, %v6757_v37  ;;  %v6572_v1 = vmax.f32 %v6234_v54, 0.0 }
 0x498   : > { %20981 = vst [vmem:[#allocation6_spill] sm:$0xff] %v18362_v27  ;;  %20982 = vst [vmem:[#allocation10_spill] sm:$0xff] %v18365_v18  ;;  %v18373_v14 = vrot.slane %v7368_v16, %v18298_v59  ;;  %v6800_v45 = vcombine.high %v6569_v3, %v6569_v3  ;;  %v6834_v43 = vcombine.high %v6571_v42, %v6571_v42 }
 0x499   : > { %v6766_v15 = vcombine.high %v6764_v20, %v6764_v20  ;;  %v7098_v0 = vcombine.low %v6731_v34, %v6765_v38  ;;  %v7152_v4 = vcombine.low %v6732_v5, %v6764_v20  ;;  %v6798_v57 = vcombine.high %v6790_v26, %v6790_v26  ;;  %v18391_v34 = vpop.f32.mrb[56].mxu1 }
 0x49a   : > { %20984 = vst [vmem:[#allocation38_spill] sm:$0xff] %v18373_v14  ;;  %v6807_v54 = vrot.slane %v6569_v3, %v20959_v25  ;;  %v6814_v46 = vrot.slane %v6800_v45, %v20959_v25  ;;  %v6850_v37 = vcombine.high %v6572_v1, %v6572_v1  ;;  %20986 = vst [vmem:[#allocation40_spill] sm:$0xff] %v18391_v34  ;;  %v6570_v20 = vmax.f32 %v6226_v55, 0.0 }
 0x49b   : > { %v18384_v44 = vrot.slane %v7098_v0, %v18298_v59  ;;  %v18387_v31 = vrot.slane %v7152_v4, %v18298_v59  ;;  %v18389_v51 = vcombine.low %v6740_v24, %v6766_v15  ;;  %v6841_v5 = vrot.slane %v6571_v42, %v20959_v25  ;;  %v20987_v0 = vld [vmem:[#allocation7_spill] sm:$0xff] }
 0x49c   : > { %v6815_v9 = vcombine.high %v6807_v54, %v6807_v54  ;;  %v6816_v16 = vcombine.high %v6814_v46, %v6814_v46  ;;  %v6848_v45 = vrot.slane %v6834_v43, %v20959_v25  ;;  %v6247_v24 = vadd.f32 %v20987_v0, %v18264_v33 }
 0x49d   : > { %20985 = vst [vmem:[#allocation39_spill] sm:$0xff] %v18387_v31  ;;  %v18402_v39 = vrot.slane %v6572_v1, %v20959_v25  ;;  %v6817_v42 = vcombine.high %v6570_v20, %v6570_v20  ;;  %v18405_v46 = vrot.slane %v6850_v37, %v20959_v25  ;;  %v6824_v55 = vrot.slane %v6570_v20, %v20959_v25  ;;  %v20990_v1 = vld [vmem:[#allocation18_spill] sm:$0xff]  ;;  %v18420_v20 = vpop.f32.mrb[57].mxu1 }
 0x49e   : > { %v7107_v15 = vcombine.low %v6790_v26, %v6816_v16  ;;  %v7377_v4 = vcombine.low %v6815_v9, %v6841_v5  ;;  %v6575_v11 = vmax.f32 %v6247_v24, 0.0  ;;  %v6239_v38 = vadd.f32 %v18264_v33, %v20988_v35  ;;  %20991 = vst [vmem:[#allocation8_spill] sm:$0xff] %v18420_v20  ;;  %v18450_v10 = vpop.f32.mrb[58].mxu1 }
 0x49f   : > { %v18412_v43 = vrot.slane %v18309_v21, %v18298_v59  ;;  %v6799_v0 = vcombine.high %v6797_v7, %v6797_v7  ;;  %v6831_v26 = vrot.slane %v6817_v42, %v20959_v25  ;;  %v6250_v5 = vadd.f32 %v20990_v1, %v18264_v33  ;;  %v18452_v41 = vpop.f32.mrb[59].mxu1 }
 0x4a0   : > { %v6832_v9 = vcombine.high %v6824_v55, %v6824_v55  ;;  %v7161_v16 = vcombine.low %v6798_v57, %v6824_v55  ;;  %v6900_v37 = vcombine.high %v6575_v11, %v6575_v11  ;;  %v18418_v3 = vrot.slane %v6575_v11, %v20959_v25 }
 0x4a1   : > { %20989 = vst [vmem:[#allocation7_spill] sm:$0xff] %v18412_v43  ;;  %v6833_v24 = vcombine.high %v6831_v26, %v6831_v26  ;;  %v7269_v35 = vcombine.low %v6799_v0, %v6831_v26  ;;  %v6573_v34 = vmax.f32 %v6239_v38, 0.0  ;;  %v6576_v53 = vmax.f32 %v6250_v5, 0.0 }
 0x4a2   : > { %v6849_v21 = vcombine.high %v6848_v45, %v6848_v45  ;;  %v6865_v49 = vcombine.high %v18402_v39, %v18402_v39  ;;  %v6866_v42 = vcombine.high %v18405_v46, %v18405_v46  ;;  %v7215_v1 = vcombine.low %v6797_v7, %v6832_v9  ;;  %v20994_v9 = vld [vmem:[#allocation19_spill] sm:$0xff] }
 0x4a3   : > { %v18427_v57 = vrot.slane %v7107_v15, %v18298_v59  ;;  %v7323_v55 = vcombine.low %v6807_v54, %v6833_v24  ;;  %v6867_v11 = vcombine.high %v6573_v34, %v6573_v34  ;;  %v6874_v52 = vrot.slane %v6573_v34, %v20959_v25  ;;  %20997 = vst [vmem:[#allocation19_spill] sm:$0xff] %v18450_v10 }
 0x4a4   : > { %v18431_v20 = vrot.slane %v7377_v4, %v18298_v59  ;;  %v18434_v38 = vrot.slane %v7161_v16, %v18298_v59  ;;  %v6914_v0 = vrot.slane %v6900_v37, %v20959_v25  ;;  %v6917_v26 = vcombine.high %v6576_v53, %v6576_v53  ;;  %v20995_v16 = vld [vmem:[#allocation20_spill] sm:$0xff] }
 0x4a5   : > { %v6915_v5 = vcombine.high %v18418_v3, %v18418_v3  ;;  %v6881_v7 = vrot.slane %v6867_v11, %v20959_v25  ;;  %v6882_v15 = vcombine.high %v6874_v52, %v6874_v52  ;;  %v6242_v54 = vadd.f32 %v18264_v33, %v20994_v9  ;;  %20998 = vst [vmem:[#allocation20_spill] sm:$0xff] %v18452_v41 }
 0x4a6   : > { %20992 = vst [vmem:[#allocation18_spill] sm:$0xff] %v18431_v20  ;;  %20993 = vst [vmem:[#allocation41_spill] sm:$0xff] %v18434_v38  ;;  %v18443_v34 = vrot.slane %v7269_v35, %v18298_v59  ;;  %v6931_v4 = vrot.slane %v6917_v26, %v20959_v25  ;;  %v6263_v24 = vadd.f32 %v20995_v16, %v18264_v33 }
 0x4a7   : > { %v6255_v37 = vadd.f32 %v18264_v33, %v20996_v40  ;;  %v6883_v13 = vcombine.high %v6881_v7, %v6881_v7  ;;  %v7116_v48 = vcombine.low %v6848_v45, %v6882_v15  ;;  %v7170_v11 = vcombine.low %v6849_v21, %v6881_v7  ;;  %v21000_v15 = vld [vmem:[#allocation22_spill] sm:$0xff] }
 0x4a8   : > { %v6574_v52 = vmax.f32 %v6242_v54, 0.0  ;;  %v6916_v9 = vcombine.high %v6914_v0, %v6914_v0  ;;  %v6933_v23 = vcombine.high %v6931_v4, %v6931_v4  ;;  %v6579_v35 = vmax.f32 %v6263_v24, 0.0 }
 0x4a9   : > { %v6577_v62 = vmax.f32 %v6255_v37, 0.0  ;;  %v18455_v26 = vrot.slane %v7116_v48, %v18298_v59  ;;  %v18458_v16 = vrot.slane %v7170_v11, %v18298_v59  ;;  %v18461_v40 = vcombine.low %v18402_v39, %v6883_v13 }
 0x4aa   : > { %v6884_v10 = vcombine.high %v6574_v52, %v6574_v52  ;;  %v18464_v45 = vcombine.low %v18418_v3, %v6933_v23  ;;  %v6891_v21 = vrot.slane %v6574_v52, %v20959_v25  ;;  %v6967_v7 = vcombine.high %v6579_v35, %v6579_v35 }
 0x4ab   : > { %20999 = vst [vmem:[#allocation21_spill] sm:$0xff] %v18458_v16  ;;  %v6266_v54 = vadd.f32 %v21000_v15, %v18264_v33  ;;  %v6934_v13 = vcombine.high %v6577_v62, %v6577_v62  ;;  %v18475_v39 = vrot.slane %v7323_v55, %v18298_v59  ;;  %v6924_v23 = vrot.slane %v6576_v53, %v20959_v25 }
 0x4ac   : > { %v6898_v24 = vrot.slane %v6884_v10, %v20959_v25  ;;  %v6899_v3 = vcombine.high %v6891_v21, %v6891_v21  ;;  %v7278_v37 = vcombine.low %v6865_v49, %v6891_v21  ;;  %v6974_v52 = vrot.slane %v6579_v35, %v20959_v25 }
 0x4ad   : > { %21001 = vst [vmem:[#allocation22_spill] sm:$0xff] %v18475_v39  ;;  %v6941_v15 = vrot.slane %v6577_v62, %v20959_v25  ;;  %v6948_v48 = vrot.slane %v6934_v13, %v20959_v25  ;;  %v6981_v4 = vrot.slane %v6967_v7, %v20959_v25  ;;  %v6580_v55 = vmax.f32 %v6266_v54, 0.0  ;;  %v21008_v62 = vld [vmem:[#allocation24_spill] sm:$0xff] }
 0x4ae   : > { %v7386_v11 = vcombine.low %v6866_v42, %v6898_v24  ;;  %v18482_v41 = vrot.slane %v7278_v37, %v18298_v59  ;;  %v7332_v10 = vcombine.low %v18405_v46, %v6899_v3  ;;  %v18498_v24 = vpop.f32.mrb[60].mxu1  ;;  %v18501_v7 = vrot.slane %v7215_v1, %v18298_v59 }
 0x4af   : > { %v6949_v53 = vcombine.high %v6941_v15, %v6941_v15  ;;  %v6950_v49 = vcombine.high %v6948_v48, %v6948_v48  ;;  %v18489_v42 = vcombine.low %v6915_v5, %v6941_v15  ;;  %v7287_v46 = vcombine.low %v6916_v9, %v6948_v48  ;;  %21004 = vst [vmem:[#allocation44_spill] sm:$0xff] %v18498_v24  ;;  %v18509_v3 = vpop.f32.mrb[61].mxu1 }
 0x4b0   : > { %v18487_v28 = vrot.slane %v7386_v11, %v18298_v59  ;;  %v18492_v35 = vrot.slane %v7332_v10, %v18298_v59  ;;  %21005 = vst [vmem:[#allocation45_spill] sm:$0xff] %v18501_v7  ;;  %21006 = vst [vmem:[#allocation46_spill] sm:$0xff] %v18509_v3  ;;  %v6932_v37 = vcombine.high %v6924_v23, %v6924_v23  ;;  %v21007_v10 = vld [vmem:[#allocation23_spill] sm:$0xff]  ;;  %v21009_v11 = vld [vmem:[#allocation25_spill] sm:$0xff]  ;;  %v18532_v61 = vpop.f32.mrb[62].mxu1 }
 0x4b1   : > { %v18505_v5 = vcombine.low %v6914_v0, %v6949_v53  ;;  %v18507_v13 = vcombine.low %v6924_v23, %v6950_v49  ;;  %v6982_v15 = vcombine.high %v6974_v52, %v6974_v52  ;;  %v6984_v9 = vcombine.high %v6580_v55, %v6580_v55  ;;  %21011 = vst [vmem:[#allocation24_spill] sm:$0xff] %v18532_v61 }
 0x4b2   : > { %21002 = vst [vmem:[#allocation42_spill] sm:$0xff] %v18487_v28  ;;  %21003 = vst [vmem:[#allocation43_spill] sm:$0xff] %v18492_v35  ;;  %v6991_v48 = vrot.slane %v6580_v55, %v20959_v25  ;;  %v6258_v1 = vadd.f32 %v18264_v33, %v21007_v10  ;;  %v6271_v54 = vadd.f32 %v18264_v33, %v21008_v62 }
 0x4b3   : > { %v6291_v0 = vadd.f32 %v17873_v17, %v18264_v33  ;;  %v6983_v53 = vcombine.high %v6981_v4, %v6981_v4  ;;  %v6998_v49 = vrot.slane %v6984_v9, %v20959_v25  ;;  %v6294_v23 = vadd.f32 %v17890_v8, %v18264_v33 }
 0x4b4   : > { %v6286_v21 = vadd.f32 %v18264_v33, %v21009_v11  ;;  %v18526_v55 = vrot.slane %v7287_v46, %v18298_v59  ;;  %v6578_v3 = vmax.f32 %v6258_v1, 0.0  ;;  %v6581_v10 = vmax.f32 %v6271_v54, 0.0  ;;  %v18534_v54 = vpop.f32.mrb[63].mxu1 }
 0x4b5   : > { %v6583_v24 = vmax.f32 %v6291_v0, 0.0  ;;  %v6999_v12 = vcombine.high %v6991_v48, %v6991_v48  ;;  %v7000_v62 = vcombine.high %v6998_v49, %v6998_v49  ;;  %v6584_v47 = vmax.f32 %v6294_v23, 0.0  ;;  %21012 = vst [vmem:[#allocation25_spill] sm:$0xff] %v18534_v54 }
 0x4b6   : > { %21010 = vst [vmem:[#allocation23_spill] sm:$0xff] %v18526_v55  ;;  %v11840_v17 = vcombine.high %v18347_v2, %v18384_v44  ;;  %v6951_v58 = vcombine.high %v6578_v3, %v6578_v3  ;;  %v6958_v9 = vrot.slane %v6578_v3, %v20959_v25  ;;  %v7001_v32 = vcombine.high %v6581_v10, %v6581_v10 }
 0x4b7   : > { %v7008_v8 = vrot.slane %v6581_v10, %v20959_v25  ;;  %v7242_v11 = vcombine.low %v6974_v52, %v7000_v62  ;;  %v7926_v46 = vcombine.high %v6583_v24, %v6583_v24  ;;  %v7943_v6 = vcombine.high %v6584_v47, %v6584_v47  ;;  %v18544_v52 = vpop.f32.mrb[64].mxu1 }
 0x4b8   : > { %v6582_v1 = vmax.f32 %v6286_v21, 0.0  ;;  %v6965_v48 = vrot.slane %v6951_v58, %v20959_v25  ;;  %v7395_v0 = vcombine.low %v6932_v37, %v6958_v9  ;;  %v7015_v23 = vrot.slane %v7001_v32, %v20959_v25  ;;  %21014 = vst [vmem:[#allocation48_spill] sm:$0xff] %v18544_v52  ;;  %v18549_v37 = vpop.f32.mrb[65].mxu1 }
 0x4b9   : > { %v7016_v60 = vcombine.high %v7008_v8, %v7008_v8  ;;  %v7296_v20 = vcombine.low %v6982_v15, %v7008_v8  ;;  %v7940_v3 = vrot.slane %v7926_v46, %v20959_v25  ;;  %v7950_v28 = vrot.slane %v6584_v47, %v20959_v25  ;;  %21015 = vst [vmem:[#allocation49_spill] sm:$0xff] %v18549_v37 }
 0x4ba   : > { %v18542_v10 = vrot.slane %v18464_v45, %v18298_v59  ;;  %v6966_v21 = vcombine.high %v6965_v48, %v6965_v48  ;;  %v7134_v62 = vcombine.low %v6965_v48, %v6999_v12  ;;  %v18547_v58 = vrot.slane %v6583_v24, %v20959_v25 }
 0x4bb   : > { %v7350_v54 = vcombine.low %v6981_v4, %v7016_v60  ;;  %v18552_v32 = vrot.slane %v7296_v20, %v18298_v59  ;;  %v7404_v15 = vcombine.low %v6983_v53, %v7015_v23  ;;  %v7942_v9 = vcombine.high %v7940_v3, %v7940_v3 }
 0x4bc   : > { %21013 = vst [vmem:[#allocation47_spill] sm:$0xff] %v18542_v10  ;;  %v7957_v47 = vrot.slane %v7943_v6, %v20959_v25  ;;  %v7188_v8 = vcombine.low %v6966_v21, %v6998_v49  ;;  %v18556_v45 = vrot.slane %v7395_v0, %v18298_v59  ;;  %v7958_v46 = vcombine.high %v7950_v28, %v7950_v28  ;;  %v18576_v21 = vpop.f32.mrb[66].mxu1 }
 0x4bd   : > { %21016 = vst [vmem:[#allocation50_spill] sm:$0xff] %v18552_v32  ;;  %v7909_v52 = vcombine.high %v6582_v1, %v6582_v1  ;;  %v18559_v60 = vrot.slane %v7404_v15, %v18298_v59  ;;  %v7916_v20 = vrot.slane %v6582_v1, %v20959_v25  ;;  %v18566_v53 = vrot.slane %v7134_v62, %v18298_v59  ;;  %v18581_v12 = vpop.f32.mrb[67].mxu1 }
 0x4be   : > { %21017 = vst [vmem:[#allocation51_spill] sm:$0xff] %v18556_v45  ;;  %v7959_v4 = vcombine.high %v7957_v47, %v7957_v47  ;;  %v11841_v6 = vcombine.high %v18427_v57, %v18455_v26  ;;  %v7460_v49 = vrot.slane %v11840_v17, %v20959_v25  ;;  %21020 = vst [vmem:[#allocation54_spill] sm:$0xff] %v18576_v21 }
 0x4bf   : > { %21018 = vst [vmem:[#allocation52_spill] sm:$0xff] %v18559_v60  ;;  %v7923_v24 = vrot.slane %v7909_v52, %v20959_v25  ;;  %21019 = vst [vmem:[#allocation53_spill] sm:$0xff] %v18566_v53  ;;  %v7924_v23 = vcombine.high %v7916_v20, %v7916_v20  ;;  %v8332_v3 = vcombine.low %v7916_v20, %v7942_v9 }
 0x4c0   : > { %v18574_v0 = vcombine.low %v18547_v58, %v7959_v4  ;;  %v7467_v15 = vrot.slane %v11841_v6, %v20959_v25  ;;  %21021 = vst [vmem:[#allocation55_spill] sm:$0xff] %v18581_v12  ;;  %v18585_v17 = vrot.slane %v18489_v42, %v18298_v59  ;;  %v7941_v4 = vcombine.high %v18547_v58, %v18547_v58 }
 0x4c1   : > { %v7925_v1 = vcombine.high %v7923_v24, %v7923_v24  ;;  %v8440_v52 = vcombine.low %v7923_v24, %v7958_v46  ;;  %v8386_v48 = vcombine.low %v7924_v23, %v7950_v28  ;;  %v11842_v9 = vcombine.high %v18542_v10, %v18566_v53  ;;  %v18622_v23 = vpop.f32.mrb[68].mxu1 }
 0x4c2   : > { %21022 = vst [vmem:[#allocation56_spill] sm:$0xff] %v18585_v17  ;;  %v18592_v46 = vrot.slane %v7350_v54, %v18298_v59  ;;  %v7468_v24 = vcombine.low %v7460_v49, %v7467_v15  ;;  %v18598_v6 = vrot.slane %v18389_v51, %v18298_v59  ;;  %v18601_v42 = vrot.slane %v8332_v3, %v18298_v59 }
 0x4c3   : > { %v18594_v20 = vcombine.low %v7925_v1, %v7957_v47  ;;  %v18604_v62 = vrot.slane %v8440_v52, %v18298_v59  ;;  %v7476_v28 = vrot.slane %v11842_v9, %v20959_v25  ;;  %v18609_v58 = vrot.slane %v18461_v40, %v18298_v59  ;;  %21029 = vst [vmem:[#allocation63_spill] sm:$0xff] %v18622_v23 }
 0x4c4   : > { %21023 = vst [vmem:[#allocation57_spill] sm:$0xff] %v18592_v46  ;;  %21024 = vst [vmem:[#allocation58_spill] sm:$0xff] %v18598_v6  ;;  %v18613_v54 = vrot.slane %v18505_v5, %v18298_v59  ;;  %v18616_v47 = vrot.slane %v7242_v11, %v18298_v59  ;;  %v11846_v51 = vcombine.high %v18412_v43, %v18598_v6  ;;  %v18630_v11 = vpop.f32.mrb[69].mxu1 }
 0x4c5   : > { %21025 = vst [vmem:[#allocation59_spill] sm:$0xff] %v18601_v42  ;;  %21026 = vst [vmem:[#allocation60_spill] sm:$0xff] %v18609_v58  ;;  %v12303_v3 = vpack.i.bf16 %v7476_v28, %v7468_v24  ;;  %v11847_v1 = vcombine.high %v18501_v7, %v18609_v58  ;;  %v6307_v5 = vadd.f32 %v17966_v30, %v18264_v33  ;;  %v12264_v28 = vpop.f32.mrb[70].mxu1 }
 0x4c6   : > { %21027 = vst [vmem:[#allocation61_spill] sm:$0xff] %v18613_v54  ;;  %21028 = vst [vmem:[#allocation62_spill] sm:$0xff] %v18616_v47  ;;  %v7600_v15 = vrot.slane %v11846_v51, %v20959_v25  ;;  %v11848_v9 = vcombine.high %v18613_v54, %v18616_v47  ;;  %v6299_v24 = vadd.f32 %v18264_v33, %v17972_v56  ;;  %v18652_v47 = vpop.f32.mrb[71].mxu1 }
 0x4c7   : > { %21030 = vst [vmem:[#allocation64_spill] sm:$0xff] %v18630_v11  ;;  %12304 = vrot.lane.b32.xlu0 %v12303_v3, %s12507_s28  ;;  %v7607_v49 = vrot.slane %v11847_v1, %v20959_v25  ;;  %v6587_v30 = vmax.f32 %v6307_v5, 0.0  ;;  %v6310_v40 = vadd.f32 %v18017_v50, %v18264_v33  ;;  %v18644_v52 = vrot.slane %v7188_v8, %v18298_v59 }
 0x4c8   : > { %v7616_v51 = vrot.slane %v11848_v9, %v20959_v25  ;;  %v6585_v6 = vmax.f32 %v6299_v24, 0.0  ;;  %v11843_v43 = vcombine.high %v18330_v19, %v18387_v31  ;;  %v11844_v56 = vcombine.high %v18434_v38, %v18458_v16  ;;  %21032 = vst [vmem:[#allocation66_spill] sm:$0xff] %v18652_v47  ;;  %v12267_v31 = vpop.f32.mrb[72].mxu1 }
 0x4c9   : > { %21031 = vst [vmem:[#allocation65_spill] sm:$0xff] %v18644_v52  ;;  %v7608_v28 = vcombine.low %v7600_v15, %v7607_v49  ;;  %v7993_v3 = vcombine.high %v6587_v30, %v6587_v30  ;;  %v8000_v1 = vrot.slane %v6587_v30, %v20959_v25  ;;  %v6588_v5 = vmax.f32 %v6310_v40, 0.0  ;;  %v6469_v38 = vpop.f32.mrb[73].mxu1 }
 0x4ca   : > { %v18655_v50 = vrot.slane %v8386_v48, %v18298_v59  ;;  %v7960_v8 = vcombine.high %v6585_v6, %v6585_v6  ;;  %v7967_v9 = vrot.slane %v6585_v6, %v20959_v25  ;;  %v7537_v54 = vrot.slane %v11844_v56, %v20959_v25  ;;  %v18666_v58 = vpop.f32.mrb[74].mxu1 }
 0x4cb   : > { %v12308_v19 = vpack.i.bf16 %v7616_v51, %v7608_v28  ;;  %v8007_v16 = vrot.slane %v7993_v3, %v20959_v25  ;;  %v8008_v49 = vcombine.high %v8000_v1, %v8000_v1  ;;  %v8010_v15 = vcombine.high %v6588_v5, %v6588_v5  ;;  %21034 = vst [vmem:[#allocation68_spill] sm:$0xff] %v18666_v58 }
 0x4cc   : > { %21033 = vst [vmem:[#allocation67_spill] sm:$0xff] %v18655_v50  ;;  %v7974_v40 = vrot.slane %v7960_v8, %v20959_v25  ;;  %v18662_v30 = vcombine.low %v7941_v4, %v7967_v9  ;;  %v8017_v48 = vrot.slane %v6588_v5, %v20959_v25  ;;  %v7530_v6 = vrot.slane %v11843_v43, %v20959_v25  ;;  %v6471_v4 = vpop.f32.mrb[75].mxu1 }
 0x4cd   : > { %12309 = vrot.lane.b32.xlu1 %v12308_v19, %s12507_s28  ;;  %v8024_v31 = vrot.slane %v8010_v15, %v20959_v25  ;;  %v11845_v51 = vcombine.high %v18585_v17, %v18644_v52  ;;  %v6302_v38 = vadd.f32 %v18264_v33, %v18022_v63  ;;  %v8009_v5 = vcombine.high %v8007_v16, %v8007_v16 }
 0x4ce   : > { %v7975_v28 = vcombine.high %v7974_v40, %v7974_v40  ;;  %v8341_v3 = vcombine.low %v7974_v40, %v8008_v49  ;;  %v8025_v1 = vcombine.high %v8017_v48, %v8017_v48  ;;  %v7538_v56 = vcombine.low %v7530_v6, %v7537_v54 }
 0x4cf   : > { %v7546_v8 = vrot.slane %v11845_v51, %v20959_v25  ;;  %v6586_v9 = vmax.f32 %v6302_v38, 0.0  ;;  %v11849_v19 = vcombine.high %v18337_v29, %v18362_v27  ;;  %v21036_v63 = vcombine.high %v18443_v34, %v18482_v41 }
 0x4d0   : > { %v18679_v43 = vrot.slane %v8341_v3, %v18298_v59  ;;  %v8395_v15 = vcombine.low %v7975_v28, %v8007_v16  ;;  %v11851_v49 = vcombine.high %v18526_v55, %v18552_v32  ;;  %v18697_v3 = vrot.slane %v18507_v13, %v18298_v59 }
 0x4d1   : > { %v7677_v4 = vrot.slane %v21036_v63, %v20959_v25  ;;  %v12313_v40 = vpack.i.bf16 %v7546_v8, %v7538_v56  ;;  %v7976_v54 = vcombine.high %v6586_v9, %v6586_v9  ;;  %v7983_v6 = vrot.slane %v6586_v9, %v20959_v25 }
 0x4d2   : > { %21035 = vst [vmem:[#allocation69_spill] sm:$0xff] %v18679_v43  ;;  %v7670_v51 = vrot.slane %v11849_v19, %v20959_v25  ;;  %v18690_v38 = vrot.slane %v8395_v15, %v18298_v59  ;;  %v7686_v28 = vrot.slane %v11851_v49, %v20959_v25  ;;  %21038 = vst [vmem:[#allocation71_spill] sm:$0xff] %v18697_v3 }
 0x4d3   : > { %12314 = vrot.lane.b32.xlu0 %v12313_v40, %s12507_s28  ;;  %v7990_v56 = vrot.slane %v7976_v54, %v20959_v25  ;;  %v7991_v8 = vcombine.high %v7983_v6, %v7983_v6  ;;  %v8449_v9 = vcombine.low %v7983_v6, %v8009_v5  ;;  %v11852_v49 = vcombine.high %v18352_v36, %v18365_v18 }
 0x4d4   : > { %21037 = vst [vmem:[#allocation70_spill] sm:$0xff] %v18690_v38  ;;  %v7678_v63 = vcombine.low %v7670_v51, %v7677_v4  ;;  %v11853_v13 = vcombine.high %v18475_v39, %v18492_v35  ;;  %v11854_v51 = vcombine.high %v18697_v3, %v18592_v46  ;;  %v18720_v19 = vrot.slane %v18594_v20, %v18298_v59  ;;  %v21056_v3 = vld [vmem:[#allocation31_spill] sm:$0xff] }
 0x4d5   : > { %v7992_v16 = vcombine.high %v7990_v56, %v7990_v56  ;;  %v18710_v40 = vrot.slane %v8449_v9, %v18298_v59  ;;  %v8503_v54 = vcombine.low %v7991_v8, %v8017_v48  ;;  %v18712_v24 = vcombine.low %v7990_v56, %v8025_v1  ;;  %v21047_v8 = vld [vmem:[#allocation26_spill] sm:$0xff]  ;;  %v21048_v48 = vld [vmem:[#allocation27_spill] sm:$0xff] }
 0x4d6   : > { %v12318_v5 = vpack.i.bf16 %v7686_v28, %v7678_v63  ;;  %v7740_v4 = vrot.slane %v11852_v49, %v20959_v25  ;;  %v7747_v6 = vrot.slane %v11853_v13, %v20959_v25  ;;  %21039 = vst [vmem:[#allocation72_spill] sm:$0xff] %v18720_v19  ;;  %v7756_v56 = vrot.slane %v11854_v51, %v20959_v25  ;;  %v18737_v63 = vpop.f32.mrb[76].mxu1  ;;  %v21044_v13 = vld [vmem:[#allocation42_spill] sm:$0xff] }
 0x4d7   : > { %v18723_v15 = vrot.slane %v8503_v54, %v18298_v59  ;;  %v18725_v9 = vcombine.low %v7992_v16, %v8024_v31  ;;  %v11855_v20 = vcombine.high %v18340_v22, %v18373_v14  ;;  %21041 = vst [vmem:[#allocation74_spill] sm:$0xff] %v18737_v63  ;;  %v21042_v31 = vcombine.low %v18347_v2, %v18384_v44  ;;  %v21045_v54 = vld [vmem:[#allocation18_spill] sm:$0xff]  ;;  %v21049_v2 = vld [vmem:[#allocation28_spill] sm:$0xff] }
 0x4d8   : > { %12319 = vrot.lane.b32.xlu1 %v12318_v5, %s12507_s28  ;;  %v7748_v28 = vcombine.low %v7740_v4, %v7747_v6  ;;  %v11856_v5 = vcombine.high %v21045_v54, %v21044_v13  ;;  %v11857_v4 = vcombine.high %v18556_v45, %v18559_v60  ;;  %v18749_v6 = vpop.f32.mrb[77].mxu1  ;;  %v6323_v1 = vadd.f32 %v21047_v8, %v18264_v33  ;;  %v21051_v60 = vld [vmem:[#allocation29_spill] sm:$0xff]  ;;  %v21052_v45 = vld [vmem:[#allocation30_spill] sm:$0xff] }
 0x4d9   : > { %21040 = vst [vmem:[#allocation73_spill] sm:$0xff] %v18723_v15  ;;  %v18743_v16 = vrot.slane %v21042_v31, %v20959_v25  ;;  %21046 = vst [vmem:[#allocation76_spill] sm:$0xff] %v18749_v6  ;;  %v7810_v51 = vrot.slane %v11855_v20, %v20959_v25  ;;  %v6315_v14 = vadd.f32 %v18264_v33, %v21048_v48 }
 0x4da   : > { %v12323_v49 = vpack.i.bf16 %v7756_v56, %v7748_v28  ;;  %v6326_v44 = vadd.f32 %v21049_v2, %v18264_v33  ;;  %v18758_v28 = vpop.f32.mrb[78].mxu1  ;;  %v7817_v56 = vrot.slane %v11856_v5, %v20959_v25  ;;  %v7826_v31 = vrot.slane %v11857_v4, %v20959_v25 }
 0x4db   : > { %21043 = vst [vmem:[#allocation75_spill] sm:$0xff] %v18743_v16  ;;  %21050 = vst [vmem:[#allocation26_spill] sm:$0xff] %v18758_v28  ;;  %v6318_v20 = vadd.f32 %v18264_v33, %v21051_v60  ;;  %v6339_v8 = vadd.f32 %v21052_v45, %v18264_v33  ;;  %v18767_v13 = vpop.f32.mrb[79].mxu1  ;;  %v21054_v48 = vcombine.low %v18427_v57, %v18455_v26  ;;  %v6591_v54 = vmax.f32 %v6323_v1, 0.0  ;;  %v21057_v26 = vld [vmem:[#allocation32_spill] sm:$0xff] }
 0x4dc   : > { %12324 = vrot.lane.b32.xlu0 %v12323_v49, %s12507_s28  ;;  %21053 = vst [vmem:[#allocation27_spill] sm:$0xff] %v18767_v13  ;;  %v6589_v49 = vmax.f32 %v6315_v14, 0.0  ;;  %v6592_v22 = vmax.f32 %v6326_v44, 0.0  ;;  %v7818_v5 = vcombine.low %v7810_v51, %v7817_v56  ;;  %v6331_v60 = vadd.f32 %v18264_v33, %v21056_v3  ;;  %v21080_v28 = vld [vmem:[#allocation4_spill] sm:$0xff] }
 0x4dd   : > { %v18773_v2 = vrot.slane %v21054_v48, %v20959_v25  ;;  %v6590_v46 = vmax.f32 %v6318_v20, 0.0  ;;  %v6595_v4 = vmax.f32 %v6339_v8, 0.0  ;;  %v8060_v35 = vcombine.high %v6591_v54, %v6591_v54 }
 0x4de   : > { %v8067_v45 = vrot.slane %v6591_v54, %v20959_v25  ;;  %v8026_v39 = vcombine.high %v6589_v49, %v6589_v49  ;;  %v8033_v18 = vrot.slane %v6589_v49, %v20959_v25  ;;  %v12328_v36 = vpack.i.bf16 %v7826_v31, %v7818_v5 }
 0x4df   : > { %21055 = vst [vmem:[#allocation28_spill] sm:$0xff] %v18773_v2  ;;  %v8077_v27 = vcombine.high %v6592_v22, %v6592_v22  ;;  %v8043_v57 = vcombine.high %v6590_v46, %v6590_v46  ;;  %v6342_v1 = vadd.f32 %v21057_v26, %v18264_v33  ;;  %v8074_v14 = vrot.slane %v8060_v35, %v20959_v25  ;;  %v21079_v2 = vld [vmem:[#allocation14_spill] sm:$0xff] }
 0x4e0   : > { %v8075_v51 = vcombine.high %v8067_v45, %v8067_v45  ;;  %v8040_v44 = vrot.slane %v8026_v39, %v20959_v25  ;;  %v8041_v56 = vcombine.high %v8033_v18, %v8033_v18  ;;  %12329 = vrot.lane.b32.xlu1 %v12328_v36, %s12507_s28  ;;  %v8084_v3 = vrot.slane %v6592_v22, %v20959_v25 }
 0x4e1   : > { %v8091_v54 = vrot.slane %v8077_v27, %v20959_v25  ;;  %v8050_v20 = vrot.slane %v6590_v46, %v20959_v25  ;;  %v8057_v31 = vrot.slane %v8043_v57, %v20959_v25  ;;  %v8076_v5 = vcombine.high %v8074_v14, %v8074_v14 }
 0x4e2   : > { %v8042_v8 = vcombine.high %v8040_v44, %v8040_v44  ;;  %v8404_v48 = vcombine.low %v8041_v56, %v8067_v45  ;;  %v8458_v49 = vcombine.low %v8040_v44, %v8075_v51  ;;  %v8127_v29 = vcombine.high %v6595_v4, %v6595_v4 }
 0x4e3   : > { %v8058_v26 = vcombine.high %v8050_v20, %v8050_v20  ;;  %v8059_v35 = vcombine.high %v8057_v31, %v8057_v31  ;;  %v8134_v39 = vrot.slane %v6595_v4, %v20959_v25  ;;  %v21058_v36 = vcombine.low %v18443_v34, %v18482_v41 }
 0x4e4   : > { %v18797_v27 = vrot.slane %v18574_v0, %v18298_v59  ;;  %v8512_v46 = vcombine.low %v8042_v8, %v8074_v14  ;;  %v8566_v57 = vcombine.low %v8050_v20, %v8076_v5  ;;  %v18801_v45 = vrot.slane %v18712_v24, %v18298_v59  ;;  %v21064_v14 = vld [vmem:[#allocation33_spill] sm:$0xff]  ;;  %v21065_v24 = vld [vmem:[#allocation34_spill] sm:$0xff] }
 0x4e5   : > { %v18793_v22 = vrot.slane %v21058_v36, %v20959_v25  ;;  %v8092_v51 = vcombine.high %v8091_v54, %v8091_v54  ;;  %v8350_v44 = vcombine.low %v8033_v18, %v8059_v35  ;;  %v8620_v56 = vcombine.low %v8058_v26, %v8084_v3 }
 0x4e6   : > { %21060 = vst [vmem:[#allocation30_spill] sm:$0xff] %v18797_v27  ;;  %21061 = vst [vmem:[#allocation31_spill] sm:$0xff] %v18801_v45  ;;  %v18804_v4 = vrot.slane %v8404_v48, %v18298_v59  ;;  %v18807_v41 = vrot.slane %v8458_v49, %v18298_v59  ;;  %v6593_v34 = vmax.f32 %v6331_v60, 0.0  ;;  %v6596_v31 = vmax.f32 %v6342_v1, 0.0 }
 0x4e7   : > { %21059 = vst [vmem:[#allocation29_spill] sm:$0xff] %v18793_v22  ;;  %v8141_v0 = vrot.slane %v8127_v29, %v20959_v25  ;;  %v8142_v36 = vcombine.high %v8134_v39, %v8134_v39  ;;  %v6334_v20 = vadd.f32 %v18264_v33, %v21064_v14  ;;  %v6355_v8 = vadd.f32 %v21065_v24, %v18264_v33  ;;  %v21068_v29 = vld [vmem:[#allocation35_spill] sm:$0xff] }
 0x4e8   : > { %21062 = vst [vmem:[#allocation32_spill] sm:$0xff] %v18804_v4  ;;  %21063 = vst [vmem:[#allocation77_spill] sm:$0xff] %v18807_v41  ;;  %v18815_v18 = vrot.slane %v8512_v46, %v18298_v59  ;;  %v8093_v3 = vcombine.high %v6593_v34, %v6593_v34  ;;  %v8100_v48 = vrot.slane %v6593_v34, %v20959_v25  ;;  %v21069_v46 = vld [vmem:[#allocation36_spill] sm:$0xff] }
 0x4e9   : > { %v8143_v5 = vcombine.high %v6596_v31, %v6596_v31  ;;  %v18819_v49 = vrot.slane %v8566_v57, %v18298_v59  ;;  %v6594_v60 = vmax.f32 %v6334_v20, 0.0  ;;  %v6599_v1 = vmax.f32 %v6355_v8, 0.0 }
 0x4ea   : > { %21066 = vst [vmem:[#allocation33_spill] sm:$0xff] %v18815_v18  ;;  %v6347_v26 = vadd.f32 %v18264_v33, %v21068_v29  ;;  %v18824_v35 = vrot.slane %v8350_v44, %v18298_v59  ;;  %v8107_v14 = vrot.slane %v8093_v3, %v20959_v25  ;;  %v8108_v24 = vcombine.high %v8100_v48, %v8100_v48 }
 0x4eb   : > { %21067 = vst [vmem:[#allocation34_spill] sm:$0xff] %v18819_v49  ;;  %v6358_v22 = vadd.f32 %v21069_v46, %v18264_v33  ;;  %v18830_v34 = vrot.slane %v8620_v56, %v18298_v59  ;;  %v18833_v57 = vrot.slane %v6596_v31, %v20959_v25  ;;  %v8110_v20 = vcombine.high %v6594_v60, %v6594_v60 }
 0x4ec   : > { %v8117_v8 = vrot.slane %v6594_v60, %v20959_v25  ;;  %v8109_v32 = vcombine.high %v8107_v14, %v8107_v14  ;;  %v8521_v29 = vcombine.low %v8108_v24, %v8134_v39  ;;  %v8575_v55 = vcombine.low %v8107_v14, %v8142_v36  ;;  %v21078_v14 = vld [vmem:[#allocation12_spill] sm:$0xff] }
 0x4ed   : > { %21070 = vst [vmem:[#allocation35_spill] sm:$0xff] %v18830_v34  ;;  %v18837_v44 = vrot.slane %v8143_v5, %v20959_v25  ;;  %v8124_v3 = vrot.slane %v8110_v20, %v20959_v25  ;;  %v8194_v17 = vcombine.high %v6599_v1, %v6599_v1  ;;  %v6597_v33 = vmax.f32 %v6347_v26, 0.0 }
 0x4ee   : > { %v8125_v52 = vcombine.high %v8117_v8, %v8117_v8  ;;  %v18841_v56 = vrot.slane %v8521_v29, %v18298_v59  ;;  %v18844_v31 = vrot.slane %v8575_v55, %v18298_v59  ;;  %v8629_v46 = vcombine.low %v8109_v32, %v8141_v0 }
 0x4ef   : > { %v6600_v7 = vmax.f32 %v6358_v22, 0.0  ;;  %v8126_v60 = vcombine.high %v8124_v3, %v8124_v3  ;;  %v8413_v39 = vcombine.low %v8092_v51, %v8124_v3  ;;  %v8201_v36 = vrot.slane %v6599_v1, %v20959_v25  ;;  %v21077_v22 = vld [vmem:[#allocation11_spill] sm:$0xff] }
 0x4f0   : > { %21071 = vst [vmem:[#allocation36_spill] sm:$0xff] %v18841_v56  ;;  %21072 = vst [vmem:[#allocation78_spill] sm:$0xff] %v18844_v31  ;;  %v8359_v16 = vcombine.low %v8091_v54, %v8125_v52  ;;  %v18848_v5 = vrot.slane %v8629_v46, %v18298_v59  ;;  %v8160_v24 = vcombine.high %v6597_v33, %v6597_v33 }
 0x4f1   : > { %v18858_v32 = vrot.slane %v8413_v39, %v18298_v59  ;;  %v8467_v52 = vcombine.low %v8100_v48, %v8126_v60  ;;  %v8167_v54 = vrot.slane %v6597_v33, %v20959_v25  ;;  %v8208_v51 = vrot.slane %v8194_v17, %v20959_v25  ;;  %v18883_v39 = vld [vmem:[%s20216_s3 + $0xb] ss:$0 sm:$0xff] }
 0x4f2   : > { %21073 = vst [vmem:[#allocation79_spill] sm:$0xff] %v18848_v5  ;;  %v18855_v55 = vrot.slane %v8359_v16, %v18298_v59  ;;  %v8174_v0 = vrot.slane %v8160_v24, %v20959_v25  ;;  %v8210_v1 = vcombine.high %v6600_v7, %v6600_v7  ;;  %v8217_v33 = vrot.slane %v6600_v7, %v20959_v25  ;;  %v21076_v24 = vld [vmem:[#allocation37_spill] sm:$0xff] }
 0x4f3   : > { %21074 = vst [vmem:[#allocation80_spill] sm:$0xff] %v18858_v32  ;;  %v18866_v20 = vrot.slane %v8467_v52, %v18298_v59  ;;  %v8175_v29 = vcombine.high %v8167_v54, %v8167_v54  ;;  %v8158_v46 = vcombine.high %v18833_v57, %v18833_v57  ;;  %v6350_v52 = vadd.f32 %v18883_v39, %v21076_v24 }
 0x4f4   : > { %v8176_v3 = vcombine.high %v8174_v0, %v8174_v0  ;;  %v8224_v17 = vrot.slane %v8210_v1, %v20959_v25  ;;  %v6363_v0 = vadd.f32 %v18883_v39, %v21077_v22  ;;  %v8159_v7 = vcombine.high %v18837_v44, %v18837_v44 }
 0x4f5   : > { %21075 = vst [vmem:[#allocation81_spill] sm:$0xff] %v18866_v20  ;;  %v8638_v26 = vcombine.low %v8175_v29, %v8201_v36  ;;  %v6366_v60 = vadd.f32 %v18883_v39, %v21078_v14  ;;  %v8209_v48 = vcombine.high %v8208_v51, %v8208_v51  ;;  %v6598_v16 = vmax.f32 %v6350_v52, 0.0 }
 0x4f6   : > { %v8368_v1 = vcombine.low %v18833_v57, %v8176_v3  ;;  %v6601_v8 = vmax.f32 %v6363_v0, 0.0  ;;  %v6383_v53 = vadd.f32 %v18883_v39, %v21079_v2  ;;  %v8225_v10 = vcombine.high %v8217_v33, %v8217_v33 }
 0x4f7   : > { %v8226_v24 = vcombine.high %v8224_v17, %v8224_v17  ;;  %v6602_v13 = vmax.f32 %v6366_v60, 0.0  ;;  %v6386_v22 = vadd.f32 %v18883_v39, %v21080_v28  ;;  %v8177_v6 = vcombine.high %v6598_v16, %v6598_v16 }
 0x4f8   : > { %v8184_v63 = vrot.slane %v6598_v16, %v20959_v25  ;;  %v8227_v57 = vcombine.high %v6601_v8, %v6601_v8  ;;  %v8234_v36 = vrot.slane %v6601_v8, %v20959_v25  ;;  %v18901_v14 = vrot.slane %v8368_v1, %v18298_v59 }
 0x4f9   : > { %v8244_v29 = vcombine.high %v6602_v13, %v6602_v13  ;;  %v8251_v3 = vrot.slane %v6602_v13, %v20959_v25  ;;  %v6603_v52 = vmax.f32 %v6383_v53, 0.0  ;;  %v8191_v2 = vrot.slane %v8177_v6, %v20959_v25 }
 0x4fa   : > { %21081 = vst [vmem:[#allocation37_spill] sm:$0xff] %v18901_v14  ;;  %v8192_v0 = vcombine.high %v8184_v63, %v8184_v63  ;;  %v8422_v60 = vcombine.low %v8158_v46, %v8184_v63  ;;  %v8241_v58 = vrot.slane %v8227_v57, %v20959_v25  ;;  %v8242_v28 = vcombine.high %v8234_v36, %v8234_v36 }
 0x4fb   : > { %v8258_v47 = vrot.slane %v8244_v29, %v20959_v25  ;;  %v8259_v16 = vcombine.high %v8251_v3, %v8251_v3  ;;  %v8539_v11 = vcombine.low %v8225_v10, %v8251_v3  ;;  %v8193_v23 = vcombine.high %v8191_v2, %v8191_v2 }
 0x4fc   : > { %v18908_v8 = vcombine.low %v18837_v44, %v8192_v0  ;;  %v8530_v1 = vcombine.low %v8159_v7, %v8191_v2  ;;  %v6604_v12 = vmax.f32 %v6386_v22, 0.0  ;;  %v8243_v21 = vcombine.high %v8241_v58, %v8241_v58  ;;  %v18923_v44 = vpop.f32.mrb[80].mxu1 }
 0x4fd   : > { %v8377_v13 = vcombine.low %v8208_v51, %v8242_v28  ;;  %v8431_v53 = vcombine.low %v8209_v48, %v8241_v58  ;;  %v18911_v6 = vrot.slane %v8539_v11, %v18298_v59  ;;  %v18914_v63 = vrot.slane %v8422_v60, %v18298_v59  ;;  %21085 = vst [vmem:[#allocation4_spill] sm:$0xff] %v18923_v44  ;;  %v18933_v48 = vpop.f32.mrb[81].mxu1 }
 0x4fe   : > { %v18917_v46 = vrot.slane %v8530_v1, %v18298_v59  ;;  %v18919_v57 = vcombine.low %v8167_v54, %v8193_v23  ;;  %v18921_v10 = vcombine.low %v8224_v17, %v8259_v16  ;;  %v18931_v11 = vcombine.low %v8217_v33, %v8243_v21  ;;  %21088 = vst [vmem:[#allocation84_spill] sm:$0xff] %v18933_v48  ;;  %v21090_v17 = vld [vmem:[#allocation2_spill] sm:$0xff]  ;;  %v18942_v29 = vpop.f32.mrb[82].mxu1  ;;  %v21095_v1 = vld [vmem:[#allocation3_spill] sm:$0xff]  ;;  %v21100_v23 = vld [vmem:[#allocation13_spill] sm:$0xff] }
 0x4ff   : > { %21082 = vst [vmem:[#allocation11_spill] sm:$0xff] %v18911_v6  ;;  %21083 = vst [vmem:[#allocation12_spill] sm:$0xff] %v18914_v63  ;;  %v18926_v7 = vrot.slane %v8377_v13, %v18298_v59  ;;  %v18929_v58 = vrot.slane %v8431_v53, %v18298_v59  ;;  %v8647_v51 = vcombine.low %v8226_v24, %v8258_v47  ;;  %v18951_v33 = vpop.f32.mrb[83].mxu1  ;;  %v21096_v53 = vld [vmem:[#allocation17_spill] sm:$0xff] }
 0x500   : > { %21084 = vst [vmem:[#allocation14_spill] sm:$0xff] %v18917_v46  ;;  %v18936_v22 = vrot.slane %v8638_v26, %v18298_v59  ;;  %v9152_v54 = vcombine.high %v6603_v52, %v6603_v52  ;;  %v6399_v36 = vadd.f32 %v18883_v39, %v21090_v17  ;;  %21091 = vst [vmem:[#allocation2_spill] sm:$0xff] %v18942_v29 }
 0x501   : > { %21086 = vst [vmem:[#allocation82_spill] sm:$0xff] %v18926_v7  ;;  %21087 = vst [vmem:[#allocation83_spill] sm:$0xff] %v18929_v58  ;;  %v18949_v47 = vrot.slane %v8647_v51, %v18298_v59  ;;  %v9169_v26 = vcombine.high %v6604_v12, %v6604_v12  ;;  %v18955_v24 = vrot.slane %v18662_v30, %v18298_v59 }
 0x502   : > { %21089 = vst [vmem:[#allocation85_spill] sm:$0xff] %v18936_v22  ;;  %21093 = vst [vmem:[#allocation87_spill] sm:$0xff] %v18951_v33  ;;  %v9159_v2 = vrot.slane %v6603_v52, %v20959_v25  ;;  %v9166_v0 = vrot.slane %v9152_v54, %v20959_v25  ;;  %v9176_v60 = vrot.slane %v6604_v12, %v20959_v25  ;;  %v6607_v17 = vmax.f32 %v6399_v36, 0.0 }
 0x503   : > { %21092 = vst [vmem:[#allocation86_spill] sm:$0xff] %v18949_v47  ;;  %21094 = vst [vmem:[#allocation88_spill] sm:$0xff] %v18955_v24  ;;  %v9183_v16 = vrot.slane %v9169_v26, %v20959_v25  ;;  %v6391_v13 = vadd.f32 %v18883_v39, %v21095_v1  ;;  %v6402_v51 = vadd.f32 %v18883_v39, %v21096_v53 }
 0x504   : > { %v18969_v30 = vrot.slane %v18725_v9, %v18298_v59  ;;  %v21098_v52 = vcombine.low %v18604_v62, %v18710_v40  ;;  %v6394_v53 = vadd.f32 %v18883_v39, %v21100_v23  ;;  %v9167_v21 = vcombine.high %v9159_v2, %v9159_v2 }
 0x505   : > { %v9185_v26 = vcombine.high %v9183_v16, %v9183_v16  ;;  %v6605_v28 = vmax.f32 %v6391_v13, 0.0  ;;  %v6608_v1 = vmax.f32 %v6402_v51, 0.0  ;;  %v9168_v3 = vcombine.high %v9166_v0, %v9166_v0 }
 0x506   : > { %21097 = vst [vmem:[#allocation3_spill] sm:$0xff] %v18969_v30  ;;  %v18975_v12 = vrot.slane %v21098_v52, %v20959_v25  ;;  %v9184_v9 = vcombine.high %v9176_v60, %v9176_v60  ;;  %v11864_v33 = vcombine.high %v18601_v42, %v18679_v43  ;;  %v9219_v44 = vcombine.high %v6607_v17, %v6607_v17 }
 0x507   : > { %v9575_v29 = vcombine.low %v9159_v2, %v9185_v26  ;;  %v9186_v48 = vcombine.high %v6605_v28, %v6605_v28  ;;  %v9193_v52 = vrot.slane %v6605_v28, %v20959_v25  ;;  %v9243_v36 = vrot.slane %v6608_v1, %v20959_v25 }
 0x508   : > { %21099 = vst [vmem:[#allocation17_spill] sm:$0xff] %v18975_v12  ;;  %v9236_v12 = vcombine.high %v6608_v1, %v6608_v1  ;;  %v6606_v16 = vmax.f32 %v6394_v53, 0.0  ;;  %v21101_v13 = vcombine.high %v18824_v35, %v18855_v55  ;;  %v8703_v43 = vrot.slane %v11864_v33, %v20959_v25 }
 0x509   : > { %v9200_v51 = vrot.slane %v9186_v48, %v20959_v25  ;;  %v9201_v54 = vcombine.high %v9193_v52, %v9193_v52  ;;  %v9629_v37 = vcombine.low %v9167_v21, %v9193_v52  ;;  %v9251_v26 = vcombine.high %v9243_v36, %v9243_v36 }
 0x50a   : > { %v8710_v23 = vrot.slane %v21101_v13, %v20959_v25  ;;  %v9250_v2 = vrot.slane %v9236_v12, %v20959_v25  ;;  %v9203_v28 = vcombine.high %v6606_v16, %v6606_v16  ;;  %v9210_v42 = vrot.slane %v6606_v16, %v20959_v25 }
 0x50b   : > { %v18994_v1 = vrot.slane %v6607_v17, %v20959_v25  ;;  %v9202_v53 = vcombine.high %v9200_v51, %v9200_v51  ;;  %v9683_v61 = vcombine.low %v9166_v0, %v9201_v54  ;;  %v9737_v22 = vcombine.low %v9168_v3, %v9200_v51  ;;  %v21106_v51 = vld [vmem:[#allocation40_spill] sm:$0xff] }
 0x50c   : > { %v9252_v47 = vcombine.high %v9250_v2, %v9250_v2  ;;  %v9217_v13 = vrot.slane %v9203_v28, %v20959_v25  ;;  %v9845_v48 = vcombine.low %v9184_v9, %v9210_v42  ;;  %v8711_v34 = vcombine.low %v8703_v43, %v8710_v23 }
 0x50d   : > { %v21102_v33 = vcombine.low %v18824_v35, %v18855_v55  ;;  %v19005_v52 = vcombine.low %v9176_v60, %v9202_v53  ;;  %v11866_v0 = vcombine.high %v18901_v14, %v18926_v7  ;;  %v19010_v3 = vrot.slane %v9219_v44, %v20959_v25  ;;  %v21154_v14 = vld [vmem:[#allocation76_spill] sm:$0xff] }
 0x50e   : > { %v19013_v42 = vcombine.low %v18994_v1, %v9252_v47  ;;  %v9218_v43 = vcombine.high %v9217_v13, %v9217_v13  ;;  %v19015_v54 = vcombine.low %v9217_v13, %v9251_v26  ;;  %v19019_v17 = vrot.slane %v18908_v8, %v18298_v59 }
 0x50f   : > { %v19003_v12 = vrot.slane %v21102_v33, %v20959_v25  ;;  %v8719_v35 = vrot.slane %v11866_v0, %v20959_v25  ;;  %v11867_v55 = vcombine.high %v18655_v50, %v18690_v38  ;;  %v11868_v60 = vcombine.high %v18804_v4, %v18858_v32 }
 0x510   : > { %21104 = vst [vmem:[#allocation89_spill] sm:$0xff] %v19019_v17  ;;  %v19028_v44 = vrot.slane %v18921_v10, %v18298_v59  ;;  %v9234_v47 = vcombine.high %v18994_v1, %v18994_v1  ;;  %v19032_v9 = vcombine.low %v9218_v43, %v9250_v2  ;;  %v11869_v8 = vcombine.high %v18914_v63, %v18929_v58 }
 0x511   : > { %21103 = vst [vmem:[#allocation13_spill] sm:$0xff] %v19003_v12  ;;  %v12333_v36 = vpack.i.bf16 %v8719_v35, %v8711_v34  ;;  %v8773_v16 = vrot.slane %v11867_v55, %v20959_v25  ;;  %v8780_v23 = vrot.slane %v11868_v60, %v20959_v25  ;;  %v6415_v26 = vadd.f32 %v18883_v39, %v21106_v51 }
 0x512   : > { %21105 = vst [vmem:[#allocation90_spill] sm:$0xff] %v19028_v44  ;;  %v19041_v28 = vrot.slane %v9575_v29, %v18298_v59  ;;  %v9235_v10 = vcombine.high %v19010_v3, %v19010_v3  ;;  %v19046_v2 = vrot.slane %v9629_v37, %v18298_v59  ;;  %v8789_v1 = vrot.slane %v11869_v8, %v20959_v25 }
 0x513   : > { %12334 = vrot.lane.b32.xlu0 %v12333_v36, %s12507_s28  ;;  %v8781_v34 = vcombine.low %v8773_v16, %v8780_v23  ;;  %v6611_v53 = vmax.f32 %v6415_v26, 0.0  ;;  %v19052_v13 = vrot.slane %v18931_v11, %v18298_v59  ;;  %v11871_v29 = vcombine.high %v18807_v41, %v18866_v20 }
 0x514   : > { %21107 = vst [vmem:[#allocation40_spill] sm:$0xff] %v19046_v2  ;;  %v19057_v33 = vrot.slane %v9683_v61, %v18298_v59  ;;  %v19060_v0 = vrot.slane %v9737_v22, %v18298_v59  ;;  %v11873_v37 = vcombine.high %v18720_v19, %v18723_v15  ;;  %v11874_v43 = vcombine.high %v18815_v18, %v18841_v56 }
 0x515   : > { %21108 = vst [vmem:[#allocation91_spill] sm:$0xff] %v19052_v13  ;;  %v12338_v35 = vpack.i.bf16 %v8789_v1, %v8781_v34  ;;  %v9286_v55 = vcombine.high %v6611_v53, %v6611_v53  ;;  %v21110_v60 = vcombine.high %v18604_v62, %v18710_v40  ;;  %v8850_v8 = vrot.slane %v11871_v29, %v20959_v25  ;;  %v21112_v40 = vld [vmem:[#allocation8_spill] sm:$0xff] }
 0x516   : > { %21109 = vst [vmem:[#allocation92_spill] sm:$0xff] %v19057_v33  ;;  %v11872_v22 = vcombine.high %v19019_v17, %v19052_v13  ;;  %v8913_v36 = vrot.slane %v11873_v37, %v20959_v25  ;;  %v8920_v16 = vrot.slane %v11874_v43, %v20959_v25  ;;  %v19078_v23 = vrot.slane %v9845_v48, %v18298_v59  ;;  %v21113_v37 = vld [vmem:[#allocation19_spill] sm:$0xff] }
 0x517   : > { %v8843_v61 = vrot.slane %v21110_v60, %v20959_v25  ;;  %12339 = vrot.lane.b32.xlu1 %v12338_v35, %s12507_s28  ;;  %v9300_v51 = vrot.slane %v9286_v55, %v20959_v25  ;;  %v11875_v62 = vcombine.high %v18917_v46, %v18911_v6  ;;  %v6407_v26 = vadd.f32 %v18883_v39, %v21112_v40  ;;  %v21114_v55 = vld [vmem:[#allocation20_spill] sm:$0xff] }
 0x518   : > { %21111 = vst [vmem:[#allocation93_spill] sm:$0xff] %v19078_v23  ;;  %v8859_v34 = vrot.slane %v11872_v22, %v20959_v25  ;;  %v8921_v29 = vcombine.low %v8913_v36, %v8920_v16  ;;  %v6418_v43 = vadd.f32 %v18883_v39, %v21113_v37  ;;  %v19090_v48 = vrot.slane %v6611_v53, %v20959_v25 }
 0x519   : > { %v8851_v1 = vcombine.low %v8843_v61, %v8850_v8  ;;  %v8929_v35 = vrot.slane %v11875_v62, %v20959_v25  ;;  %v6609_v60 = vmax.f32 %v6407_v26, 0.0  ;;  %v6410_v21 = vadd.f32 %v18883_v39, %v21114_v55 }
 0x51a   : > { %v9302_v11 = vcombine.high %v9300_v51, %v9300_v51  ;;  %v6612_v46 = vmax.f32 %v6418_v43, 0.0  ;;  %v19097_v61 = vrot.slane %v18919_v57, %v18298_v59  ;;  %v11877_v51 = vcombine.high %v18819_v49, %v18844_v31  ;;  %v21127_v49 = vld [vmem:[#allocation44_spill] sm:$0xff] }
 0x51b   : > { %v12348_v6 = vpack.i.bf16 %v8859_v34, %v8851_v1  ;;  %v12343_v8 = vpack.i.bf16 %v8929_v35, %v8921_v29  ;;  %v9253_v22 = vcombine.high %v6609_v60, %v6609_v60  ;;  %v9260_v36 = vrot.slane %v6609_v60, %v20959_v25 }
 0x51c   : > { %21115 = vst [vmem:[#allocation8_spill] sm:$0xff] %v19097_v61  ;;  %v6610_v16 = vmax.f32 %v6410_v21, 0.0  ;;  %v9303_v53 = vcombine.high %v6612_v46, %v6612_v46  ;;  %v9310_v62 = vrot.slane %v6612_v46, %v20959_v25  ;;  %v11876_v46 = vcombine.high %v18797_v27, %v18801_v45 }
 0x51d   : > { %12349 = vrot.lane.b32.xlu0 %v12348_v6, %s12507_s28  ;;  %12344 = vrot.lane.b32.xlu1 %v12343_v8, %s12507_s28  ;;  %v9267_v57 = vrot.slane %v9253_v22, %v20959_v25  ;;  %v9268_v26 = vcombine.high %v9260_v36, %v9260_v36  ;;  %v9746_v1 = vcombine.low %v9234_v47, %v9260_v36 }
 0x51e   : > { %v9269_v34 = vcombine.high %v6610_v16, %v6610_v16  ;;  %v9317_v21 = vrot.slane %v9303_v53, %v20959_v25  ;;  %v9318_v29 = vcombine.high %v9310_v62, %v9310_v62  ;;  %v9276_v6 = vrot.slane %v6610_v16, %v20959_v25  ;;  %v19123_v36 = vpop.f32.mrb[84].mxu1 }
 0x51f   : > { %v19113_v37 = vrot.slane %v9746_v1, %v18298_v59  ;;  %v9800_v43 = vcombine.low %v19010_v3, %v9268_v26  ;;  %v19116_v35 = vcombine.low %v9235_v10, %v9267_v57  ;;  %v19121_v47 = vrot.slane %v19005_v52, %v18298_v59  ;;  %v19133_v57 = vpop.f32.mrb[85].mxu1 }
 0x520   : > { %v9283_v60 = vrot.slane %v9269_v34, %v20959_v25  ;;  %v9319_v55 = vcombine.high %v9317_v21, %v9317_v21  ;;  %v9284_v8 = vcombine.high %v9276_v6, %v9276_v6  ;;  %v9593_v22 = vcombine.low %v9276_v6, %v9302_v11  ;;  %v19140_v34 = vpop.f32.mrb[86].mxu1 }
 0x521   : > { %21116 = vst [vmem:[#allocation19_spill] sm:$0xff] %v19121_v47  ;;  %v19126_v16 = vrot.slane %v9800_v43, %v18298_v59  ;;  %v8990_v10 = vrot.slane %v11877_v51, %v20959_v25  ;;  %v19137_v52 = vrot.slane %v19013_v42, %v18298_v59  ;;  %v9301_v6 = vcombine.high %v19090_v48, %v19090_v48  ;;  %v19147_v40 = vpop.f32.mrb[87].mxu1  ;;  %v21125_v43 = vld [vmem:[#allocation86_spill] sm:$0xff] }
 0x522   : > { %v9809_v11 = vcombine.low %v19090_v48, %v9319_v55  ;;  %v9285_v26 = vcombine.high %v9283_v60, %v9283_v60  ;;  %v9647_v1 = vcombine.low %v9284_v8, %v9310_v62  ;;  %v9701_v53 = vcombine.low %v9283_v60, %v9318_v29  ;;  %21119 = vst [vmem:[#allocation95_spill] sm:$0xff] %v19147_v40 }
 0x523   : > { %21117 = vst [vmem:[#allocation20_spill] sm:$0xff] %v19126_v16  ;;  %21118 = vst [vmem:[#allocation94_spill] sm:$0xff] %v19137_v52  ;;  %v8983_v51 = vrot.slane %v11876_v46, %v20959_v25  ;;  %v19153_v55 = vrot.slane %v9593_v22, %v18298_v59  ;;  %v11878_v48 = vcombine.high %v19097_v61, %v19028_v44  ;;  %v21123_v46 = vld [vmem:[#allocation35_spill] sm:$0xff]  ;;  %v21126_v22 = vld [vmem:[#allocation85_spill] sm:$0xff] }
 0x524   : > { %v19150_v42 = vrot.slane %v9809_v11, %v18298_v59  ;;  %v19156_v62 = vrot.slane %v9647_v1, %v18298_v59  ;;  %v9755_v8 = vcombine.low %v9285_v26, %v9317_v21  ;;  %v11879_v29 = vcombine.high %v18955_v24, %v18969_v30  ;;  %v21128_v21 = vld [vmem:[#allocation46_spill] sm:$0xff]  ;;  %v21129_v24 = vld [vmem:[#allocation24_spill] sm:$0xff] }
 0x525   : > { %21121 = vst [vmem:[#allocation97_spill] sm:$0xff] %v19153_v55  ;;  %v8991_v3 = vcombine.low %v8983_v51, %v8990_v10  ;;  %v11880_v60 = vcombine.high %v21123_v46, %v18848_v5  ;;  %v19165_v11 = vrot.slane %v9701_v53, %v18298_v59  ;;  %v11881_v31 = vcombine.high %v21126_v22, %v21125_v43  ;;  %v21130_v43 = vld [vmem:[#allocation25_spill] sm:$0xff] }
 0x526   : > { %21120 = vst [vmem:[#allocation96_spill] sm:$0xff] %v19150_v42  ;;  %21122 = vst [vmem:[#allocation98_spill] sm:$0xff] %v19156_v62  ;;  %v6431_v1 = vadd.f32 %v18883_v39, %v21127_v49  ;;  %v6423_v10 = vadd.f32 %v18883_v39, %v21128_v21  ;;  %v8999_v26 = vrot.slane %v11878_v48, %v20959_v25  ;;  %v21131_v21 = vld [vmem:[#allocation48_spill] sm:$0xff] }
 0x527   : > { %21124 = vst [vmem:[#allocation99_spill] sm:$0xff] %v19165_v11  ;;  %v9053_v51 = vrot.slane %v11879_v29, %v20959_v25  ;;  %v9060_v30 = vrot.slane %v11880_v60, %v20959_v25  ;;  %v6434_v5 = vadd.f32 %v18883_v39, %v21129_v24  ;;  %v9069_v53 = vrot.slane %v11881_v31, %v20959_v25 }
 0x528   : > { %v6615_v46 = vmax.f32 %v6431_v1, 0.0  ;;  %v6613_v44 = vmax.f32 %v6423_v10, 0.0  ;;  %v6426_v22 = vadd.f32 %v18883_v39, %v21130_v43  ;;  %v12353_v49 = vpack.i.bf16 %v8999_v26, %v8991_v3 }
 0x529   : > { %v9061_v61 = vcombine.low %v9053_v51, %v9060_v30  ;;  %v6616_v45 = vmax.f32 %v6434_v5, 0.0  ;;  %v6447_v48 = vadd.f32 %v18883_v39, %v21131_v21  ;;  %v19190_v26 = vrot.slane %v9755_v8, %v18298_v59 }
 0x52a   : > { %v9353_v27 = vcombine.high %v6615_v46, %v6615_v46  ;;  %v9360_v29 = vrot.slane %v6615_v46, %v20959_v25  ;;  %v9320_v60 = vcombine.high %v6613_v44, %v6613_v44  ;;  %v9327_v56 = vrot.slane %v6613_v44, %v20959_v25  ;;  %12354 = vrot.lane.b32.xlu0 %v12353_v49, %s12507_s28 }
 0x52b   : > { %v12358_v31 = vpack.i.bf16 %v9069_v53, %v9061_v61  ;;  %v9370_v24 = vcombine.high %v6616_v45, %v6616_v45  ;;  %v9377_v1 = vrot.slane %v6616_v45, %v20959_v25  ;;  %v6614_v10 = vmax.f32 %v6426_v22, 0.0 }
 0x52c   : > { %v9367_v3 = vrot.slane %v9353_v27, %v20959_v25  ;;  %v9368_v30 = vcombine.high %v9360_v29, %v9360_v29  ;;  %v9334_v5 = vrot.slane %v9320_v60, %v20959_v25  ;;  %v9863_v43 = vcombine.low %v9301_v6, %v9327_v56  ;;  %v21132_v29 = vld [vmem:[#allocation49_spill] sm:$0xff] }
 0x52d   : > { %12359 = vrot.lane.b32.xlu1 %v12358_v31, %s12507_s28  ;;  %v9385_v46 = vcombine.high %v9377_v1, %v9377_v1  ;;  %v9336_v44 = vcombine.high %v6614_v10, %v6614_v10  ;;  %v9343_v51 = vrot.slane %v6614_v10, %v20959_v25  ;;  %v9384_v45 = vrot.slane %v9370_v24, %v20959_v25  ;;  %v21134_v31 = vld [vmem:[#allocation54_spill] sm:$0xff] }
 0x52e   : > { %v9335_v61 = vcombine.high %v9334_v5, %v9334_v5  ;;  %v9602_v53 = vcombine.low %v9334_v5, %v9368_v30  ;;  %v9369_v22 = vcombine.high %v9367_v3, %v9367_v3  ;;  %v6619_v21 = vmax.f32 %v6447_v48, 0.0 }
 0x52f   : > { %v9350_v27 = vrot.slane %v9336_v44, %v20959_v25  ;;  %v9351_v49 = vcombine.high %v9343_v51, %v9343_v51  ;;  %v6439_v56 = vadd.f32 %v18883_v39, %v21132_v29  ;;  %v6450_v10 = vadd.f32 %v18883_v39, %v21134_v31  ;;  %v21140_v31 = vld [vmem:[#allocation55_spill] sm:$0xff] }
 0x530   : > { %v19199_v6 = vrot.slane %v9602_v53, %v18298_v59  ;;  %v9656_v8 = vcombine.low %v9335_v61, %v9367_v3  ;;  %v9710_v60 = vcombine.low %v9343_v51, %v9369_v22  ;;  %v9420_v24 = vcombine.high %v6619_v21, %v6619_v21  ;;  %v21141_v22 = vld [vmem:[#allocation63_spill] sm:$0xff] }
 0x531   : > { %v9352_v18 = vcombine.high %v9350_v27, %v9350_v27  ;;  %v9764_v30 = vcombine.low %v9351_v49, %v9377_v1  ;;  %v9818_v5 = vcombine.low %v9350_v27, %v9385_v46  ;;  %v9427_v53 = vrot.slane %v6619_v21, %v20959_v25 }
 0x532   : > { %21133 = vst [vmem:[#allocation44_spill] sm:$0xff] %v19199_v6  ;;  %v19204_v15 = vrot.slane %v9656_v8, %v18298_v59  ;;  %v19209_v44 = vrot.slane %v9710_v60, %v18298_v59  ;;  %v19213_v3 = vrot.slane %v9863_v43, %v18298_v59  ;;  %v9434_v49 = vrot.slane %v9420_v24, %v20959_v25 }
 0x533   : > { %v19216_v51 = vrot.slane %v9764_v30, %v18298_v59  ;;  %v19219_v1 = vrot.slane %v9818_v5, %v18298_v59  ;;  %v9872_v46 = vcombine.low %v9352_v18, %v9384_v45  ;;  %v6617_v45 = vmax.f32 %v6439_v56, 0.0  ;;  %v21142_v18 = vld [vmem:[#allocation64_spill] sm:$0xff] }
 0x534   : > { %21135 = vst [vmem:[#allocation46_spill] sm:$0xff] %v19204_v15  ;;  %21136 = vst [vmem:[#allocation24_spill] sm:$0xff] %v19209_v44  ;;  %v19237_v29 = vrot.slane %v19015_v54, %v18298_v59  ;;  %v9435_v8 = vcombine.high %v9427_v53, %v9427_v53  ;;  %v6620_v60 = vmax.f32 %v6450_v10, 0.0  ;;  %v6442_v30 = vadd.f32 %v18883_v39, %v21140_v31 }
 0x535   : > { %21137 = vst [vmem:[#allocation25_spill] sm:$0xff] %v19213_v3  ;;  %21138 = vst [vmem:[#allocation48_spill] sm:$0xff] %v19219_v1  ;;  %v19229_v43 = vrot.slane %v9872_v46, %v18298_v59  ;;  %v9386_v24 = vcombine.high %v6617_v45, %v6617_v45  ;;  %v9393_v46 = vrot.slane %v6617_v45, %v20959_v25 }
 0x536   : > { %v6463_v61 = vadd.f32 %v18883_v39, %v21141_v22  ;;  %v9437_v48 = vcombine.high %v6620_v60, %v6620_v60  ;;  %v6618_v56 = vmax.f32 %v6442_v30, 0.0  ;;  %v9436_v21 = vcombine.high %v9434_v49, %v9434_v49  ;;  %v21144_v22 = vld [vmem:[#allocation66_spill] sm:$0xff] }
 0x537   : > { %21139 = vst [vmem:[#allocation49_spill] sm:$0xff] %v19229_v43  ;;  %v6455_v54 = vadd.f32 %v18883_v39, %v21142_v18  ;;  %v19250_v10 = vrot.slane %v19032_v9, %v18298_v59  ;;  %v9400_v31 = vrot.slane %v9386_v24, %v20959_v25  ;;  %v9401_v27 = vcombine.high %v9393_v46, %v9393_v46 }
 0x538   : > { %v6623_v5 = vmax.f32 %v6463_v61, 0.0  ;;  %v9451_v19 = vrot.slane %v9437_v48, %v20959_v25  ;;  %v9403_v45 = vcombine.high %v6618_v56, %v6618_v56  ;;  %v9410_v13 = vrot.slane %v6618_v56, %v20959_v25 }
 0x539   : > { %21143 = vst [vmem:[#allocation54_spill] sm:$0xff] %v19250_v10  ;;  %v6458_v30 = vadd.f32 %v18883_v39, %v21144_v22  ;;  %v9402_v17 = vcombine.high %v9400_v31, %v9400_v31  ;;  %v9665_v20 = vcombine.low %v9401_v27, %v9427_v53  ;;  %v9719_v41 = vcombine.low %v9400_v31, %v9435_v8 }
 0x53a   : > { %v6621_v18 = vmax.f32 %v6455_v54, 0.0  ;;  %v9444_v58 = vrot.slane %v6620_v60, %v20959_v25  ;;  %v9417_v9 = vrot.slane %v9403_v45, %v20959_v25  ;;  %v9418_v63 = vcombine.high %v9410_v13, %v9410_v13  ;;  %v21149_v45 = vld [vmem:[#allocation74_spill] sm:$0xff] }
 0x53b   : > { %v9827_v24 = vcombine.low %v9410_v13, %v9436_v21  ;;  %v19261_v61 = vrot.slane %v19116_v35, %v18298_v59  ;;  %v19263_v48 = vcombine.low %v9402_v17, %v9434_v49  ;;  %v9487_v56 = vcombine.high %v6623_v5, %v6623_v5  ;;  %v21148_v17 = vld [vmem:[#allocation68_spill] sm:$0xff] }
 0x53c   : > { %v9494_v32 = vrot.slane %v6623_v5, %v20959_v25  ;;  %v19267_v22 = vrot.slane %v9665_v20, %v18298_v59  ;;  %v9452_v53 = vcombine.high %v9451_v19, %v9451_v19  ;;  %v9419_v27 = vcombine.high %v9417_v9, %v9417_v9 }
 0x53d   : > { %21145 = vst [vmem:[#allocation55_spill] sm:$0xff] %v19261_v61  ;;  %v9881_v8 = vcombine.low %v9418_v63, %v9444_v58  ;;  %v9453_v54 = vcombine.high %v6621_v18, %v6621_v18  ;;  %v9460_v31 = vrot.slane %v6621_v18, %v20959_v25  ;;  %v6622_v13 = vmax.f32 %v6458_v30, 0.0 }
 0x53e   : > { %21146 = vst [vmem:[#allocation63_spill] sm:$0xff] %v19267_v22  ;;  %v9502_v60 = vcombine.high %v9494_v32, %v9494_v32  ;;  %v19271_v21 = vrot.slane %v9719_v41, %v18298_v59  ;;  %v9611_v35 = vcombine.low %v9393_v46, %v9419_v27  ;;  %v6478_v49 = vadd.f32 %v18883_v39, %v21148_v17 }
 0x53f   : > { %v6491_v5 = vadd.f32 %v18883_v39, %v21149_v45  ;;  %v9467_v20 = vrot.slane %v9453_v54, %v20959_v25  ;;  %v9468_v4 = vcombine.high %v9460_v31, %v9460_v31  ;;  %v9470_v9 = vcombine.high %v6622_v13, %v6622_v13 }
 0x540   : > { %21147 = vst [vmem:[#allocation64_spill] sm:$0xff] %v19271_v21  ;;  %v9477_v63 = vrot.slane %v6622_v13, %v20959_v25  ;;  %v19282_v30 = vrot.slane %v9827_v24, %v18298_v59  ;;  %v9501_v41 = vrot.slane %v9487_v56, %v20959_v25  ;;  %v6624_v46 = vmax.f32 %v6478_v49, 0.0 }
 0x541   : > { %v6627_v18 = vmax.f32 %v6491_v5, 0.0  ;;  %v9469_v17 = vcombine.high %v9467_v20, %v9467_v20  ;;  %v9782_v38 = vcombine.low %v9468_v4, %v9494_v32  ;;  %v9836_v45 = vcombine.low %v9467_v20, %v9502_v60 }
 0x542   : > { %v19279_v58 = vpop.f32.mrb[88].mxu1  ;;  %21151 = vst [vmem:[#allocation68_spill] sm:$0xff] %v19282_v30  ;;  %v9484_v54 = vrot.slane %v9470_v9, %v20959_v25  ;;  %v9485_v12 = vcombine.high %v9477_v63, %v9477_v63  ;;  %v10395_v13 = vcombine.high %v6624_v46, %v6624_v46  ;;  %v10402_v7 = vrot.slane %v6624_v46, %v20959_v25 }
 0x543   : > { %21150 = vst [vmem:[#allocation66_spill] sm:$0xff] %v19279_v58  ;;  %v19285_v27 = vpop.f32.mrb[89].mxu1  ;;  %v6483_v24 = vadd.f32 %v18883_v39, %v21154_v14  ;;  %v19296_v56 = vrot.slane %v9881_v8, %v18298_v59  ;;  %v19299_v49 = vrot.slane %v9836_v45, %v18298_v59  ;;  %v19301_v4 = vcombine.low %v9469_v17, %v9501_v41  ;;  %v21163_v45 = vld [vmem:[#allocation27_spill] sm:$0xff] }
 0x544   : > { %21152 = vst [vmem:[#allocation74_spill] sm:$0xff] %v19285_v27  ;;  %v19288_v50 = vpop.f32.mrb[90].mxu1  ;;  %v9486_v32 = vcombine.high %v9484_v54, %v9484_v54  ;;  %v19304_v60 = vrot.slane %v9611_v35, %v18298_v59  ;;  %v9620_v5 = vcombine.low %v9451_v19, %v9485_v12  ;;  %v9674_v20 = vcombine.low %v9452_v53, %v9484_v54  ;;  %v21162_v53 = vld [vmem:[#allocation26_spill] sm:$0xff] }
 0x545   : > { %21153 = vst [vmem:[#allocation100_spill] sm:$0xff] %v19288_v50  ;;  %v19293_v58 = vpop.f32.mrb[91].mxu1  ;;  %21156 = vst [vmem:[#allocation101_spill] sm:$0xff] %v19296_v56  ;;  %v10446_v9 = vcombine.high %v6627_v18, %v6627_v18  ;;  %v19307_v63 = vrot.slane %v9782_v38, %v18298_v59  ;;  %v10409_v46 = vrot.slane %v10395_v13, %v20959_v25  ;;  %v6625_v19 = vmax.f32 %v6483_v24, 0.0 }
 0x546   : > { %21155 = vst [vmem:[#allocation76_spill] sm:$0xff] %v19293_v58  ;;  %21157 = vst [vmem:[#allocation102_spill] sm:$0xff] %v19299_v49  ;;  %v19311_v8 = vcombine.low %v9460_v31, %v9486_v32  ;;  %v19315_v41 = vrot.slane %v9620_v5, %v18298_v59  ;;  %v19318_v17 = vrot.slane %v9674_v20, %v18298_v59 }
 0x547   : > { %21158 = vst [vmem:[#allocation103_spill] sm:$0xff] %v19304_v60  ;;  %21159 = vst [vmem:[#allocation104_spill] sm:$0xff] %v19307_v63  ;;  %v10410_v35 = vcombine.high %v10402_v7, %v10402_v7  ;;  %v10453_v12 = vrot.slane %v6627_v18, %v20959_v25  ;;  %v6494_v38 = vadd.f32 %v18883_v39, %v21162_v53 }
 0x548   : > { %21160 = vst [vmem:[#allocation105_spill] sm:$0xff] %v19315_v41  ;;  %21161 = vst [vmem:[#allocation106_spill] sm:$0xff] %v19318_v17  ;;  %v6486_v54 = vadd.f32 %v18883_v39, %v21163_v45  ;;  %v11906_v31 = vcombine.high %v19121_v47, %v19126_v16  ;;  %v10412_v5 = vcombine.high %v6625_v19, %v6625_v19 }
 0x549   : > { %v10419_v24 = vrot.slane %v6625_v19, %v20959_v25  ;;  %v19333_v18 = vrot.slane %v10446_v9, %v20959_v25  ;;  %v6628_v20 = vmax.f32 %v6494_v38, 0.0  ;;  %v11907_v45 = vcombine.high %v19150_v42, %v19219_v1 }
 0x54a   : > { %v6626_v53 = vmax.f32 %v6486_v54, 0.0  ;;  %v10426_v14 = vrot.slane %v10412_v5, %v20959_v25  ;;  %v10226_v47 = vrot.slane %v11906_v31, %v20959_v25  ;;  %v11908_v13 = vcombine.high %v19282_v30, %v19299_v49 }
 0x54b   : > { %v10427_v16 = vcombine.high %v10419_v24, %v10419_v24  ;;  %v10462_v32 = vcombine.high %v6628_v20, %v6628_v20  ;;  %v19342_v58 = vrot.slane %v6628_v20, %v20959_v25  ;;  %v10233_v50 = vrot.slane %v11907_v45, %v20959_v25 }
 0x54c   : > { %v10429_v19 = vcombine.high %v6626_v53, %v6626_v53  ;;  %v10436_v9 = vrot.slane %v6626_v53, %v20959_v25  ;;  %v10428_v38 = vcombine.high %v10426_v14, %v10426_v14  ;;  %v10242_v1 = vrot.slane %v11908_v13, %v20959_v25 }
 0x54d   : > { %v11088_v54 = vcombine.low %v10427_v16, %v10453_v12  ;;  %v10411_v5 = vcombine.high %v10409_v46, %v10409_v46  ;;  %v19348_v42 = vrot.slane %v10462_v32, %v20959_v25  ;;  %v10234_v20 = vcombine.low %v10226_v47, %v10233_v50 }
 0x54e   : > { %v10443_v31 = vrot.slane %v10429_v19, %v20959_v25  ;;  %v10444_v49 = vcombine.high %v10436_v9, %v10436_v9  ;;  %v10818_v30 = vcombine.low %v10402_v7, %v10428_v38  ;;  %v10872_v27 = vcombine.low %v10410_v35, %v10436_v9  ;;  %v21165_v35 = vld [vmem:[#allocation4_spill] sm:$0xff] }
 0x54f   : > { %v19353_v40 = vrot.slane %v19263_v48, %v18298_v59  ;;  %v19358_v53 = vrot.slane %v11088_v54, %v18298_v59  ;;  %v12368_v45 = vpack.i.bf16 %v10242_v1, %v10234_v20  ;;  %v6507_v19 = vadd.f32 %v18883_v39, %v21165_v35 }
 0x550   : > { %v10445_v14 = vcombine.high %v10443_v31, %v10443_v31  ;;  %v10926_v12 = vcombine.low %v10409_v46, %v10444_v49  ;;  %v10980_v13 = vcombine.low %v10411_v5, %v10443_v31  ;;  %v19365_v7 = vrot.slane %v10818_v30, %v18298_v59 }
 0x551   : > { %21164 = vst [vmem:[#allocation26_spill] sm:$0xff] %v19353_v40  ;;  %v11904_v49 = vcombine.high %v19190_v26, %v19216_v51  ;;  %v19372_v46 = vrot.slane %v10872_v27, %v18298_v59  ;;  %12369 = vrot.lane.b32.xlu0 %v12368_v45, %s12507_s28  ;;  %v11905_v1 = vcombine.high %v19353_v40, %v19307_v63  ;;  %v6631_v31 = vmax.f32 %v6507_v19, 0.0 }
 0x552   : > { %v11034_v48 = vcombine.low %v10419_v24, %v10445_v14  ;;  %v11894_v30 = vcombine.high %v19041_v28, %v19237_v29  ;;  %v21166_v24 = vcombine.high %v19060_v0, %v19113_v37  ;;  %v11895_v27 = vcombine.high %v19153_v55, %v19199_v6  ;;  %v21230_v55 = vld [vmem:[#allocation100_spill] sm:$0xff] }
 0x553   : > { %v10163_v38 = vrot.slane %v11904_v49, %v20959_v25  ;;  %v11896_v54 = vcombine.high %v19304_v60, %v19315_v41  ;;  %v10172_v5 = vrot.slane %v11905_v1, %v20959_v25  ;;  %v11897_v14 = vcombine.high %v19046_v2, %v19250_v10 }
 0x554   : > { %v10156_v9 = vrot.slane %v21166_v24, %v20959_v25  ;;  %v9946_v20 = vrot.slane %v11894_v30, %v20959_v25  ;;  %v9953_v35 = vrot.slane %v11895_v27, %v20959_v25  ;;  %v11898_v49 = vcombine.high %v19156_v62, %v19204_v15  ;;  %v21167_v27 = vld [vmem:[#allocation84_spill] sm:$0xff]  ;;  %v21209_v62 = vld [vmem:[#allocation66_spill] sm:$0xff] }
 0x555   : > { %v9962_v24 = vrot.slane %v11896_v54, %v20959_v25  ;;  %v19399_v50 = vrot.slane %v10926_v12, %v18298_v59  ;;  %v19402_v47 = vrot.slane %v10980_v13, %v18298_v59  ;;  %v10016_v1 = vrot.slane %v11897_v14, %v20959_v25  ;;  %v21168_v13 = vld [vmem:[#allocation2_spill] sm:$0xff] }
 0x556   : > { %v10164_v45 = vcombine.low %v10156_v9, %v10163_v38  ;;  %v11899_v19 = vcombine.high %v19267_v22, %v19318_v17  ;;  %v9954_v9 = vcombine.low %v9946_v20, %v9953_v35  ;;  %v10023_v38 = vrot.slane %v11898_v49, %v20959_v25  ;;  %v21169_v20 = vld [vmem:[#allocation87_spill] sm:$0xff] }
 0x557   : > { %v6499_v54 = vadd.f32 %v18883_v39, %v21167_v27  ;;  %v19411_v32 = vrot.slane %v11034_v48, %v18298_v59  ;;  %v10512_v12 = vcombine.high %v6631_v31, %v6631_v31  ;;  %v6510_v63 = vadd.f32 %v18883_v39, %v21168_v13 }
 0x558   : > { %v12363_v30 = vpack.i.bf16 %v10172_v5, %v10164_v45  ;;  %v10032_v16 = vrot.slane %v11899_v19, %v20959_v25  ;;  %v12373_v14 = vpack.i.bf16 %v9962_v24, %v9954_v9  ;;  %v10024_v40 = vcombine.low %v10016_v1, %v10023_v38 }
 0x559   : > { %v6629_v5 = vmax.f32 %v6499_v54, 0.0  ;;  %v6502_v45 = vadd.f32 %v18883_v39, %v21169_v20  ;;  %v19420_v35 = vrot.slane %v6631_v31, %v20959_v25  ;;  %v6632_v49 = vmax.f32 %v6510_v63, 0.0 }
 0x55a   : > { %12364 = vrot.lane.b32.xlu1 %v12363_v30, %s12507_s28  ;;  %v19424_v48 = vrot.slane %v19311_v8, %v18298_v59  ;;  %v11900_v19 = vcombine.high %v19057_v33, %v19137_v52  ;;  %12374 = vrot.lane.b32.xlu0 %v12373_v14, %s12507_s28  ;;  %v12378_v30 = vpack.i.bf16 %v10032_v16, %v10024_v40 }
 0x55b   : > { %v10479_v24 = vcombine.high %v6629_v5, %v6629_v5  ;;  %v10486_v1 = vrot.slane %v6629_v5, %v20959_v25  ;;  %v6630_v9 = vmax.f32 %v6502_v45, 0.0  ;;  %v19431_v38 = vrot.slane %v10512_v12, %v20959_v25 }
 0x55c   : > { %21170 = vst [vmem:[#allocation27_spill] sm:$0xff] %v19424_v48  ;;  %v10529_v31 = vcombine.high %v6632_v49, %v6632_v49  ;;  %v19434_v63 = vrot.slane %v6632_v49, %v20959_v25  ;;  %v10086_v12 = vrot.slane %v11900_v19, %v20959_v25  ;;  %v21171_v14 = vcombine.high %v19165_v11, %v19209_v44 }
 0x55d   : > { %v10493_v27 = vrot.slane %v10479_v24, %v20959_v25  ;;  %v10494_v54 = vcombine.high %v10486_v1, %v10486_v1  ;;  %v10496_v40 = vcombine.high %v6630_v9, %v6630_v9  ;;  %v10503_v16 = vrot.slane %v6630_v9, %v20959_v25 }
 0x55e   : > { %12379 = vrot.lane.b32.xlu1 %v12378_v30, %s12507_s28  ;;  %v10543_v13 = vrot.slane %v10529_v31, %v20959_v25  ;;  %v10093_v5 = vrot.slane %v21171_v14, %v20959_v25  ;;  %v11902_v20 = vcombine.high %v19271_v21, %v19424_v48  ;;  %v21172_v24 = vcombine.high %v19333_v18, %v19333_v18 }
 0x55f   : > { %v10495_v49 = vcombine.high %v10493_v27, %v10493_v27  ;;  %v10827_v30 = vcombine.low %v19333_v18, %v10494_v54  ;;  %v10510_v9 = vrot.slane %v10496_v40, %v20959_v25  ;;  %v10511_v8 = vcombine.high %v10503_v16, %v10503_v16 }
 0x560   : > { %v10881_v1 = vcombine.low %v21172_v24, %v10493_v27  ;;  %v10545_v31 = vcombine.high %v10543_v13, %v10543_v13  ;;  %v21173_v14 = vcombine.high %v19342_v58, %v19342_v58  ;;  %v10094_v48 = vcombine.low %v10086_v12, %v10093_v5 }
 0x561   : > { %v19464_v11 = vrot.slane %v10827_v30, %v18298_v59  ;;  %v10935_v18 = vcombine.low %v19342_v58, %v10495_v49  ;;  %v21174_v27 = vcombine.high %v19348_v42, %v19348_v42  ;;  %v11043_v12 = vcombine.low %v19348_v42, %v10511_v8 }
 0x562   : > { %v10989_v44 = vcombine.low %v21173_v14, %v10503_v16  ;;  %v19467_v54 = vrot.slane %v10881_v1, %v18298_v59  ;;  %v10836_v24 = vcombine.low %v19420_v35, %v10545_v31  ;;  %v10102_v5 = vrot.slane %v11902_v20, %v20959_v25  ;;  %v21176_v31 = vld [vmem:[#allocation47_spill] sm:$0xff] }
 0x563   : > { %v11097_v40 = vcombine.low %v21174_v27, %v10510_v9  ;;  %v19482_v30 = vrot.slane %v10935_v18, %v18298_v59  ;;  %v19493_v42 = vrot.slane %v11043_v12, %v18298_v59  ;;  %v19514_v1 = vrot.slane %v19301_v4, %v18298_v59  ;;  %v21177_v12 = vld [vmem:[#allocation53_spill] sm:$0xff] }
 0x564   : > { %v19477_v16 = vrot.slane %v10989_v44, %v18298_v59  ;;  %v10527_v44 = vcombine.high %v19420_v35, %v19420_v35  ;;  %v12388_v18 = vpack.i.bf16 %v10102_v5, %v10094_v48  ;;  %v12305_v35 = vpop.permute.xlu0 %12304  ;;  %v11909_v48 = vcombine.high %v19078_v23, %v19261_v61 }
 0x565   : > { %v19449_v45 = vpop.f32.mrb[92].mxu1  ;;  %v19496_v8 = vrot.slane %v11097_v40, %v18298_v59  ;;  %21175 = vst [vmem:[#allocation4_spill] sm:$0xff] %v19514_v1  ;;  %v11910_v5 = vcombine.high %v19213_v3, %v19229_v43  ;;  %v6523_v40 = vadd.f32 %v18883_v39, %v19123_v36  ;;  %v21178_v20 = vcombine.low %v21176_v31, %v21177_v12  ;;  %v12310_v39 = vpop.permute.xlu1 %12309  ;;  %v21180_v31 = vld [vmem:[#allocation28_spill] sm:$0xff]  ;;  %v21181_v12 = vld [vmem:[#allocation75_spill] sm:$0xff] }
 0x566   : > { %v19456_v19 = vpop.f32.mrb[93].mxu1  ;;  %12389 = vrot.lane.b32.xlu0 %v12388_v18, %s12507_s28  ;;  %v11911_v18 = vcombine.high %v19296_v56, %v19514_v1  ;;  %v12307_v14 = vunpack.i.h.bf16 %v12305_v35  ;;  %v10296_v49 = vrot.slane %v11909_v48, %v20959_v25  ;;  %v12306_v43 = vunpack.i.l.bf16 %v12305_v35  ;;  %v19549_v35 = vld [vmem:[%s20216_s3 + $0xb] ss:$0 sm:$0xff] }
 0x567   : > { %v19461_v21 = vpop.f32.mrb[94].mxu1  ;;  %v7443_v58 = vrot.slane %v21178_v20, %v20959_v25  ;;  %v10303_v27 = vrot.slane %v11910_v5, %v20959_v25  ;;  %v6635_v9 = vmax.f32 %v6523_v40, 0.0  ;;  %v19541_v36 = vrot.slane %v10836_v24, %v18298_v59 }
 0x568   : > { %v19473_v13 = vpop.f32.mrb[95].mxu1  ;;  %v10312_v20 = vrot.slane %v11911_v18, %v20959_v25  ;;  %v7435_v48 = vcombine.low %v21181_v12, %v21180_v31  ;;  %v6515_v40 = vadd.f32 %v19549_v35, %v19133_v57  ;;  %v21182_v31 = vld [vmem:[#allocation45_spill] sm:$0xff]  ;;  %v21183_v12 = vld [vmem:[#allocation60_spill] sm:$0xff]  ;;  %v12312_v61 = vunpack.i.h.bf16 %v12310_v39 }
 0x569   : > { %v10304_v5 = vcombine.low %v10296_v49, %v10303_v27  ;;  %v10579_v4 = vcombine.high %v6635_v9, %v6635_v9  ;;  %v19554_v24 = vrot.slane %v6635_v9, %v20959_v25  ;;  %v7835_v18 = vsel %vm7833_vm8, %v7443_v58, %v12307_v14  ;;  %v21185_v9 = vld [vmem:[#allocation61_spill] sm:$0xff]  ;;  %v21186_v58 = vld [vmem:[#allocation62_spill] sm:$0xff] }
 0x56a   : > { %v19558_v1 = vsel %vm7833_vm8, %v7435_v48, %v12306_v43  ;;  %v6633_v56 = vmax.f32 %v6515_v40, 0.0  ;;  %v21184_v3 = vcombine.low %v21182_v31, %v21183_v12  ;;  %v21187_v14 = vcombine.low %v21185_v9, %v21186_v58  ;;  %v21189_v48 = vld [vmem:[#allocation58_spill] sm:$0xff]  ;;  %v12315_v31 = vpop.permute.xlu0 %12314  ;;  %v21193_v12 = vld [vmem:[#allocation21_spill] sm:$0xff] }
 0x56b   : > { %v12383_v33 = vpack.i.bf16 %v10312_v20, %v10304_v5  ;;  %v19565_v57 = vrot.slane %v10579_v4, %v20959_v25  ;;  %v12311_v20 = vunpack.i.l.bf16 %v12310_v39  ;;  %v21188_v4 = vld [vmem:[#allocation7_spill] sm:$0xff]  ;;  %v6526_v58 = vadd.f32 %v19549_v35, %v19140_v34 }
 0x56c   : > { %v7574_v23 = vrot.slane %v21184_v3, %v20959_v25  ;;  %v7583_v43 = vrot.slane %v21187_v14, %v20959_v25  ;;  %v10546_v27 = vcombine.high %v6633_v56, %v6633_v56  ;;  %v10553_v3 = vrot.slane %v6633_v56, %v20959_v25  ;;  %v21191_v14 = vld [vmem:[#allocation95_spill] sm:$0xff] }
 0x56d   : > { %v21190_v40 = vcombine.low %v21188_v4, %v21189_v48  ;;  %12384 = vrot.lane.b32.xlu1 %v12383_v33, %s12507_s28  ;;  %v6518_v56 = vadd.f32 %v19549_v35, %v21191_v14  ;;  %v21192_v33 = vld [vmem:[#allocation41_spill] sm:$0xff]  ;;  %v21195_v14 = vcombine.high %v19431_v38, %v19431_v38 }
 0x56e   : > { %v19588_v9 = vsel %vm7833_vm8, %v7583_v43, %v12312_v61  ;;  %v10560_v39 = vrot.slane %v10546_v27, %v20959_v25  ;;  %v10561_v49 = vcombine.high %v10553_v3, %v10553_v3  ;;  %v10890_v4 = vcombine.low %v10527_v44, %v10553_v3  ;;  %v21196_v27 = vld [vmem:[#allocation56_spill] sm:$0xff]  ;;  %v21197_v44 = vld [vmem:[#allocation65_spill] sm:$0xff] }
 0x56f   : > { %v7567_v5 = vrot.slane %v21190_v40, %v20959_v25  ;;  %v6636_v40 = vmax.f32 %v6526_v58, 0.0  ;;  %v6634_v52 = vmax.f32 %v6518_v56, 0.0  ;;  %v21194_v17 = vcombine.low %v21192_v33, %v21193_v12 }
 0x570   : > { %v12317_v43 = vunpack.i.h.bf16 %v12315_v31  ;;  %v10562_v22 = vcombine.high %v10560_v39, %v10560_v39  ;;  %v10944_v34 = vcombine.low %v19431_v38, %v10561_v49  ;;  %v10998_v41 = vcombine.low %v21195_v14, %v10560_v39 }
 0x571   : > { %v7575_v48 = vcombine.low %v7567_v5, %v7574_v23  ;;  %v7504_v61 = vrot.slane %v21194_v17, %v20959_v25  ;;  %v21198_v23 = vcombine.low %v21196_v27, %v21197_v44  ;;  %v19609_v5 = vrot.slane %v10890_v4, %v18298_v59 }
 0x572   : > { %v10596_v58 = vcombine.high %v6636_v40, %v6636_v40  ;;  %v10603_v12 = vrot.slane %v6636_v40, %v20959_v25  ;;  %v10563_v17 = vcombine.high %v6634_v52, %v6634_v52  ;;  %v19613_v56 = vrot.slane %v10944_v34, %v18298_v59  ;;  %v12320_v40 = vpop.permute.xlu1 %12319 }
 0x573   : > { %v7513_v3 = vrot.slane %v21198_v23, %v20959_v25  ;;  %v11052_v49 = vcombine.low %v19434_v63, %v10562_v22  ;;  %v7838_v38 = vsel %vm7833_vm8, %v7575_v48, %v12311_v20  ;;  %v10570_v39 = vrot.slane %v6634_v52, %v20959_v25 }
 0x574   : > { %v10610_v33 = vrot.slane %v10596_v58, %v20959_v25  ;;  %v10611_v14 = vcombine.high %v10603_v12, %v10603_v12  ;;  %v10577_v27 = vrot.slane %v10563_v17, %v20959_v25  ;;  %v19627_v22 = vrot.slane %v10998_v41, %v18298_v59  ;;  %v21200_v12 = vld [vmem:[#allocation5_spill] sm:$0xff]  ;;  %v21201_v17 = vld [vmem:[#allocation39_spill] sm:$0xff] }
 0x575   : > { %v7837_v4 = vsel %vm7833_vm8, %v7513_v3, %v12317_v43  ;;  %v21199_v52 = vcombine.high %v19434_v63, %v19434_v63  ;;  %v12316_v34 = vunpack.i.l.bf16 %v12315_v31  ;;  %v21202_v60 = vcombine.low %v21200_v12, %v21201_v17  ;;  %v21203_v63 = vld [vmem:[#allocation23_spill] sm:$0xff]  ;;  %v21204_v3 = vld [vmem:[#allocation50_spill] sm:$0xff] }
 0x576   : > { %v11959_v48 = vpack.c.bf16 %v7837_v4, %v7835_v18  ;;  %v10612_v44 = vcombine.high %v10610_v33, %v10610_v33  ;;  %v10578_v23 = vcombine.high %v10577_v27, %v10577_v27  ;;  %v10845_v58 = vcombine.low %v10577_v27, %v10611_v14  ;;  %v21207_v12 = vld [vmem:[#allocation6_spill] sm:$0xff] }
 0x577   : > { %v11106_v20 = vcombine.low %v21199_v52, %v10570_v39  ;;  %v7497_v15 = vrot.slane %v21202_v60, %v20959_v25  ;;  %v19637_v43 = vrot.slane %v11052_v49, %v18298_v59  ;;  %v21205_v18 = vcombine.low %v21203_v63, %v21204_v3  ;;  %v21210_v3 = vld [vmem:[#allocation29_spill] sm:$0xff] }
 0x578   : > { %7885 = vst [vmem:[%s19623_s11 + $0x18] sm:$0x33] %v11959_v48  ;;  %v12322_v39 = vunpack.i.h.bf16 %v12320_v40  ;;  %v10953_v14 = vcombine.low %v19554_v24, %v10612_v44  ;;  %v19649_v27 = vrot.slane %v10845_v58, %v18298_v59  ;;  %v10899_v4 = vcombine.low %v10578_v23, %v10610_v33  ;;  %v12325_v33 = vpop.permute.xlu0 %12324 }
 0x579   : > { %v19640_v41 = vrot.slane %v11106_v20, %v18298_v59  ;;  %v7653_v31 = vrot.slane %v21205_v18, %v20959_v25  ;;  %v7505_v60 = vcombine.low %v7497_v15, %v7504_v61  ;;  %v12321_v52 = vunpack.i.l.bf16 %v12320_v40  ;;  %v21206_v20 = vld [vmem:[#allocation15_spill] sm:$0xff] }
 0x57a   : > { %v21208_v48 = vcombine.low %v21206_v20, %v21207_v12  ;;  %v6539_v63 = vadd.f32 %v19549_v35, %v21209_v62  ;;  %v19659_v44 = vrot.slane %v10953_v14, %v18298_v59  ;;  %v19662_v58 = vrot.slane %v10899_v4, %v18298_v59  ;;  %v21211_v14 = vld [vmem:[#allocation9_spill] sm:$0xff]  ;;  %v21212_v4 = vld [vmem:[#allocation10_spill] sm:$0xff] }
 0x57b   : > { %v7841_v49 = vsel %vm7833_vm8, %v7653_v31, %v12322_v39  ;;  %v7836_v61 = vsel %vm7833_vm8, %v7505_v60, %v12316_v34  ;;  %v21213_v20 = vcombine.low %v21211_v14, %v21212_v4  ;;  %v21214_v34 = vld [vmem:[#allocation22_spill] sm:$0xff]  ;;  %v21215_v60 = vld [vmem:[#allocation43_spill] sm:$0xff]  ;;  %v12327_v62 = vunpack.i.h.bf16 %v12325_v33 }
 0x57c   : > { %v7637_v17 = vrot.slane %v21208_v48, %v20959_v25  ;;  %v11956_v40 = vpack.c.bf16 %v7836_v61, %v19558_v1  ;;  %v11960_v23 = vpack.c.bf16 %v7841_v49, %v19588_v9  ;;  %v6639_v31 = vmax.f32 %v6539_v63, 0.0  ;;  %v21218_v63 = vld [vmem:[#allocation57_spill] sm:$0xff] }
 0x57d   : > { %v7707_v12 = vrot.slane %v21213_v20, %v20959_v25  ;;  %v21216_v1 = vcombine.low %v21214_v34, %v21215_v60  ;;  %v12326_v4 = vunpack.i.l.bf16 %v12325_v33  ;;  %v21220_v20 = vld [vmem:[#allocation74_spill] sm:$0xff]  ;;  %v12330_v34 = vpop.permute.xlu1 %12329 }
 0x57e   : > { %v7645_v18 = vcombine.low %v7637_v17, %v21210_v3  ;;  %7882 = vst [vmem:[%s19623_s11] sm:$0xff] %v11956_v40  ;;  %7886 = vst [vmem:[%s19623_s11 + $0x20] sm:$0x33] %v11960_v23  ;;  %v10646_v49 = vcombine.high %v6639_v31, %v6639_v31  ;;  %v21217_v17 = vld [vmem:[#allocation71_spill] sm:$0xff]  ;;  %v6531_v15 = vadd.f32 %v19549_v35, %v21220_v20  ;;  %v21221_v23 = vld [vmem:[#allocation16_spill] sm:$0xff]  ;;  %v12331_v6 = vunpack.i.l.bf16 %v12330_v34 }
 0x57f   : > { %v7714_v48 = vrot.slane %v21216_v1, %v20959_v25  ;;  %v21219_v61 = vcombine.low %v21217_v17, %v21218_v63  ;;  %v19692_v60 = vrot.slane %v6639_v31, %v20959_v25  ;;  %v21227_v31 = vld [vmem:[#allocation51_spill] sm:$0xff] }
 0x580   : > { %v7840_v9 = vsel %vm7833_vm8, %v7645_v18, %v12321_v52  ;;  %v10660_v40 = vrot.slane %v10646_v49, %v20959_v25  ;;  %v21222_v18 = vld [vmem:[#allocation38_spill] sm:$0xff]  ;;  %v6637_v33 = vmax.f32 %v6531_v15, 0.0 }
 0x581   : > { %v7723_v3 = vrot.slane %v21219_v61, %v20959_v25  ;;  %v11957_v39 = vpack.c.bf16 %v7840_v9, %v7838_v38  ;;  %v7715_v14 = vcombine.low %v7707_v12, %v7714_v48  ;;  %v21223_v1 = vcombine.low %v21221_v23, %v21222_v18  ;;  %v21224_v12 = vld [vmem:[#allocation18_spill] sm:$0xff]  ;;  %v21228_v61 = vld [vmem:[#allocation52_spill] sm:$0xff] }
 0x582   : > { %v21225_v48 = vld [vmem:[#allocation42_spill] sm:$0xff]  ;;  %v21229_v49 = vcombine.low %v21227_v31, %v21228_v61  ;;  %v6542_v23 = vadd.f32 %v19549_v35, %v21230_v55 }
 0x583   : > { %v7843_v52 = vsel %vm7833_vm8, %v7723_v3, %v12327_v62  ;;  %v7777_v17 = vrot.slane %v21223_v1, %v20959_v25  ;;  %7883 = vst [vmem:[%s19623_s11 + $0x8] sm:$0xff] %v11957_v39  ;;  %v7842_v38 = vsel %vm7833_vm8, %v7715_v14, %v12326_v4  ;;  %v21226_v9 = vcombine.low %v21224_v12, %v21225_v48  ;;  %v21231_v4 = vld [vmem:[#allocation76_spill] sm:$0xff] }
 0x584   : > { %v7793_v20 = vrot.slane %v21229_v49, %v20959_v25  ;;  %v10662_v62 = vcombine.high %v10660_v40, %v10660_v40  ;;  %v12332_v3 = vunpack.i.h.bf16 %v12330_v34  ;;  %v10613_v39 = vcombine.high %v6637_v33, %v6637_v33 }
 0x585   : > { %v7784_v63 = vrot.slane %v21226_v9, %v20959_v25  ;;  %v10620_v14 = vrot.slane %v6637_v33, %v20959_v25  ;;  %v6534_v18 = vadd.f32 %v19549_v35, %v21231_v4  ;;  %v6640_v12 = vmax.f32 %v6542_v23, 0.0 }
 0x586   : > { %v7845_v1 = vsel %vm7833_vm8, %v7793_v20, %v12332_v3  ;;  %v6555_v48 = vadd.f32 %v19549_v35, %v19449_v45  ;;  %v6547_v34 = vadd.f32 %v19549_v35, %v19456_v19  ;;  %v10627_v40 = vrot.slane %v10613_v39, %v20959_v25 }
 0x587   : > { %v7785_v15 = vcombine.low %v7777_v17, %v7784_v63  ;;  %v10628_v55 = vcombine.high %v10620_v14, %v10620_v14  ;;  %v21232_v33 = vcombine.high %v19554_v24, %v19554_v24  ;;  %v11961_v9 = vpack.c.bf16 %v7845_v1, %v7843_v52 }
 0x588   : > { %v10663_v31 = vcombine.high %v6640_v12, %v6640_v12  ;;  %v10670_v61 = vrot.slane %v6640_v12, %v20959_v25  ;;  %v6638_v49 = vmax.f32 %v6534_v18, 0.0  ;;  %v21233_v20 = vcombine.high %v19565_v57, %v19565_v57 }
 0x589   : > { %v11007_v17 = vcombine.low %v21232_v33, %v10620_v14  ;;  %v7844_v63 = vsel %vm7833_vm8, %v7785_v15, %v12331_v6  ;;  %v11061_v19 = vcombine.low %v19565_v57, %v10628_v55  ;;  %7887 = vst [vmem:[%s19623_s11 + $0x28] sm:$0x33] %v11961_v9 }
 0x58a   : > { %v11115_v3 = vcombine.low %v21233_v20, %v10627_v40  ;;  %v11958_v24 = vpack.c.bf16 %v7844_v63, %v7842_v38  ;;  %v10677_v52 = vrot.slane %v10663_v31, %v20959_v25  ;;  %v10678_v23 = vcombine.high %v10670_v61, %v10670_v61 }
 0x58b   : > { %v19727_v45 = vrot.slane %v11007_v17, %v18298_v59  ;;  %v10629_v6 = vcombine.high %v6638_v49, %v6638_v49  ;;  %v10636_v39 = vrot.slane %v6638_v49, %v20959_v25  ;;  %v19737_v14 = vrot.slane %v11061_v19, %v18298_v59 }
 0x58c   : > { %v19740_v15 = vrot.slane %v11115_v3, %v18298_v59  ;;  %7884 = vst [vmem:[%s19623_s11 + $0x10] sm:$0xff] %v11958_v24  ;;  %v10679_v38 = vcombine.high %v10677_v52, %v10677_v52  ;;  %v10661_v40 = vcombine.high %v19692_v60, %v19692_v60  ;;  %v6643_v17 = vmax.f32 %v6555_v48, 0.0 }
 0x58d   : > { %v10643_v18 = vrot.slane %v10629_v6, %v20959_v25  ;;  %v10644_v1 = vcombine.high %v10636_v39, %v10636_v39  ;;  %v10854_v12 = vcombine.low %v10636_v39, %v10662_v62  ;;  %v6641_v3 = vmax.f32 %v6547_v34, 0.0 }
 0x58e   : > { %v19755_v9 = vcombine.low %v19692_v60, %v10679_v38  ;;  %v10713_v62 = vcombine.high %v6643_v17, %v6643_v17  ;;  %v10720_v20 = vrot.slane %v6643_v17, %v20959_v25  ;;  %v6558_v48 = vadd.f32 %v19549_v35, %v19461_v21 }
 0x58f   : > { %v10645_v63 = vcombine.high %v10643_v18, %v10643_v18  ;;  %v19758_v31 = vrot.slane %v10854_v12, %v18298_v59  ;;  %v10908_v49 = vcombine.low %v10644_v1, %v10670_v61  ;;  %v10962_v19 = vcombine.low %v10643_v18, %v10678_v23 }
 0x590   : > { %v6550_v60 = vadd.f32 %v19549_v35, %v19473_v13  ;;  %v10727_v61 = vrot.slane %v10713_v62, %v20959_v25  ;;  %v10728_v23 = vcombine.high %v10720_v20, %v10720_v20  ;;  %v10680_v38 = vcombine.high %v6641_v3, %v6641_v3 }
 0x591   : > { %21234 = vst [vmem:[#allocation84_spill] sm:$0xff] %v19758_v31  ;;  %v19762_v24 = vrot.slane %v10908_v49, %v18298_v59  ;;  %v11016_v6 = vcombine.low %v10645_v63, %v10677_v52  ;;  %v19769_v39 = vrot.slane %v10962_v19, %v18298_v59  ;;  %v10687_v18 = vrot.slane %v6641_v3, %v20959_v25 }
 0x592   : > { %v6644_v34 = vmax.f32 %v6558_v48, 0.0  ;;  %v6642_v1 = vmax.f32 %v6550_v60, 0.0  ;;  %v11925_v52 = vcombine.high %v19541_v36, %v19649_v27  ;;  %v10694_v12 = vrot.slane %v10680_v38, %v20959_v25 }
 0x593   : > { %21235 = vst [vmem:[#allocation2_spill] sm:$0xff] %v19762_v24  ;;  %21236 = vst [vmem:[#allocation87_spill] sm:$0xff] %v19769_v39  ;;  %v10729_v21 = vcombine.high %v10727_v61, %v10727_v61  ;;  %v21237_v13 = vcombine.high %v19365_v7, %v19464_v11  ;;  %v11927_v17 = vcombine.high %v19372_v46, %v19467_v54 }
 0x594   : > { %v11124_v63 = vcombine.low %v10661_v40, %v10687_v18  ;;  %v10730_v49 = vcombine.high %v6644_v34, %v6644_v34  ;;  %v10737_v19 = vrot.slane %v6644_v34, %v20959_v25  ;;  %v10696_v62 = vcombine.high %v6642_v1, %v6642_v1 }
 0x595   : > { %v11189_v35 = vrot.slane %v21237_v13, %v20959_v25  ;;  %v10695_v20 = vcombine.high %v10694_v12, %v10694_v12  ;;  %v10863_v3 = vcombine.low %v10694_v12, %v10728_v23  ;;  %v10703_v48 = vrot.slane %v6642_v1, %v20959_v25 }
 0x596   : > { %v11196_v60 = vrot.slane %v11925_v52, %v20959_v25  ;;  %v19786_v38 = vrot.slane %v11124_v63, %v18298_v59  ;;  %v10744_v33 = vrot.slane %v10730_v49, %v20959_v25  ;;  %v10745_v13 = vcombine.high %v10737_v19, %v10737_v19  ;;  %v12340_v52 = vpop.permute.xlu1 %12339 }
 0x597   : > { %v10710_v55 = vrot.slane %v10696_v62, %v20959_v25  ;;  %v19791_v40 = vrot.slane %v10863_v3, %v18298_v59  ;;  %v10917_v18 = vcombine.low %v10695_v20, %v10727_v61  ;;  %v10711_v34 = vcombine.high %v10703_v48, %v10703_v48 }
 0x598   : > { %v10971_v4 = vcombine.low %v10703_v48, %v10729_v21  ;;  %v11197_v12 = vcombine.low %v11189_v35, %v11196_v60  ;;  %v11928_v1 = vcombine.high %v19609_v5, %v19662_v58  ;;  %v11259_v35 = vrot.slane %v11927_v17, %v20959_v25 }
 0x599   : > { %21238 = vst [vmem:[#allocation47_spill] sm:$0xff] %v19791_v40  ;;  %v10712_v57 = vcombine.high %v10710_v55, %v10710_v55  ;;  %v11079_v23 = vcombine.low %v10710_v55, %v10745_v13  ;;  %v11025_v49 = vcombine.low %v10711_v34, %v10737_v19  ;;  %v11926_v62 = vcombine.high %v19758_v31, %v19791_v40  ;;  %v21258_v31 = vld [vmem:[#allocation12_spill] sm:$0xff] }
 0x59a   : > { %v19798_v63 = vrot.slane %v10971_v4, %v18298_v59  ;;  %v19806_v55 = vrot.slane %v10917_v18, %v18298_v59  ;;  %v11266_v3 = vrot.slane %v11928_v1, %v20959_v25  ;;  %v11931_v17 = vcombine.high %v19613_v56, %v19659_v44 }
 0x59b   : > { %v19803_v61 = vrot.slane %v11079_v23, %v18298_v59  ;;  %v11133_v21 = vcombine.low %v10712_v57, %v10744_v33  ;;  %v19810_v20 = vrot.slane %v11025_v49, %v18298_v59  ;;  %v11205_v19 = vrot.slane %v11926_v62, %v20959_v25 }
 0x59c   : > { %21239 = vst [vmem:[#allocation53_spill] sm:$0xff] %v19798_v63  ;;  %21240 = vst [vmem:[#allocation28_spill] sm:$0xff] %v19806_v55  ;;  %v11929_v57 = vcombine.high %v19762_v24, %v19806_v55  ;;  %v11930_v33 = vcombine.high %v19399_v50, %v19482_v30  ;;  %v11267_v13 = vcombine.low %v11259_v35, %v11266_v3 }
 0x59d   : > { %21241 = vst [vmem:[#allocation75_spill] sm:$0xff] %v19810_v20  ;;  %v12393_v60 = vpack.i.bf16 %v11205_v19, %v11197_v12  ;;  %v11932_v18 = vcombine.high %v19769_v39, %v19798_v63  ;;  %v19827_v34 = vrot.slane %v11016_v6, %v18298_v59  ;;  %v11336_v49 = vrot.slane %v11931_v17, %v20959_v25 }
 0x59e   : > { %v11275_v23 = vrot.slane %v11929_v57, %v20959_v25  ;;  %v11329_v1 = vrot.slane %v11930_v33, %v20959_v25  ;;  %v21243_v62 = vcombine.high %v19402_v47, %v19477_v16  ;;  %v21244_v6 = vcombine.high %v19627_v22, %v19727_v45  ;;  %v12335_v57 = vpop.permute.xlu0 %12334 }
 0x59f   : > { %21242 = vst [vmem:[#allocation45_spill] sm:$0xff] %v19827_v34  ;;  %12394 = vrot.lane.b32.xlu0 %v12393_v60, %s12507_s28  ;;  %v11345_v12 = vrot.slane %v11932_v18, %v20959_v25  ;;  %v11935_v3 = vcombine.high %v19827_v34, %v19810_v20  ;;  %v11936_v60 = vcombine.high %v19411_v32, %v19493_v42  ;;  %v12336_v24 = vunpack.i.l.bf16 %v12335_v57 }
 0x5a0   : > { %v11399_v4 = vrot.slane %v21243_v62, %v20959_v25  ;;  %v11406_v19 = vrot.slane %v21244_v6, %v20959_v25  ;;  %v12403_v33 = vpack.i.bf16 %v11275_v23, %v11267_v13  ;;  %v11337_v17 = vcombine.low %v11329_v1, %v11336_v49 }
 0x5a1   : > { %v19848_v62 = vrot.slane %v19755_v9, %v18298_v59  ;;  %v11415_v35 = vrot.slane %v11935_v3, %v20959_v25  ;;  %v11937_v48 = vcombine.high %v19637_v43, %v19737_v14  ;;  %v19856_v6 = vrot.slane %v11133_v21, %v18298_v59  ;;  %v21245_v3 = vld [vmem:[#allocation59_spill] sm:$0xff] }
 0x5a2   : > { %v11407_v18 = vcombine.low %v11399_v4, %v11406_v19  ;;  %12404 = vrot.lane.b32.xlu1 %v12403_v33, %s12507_s28  ;;  %v12398_v13 = vpack.i.bf16 %v11345_v12, %v11337_v17  ;;  %v11469_v23 = vrot.slane %v11936_v60, %v20959_v25  ;;  %v11939_v4 = vcombine.high %v19358_v53, %v19496_v8  ;;  %v21246_v33 = vld [vmem:[#allocation69_spill] sm:$0xff]  ;;  %v12350_v55 = vpop.permute.xlu0 %12349 }
 0x5a3   : > { %v11938_v9 = vcombine.high %v19848_v62, %v19803_v61  ;;  %v11476_v49 = vrot.slane %v11937_v48, %v20959_v25  ;;  %v11940_v19 = vcombine.high %v19640_v41, %v19740_v15  ;;  %v11941_v59 = vcombine.high %v19786_v38, %v19856_v6  ;;  %v21249_v48 = vld [vmem:[#allocation82_spill] sm:$0xff] }
 0x5a4   : > { %v12408_v1 = vpack.i.bf16 %v11415_v35, %v11407_v18  ;;  %12399 = vrot.lane.b32.xlu0 %v12398_v13, %s12507_s28  ;;  %v11539_v12 = vrot.slane %v11939_v4, %v20959_v25  ;;  %v21247_v17 = vcombine.low %v21245_v3, %v21246_v33  ;;  %v21248_v35 = vld [vmem:[#allocation37_spill] sm:$0xff]  ;;  %v12337_v13 = vunpack.i.h.bf16 %v12335_v57  ;;  %v21252_v3 = vld [vmem:[#allocation67_spill] sm:$0xff]  ;;  %v21253_v33 = vld [vmem:[#allocation70_spill] sm:$0xff]  ;;  %v12345_v57 = vpop.permute.xlu1 %12344 }
 0x5a5   : > { %v11485_v21 = vrot.slane %v11938_v9, %v20959_v25  ;;  %v21250_v18 = vcombine.low %v21248_v35, %v21249_v48  ;;  %v11477_v34 = vcombine.low %v11469_v23, %v11476_v49  ;;  %v11546_v63 = vrot.slane %v11940_v19, %v20959_v25  ;;  %v21251_v9 = vld [vmem:[#allocation13_spill] sm:$0xff]  ;;  %v21255_v35 = vld [vmem:[#allocation32_spill] sm:$0xff] }
 0x5a6   : > { %v8670_v60 = vrot.slane %v21247_v17, %v20959_v25  ;;  %v11555_v39 = vrot.slane %v11941_v59, %v20959_v25  ;;  %12409 = vrot.lane.b32.xlu1 %v12408_v1, %s12507_s28  ;;  %v21254_v17 = vcombine.low %v21252_v3, %v21253_v33  ;;  %v21256_v48 = vld [vmem:[#allocation80_spill] sm:$0xff]  ;;  %v21259_v1 = vld [vmem:[#allocation83_spill] sm:$0xff]  ;;  %v12342_v3 = vunpack.i.h.bf16 %v12340_v52 }
 0x5a7   : > { %v8686_v20 = vrot.slane %v21250_v18, %v20959_v25  ;;  %v21257_v23 = vcombine.low %v21255_v35, %v21256_v48  ;;  %v12413_v19 = vpack.i.bf16 %v11485_v21, %v11477_v34  ;;  %v11547_v18 = vcombine.low %v11539_v12, %v11546_v63  ;;  %v21261_v35 = vld [vmem:[#allocation77_spill] sm:$0xff]  ;;  %v21265_v12 = vld [vmem:[#allocation91_spill] sm:$0xff] }
 0x5a8   : > { %v8678_v4 = vcombine.low %v8670_v60, %v21251_v9  ;;  %v8740_v40 = vrot.slane %v21254_v17, %v20959_v25  ;;  %v21260_v2 = vcombine.low %v21258_v31, %v21259_v1  ;;  %v12341_v33 = vunpack.i.l.bf16 %v12340_v52  ;;  %v21262_v34 = vld [vmem:[#allocation81_spill] sm:$0xff] }
 0x5a9   : > { %v8747_v49 = vrot.slane %v21257_v23, %v20959_v25  ;;  %v9077_v59 = vsel %vm7833_vm8, %v8686_v20, %v12337_v13  ;;  %12414 = vrot.lane.b32.xlu0 %v12413_v19, %s12507_s28  ;;  %v12418_v17 = vpack.i.bf16 %v11555_v39, %v11547_v18  ;;  %v21263_v63 = vcombine.low %v21261_v35, %v21262_v34  ;;  %v21264_v20 = vld [vmem:[#allocation89_spill] sm:$0xff]  ;;  %v21267_v39 = vld [vmem:[#allocation72_spill] sm:$0xff]  ;;  %v12355_v34 = vpop.permute.xlu0 %12354 }
 0x5aa   : > { %v8756_v60 = vrot.slane %v21260_v2, %v20959_v25  ;;  %v9076_v9 = vsel %vm7833_vm8, %v8678_v4, %v12336_v24  ;;  %v21266_v13 = vcombine.low %v21264_v20, %v21265_v12  ;;  %v12352_v2 = vunpack.i.h.bf16 %v12350_v55  ;;  %v21268_v4 = vld [vmem:[#allocation73_spill] sm:$0xff] }
 0x5ab   : > { %v8748_v10 = vcombine.low %v8740_v40, %v8747_v49  ;;  %v8817_v21 = vrot.slane %v21263_v63, %v20959_v25  ;;  %v12351_v52 = vunpack.i.l.bf16 %v12350_v55  ;;  %v21269_v48 = vcombine.low %v21267_v39, %v21268_v4  ;;  %12419 = vrot.lane.b32.xlu1 %v12418_v17, %s12507_s28  ;;  %v21270_v18 = vld [vmem:[#allocation17_spill] sm:$0xff]  ;;  %v21274_v55 = vld [vmem:[#allocation14_spill] sm:$0xff]  ;;  %v21278_v17 = vld [vmem:[#allocation31_spill] sm:$0xff] }
 0x5ac   : > { %v8826_v31 = vrot.slane %v21266_v13, %v20959_v25  ;;  %v9079_v24 = vsel %vm7833_vm8, %v8756_v60, %v12342_v3  ;;  %v21271_v63 = vld [vmem:[#allocation33_spill] sm:$0xff]  ;;  %v21272_v60 = vld [vmem:[#allocation36_spill] sm:$0xff]  ;;  %v12347_v13 = vunpack.i.h.bf16 %v12345_v57  ;;  %v12346_v39 = vunpack.i.l.bf16 %v12345_v57 }
 0x5ad   : > { %v9078_v40 = vsel %vm7833_vm8, %v8748_v10, %v12341_v33  ;;  %v8880_v23 = vrot.slane %v21269_v48, %v20959_v25  ;;  %v11965_v49 = vpack.c.bf16 %v9079_v24, %v9077_v59  ;;  %v8818_v1 = vcombine.low %v21270_v18, %v8817_v21  ;;  %v21275_v33 = vld [vmem:[#allocation11_spill] sm:$0xff]  ;;  %v21281_v24 = vld [vmem:[#allocation78_spill] sm:$0xff]  ;;  %v21283_v48 = vld [vmem:[#allocation8_spill] sm:$0xff] }
 0x5ae   : > { %v11962_v19 = vpack.c.bf16 %v9078_v40, %v9076_v9  ;;  %v9081_v35 = vsel %vm7833_vm8, %v8826_v31, %v12352_v2  ;;  %v21273_v3 = vcombine.low %v21271_v63, %v21272_v60  ;;  %v21276_v20 = vcombine.low %v21274_v55, %v21275_v33  ;;  %v21277_v9 = vld [vmem:[#allocation30_spill] sm:$0xff]  ;;  %v21286_v33 = vld [vmem:[#allocation88_spill] sm:$0xff] }
 0x5af   : > { %11891 = vst [vmem:[%s19623_s11 + $0x48] sm:$0x33] %v11965_v49  ;;  %v9080_v59 = vsel %vm7833_vm8, %v8818_v1, %v12351_v52  ;;  %v21279_v21 = vcombine.low %v21277_v9, %v21278_v17  ;;  %v21280_v2 = vld [vmem:[#allocation34_spill] sm:$0xff]  ;;  %v12360_v49 = vpop.permute.xlu1 %12359  ;;  %v12357_v1 = vunpack.i.h.bf16 %v12355_v34  ;;  %v12356_v60 = vunpack.i.l.bf16 %v12355_v34 }
 0x5b0   : > { %v8887_v10 = vrot.slane %v21273_v3, %v20959_v25  ;;  %v8896_v12 = vrot.slane %v21276_v20, %v20959_v25  ;;  %11888 = vst [vmem:[%s19623_s11 + $0x30] sm:$0xff] %v11962_v19  ;;  %v21282_v40 = vcombine.low %v21280_v2, %v21281_v24  ;;  %v21284_v18 = vld [vmem:[#allocation90_spill] sm:$0xff]  ;;  %v21287_v20 = vld [vmem:[#allocation3_spill] sm:$0xff] }
 0x5b1   : > { %v8950_v31 = vrot.slane %v21279_v21, %v20959_v25  ;;  %v21285_v63 = vcombine.low %v21283_v48, %v21284_v18  ;;  %v21288_v9 = vcombine.low %v21286_v33, %v21287_v20  ;;  %v21289_v21 = vld [vmem:[#allocation35_spill] sm:$0xff]  ;;  %v21293_v34 = vld [vmem:[#allocation86_spill] sm:$0xff]  ;;  %v21298_v33 = vld [vmem:[#allocation96_spill] sm:$0xff] }
 0x5b2   : > { %v8957_v4 = vrot.slane %v21282_v40, %v20959_v25  ;;  %v8888_v19 = vcombine.low %v8880_v23, %v8887_v10  ;;  %v9083_v52 = vsel %vm7833_vm8, %v8896_v12, %v12347_v13  ;;  %v21290_v2 = vld [vmem:[#allocation79_spill] sm:$0xff]  ;;  %v21292_v10 = vld [vmem:[#allocation85_spill] sm:$0xff]  ;;  %v12362_v13 = vunpack.i.h.bf16 %v12360_v49  ;;  %v21299_v20 = vld [vmem:[#allocation48_spill] sm:$0xff] }
 0x5b3   : > { %v8966_v57 = vrot.slane %v21285_v63, %v20959_v25  ;;  %v11966_v3 = vpack.c.bf16 %v9083_v52, %v9081_v35  ;;  %v9020_v17 = vrot.slane %v21288_v9, %v20959_v25  ;;  %v21291_v24 = vcombine.low %v21289_v21, %v21290_v2 }
 0x5b4   : > { %v8958_v55 = vcombine.low %v8950_v31, %v8957_v4  ;;  %v9082_v48 = vsel %vm7833_vm8, %v8888_v19, %v12346_v39  ;;  %v21294_v35 = vcombine.low %v21292_v10, %v21293_v34  ;;  %v12361_v63 = vunpack.i.l.bf16 %v12360_v49  ;;  %v21295_v39 = vld [vmem:[#allocation19_spill] sm:$0xff]  ;;  %v21296_v19 = vld [vmem:[#allocation20_spill] sm:$0xff] }
 0x5b5   : > { %v9027_v40 = vrot.slane %v21291_v24, %v20959_v25  ;;  %v9085_v23 = vsel %vm7833_vm8, %v8966_v57, %v12357_v1  ;;  %v11963_v31 = vpack.c.bf16 %v9082_v48, %v9080_v59  ;;  %11892 = vst [vmem:[%s19623_s11 + $0x50] sm:$0x33] %v11966_v3  ;;  %v21297_v57 = vcombine.low %v21295_v39, %v21296_v19 }
 0x5b6   : > { %v9036_v12 = vrot.slane %v21294_v35, %v20959_v25  ;;  %v9084_v4 = vsel %vm7833_vm8, %v8958_v55, %v12356_v60  ;;  %v21300_v9 = vcombine.low %v21298_v33, %v21299_v20  ;;  %v21301_v59 = vcombine.low %v19060_v0, %v19113_v37  ;;  %v21321_v33 = vld [vmem:[#allocation46_spill] sm:$0xff] }
 0x5b7   : > { %v9028_v18 = vcombine.low %v9020_v17, %v9027_v40  ;;  %v19961_v1 = vrot.slane %v21297_v57, %v20959_v25  ;;  %11889 = vst [vmem:[%s19623_s11 + $0x38] sm:$0xff] %v11963_v31  ;;  %v21302_v55 = vcombine.low %v19190_v26, %v19216_v51  ;;  %v21303_v37 = vcombine.low %v19627_v22, %v19727_v45  ;;  %v21320_v57 = vld [vmem:[#allocation98_spill] sm:$0xff] }
 0x5b8   : > { %v9087_v52 = vsel %vm7833_vm8, %v9036_v12, %v12362_v13  ;;  %v19967_v21 = vrot.slane %v21300_v9, %v20959_v25  ;;  %v19973_v60 = vrot.slane %v21301_v59, %v20959_v25  ;;  %v21304_v26 = vcombine.low %v19365_v7, %v19464_v11 }
 0x5b9   : > { %v11967_v49 = vpack.c.bf16 %v9087_v52, %v9085_v23  ;;  %v9086_v3 = vsel %vm7833_vm8, %v9028_v18, %v12361_v63  ;;  %v19981_v17 = vrot.slane %v21302_v55, %v20959_v25  ;;  %v19992_v40 = vrot.slane %v21303_v37, %v20959_v25  ;;  %v21316_v18 = vld [vmem:[#allocation40_spill] sm:$0xff] }
 0x5ba   : > { %v11964_v2 = vpack.c.bf16 %v9086_v3, %v9084_v4  ;;  %v10201_v24 = vcombine.low %v19961_v1, %v19967_v21  ;;  %v19999_v51 = vrot.slane %v21304_v26, %v20959_v25  ;;  %v21305_v48 = vcombine.low %v19402_v47, %v19477_v16  ;;  %v21324_v3 = vld [vmem:[#allocation105_spill] sm:$0xff]  ;;  %v21354_v1 = vld [vmem:[#allocation2_spill] sm:$0xff]  ;;  %v21355_v21 = vld [vmem:[#allocation28_spill] sm:$0xff] }
 0x5bb   : > { %11893 = vst [vmem:[%s19623_s11 + $0x58] sm:$0x33] %v11967_v49  ;;  %v10131_v0 = vcombine.low %v19973_v60, %v19981_v17  ;;  %v21306_v10 = vcombine.low %v19541_v36, %v19649_v27  ;;  %v21307_v45 = vcombine.low %v19372_v46, %v19467_v54  ;;  %v21308_v11 = vcombine.low %v19609_v5, %v19662_v58 }
 0x5bc   : > { %11890 = vst [vmem:[%s19623_s11 + $0x40] sm:$0xff] %v11964_v2  ;;  %v20005_v23 = vrot.slane %v21305_v48, %v20959_v25  ;;  %v21309_v16 = vcombine.low %v19399_v50, %v19482_v30  ;;  %v21310_v46 = vcombine.low %v19613_v56, %v19659_v44  ;;  %v21311_v58 = vcombine.low %v19411_v32, %v19493_v42  ;;  %v21326_v48 = vld [vmem:[#allocation63_spill] sm:$0xff] }
 0x5bd   : > { %v20011_v22 = vrot.slane %v21306_v10, %v20959_v25  ;;  %v20017_v34 = vrot.slane %v21307_v45, %v20959_v25  ;;  %v20023_v7 = vrot.slane %v21308_v11, %v20959_v25  ;;  %v21312_v50 = vcombine.low %v19637_v43, %v19737_v14  ;;  %v21327_v10 = vld [vmem:[#allocation106_spill] sm:$0xff] }
 0x5be   : > { %v20031_v36 = vrot.slane %v21309_v16, %v20959_v25  ;;  %v20037_v54 = vrot.slane %v21310_v46, %v20959_v25  ;;  %v11374_v5 = vcombine.low %v20005_v23, %v19992_v40  ;;  %v20047_v35 = vrot.slane %v21311_v58, %v20959_v25 }
 0x5bf   : > { %v11164_v47 = vcombine.low %v19999_v51, %v20011_v22  ;;  %v11234_v27 = vcombine.low %v20017_v34, %v20023_v7  ;;  %v20053_v30 = vrot.slane %v21312_v50, %v20959_v25  ;;  %v11445_v44 = vcombine.low %v19848_v62, %v19803_v61  ;;  %v21360_v22 = vld [vmem:[#allocation45_spill] sm:$0xff] }
 0x5c0   : > { %v11304_v56 = vcombine.low %v20031_v36, %v20037_v54  ;;  %v21313_v12 = vcombine.low %v19358_v53, %v19496_v8  ;;  %v21314_v32 = vcombine.low %v19640_v41, %v19740_v15  ;;  %v11515_v14 = vcombine.low %v19786_v38, %v19856_v6  ;;  %v21315_v8 = vld [vmem:[#allocation54_spill] sm:$0xff]  ;;  %v21317_v41 = vld [vmem:[#allocation97_spill] sm:$0xff]  ;;  %v21318_v15 = vld [vmem:[#allocation44_spill] sm:$0xff] }
 0x5c1   : > { %v11444_v43 = vcombine.low %v20047_v35, %v20053_v30  ;;  %v9905_v53 = vcombine.low %v19041_v28, %v19237_v29  ;;  %v9975_v63 = vcombine.low %v21316_v18, %v21315_v8  ;;  %v21319_v52 = vcombine.low %v21317_v41, %v21318_v15  ;;  %v21323_v29 = vld [vmem:[#allocation103_spill] sm:$0xff]  ;;  %v21330_v41 = vld [vmem:[#allocation92_spill] sm:$0xff] }
 0x5c2   : > { %v20063_v13 = vrot.slane %v21313_v12, %v20959_v25  ;;  %v20069_v42 = vrot.slane %v21314_v32, %v20959_v25  ;;  %v21322_v20 = vcombine.low %v21320_v57, %v21321_v33  ;;  %v21325_v55 = vcombine.low %v21323_v29, %v21324_v3 }
 0x5c3   : > { %v12370_v4 = vpop.permute.xlu0 %12369  ;;  %v9920_v39 = vrot.slane %v21319_v52, %v20959_v25  ;;  %v9913_v59 = vrot.slane %v9905_v53, %v20959_v25  ;;  %v9983_v49 = vrot.slane %v9975_v63, %v20959_v25  ;;  %v21328_v45 = vcombine.low %v21326_v48, %v21327_v10  ;;  %v21329_v63 = vld [vmem:[#allocation94_spill] sm:$0xff]  ;;  %v21331_v52 = vld [vmem:[#allocation99_spill] sm:$0xff] }
 0x5c4   : > { %v11514_v31 = vcombine.low %v20063_v13, %v20069_v42  ;;  %v9990_v9 = vrot.slane %v21322_v20, %v20959_v25  ;;  %v9929_v17 = vrot.slane %v21325_v55, %v20959_v25  ;;  %v10045_v15 = vcombine.low %v21330_v41, %v21329_v63 }
 0x5c5   : > { %v9921_v28 = vcombine.low %v9913_v59, %v9920_v39  ;;  %v9999_v11 = vrot.slane %v21328_v45, %v20959_v25  ;;  %v21332_v39 = vld [vmem:[#allocation24_spill] sm:$0xff]  ;;  %v21340_v45 = vld [vmem:[#allocation55_spill] sm:$0xff]  ;;  %v12372_v41 = vunpack.i.h.bf16 %v12370_v4  ;;  %v11452_v36 = vrot.slane %v11445_v44, %v20959_v25 }
 0x5c6   : > { %v9991_v26 = vcombine.low %v9983_v49, %v9990_v9  ;;  %v21333_v57 = vcombine.low %v21331_v52, %v21332_v39  ;;  %v10053_v59 = vrot.slane %v10045_v15, %v20959_v25  ;;  %v21335_v49 = vld [vmem:[#allocation104_spill] sm:$0xff]  ;;  %v12371_v15 = vunpack.i.l.bf16 %v12370_v4  ;;  %v21346_v39 = vld [vmem:[#allocation102_spill] sm:$0xff] }
 0x5c7   : > { %v11522_v40 = vrot.slane %v11515_v14, %v20959_v25 }
 0x5c8   : > { %v10060_v33 = vrot.slane %v21333_v57, %v20959_v25  ;;  %v10327_v4 = vsel %vm7833_vm8, %v10201_v24, %v12371_v15  ;;  %v21356_v24 = vcombine.low %v21354_v1, %v21355_v21 }
 0x5ca   : > { %v10061_v55 = vcombine.low %v10053_v59, %v10060_v33  ;;  %v21348_v59 = vld [vmem:[#allocation101_spill] sm:$0xff] }
 0x5cc   : > { %v12365_v19 = vpop.permute.xlu1 %12364  ;;  %v12375_v60 = vpop.permute.xlu0 %12374 }
 0x5cd   : > { %v12377_v2 = vunpack.i.h.bf16 %v12375_v60  ;;  %v12376_v37 = vunpack.i.l.bf16 %v12375_v60  ;;  %v12367_v20 = vunpack.i.h.bf16 %v12365_v19  ;;  %v12366_v9 = vunpack.i.l.bf16 %v12365_v19  ;;  %v21334_v60 = vld [vmem:[#allocation26_spill] sm:$0xff]  ;;  %v21341_v19 = vld [vmem:[#allocation93_spill] sm:$0xff] }
 0x5cf   : > { %v10320_v46 = vsel %vm7833_vm8, %v9929_v17, %v12377_v2  ;;  %v10319_v58 = vsel %vm7833_vm8, %v9921_v28, %v12376_v37  ;;  %v21336_v28 = vcombine.low %v21334_v60, %v21335_v49  ;;  %v21337_v17 = vld [vmem:[#allocation64_spill] sm:$0xff]  ;;  %v21338_v2 = vld [vmem:[#allocation27_spill] sm:$0xff] }
 0x5d0   : > { %v12380_v16 = vpop.permute.xlu1 %12379  ;;  %v21339_v37 = vcombine.low %v21337_v17, %v21338_v2  ;;  %v21349_v60 = vld [vmem:[#allocation4_spill] sm:$0xff] }
 0x5d1   : > { %v12382_v50 = vunpack.i.h.bf16 %v12380_v16  ;;  %v12381_v12 = vunpack.i.l.bf16 %v12380_v16  ;;  %v10139_v29 = vrot.slane %v21336_v28, %v20959_v25  ;;  %v21350_v49 = vcombine.low %v21348_v59, %v21349_v60 }
 0x5d3   : > { %v10322_v32 = vsel %vm7833_vm8, %v9999_v11, %v12382_v50  ;;  %v10321_v53 = vsel %vm7833_vm8, %v9991_v26, %v12381_v12  ;;  %v10069_v26 = vrot.slane %v21339_v37, %v20959_v25  ;;  %v10255_v11 = vcombine.low %v21341_v19, %v21340_v45  ;;  %v21351_v19 = vld [vmem:[#allocation84_spill] sm:$0xff] }
 0x5d4   : > { %v11971_v8 = vpack.c.bf16 %v10322_v32, %v10320_v46  ;;  %v11968_v18 = vpack.c.bf16 %v10321_v53, %v10319_v58  ;;  %v10326_v16 = vsel %vm7833_vm8, %v10139_v29, %v12367_v20  ;;  %v10325_v46 = vsel %vm7833_vm8, %v10131_v0, %v12366_v9  ;;  %v21342_v53 = vld [vmem:[#allocation25_spill] sm:$0xff]  ;;  %v21345_v0 = vld [vmem:[#allocation68_spill] sm:$0xff] }
 0x5d5   : > { %v10263_v52 = vrot.slane %v10255_v11, %v20959_v25  ;;  %v21347_v57 = vcombine.low %v21345_v0, %v21346_v39  ;;  %v10279_v28 = vrot.slane %v21350_v49, %v20959_v25  ;;  %v21352_v11 = vld [vmem:[#allocation47_spill] sm:$0xff] }
 0x5d6   : > { %11918 = vst [vmem:[%s19623_s11 + $0x60] sm:$0xff] %v11968_v18  ;;  %11921 = vst [vmem:[%s19623_s11 + $0x78] sm:$0x33] %v11971_v8  ;;  %v21343_v8 = vld [vmem:[#allocation49_spill] sm:$0xff] }
 0x5d7   : > { %v21344_v18 = vcombine.low %v21342_v53, %v21343_v8  ;;  %v10209_v33 = vrot.slane %v21347_v57, %v20959_v25 }
 0x5d8   : > { %v12390_v3 = vpop.permute.xlu0 %12389 }
 0x5d9   : > { %v12392_v48 = vunpack.i.h.bf16 %v12390_v3  ;;  %v12391_v10 = vunpack.i.l.bf16 %v12390_v3  ;;  %v10270_v63 = vrot.slane %v21344_v18, %v20959_v25 }
 0x5db   : > { %v10324_v58 = vsel %vm7833_vm8, %v10069_v26, %v12392_v48  ;;  %v10323_v50 = vsel %vm7833_vm8, %v10061_v55, %v12391_v10  ;;  %v10271_v9 = vcombine.low %v10263_v52, %v10270_v63  ;;  %v10328_v55 = vsel %vm7833_vm8, %v10209_v33, %v12372_v41  ;;  %v21357_v33 = vld [vmem:[#allocation87_spill] sm:$0xff] }
 0x5dc   : > { %v11969_v12 = vpack.c.bf16 %v10325_v46, %v10323_v50  ;;  %v11972_v32 = vpack.c.bf16 %v10326_v16, %v10324_v58  ;;  %v21353_v16 = vcombine.low %v21351_v19, %v21352_v11  ;;  %v11242_v50 = vrot.slane %v21356_v24, %v20959_v25 }
 0x5de   : > { %11919 = vst [vmem:[%s19623_s11 + $0x68] sm:$0xff] %v11969_v12  ;;  %11922 = vst [vmem:[%s19623_s11 + $0x80] sm:$0x33] %v11972_v32  ;;  %v11172_v46 = vrot.slane %v21353_v16, %v20959_v25 }
 0x5df   : > { %v12385_v20 = vpop.permute.xlu1 %12384 }
 0x5e0   : > { %v12387_v29 = vunpack.i.h.bf16 %v12385_v20  ;;  %v12386_v3 = vunpack.i.l.bf16 %v12385_v20  ;;  %v21358_v20 = vld [vmem:[#allocation53_spill] sm:$0xff] }
 0x5e2   : > { %v10330_v17 = vsel %vm7833_vm8, %v10279_v28, %v12387_v29  ;;  %v10329_v2 = vsel %vm7833_vm8, %v10271_v9, %v12386_v3  ;;  %v21359_v9 = vcombine.low %v21357_v33, %v21358_v20 }
 0x5e3   : > { %v11973_v37 = vpack.c.bf16 %v10330_v17, %v10328_v55  ;;  %v11970_v26 = vpack.c.bf16 %v10329_v2, %v10327_v4 }
 0x5e4   : > { %v11312_v51 = vrot.slane %v21359_v9, %v20959_v25 }
 0x5e5   : > { %11920 = vst [vmem:[%s19623_s11 + $0x70] sm:$0xff] %v11970_v26  ;;  %11923 = vst [vmem:[%s19623_s11 + $0x88] sm:$0x33] %v11973_v37 }
 0x611   : > { %v12395_v48 = vpop.permute.xlu0 %12394 }
 0x612   : > { %v12397_v10 = vunpack.i.h.bf16 %v12395_v48  ;;  %v12396_v45 = vunpack.i.l.bf16 %v12395_v48 }
 0x614   : > { %v12405_v58 = vpop.permute.xlu1 %12404  ;;  %v11563_v53 = vsel %vm7833_vm8, %v11172_v46, %v12397_v10  ;;  %v11562_v8 = vsel %vm7833_vm8, %v11164_v47, %v12396_v45  ;;  %v21361_v47 = vld [vmem:[#allocation75_spill] sm:$0xff] }
 0x615   : > { %v12407_v12 = vunpack.i.h.bf16 %v12405_v58  ;;  %v12406_v32 = vunpack.i.l.bf16 %v12405_v58  ;;  %v21362_v59 = vcombine.low %v21360_v22, %v21361_v47 }
 0x616   : > { %v12400_v18 = vpop.permute.xlu0 %12399 }
 0x617   : > { %v11565_v63 = vsel %vm7833_vm8, %v11242_v50, %v12407_v12  ;;  %v11564_v41 = vsel %vm7833_vm8, %v11234_v27, %v12406_v32  ;;  %v12402_v15 = vunpack.i.h.bf16 %v12400_v18  ;;  %v12401_v52 = vunpack.i.l.bf16 %v12400_v18 }
 0x618   : > { %v11977_v0 = vpack.c.bf16 %v11565_v63, %v11563_v53  ;;  %v11974_v39 = vpack.c.bf16 %v11564_v41, %v11562_v8  ;;  %v12410_v57 = vpop.permute.xlu1 %12409  ;;  %v11382_v60 = vrot.slane %v21362_v59, %v20959_v25 }
 0x619   : > { %v12412_v34 = vunpack.i.h.bf16 %v12410_v57  ;;  %v12411_v7 = vunpack.i.l.bf16 %v12410_v57  ;;  %v11567_v27 = vsel %vm7833_vm8, %v11312_v51, %v12402_v15  ;;  %v11566_v49 = vsel %vm7833_vm8, %v11304_v56, %v12401_v52 }
 0x61a   : > { %11948 = vst [vmem:[%s19623_s11 + $0x90] sm:$0xff] %v11974_v39  ;;  %11951 = vst [vmem:[%s19623_s11 + $0xa8] sm:$0x33] %v11977_v0 }
 0x61b   : > { %v11569_v28 = vsel %vm7833_vm8, %v11382_v60, %v12412_v34  ;;  %v11568_v29 = vsel %vm7833_vm8, %v11374_v5, %v12411_v7  ;;  %v12415_v3 = vpop.permute.xlu0 %12414 }
 0x61c   : > { %v11978_v55 = vpack.c.bf16 %v11569_v28, %v11567_v27  ;;  %v11975_v4 = vpack.c.bf16 %v11568_v29, %v11566_v49  ;;  %v12417_v17 = vunpack.i.h.bf16 %v12415_v3  ;;  %v12416_v2 = vunpack.i.l.bf16 %v12415_v3 }
 0x61d   : > { %v12420_v37 = vpop.permute.xlu1 %12419 }
 0x61e   : > { %11949 = vst [vmem:[%s19623_s11 + $0x98] sm:$0xff] %v11975_v4  ;;  %11952 = vst [vmem:[%s19623_s11 + $0xb0] sm:$0x33] %v11978_v55  ;;  %v12422_v23 = vunpack.i.h.bf16 %v12420_v37  ;;  %v12421_v54 = vunpack.i.l.bf16 %v12420_v37  ;;  %v11571_v5 = vsel %vm7833_vm8, %v11452_v36, %v12417_v17  ;;  %v11570_v56 = vsel %vm7833_vm8, %v11444_v43, %v12416_v2 }
 0x620   : > { %v11573_v26 = vsel %vm7833_vm8, %v11522_v40, %v12422_v23  ;;  %v11572_v61 = vsel %vm7833_vm8, %v11514_v31, %v12421_v54 }
 0x621   : > { %v11979_v62 = vpack.c.bf16 %v11573_v26, %v11571_v5  ;;  %v11976_v44 = vpack.c.bf16 %v11572_v61, %v11570_v56 }
 0x623   : > { %11950 = vst [vmem:[%s19623_s11 + $0xa0] sm:$0xff] %v11976_v44  ;;  %11953 = vst [vmem:[%s19623_s11 + $0xb8] sm:$0x33] %v11979_v62 }
 0x624 PF: > { %s14_s15 = sadd.s32 1, %s12503_s15  }
 0x625   : > { %p11_p5 = scmp.ge.s32.totalorder %s14_s15, 4  }
 0x627   :  { %13 = sbr.rel (!%p11_p5) target bundleno = 1 (0x1), region = 69 }

</bundles_post_ra>
